<compile_context>
chip_gen: v7x
topology: tpu7x:2x2x1
jax: 0.10.0
libtpu: 0.0.40
codegen_flags: <defaults>
</compile_context>

<pallas_src>
import jax
import jax.numpy as jnp
from jax import lax
from jax.experimental import pallas as pl
from jax.experimental.pallas import tpu as pltpu

_BN_EPS = 1e-5
_TM_TARGET = 1024                   # lane width target per grid step
_VMEM_LIMIT = 32 * 1024 * 1024      # safe on v5e/v6e (128 MiB) and v7x (64 MiB)


def _cdiv(a, b):
    return -(-a // b)


def _round_up(a, b):
    return _cdiv(a, b) * b


def _plan(mg, smax):
    """Tile plan for a flat activation of mg columns and max |tap shift| smax."""
    halo = _round_up(max(int(smax), 1), 128)
    tm = max(halo, (_TM_TARGET // halo) * halo)
    # Aim for >= 2 grid steps so v7x megacore has work on both TensorCores.
    tm = max(halo, min(tm, _round_up(_cdiv(mg, 2), halo)))
    n_tiles = _cdiv(mg, tm)
    return tm, halo, n_tiles, n_tiles * tm


# ---------------------------------------------------------------------------
# Generic shifted-tap conv kernel:
#   out(:, m) = W_stacked @ stack_t(act[:, m + s_t])  (+ bias [+ residual])
# with optional fused BatchNorm->ReLU->padding-mask on the input strip and
# per-tile BN partial sums (sum / sum-of-squares over valid output columns).
# ---------------------------------------------------------------------------
def _make_conv_kernel(strip_shifts, tm, cin_eff, n_left, fuse_bn, has_residual):
    n_x = n_left + 2            # [left-halo], main, right-halo
    n_m = n_x if fuse_bn else 1

    def kernel(*refs):
        idx = 0
        x_refs = refs[idx:idx + n_x]; idx += n_x
        m_refs = refs[idx:idx + n_m]; idx += n_m
        if fuse_bn:
            sc_ref, sh_ref = refs[idx], refs[idx + 1]; idx += 2
        w_ref, b_ref = refs[idx], refs[idx + 1]; idx += 2
        if has_residual:
            r_ref = refs[idx]; idx += 1
        o_ref, s_ref, stk_ref = refs[idx], refs[idx + 1], refs[idx + 2]

        # Strip covering [tile_start - n_left*halo, tile_start + tm + halo).
        strip = jnp.concatenate([x[...] for x in x_refs], axis=1)

        if fuse_bn:
            # Fused BatchNorm -> ReLU -> conv zero-padding mask (keeps the
            # padded-grid pad ring / garbage columns at exactly zero).
            mstrip = jnp.concatenate([m[...] for m in m_refs], axis=1)
            act = jnp.maximum(
                strip.astype(jnp.float32) * sc_ref[...] + sh_ref[...], 0.0)
            act = jnp.where(mstrip > 0.5, act, 0.0).astype(jnp.bfloat16)
        else:
            act = strip  # already normalized / zero-padded by XLA staging

        # Build the K-stacked operand (ntap * cin_eff, tm) and do ONE matmul.
        for t, s in enumerate(strip_shifts):
            stk_ref[pl.ds(t * cin_eff, cin_eff), :] = act[:, s:s + tm]
        acc = jnp.dot(w_ref[...], stk_ref[...],
                      preferred_element_type=jnp.float32)
        acc = acc + b_ref[...]                       # (Cout, 1) broadcast, f32
        if has_residual:
            acc = acc + r_ref[...].astype(jnp.float32)
        o_ref[...] = acc.astype(o_ref.dtype)

        # BatchNorm partial sums for the *next* BN, from the f32 accumulator,
        # restricted to valid output columns.
        m_main = m_refs[n_left if fuse_bn else 0][...]     # (1, tm)
        valid = jnp.where(m_main > 0.5, acc, 0.0)
        ssum = jnp.sum(valid, axis=1, keepdims=True)       # (Cout, 1)
        ssq = jnp.sum(valid * valid, axis=1, keepdims=True)
        s_ref[...] = jnp.concatenate([ssum, ssq], axis=1)[None]   # (1, Cout, 2)

    return kernel


def _shift_conv(x_flat, mask_flat, w_stacked, bias, raw_shifts, plan, *,
                two_sided, fuse_bn, scale=None, shift=None, residual=None):
    """x_flat: (Cin_eff, L) bf16; mask_flat: (1, L) f32; w_stacked: (Cout, K)."""
    tm, halo, n_tiles, L = plan
    cin_eff = x_flat.shape[0]
    cout, kst = w_stacked.shape
    n_left = 1 if two_sided else 0
    r = tm // halo
    nhb = L // halo
    strip_shifts = tuple(int(s) + n_left * halo for s in raw_shifts)

    def _main_map(i):
        return (0, i)

    def _left_map(i):
        # Clamped: for tile 0 the "left halo" only feeds invalid (masked) cols.
        return (0, jnp.maximum(i * r - 1, 0))

    def _right_map(i):
        # Clamped: past-the-end halo only feeds invalid (masked) cols.
        return (0, jnp.minimum((i + 1) * r, nhb - 1))

    x_specs = []
    if n_left:
        x_specs.append(pl.BlockSpec((cin_eff, halo), _left_map))
    x_specs.append(pl.BlockSpec((cin_eff, tm), _main_map))
    x_specs.append(pl.BlockSpec((cin_eff, halo), _right_map))

    if fuse_bn:
        m_specs = []
        if n_left:
            m_specs.append(pl.BlockSpec((1, halo), _left_map))
        m_specs.append(pl.BlockSpec((1, tm), _main_map))
        m_specs.append(pl.BlockSpec((1, halo), _right_map))
    else:
        m_specs = [pl.BlockSpec((1, tm), _main_map)]

    in_specs = list(x_specs) + list(m_specs)
    args = [x_flat] * len(x_specs) + [mask_flat] * len(m_specs)

    if fuse_bn:
        in_specs += [pl.BlockSpec((cin_eff, 1), lambda i: (0, 0)),
                     pl.BlockSpec((cin_eff, 1), lambda i: (0, 0))]
        args += [scale.reshape(cin_eff, 1).astype(jnp.float32),
                 shift.reshape(cin_eff, 1).astype(jnp.float32)]

    in_specs += [pl.BlockSpec((cout, kst), lambda i: (0, 0)),   # resident W
                 pl.BlockSpec((cout, 1), lambda i: (0, 0))]     # resident bias
    args += [w_stacked.astype(jnp.bfloat16),
             bias.reshape(cout, 1).astype(jnp.float32)]

    if residual is not None:
        in_specs.append(pl.BlockSpec((cout, tm), _main_map))
        args.append(residual)

    kernel = _make_conv_kernel(strip_shifts, tm, cin_eff, n_left, fuse_bn,
                               residual is not None)
    out, stats = pl.pallas_call(
        kernel,
        grid=(n_tiles,),
        in_specs=in_specs,
        out_specs=(pl.BlockSpec((cout, tm), _main_map),
                   pl.BlockSpec((1, cout, 2), lambda i: (i, 0, 0))),
        out_shape=(jax.ShapeDtypeStruct((cout, L), jnp.bfloat16),
                   jax.ShapeDtypeStruct((n_tiles, cout, 2), jnp.float32)),
        scratch_shapes=[pltpu.VMEM((len(strip_shifts) * cin_eff, tm),
                                   jnp.bfloat16)],
        compiler_params=pltpu.CompilerParams(
            dimension_semantics=("parallel",),
            vmem_limit_bytes=_VMEM_LIMIT),
    )(*args)
    return out, stats


# ---------------------------------------------------------------------------
# 4x4x4 stride-2 conv: 8 space-to-depth parity branches of 2x2x2 stride-1 taps,
# merged into the channel axis (Cin_eff = 8*Cin).  BN+ReLU (if any) is applied
# by the caller in the XLA staging that does the unavoidable pad/s2d copy.
# Output is anchored at receptive-field corners of the coarse grid.
# ---------------------------------------------------------------------------
def _conv4x4(h5, w, b):
    cout, cin = w.shape[0], w.shape[1]
    C, N, D, H, W = h5.shape
    assert C == cin
    assert D % 2 == 0 and H % 2 == 0 and W % 2 == 0, \
        "stride-2 4x4x4 conv path requires even spatial dims"
    Dc, Hc, Wc = (D + 2) // 2, (H + 2) // 2, (W + 2) // 2
    Do, Ho, Wo = D // 2, H // 2, W // 2
    mg = N * Dc * Hc * Wc
    smax = Hc * Wc + Wc + 1
    plan = _plan(mg, smax)
    L = plan[3]

    xp = jnp.pad(h5, ((0, 0), (0, 0), (1, 1), (1, 1), (1, 1)))
    xg = xp.reshape(C, N, Dc, 2, Hc, 2, Wc, 2)
    xg = jnp.transpose(xg, (3, 5, 7, 0, 1, 2, 4, 6)).reshape(8 * C, mg)
    xg = jnp.pad(xg, ((0, 0), (0, L - mg))).astype(jnp.bfloat16)

    mask = jnp.pad(jnp.ones((N, Do, Ho, Wo), jnp.float32),
                   ((0, 0), (0, Dc - Do), (0, Hc - Ho), (0, Wc - Wo))
                   ).reshape(1, mg)
    mask = jnp.pad(mask, ((0, 0), (0, L - mg)))

    shifts = [dd * Hc * Wc + dh * Wc + dw
              for dd in range(2) for dh in range(2) for dw in range(2)]
    w8 = w.reshape(cout, cin, 2, 2, 2, 2, 2, 2)   # (o, ci, dd, pd, dh, ph, dw, pw)
    w_st = jnp.transpose(w8, (0, 2, 4, 6, 3, 5, 7, 1)).reshape(cout, 8 * 8 * cin)

    y_flat, stats = _shift_conv(xg, mask, w_st, b, shifts, plan,
                                two_sided=False, fuse_bn=False)
    y5 = y_flat[:, :mg].reshape(cout, N, Dc, Hc, Wc)[:, :, :Do, :Ho, :Wo]
    return y5, stats


# ---------------------------------------------------------------------------
# 3x3x3 stride-1 conv on the flat padded-grid ("P") layout.  BN+ReLU+mask is
# fused into the kernel input path, so consecutive 3x3x3 convs (the whole
# ResBlock chain) need no XLA restaging.  Output is anchored at the *centered*
# position (so the output array is itself a valid P-layout input).
# ---------------------------------------------------------------------------
def _conv3x3(x_flat, mask_flat, w, b, grid_dims, plan, scale, shift,
             residual=None):
    Ds, Hs, Ws = grid_dims
    cout, cin = w.shape[0], w.shape[1]
    shifts = [(kd - 1) * Hs * Ws + (kh - 1) * Ws + (kw - 1)
              for kd in range(3) for kh in range(3) for kw in range(3)]
    w_st = jnp.transpose(w, (0, 2, 3, 4, 1)).reshape(cout, 27 * cin)
    return _shift_conv(x_flat, mask_flat, w_st, b, shifts, plan,
                       two_sided=True, fuse_bn=True, scale=scale, shift=shift,
                       residual=residual)


def _stage_chain(h5):
    """Place a dense raw activation into the flat padded-grid (P) layout."""
    C, N, D, H, W = h5.shape
    Ds, Hs, Ws = D + 2, H + 2, W + 2
    mg = N * Ds * Hs * Ws
    smax = Hs * Ws + Ws + 1
    plan = _plan(mg, smax)
    L = plan[3]
    xf = jnp.pad(h5, ((0, 0), (0, 0), (1, 1), (1, 1), (1, 1))).reshape(C, mg)
    xf = jnp.pad(xf, ((0, 0), (0, L - mg))).astype(jnp.bfloat16)
    mask = jnp.pad(jnp.ones((N, D, H, W), jnp.float32),
                   ((0, 0), (1, 1), (1, 1), (1, 1))).reshape(1, mg)
    mask = jnp.pad(mask, ((0, 0), (0, L - mg)))
    return xf, mask, (Ds, Hs, Ws), plan


# ---------------------------------------------------------------------------
# 1x1x1 head conv with BN-normalize + ReLU fused into the matmul kernel.
# ---------------------------------------------------------------------------
def _head_kernel(x_ref, sc_ref, sh_ref, w_ref, b_ref, o_ref):
    a = jnp.maximum(x_ref[...].astype(jnp.float32) * sc_ref[...] + sh_ref[...],
                    0.0)
    o_ref[...] = jnp.dot(w_ref[...], a,
                         preferred_element_type=jnp.float32) + b_ref[...]


def _head_conv(x_flat, scale, shift, w, b, plan):
    tm, _, n_tiles, L = plan
    C = x_flat.shape[0]
    cout = w.shape[0]
    out = pl.pallas_call(
        _head_kernel,
        grid=(n_tiles,),
        in_specs=[pl.BlockSpec((C, tm), lambda i: (0, i)),
                  pl.BlockSpec((C, 1), lambda i: (0, 0)),
                  pl.BlockSpec((C, 1), lambda i: (0, 0)),
                  pl.BlockSpec((cout, C), lambda i: (0, 0)),
                  pl.BlockSpec((cout, 1), lambda i: (0, 0))],
        out_specs=pl.BlockSpec((cout, tm), lambda i: (0, i)),
        out_shape=jax.ShapeDtypeStruct((cout, L), jnp.float32),
        compiler_params=pltpu.CompilerParams(
            dimension_semantics=("parallel",),
            vmem_limit_bytes=_VMEM_LIMIT),
    )(x_flat,
      scale.reshape(C, 1).astype(jnp.float32),
      shift.reshape(C, 1).astype(jnp.float32),
      w.reshape(cout, C).astype(jnp.float32),
      b.reshape(cout, 1).astype(jnp.float32))
    return out


# ---------------------------------------------------------------------------
# BatchNorm finalize from fused conv-epilogue partials (training-mode stats).
# ---------------------------------------------------------------------------
def _bn_scale_shift(stats, gamma, beta, count, eps=_BN_EPS):
    s = jnp.sum(stats, axis=0)                    # (C, 2)
    mean = s[:, 0] / count
    var = jnp.maximum(s[:, 1] / count - mean * mean, 0.0)
    inv = lax.rsqrt(var + eps)
    scale = gamma * inv
    shift = beta - mean * scale
    return scale, shift


# ---------------------------------------------------------------------------
# Parameter init (deterministic, PyTorch-like uniform(-1/sqrt(fan_in), ...))
# ---------------------------------------------------------------------------
def _conv_params(key, cout, cin, k):
    kw_key, kb_key = jax.random.split(key)
    fan_in = cin * k ** 3
    bound = 1.0 / (fan_in ** 0.5)
    w = jax.random.uniform(kw_key, (cout, cin, k, k, k), jnp.float32,
                           -bound, bound)
    b = jax.random.uniform(kb_key, (cout,), jnp.float32, -bound, bound)
    return {"w": w, "b": b}


def _bn_params(c):
    return {"gamma": jnp.ones((c,), jnp.float32),
            "beta": jnp.zeros((c,), jnp.float32)}


def init_encoder_params(key, input_size, hidden_size, output_size,
                        num_res_block, res_size, stride):
    keys = iter(jax.random.split(key, 64))
    if stride == 8:
        stem_cfg = [(input_size, hidden_size // 2, 4),
                    (hidden_size // 2, hidden_size // 2, 4),
                    (hidden_size // 2, hidden_size, 4),
                    (hidden_size, hidden_size, 3)]
    elif stride == 4:
        stem_cfg = [(input_size, hidden_size // 2, 4),
                    (hidden_size // 2, hidden_size, 4),
                    (hidden_size, hidden_size, 3)]
    elif stride == 2:
        stem_cfg = [(input_size, hidden_size // 2, 4),
                    (hidden_size // 2, hidden_size, 3)]
    else:
        raise ValueError("Not valid stride")

    params = {"stem": [], "res": []}
    for idx, (cin, cout, k) in enumerate(stem_cfg):
        layer = {"conv": _conv_params(next(keys), cout, cin, k)}
        if idx < len(stem_cfg) - 1:
            layer["bn"] = _bn_params(cout)
        params["stem"].append(layer)

    for _ in range(num_res_block):
        params["res"].append({
            "bn1": _bn_params(hidden_size),
            "conv1": _conv_params(next(keys), res_size, hidden_size, 3),
            "bn2": _bn_params(res_size),
            "conv2": _conv_params(next(keys), hidden_size, res_size, 3),
        })

    params["bn_out"] = _bn_params(hidden_size)
    params["conv_out"] = _conv_params(next(keys), output_size, hidden_size, 1)
    return params


# ---------------------------------------------------------------------------
# Forward pass (== Encoder.forward).
# ---------------------------------------------------------------------------
def encoder_forward(params, x):
    h5 = jnp.transpose(x, (1, 0, 2, 3, 4)).astype(jnp.float32)  # (C,N,D,H,W)
    stem = params["stem"]

    stats = None
    count = None
    prev_bn = None
    li = 0
    # --- stride-2 4x4x4 stem convs: BN+ReLU folded into the s2d staging copy ---
    while stem[li]["conv"]["w"].shape[2] == 4:
        layer = stem[li]
        if prev_bn is not None:
            sc, sh = _bn_scale_shift(stats, prev_bn["gamma"], prev_bn["beta"],
                                     count)
            h5 = jnp.maximum(
                h5.astype(jnp.float32) * sc[:, None, None, None, None]
                + sh[:, None, None, None, None], 0.0)
        h5, stats = _conv4x4(h5, layer["conv"]["w"], layer["conv"]["b"])
        count = h5.shape[1] * h5.shape[2] * h5.shape[3] * h5.shape[4]
        prev_bn = layer["bn"]
        li += 1

    # --- flat 3x3x3 chain (stem tail + ResBlocks + head): no restaging ---
    hf, mask, grid_dims, plan = _stage_chain(h5)
    N, D, H, W = h5.shape[1], h5.shape[2], h5.shape[3], h5.shape[4]
    chain_count = N * D * H * W

    layer = stem[li]
    sc, sh = _bn_scale_shift(stats, prev_bn["gamma"], prev_bn["beta"], count)
    hf, stats = _conv3x3(hf, mask, layer["conv"]["w"], layer["conv"]["b"],
                         grid_dims, plan, sc, sh)

    for rb in params["res"]:
        sc1, sh1 = _bn_scale_shift(stats, rb["bn1"]["gamma"], rb["bn1"]["beta"],
                                   chain_count)
        t1, st1 = _conv3x3(hf, mask, rb["conv1"]["w"], rb["conv1"]["b"],
                           grid_dims, plan, sc1, sh1)
        sc2, sh2 = _bn_scale_shift(st1, rb["bn2"]["gamma"], rb["bn2"]["beta"],
                                   chain_count)
        hf, stats = _conv3x3(t1, mask, rb["conv2"]["w"], rb["conv2"]["b"],
                             grid_dims, plan, sc2, sh2, residual=hf)

    sco, sho = _bn_scale_shift(stats, params["bn_out"]["gamma"],
                               params["bn_out"]["beta"], chain_count)
    of = _head_conv(hf, sco, sho, params["conv_out"]["w"],
                    params["conv_out"]["b"], plan)

    Ds, Hs, Ws = grid_dims
    mg = N * Ds * Hs * Ws
    out5 = of[:, :mg].reshape(-1, N, Ds, Hs, Ws)[:, :, 1:D + 1, 1:H + 1,
                                                 1:W + 1]
    return jnp.transpose(out5, (1, 0, 2, 3, 4))                 # back to NCDHW


# ---------------------------------------------------------------------------
# Pure-JAX/XLA f32 reference (same semantics as the PyTorch module, train mode)
# ---------------------------------------------------------------------------
def encoder_reference(params, x):
    def bn_relu(h, bn):
        mean = jnp.mean(h, axis=(0, 2, 3, 4), keepdims=True)
        var = jnp.mean((h - mean) ** 2, axis=(0, 2, 3, 4), keepdims=True)
        g = bn["gamma"][None, :, None, None, None]
        b = bn["beta"][None, :, None, None, None]
        return jnp.maximum((h - mean) * lax.rsqrt(var + _BN_EPS) * g + b, 0.0)

    def conv(h, p, stride, pad):
        out = lax.conv_general_dilated(
            h, p["w"], (stride, stride, stride), [(pad, pad)] * 3,
            dimension_numbers=("NCDHW", "OIDHW", "NCDHW"))
        return out + p["b"][None, :, None, None, None]

    h = x.astype(jnp.float32)
    stem = params["stem"]
    for i, layer in enumerate(stem):
        k = layer["conv"]["w"].shape[2]
        stride, pad = (2, 1) if k == 4 else (1, 1)
        h = conv(h, layer["conv"], stride, pad)
        if i < len(stem) - 1:
            h = bn_relu(h, layer["bn"])
    for rb in params["res"]:
        t = bn_relu(h, rb["bn1"])
        t = conv(t, rb["conv1"], 1, 1)
        t = bn_relu(t, rb["bn2"])
        t = conv(t, rb["conv2"], 1, 1)
        h = h + t
    h = bn_relu(h, params["bn_out"])
    h = conv(h, params["conv_out"], 1, 0)
    return h


if __name__ == "__main__":
    # stride=4 encoder: two stride-2 4x4x4 convs + 3x3x3 conv, 2 ResBlocks,
    # final 1x1x1 projection.
    input_size, hidden_size, output_size = 4, 16, 8
    num_res_block, res_size, stride = 2, 8, 4

    key = jax.random.PRNGKey(0)
    pkey, xkey = jax.random.split(key)
    params = init_encoder_params(pkey, input_size, hidden_size, output_size,
                                 num_res_block, res_size, stride)

    # NCDHW input (video volume): (N=2, C=4, D=16, H=16, W=16)
    x = jax.random.normal(xkey, (2, input_size, 16, 16, 16), dtype=jnp.float32)

    fwd = jax.jit(encoder_forward)
    out = jax.block_until_ready(fwd(params, x))

    assert out.shape == (2, output_size, 4, 4, 4), out.shape
    assert out.dtype == jnp.float32
    assert bool(jnp.all(jnp.isfinite(out)))

    # Numerical validation against the f32 XLA reference (tolerance accounts
    # for bf16 activation/weight storage in the Pallas pipeline).
    ref = jax.block_until_ready(jax.jit(encoder_reference)(params, x))
    rel = float(jnp.max(jnp.abs(out - ref)) / (jnp.max(jnp.abs(ref)) + 1e-6))
    assert rel < 0.12, f"numerical mismatch vs reference: rel_max_err={rel:.4f}"

    print("KERNEL_OK")
</pallas_src>

<mosaic_0001>
module attributes {stable_mosaic.version = 11 : i64} {
  func.func @kernel(%arg0: i32, %arg1: memref<32x768xbf16, #tpu.memory_space<vmem>>, %arg2: memref<32x128xbf16, #tpu.memory_space<vmem>>, %arg3: memref<1x768xf32, #tpu.memory_space<vmem>>, %arg4: memref<8x256xbf16, #tpu.memory_space<vmem>>, %arg5: memref<8x1xf32, #tpu.memory_space<vmem>>, %arg6: memref<8x768xbf16, #tpu.memory_space<vmem>>, %arg7: memref<1x8x2xf32, #tpu.memory_space<vmem>>, %arg8: memref<256x768xbf16, #tpu.memory_space<vmem>>) attributes {dimension_semantics = [#tpu.dimension_semantics<parallel>], iteration_bounds = array<i64: 2>, scalar_prefetch = 0 : i64, scratch_operands = 1 : i64, tpu.core_type = #tpu.core_type<tc>, window_params = [{transform_indices = @transform_0, window_bounds = array<i64: 32, 768>}, {transform_indices = @transform_1, window_bounds = array<i64: 32, 128>}, {transform_indices = @transform_2, window_bounds = array<i64: 1, 768>}, {pipeline_mode = #tpu.pipeline_mode<synchronous>, transform_indices = @transform_3, window_bounds = array<i64: 8, 256>}, {pipeline_mode = #tpu.pipeline_mode<synchronous>, transform_indices = @transform_4, window_bounds = array<i64: 8, 1>}, {transform_indices = @transform_5, window_bounds = array<i64: 8, 768>}, {transform_indices = @transform_6, window_bounds = array<i64: 1, 8, 2>}]} {
    %c0 = arith.constant 0 : index
    %c0_0 = arith.constant 0 : index
    %0 = vector.load %arg1[%c0, %c0_0] : memref<32x768xbf16, #tpu.memory_space<vmem>>, vector<32x768xbf16>
    %c0_1 = arith.constant 0 : index
    %c0_2 = arith.constant 0 : index
    %1 = vector.load %arg2[%c0_1, %c0_2] : memref<32x128xbf16, #tpu.memory_space<vmem>>, vector<32x128xbf16>
    %2 = tpu.concatenate %0, %1 in 1 : vector<32x768xbf16>, vector<32x128xbf16> -> vector<32x896xbf16>
    %3 = vector.extract_strided_slice %2 {offsets = [0, 0], sizes = [32, 768], strides = [1, 1]} : vector<32x896xbf16> to vector<32x768xbf16>
    %c0_3 = arith.constant 0 : index
    %c0_4 = arith.constant 0 : index
    %4 = vector.load %arg8[%c0_3, %c0_4] : memref<256x768xbf16, #tpu.memory_space<vmem>>, vector<32x768xbf16>
    tpu.vector_store %arg8[%c0_3, %c0_4], %3 {strides = array<i32>} : memref<256x768xbf16, #tpu.memory_space<vmem>>, vector<32x768xbf16>,
    %5 = vector.extract_strided_slice %2 {offsets = [0, 1], sizes = [32, 768], strides = [1, 1]} : vector<32x896xbf16> to vector<32x768xbf16>
    %c32 = arith.constant 32 : index
    %c0_5 = arith.constant 0 : index
    %6 = vector.load %arg8[%c32, %c0_5] : memref<256x768xbf16, #tpu.memory_space<vmem>>, vector<32x768xbf16>
    tpu.vector_store %arg8[%c32, %c0_5], %5 {strides = array<i32>} : memref<256x768xbf16, #tpu.memory_space<vmem>>, vector<32x768xbf16>,
    %7 = vector.extract_strided_slice %2 {offsets = [0, 9], sizes = [32, 768], strides = [1, 1]} : vector<32x896xbf16> to vector<32x768xbf16>
    %c64 = arith.constant 64 : index
    %c0_6 = arith.constant 0 : index
    %8 = vector.load %arg8[%c64, %c0_6] : memref<256x768xbf16, #tpu.memory_space<vmem>>, vector<32x768xbf16>
    tpu.vector_store %arg8[%c64, %c0_6], %7 {strides = array<i32>} : memref<256x768xbf16, #tpu.memory_space<vmem>>, vector<32x768xbf16>,
    %9 = vector.extract_strided_slice %2 {offsets = [0, 10], sizes = [32, 768], strides = [1, 1]} : vector<32x896xbf16> to vector<32x768xbf16>
    %c96 = arith.constant 96 : index
    %c0_7 = arith.constant 0 : index
    %10 = vector.load %arg8[%c96, %c0_7] : memref<256x768xbf16, #tpu.memory_space<vmem>>, vector<32x768xbf16>
    tpu.vector_store %arg8[%c96, %c0_7], %9 {strides = array<i32>} : memref<256x768xbf16, #tpu.memory_space<vmem>>, vector<32x768xbf16>,
    %11 = vector.extract_strided_slice %2 {offsets = [0, 81], sizes = [32, 768], strides = [1, 1]} : vector<32x896xbf16> to vector<32x768xbf16>
    %c128 = arith.constant 128 : index
    %c0_8 = arith.constant 0 : index
    %12 = vector.load %arg8[%c128, %c0_8] : memref<256x768xbf16, #tpu.memory_space<vmem>>, vector<32x768xbf16>
    tpu.vector_store %arg8[%c128, %c0_8], %11 {strides = array<i32>} : memref<256x768xbf16, #tpu.memory_space<vmem>>, vector<32x768xbf16>,
    %13 = vector.extract_strided_slice %2 {offsets = [0, 82], sizes = [32, 768], strides = [1, 1]} : vector<32x896xbf16> to vector<32x768xbf16>
    %c160 = arith.constant 160 : index
    %c0_9 = arith.constant 0 : index
    %14 = vector.load %arg8[%c160, %c0_9] : memref<256x768xbf16, #tpu.memory_space<vmem>>, vector<32x768xbf16>
    tpu.vector_store %arg8[%c160, %c0_9], %13 {strides = array<i32>} : memref<256x768xbf16, #tpu.memory_space<vmem>>, vector<32x768xbf16>,
    %15 = vector.extract_strided_slice %2 {offsets = [0, 90], sizes = [32, 768], strides = [1, 1]} : vector<32x896xbf16> to vector<32x768xbf16>
    %c192 = arith.constant 192 : index
    %c0_10 = arith.constant 0 : index
    %16 = vector.load %arg8[%c192, %c0_10] : memref<256x768xbf16, #tpu.memory_space<vmem>>, vector<32x768xbf16>
    tpu.vector_store %arg8[%c192, %c0_10], %15 {strides = array<i32>} : memref<256x768xbf16, #tpu.memory_space<vmem>>, vector<32x768xbf16>,
    %17 = vector.extract_strided_slice %2 {offsets = [0, 91], sizes = [32, 768], strides = [1, 1]} : vector<32x896xbf16> to vector<32x768xbf16>
    %c224 = arith.constant 224 : index
    %c0_11 = arith.constant 0 : index
    %18 = vector.load %arg8[%c224, %c0_11] : memref<256x768xbf16, #tpu.memory_space<vmem>>, vector<32x768xbf16>
    tpu.vector_store %arg8[%c224, %c0_11], %17 {strides = array<i32>} : memref<256x768xbf16, #tpu.memory_space<vmem>>, vector<32x768xbf16>,
    %c0_12 = arith.constant 0 : index
    %c0_13 = arith.constant 0 : index
    %19 = vector.load %arg4[%c0_12, %c0_13] : memref<8x256xbf16, #tpu.memory_space<vmem>>, vector<8x256xbf16>
    %c0_14 = arith.constant 0 : index
    %c0_15 = arith.constant 0 : index
    %20 = vector.load %arg8[%c0_14, %c0_15] : memref<256x768xbf16, #tpu.memory_space<vmem>>, vector<256x768xbf16>
    %cst = arith.constant dense<0.000000e+00> : vector<8x768xf32>
    %21 = tpu.matmul %19, %20, %cst {dimension_numbers = #tpu.dot_dimension_numbers<[1], [0], [0], [1], [0, 0, 1, 1], [], []>} : vector<8x256xbf16>, vector<256x768xbf16>, vector<8x768xf32> -> vector<8x768xf32>
    %c0_16 = arith.constant 0 : index
    %c0_17 = arith.constant 0 : index
    %22 = vector.load %arg5[%c0_16, %c0_17] : memref<8x1xf32, #tpu.memory_space<vmem>>, vector<8x1xf32>
    %23 = vector.broadcast %22 : vector<8x1xf32> to vector<8x768xf32>
    %24 = arith.addf %21, %23 : vector<8x768xf32>
    %25 = arith.truncf %24 : vector<8x768xf32> to vector<8x768xbf16>
    %c0_18 = arith.constant 0 : index
    %c0_19 = arith.constant 0 : index
    %26 = vector.load %arg6[%c0_18, %c0_19] : memref<8x768xbf16, #tpu.memory_space<vmem>>, vector<8x768xbf16>
    tpu.vector_store %arg6[%c0_18, %c0_19], %25 {strides = array<i32>} : memref<8x768xbf16, #tpu.memory_space<vmem>>, vector<8x768xbf16>,
    %c0_20 = arith.constant 0 : index
    %c0_21 = arith.constant 0 : index
    %27 = vector.load %arg3[%c0_20, %c0_21] : memref<1x768xf32, #tpu.memory_space<vmem>>, vector<1x768xf32>
    %cst_22 = arith.constant 5.000000e-01 : f32
    %28 = vector.broadcast %cst_22 : f32 to vector<1x768xf32>
    %29 = arith.cmpf ogt, %27, %28 : vector<1x768xf32>
    %cst_23 = arith.constant 0.000000e+00 : f32
    %30 = vector.shape_cast %29 : vector<1x768xi1> to vector<1x768xi1>
    %31 = vector.broadcast %30 : vector<1x768xi1> to vector<8x768xi1>
    %32 = vector.broadcast %cst_23 : f32 to vector<8x768xf32>
    %33 = arith.select %31, %24, %32 : vector<8x768xi1>, vector<8x768xf32>
    %cst_24 = arith.constant dense<0.000000e+00> : vector<8xf32>
    %34 = vector.multi_reduction <add>, %33, %cst_24 [1] : vector<8x768xf32> to vector<8xf32>
    %35 = vector.shape_cast %34 : vector<8xf32> to vector<8x1xf32>
    %36 = arith.mulf %33, %33 : vector<8x768xf32>
    %cst_25 = arith.constant dense<0.000000e+00> : vector<8xf32>
    %37 = vector.multi_reduction <add>, %36, %cst_25 [1] : vector<8x768xf32> to vector<8xf32>
    %38 = vector.shape_cast %37 : vector<8xf32> to vector<8x1xf32>
    %39 = tpu.concatenate %35, %38 in 1 : vector<8x1xf32>, vector<8x1xf32> -> vector<8x2xf32>
    %40 = vector.shape_cast %39 : vector<8x2xf32> to vector<1x8x2xf32>
    %c0_26 = arith.constant 0 : index
    %c0_27 = arith.constant 0 : index
    %c0_28 = arith.constant 0 : index
    %41 = vector.load %arg7[%c0_26, %c0_27, %c0_28] : memref<1x8x2xf32, #tpu.memory_space<vmem>>, vector<1x8x2xf32>
    tpu.vector_store %arg7[%c0_26, %c0_27, %c0_28], %40 {strides = array<i32>} : memref<1x8x2xf32, #tpu.memory_space<vmem>>, vector<1x8x2xf32>,
    return
  }
  func.func @transform_0(%arg0: i32) -> (i32, i32) {
    %c0_i32 = arith.constant 0 : i32
    %c0_i32_0 = arith.constant 0 : i32
    return %c0_i32, %arg0 : i32, i32
  }
  func.func @transform_1(%arg0: i32) -> (i32, i32) {
    %c1_i32 = arith.constant 1 : i32
    %0 = arith.addi %arg0, %c1_i32 : i32
    %c6_i32 = arith.constant 6 : i32
    %1 = arith.muli %0, %c6_i32 : i32
    %c11_i32 = arith.constant 11 : i32
    %2 = arith.minsi %1, %c11_i32 : i32
    %c0_i32 = arith.constant 0 : i32
    %c0_i32_0 = arith.constant 0 : i32
    return %c0_i32, %2 : i32, i32
  }
  func.func @transform_2(%arg0: i32) -> (i32, i32) {
    %c0_i32 = arith.constant 0 : i32
    %c0_i32_0 = arith.constant 0 : i32
    return %c0_i32, %arg0 : i32, i32
  }
  func.func @transform_3(%arg0: i32) -> (i32, i32) {
    %c0_i32 = arith.constant 0 : i32
    %c0_i32_0 = arith.constant 0 : i32
    %c0_i32_1 = arith.constant 0 : i32
    return %c0_i32, %c0_i32_0 : i32, i32
  }
  func.func @transform_4(%arg0: i32) -> (i32, i32) {
    %c0_i32 = arith.constant 0 : i32
    %c0_i32_0 = arith.constant 0 : i32
    %c0_i32_1 = arith.constant 0 : i32
    return %c0_i32, %c0_i32_0 : i32, i32
  }
  func.func @transform_5(%arg0: i32) -> (i32, i32) {
    %c0_i32 = arith.constant 0 : i32
    %c0_i32_0 = arith.constant 0 : i32
    return %c0_i32, %arg0 : i32, i32
  }
  func.func @transform_6(%arg0: i32) -> (i32, i32, i32) {
    %c0_i32 = arith.constant 0 : i32
    %c0_i32_0 = arith.constant 0 : i32
    %c0_i32_1 = arith.constant 0 : i32
    return %arg0, %c0_i32, %c0_i32_0 : i32, i32, i32
  }
}

module attributes {stable_mosaic.version = 11 : i64} {
  func.func @kernel(%arg0: i32, %arg1: memref<64x128xbf16, #tpu.memory_space<vmem>>, %arg2: memref<64x128xbf16, #tpu.memory_space<vmem>>, %arg3: memref<1x128xf32, #tpu.memory_space<vmem>>, %arg4: memref<16x512xbf16, #tpu.memory_space<vmem>>, %arg5: memref<16x1xf32, #tpu.memory_space<vmem>>, %arg6: memref<16x128xbf16, #tpu.memory_space<vmem>>, %arg7: memref<1x16x2xf32, #tpu.memory_space<vmem>>, %arg8: memref<512x128xbf16, #tpu.memory_space<vmem>>) attributes {dimension_semantics = [#tpu.dimension_semantics<parallel>], iteration_bounds = array<i64: 2>, scalar_prefetch = 0 : i64, scratch_operands = 1 : i64, tpu.core_type = #tpu.core_type<tc>, window_params = [{transform_indices = @transform_0, window_bounds = array<i64: 64, 128>}, {transform_indices = @transform_1, window_bounds = array<i64: 64, 128>}, {transform_indices = @transform_2, window_bounds = array<i64: 1, 128>}, {pipeline_mode = #tpu.pipeline_mode<synchronous>, transform_indices = @transform_3, window_bounds = array<i64: 16, 512>}, {pipeline_mode = #tpu.pipeline_mode<synchronous>, transform_indices = @transform_4, window_bounds = array<i64: 16, 1>}, {transform_indices = @transform_5, window_bounds = array<i64: 16, 128>}, {transform_indices = @transform_6, window_bounds = array<i64: 1, 16, 2>}]} {
    %c0 = arith.constant 0 : index
    %c0_0 = arith.constant 0 : index
    %0 = vector.load %arg1[%c0, %c0_0] : memref<64x128xbf16, #tpu.memory_space<vmem>>, vector<64x128xbf16>
    %c0_1 = arith.constant 0 : index
    %c0_2 = arith.constant 0 : index
    %1 = vector.load %arg2[%c0_1, %c0_2] : memref<64x128xbf16, #tpu.memory_space<vmem>>, vector<64x128xbf16>
    %2 = tpu.concatenate %0, %1 in 1 : vector<64x128xbf16>, vector<64x128xbf16> -> vector<64x256xbf16>
    %3 = vector.extract_strided_slice %2 {offsets = [0, 0], sizes = [64, 128], strides = [1, 1]} : vector<64x256xbf16> to vector<64x128xbf16>
    %c0_3 = arith.constant 0 : index
    %c0_4 = arith.constant 0 : index
    %4 = vector.load %arg8[%c0_3, %c0_4] : memref<512x128xbf16, #tpu.memory_space<vmem>>, vector<64x128xbf16>
    tpu.vector_store %arg8[%c0_3, %c0_4], %3 {strides = array<i32>} : memref<512x128xbf16, #tpu.memory_space<vmem>>, vector<64x128xbf16>,
    %5 = vector.extract_strided_slice %2 {offsets = [0, 1], sizes = [64, 128], strides = [1, 1]} : vector<64x256xbf16> to vector<64x128xbf16>
    %c64 = arith.constant 64 : index
    %c0_5 = arith.constant 0 : index
    %6 = vector.load %arg8[%c64, %c0_5] : memref<512x128xbf16, #tpu.memory_space<vmem>>, vector<64x128xbf16>
    tpu.vector_store %arg8[%c64, %c0_5], %5 {strides = array<i32>} : memref<512x128xbf16, #tpu.memory_space<vmem>>, vector<64x128xbf16>,
    %7 = vector.extract_strided_slice %2 {offsets = [0, 5], sizes = [64, 128], strides = [1, 1]} : vector<64x256xbf16> to vector<64x128xbf16>
    %c128 = arith.constant 128 : index
    %c0_6 = arith.constant 0 : index
    %8 = vector.load %arg8[%c128, %c0_6] : memref<512x128xbf16, #tpu.memory_space<vmem>>, vector<64x128xbf16>
    tpu.vector_store %arg8[%c128, %c0_6], %7 {strides = array<i32>} : memref<512x128xbf16, #tpu.memory_space<vmem>>, vector<64x128xbf16>,
    %9 = vector.extract_strided_slice %2 {offsets = [0, 6], sizes = [64, 128], strides = [1, 1]} : vector<64x256xbf16> to vector<64x128xbf16>
    %c192 = arith.constant 192 : index
    %c0_7 = arith.constant 0 : index
    %10 = vector.load %arg8[%c192, %c0_7] : memref<512x128xbf16, #tpu.memory_space<vmem>>, vector<64x128xbf16>
    tpu.vector_store %arg8[%c192, %c0_7], %9 {strides = array<i32>} : memref<512x128xbf16, #tpu.memory_space<vmem>>, vector<64x128xbf16>,
    %11 = vector.extract_strided_slice %2 {offsets = [0, 25], sizes = [64, 128], strides = [1, 1]} : vector<64x256xbf16> to vector<64x128xbf16>
    %c256 = arith.constant 256 : index
    %c0_8 = arith.constant 0 : index
    %12 = vector.load %arg8[%c256, %c0_8] : memref<512x128xbf16, #tpu.memory_space<vmem>>, vector<64x128xbf16>
    tpu.vector_store %arg8[%c256, %c0_8], %11 {strides = array<i32>} : memref<512x128xbf16, #tpu.memory_space<vmem>>, vector<64x128xbf16>,
    %13 = vector.extract_strided_slice %2 {offsets = [0, 26], sizes = [64, 128], strides = [1, 1]} : vector<64x256xbf16> to vector<64x128xbf16>
    %c320 = arith.constant 320 : index
    %c0_9 = arith.constant 0 : index
    %14 = vector.load %arg8[%c320, %c0_9] : memref<512x128xbf16, #tpu.memory_space<vmem>>, vector<64x128xbf16>
    tpu.vector_store %arg8[%c320, %c0_9], %13 {strides = array<i32>} : memref<512x128xbf16, #tpu.memory_space<vmem>>, vector<64x128xbf16>,
    %15 = vector.extract_strided_slice %2 {offsets = [0, 30], sizes = [64, 128], strides = [1, 1]} : vector<64x256xbf16> to vector<64x128xbf16>
    %c384 = arith.constant 384 : index
    %c0_10 = arith.constant 0 : index
    %16 = vector.load %arg8[%c384, %c0_10] : memref<512x128xbf16, #tpu.memory_space<vmem>>, vector<64x128xbf16>
    tpu.vector_store %arg8[%c384, %c0_10], %15 {strides = array<i32>} : memref<512x128xbf16, #tpu.memory_space<vmem>>, vector<64x128xbf16>,
    %17 = vector.extract_strided_slice %2 {offsets = [0, 31], sizes = [64, 128], strides = [1, 1]} : vector<64x256xbf16> to vector<64x128xbf16>
    %c448 = arith.constant 448 : index
    %c0_11 = arith.constant 0 : index
    %18 = vector.load %arg8[%c448, %c0_11] : memref<512x128xbf16, #tpu.memory_space<vmem>>, vector<64x128xbf16>
    tpu.vector_store %arg8[%c448, %c0_11], %17 {strides = array<i32>} : memref<512x128xbf16, #tpu.memory_space<vmem>>, vector<64x128xbf16>,
    %c0_12 = arith.constant 0 : index
    %c0_13 = arith.constant 0 : index
    %19 = vector.load %arg4[%c0_12, %c0_13] : memref<16x512xbf16, #tpu.memory_space<vmem>>, vector<16x512xbf16>
    %c0_14 = arith.constant 0 : index
    %c0_15 = arith.constant 0 : index
    %20 = vector.load %arg8[%c0_14, %c0_15] : memref<512x128xbf16, #tpu.memory_space<vmem>>, vector<512x128xbf16>
    %cst = arith.constant dense<0.000000e+00> : vector<16x128xf32>
    %21 = tpu.matmul %19, %20, %cst {dimension_numbers = #tpu.dot_dimension_numbers<[1], [0], [0], [1], [0, 0, 1, 1], [], []>} : vector<16x512xbf16>, vector<512x128xbf16>, vector<16x128xf32> -> vector<16x128xf32>
    %c0_16 = arith.constant 0 : index
    %c0_17 = arith.constant 0 : index
    %22 = vector.load %arg5[%c0_16, %c0_17] : memref<16x1xf32, #tpu.memory_space<vmem>>, vector<16x1xf32>
    %23 = vector.broadcast %22 : vector<16x1xf32> to vector<16x128xf32>
    %24 = arith.addf %21, %23 : vector<16x128xf32>
    %25 = arith.truncf %24 : vector<16x128xf32> to vector<16x128xbf16>
    %c0_18 = arith.constant 0 : index
    %c0_19 = arith.constant 0 : index
    %26 = vector.load %arg6[%c0_18, %c0_19] : memref<16x128xbf16, #tpu.memory_space<vmem>>, vector<16x128xbf16>
    tpu.vector_store %arg6[%c0_18, %c0_19], %25 {strides = array<i32>} : memref<16x128xbf16, #tpu.memory_space<vmem>>, vector<16x128xbf16>,
    %c0_20 = arith.constant 0 : index
    %c0_21 = arith.constant 0 : index
    %27 = vector.load %arg3[%c0_20, %c0_21] : memref<1x128xf32, #tpu.memory_space<vmem>>, vector<1x128xf32>
    %cst_22 = arith.constant 5.000000e-01 : f32
    %28 = vector.broadcast %cst_22 : f32 to vector<1x128xf32>
    %29 = arith.cmpf ogt, %27, %28 : vector<1x128xf32>
    %cst_23 = arith.constant 0.000000e+00 : f32
    %30 = vector.shape_cast %29 : vector<1x128xi1> to vector<1x128xi1>
    %31 = vector.broadcast %30 : vector<1x128xi1> to vector<16x128xi1>
    %32 = vector.broadcast %cst_23 : f32 to vector<16x128xf32>
    %33 = arith.select %31, %24, %32 : vector<16x128xi1>, vector<16x128xf32>
    %cst_24 = arith.constant dense<0.000000e+00> : vector<16xf32>
    %34 = vector.multi_reduction <add>, %33, %cst_24 [1] : vector<16x128xf32> to vector<16xf32>
    %35 = vector.shape_cast %34 : vector<16xf32> to vector<16x1xf32>
    %36 = arith.mulf %33, %33 : vector<16x128xf32>
    %cst_25 = arith.constant dense<0.000000e+00> : vector<16xf32>
    %37 = vector.multi_reduction <add>, %36, %cst_25 [1] : vector<16x128xf32> to vector<16xf32>
    %38 = vector.shape_cast %37 : vector<16xf32> to vector<16x1xf32>
    %39 = tpu.concatenate %35, %38 in 1 : vector<16x1xf32>, vector<16x1xf32> -> vector<16x2xf32>
    %40 = vector.shape_cast %39 : vector<16x2xf32> to vector<1x16x2xf32>
    %c0_26 = arith.constant 0 : index
    %c0_27 = arith.constant 0 : index
    %c0_28 = arith.constant 0 : index
    %41 = vector.load %arg7[%c0_26, %c0_27, %c0_28] : memref<1x16x2xf32, #tpu.memory_space<vmem>>, vector<1x16x2xf32>
    tpu.vector_store %arg7[%c0_26, %c0_27, %c0_28], %40 {strides = array<i32>} : memref<1x16x2xf32, #tpu.memory_space<vmem>>, vector<1x16x2xf32>,
    return
  }
  func.func @transform_0(%arg0: i32) -> (i32, i32) {
    %c0_i32 = arith.constant 0 : i32
    %c0_i32_0 = arith.constant 0 : i32
    return %c0_i32, %arg0 : i32, i32
  }
  func.func @transform_1(%arg0: i32) -> (i32, i32) {
    %c1_i32 = arith.constant 1 : i32
    %0 = arith.addi %arg0, %c1_i32 : i32
    %c1_i32_0 = arith.constant 1 : i32
    %1 = arith.muli %0, %c1_i32_0 : i32
    %c1_i32_1 = arith.constant 1 : i32
    %2 = arith.minsi %1, %c1_i32_1 : i32
    %c0_i32 = arith.constant 0 : i32
    %c0_i32_2 = arith.constant 0 : i32
    return %c0_i32, %2 : i32, i32
  }
  func.func @transform_2(%arg0: i32) -> (i32, i32) {
    %c0_i32 = arith.constant 0 : i32
    %c0_i32_0 = arith.constant 0 : i32
    return %c0_i32, %arg0 : i32, i32
  }
  func.func @transform_3(%arg0: i32) -> (i32, i32) {
    %c0_i32 = arith.constant 0 : i32
    %c0_i32_0 = arith.constant 0 : i32
    %c0_i32_1 = arith.constant 0 : i32
    return %c0_i32, %c0_i32_0 : i32, i32
  }
  func.func @transform_4(%arg0: i32) -> (i32, i32) {
    %c0_i32 = arith.constant 0 : i32
    %c0_i32_0 = arith.constant 0 : i32
    %c0_i32_1 = arith.constant 0 : i32
    return %c0_i32, %c0_i32_0 : i32, i32
  }
  func.func @transform_5(%arg0: i32) -> (i32, i32) {
    %c0_i32 = arith.constant 0 : i32
    %c0_i32_0 = arith.constant 0 : i32
    return %c0_i32, %arg0 : i32, i32
  }
  func.func @transform_6(%arg0: i32) -> (i32, i32, i32) {
    %c0_i32 = arith.constant 0 : i32
    %c0_i32_0 = arith.constant 0 : i32
    %c0_i32_1 = arith.constant 0 : i32
    return %arg0, %c0_i32, %c0_i32_0 : i32, i32, i32
  }
}

module attributes {stable_mosaic.version = 11 : i64} {
  func.func @kernel(%arg0: i32, %arg1: memref<16x128xbf16, #tpu.memory_space<vmem>>, %arg2: memref<16x256xbf16, #tpu.memory_space<vmem>>, %arg3: memref<16x128xbf16, #tpu.memory_space<vmem>>, %arg4: memref<1x128xf32, #tpu.memory_space<vmem>>, %arg5: memref<1x256xf32, #tpu.memory_space<vmem>>, %arg6: memref<1x128xf32, #tpu.memory_space<vmem>>, %arg7: memref<16x1xf32, #tpu.memory_space<vmem>>, %arg8: memref<16x1xf32, #tpu.memory_space<vmem>>, %arg9: memref<16x432xbf16, #tpu.memory_space<vmem>>, %arg10: memref<16x1xf32, #tpu.memory_space<vmem>>, %arg11: memref<16x256xbf16, #tpu.memory_space<vmem>>, %arg12: memref<1x16x2xf32, #tpu.memory_space<vmem>>, %arg13: memref<432x256xbf16, #tpu.memory_space<vmem>>) attributes {dimension_semantics = [#tpu.dimension_semantics<parallel>], iteration_bounds = array<i64: 2>, scalar_prefetch = 0 : i64, scratch_operands = 1 : i64, tpu.core_type = #tpu.core_type<tc>, window_params = [{transform_indices = @transform_0, window_bounds = array<i64: 16, 128>}, {transform_indices = @transform_1, window_bounds = array<i64: 16, 256>}, {transform_indices = @transform_2, window_bounds = array<i64: 16, 128>}, {transform_indices = @transform_3, window_bounds = array<i64: 1, 128>}, {transform_indices = @transform_4, window_bounds = array<i64: 1, 256>}, {transform_indices = @transform_5, window_bounds = array<i64: 1, 128>}, {pipeline_mode = #tpu.pipeline_mode<synchronous>, transform_indices = @transform_6, window_bounds = array<i64: 16, 1>}, {pipeline_mode = #tpu.pipeline_mode<synchronous>, transform_indices = @transform_7, window_bounds = array<i64: 16, 1>}, {pipeline_mode = #tpu.pipeline_mode<synchronous>, transform_indices = @transform_8, window_bounds = array<i64: 16, 432>}, {pipeline_mode = #tpu.pipeline_mode<synchronous>, transform_indices = @transform_9, window_bounds = array<i64: 16, 1>}, {transform_indices = @transform_10, window_bounds = array<i64: 16, 256>}, {transform_indices = @transform_11, window_bounds = array<i64: 1, 16, 2>}]} {
    %c0 = arith.constant 0 : index
    %c0_0 = arith.constant 0 : index
    %0 = vector.load %arg1[%c0, %c0_0] : memref<16x128xbf16, #tpu.memory_space<vmem>>, vector<16x128xbf16>
    %c0_1 = arith.constant 0 : index
    %c0_2 = arith.constant 0 : index
    %1 = vector.load %arg2[%c0_1, %c0_2] : memref<16x256xbf16, #tpu.memory_space<vmem>>, vector<16x256xbf16>
    %c0_3 = arith.constant 0 : index
    %c0_4 = arith.constant 0 : index
    %2 = vector.load %arg3[%c0_3, %c0_4] : memref<16x128xbf16, #tpu.memory_space<vmem>>, vector<16x128xbf16>
    %3 = tpu.concatenate %0, %1, %2 in 1 : vector<16x128xbf16>, vector<16x256xbf16>, vector<16x128xbf16> -> vector<16x512xbf16>
    %c0_5 = arith.constant 0 : index
    %c0_6 = arith.constant 0 : index
    %4 = vector.load %arg4[%c0_5, %c0_6] : memref<1x128xf32, #tpu.memory_space<vmem>>, vector<1x128xf32>
    %c0_7 = arith.constant 0 : index
    %c0_8 = arith.constant 0 : index
    %5 = vector.load %arg5[%c0_7, %c0_8] : memref<1x256xf32, #tpu.memory_space<vmem>>, vector<1x256xf32>
    %c0_9 = arith.constant 0 : index
    %c0_10 = arith.constant 0 : index
    %6 = vector.load %arg6[%c0_9, %c0_10] : memref<1x128xf32, #tpu.memory_space<vmem>>, vector<1x128xf32>
    %7 = tpu.concatenate %4, %5, %6 in 1 : vector<1x128xf32>, vector<1x256xf32>, vector<1x128xf32> -> vector<1x512xf32>
    %8 = arith.extf %3 : vector<16x512xbf16> to vector<16x512xf32>
    %c0_11 = arith.constant 0 : index
    %c0_12 = arith.constant 0 : index
    %9 = vector.load %arg7[%c0_11, %c0_12] : memref<16x1xf32, #tpu.memory_space<vmem>>, vector<16x1xf32>
    %10 = vector.broadcast %9 : vector<16x1xf32> to vector<16x512xf32>
    %11 = arith.mulf %8, %10 : vector<16x512xf32>
    %c0_13 = arith.constant 0 : index
    %c0_14 = arith.constant 0 : index
    %12 = vector.load %arg8[%c0_13, %c0_14] : memref<16x1xf32, #tpu.memory_space<vmem>>, vector<16x1xf32>
    %13 = vector.broadcast %12 : vector<16x1xf32> to vector<16x512xf32>
    %14 = arith.addf %11, %13 : vector<16x512xf32>
    %cst = arith.constant 0.000000e+00 : f32
    %15 = vector.broadcast %cst : f32 to vector<16x512xf32>
    %16 = arith.maximumf %14, %15 : vector<16x512xf32>
    %cst_15 = arith.constant 5.000000e-01 : f32
    %17 = vector.broadcast %cst_15 : f32 to vector<1x512xf32>
    %18 = arith.cmpf ogt, %7, %17 : vector<1x512xf32>
    %cst_16 = arith.constant 0.000000e+00 : f32
    %19 = vector.shape_cast %18 : vector<1x512xi1> to vector<1x512xi1>
    %20 = vector.broadcast %19 : vector<1x512xi1> to vector<16x512xi1>
    %21 = vector.broadcast %cst_16 : f32 to vector<16x512xf32>
    %22 = arith.select %20, %16, %21 : vector<16x512xi1>, vector<16x512xf32>
    %23 = arith.truncf %22 : vector<16x512xf32> to vector<16x512xbf16>
    %24 = vector.extract_strided_slice %23 {offsets = [0, 85], sizes = [16, 256], strides = [1, 1]} : vector<16x512xbf16> to vector<16x256xbf16>
    %c0_17 = arith.constant 0 : index
    %c0_18 = arith.constant 0 : index
    %25 = vector.load %arg13[%c0_17, %c0_18] : memref<432x256xbf16, #tpu.memory_space<vmem>>, vector<16x256xbf16>
    tpu.vector_store %arg13[%c0_17, %c0_18], %24 {strides = array<i32>} : memref<432x256xbf16, #tpu.memory_space<vmem>>, vector<16x256xbf16>,
    %26 = vector.extract_strided_slice %23 {offsets = [0, 86], sizes = [16, 256], strides = [1, 1]} : vector<16x512xbf16> to vector<16x256xbf16>
    %c16 = arith.constant 16 : index
    %c0_19 = arith.constant 0 : index
    %27 = vector.load %arg13[%c16, %c0_19] : memref<432x256xbf16, #tpu.memory_space<vmem>>, vector<16x256xbf16>
    tpu.vector_store %arg13[%c16, %c0_19], %26 {strides = array<i32>} : memref<432x256xbf16, #tpu.memory_space<vmem>>, vector<16x256xbf16>,
    %28 = vector.extract_strided_slice %23 {offsets = [0, 87], sizes = [16, 256], strides = [1, 1]} : vector<16x512xbf16> to vector<16x256xbf16>
    %c32 = arith.constant 32 : index
    %c0_20 = arith.constant 0 : index
    %29 = vector.load %arg13[%c32, %c0_20] : memref<432x256xbf16, #tpu.memory_space<vmem>>, vector<16x256xbf16>
    tpu.vector_store %arg13[%c32, %c0_20], %28 {strides = array<i32>} : memref<432x256xbf16, #tpu.memory_space<vmem>>, vector<16x256xbf16>,
    %30 = vector.extract_strided_slice %23 {offsets = [0, 91], sizes = [16, 256], strides = [1, 1]} : vector<16x512xbf16> to vector<16x256xbf16>
    %c48 = arith.constant 48 : index
    %c0_21 = arith.constant 0 : index
    %31 = vector.load %arg13[%c48, %c0_21] : memref<432x256xbf16, #tpu.memory_space<vmem>>, vector<16x256xbf16>
    tpu.vector_store %arg13[%c48, %c0_21], %30 {strides = array<i32>} : memref<432x256xbf16, #tpu.memory_space<vmem>>, vector<16x256xbf16>,
    %32 = vector.extract_strided_slice %23 {offsets = [0, 92], sizes = [16, 256], strides = [1, 1]} : vector<16x512xbf16> to vector<16x256xbf16>
    %c64 = arith.constant 64 : index
    %c0_22 = arith.constant 0 : index
    %33 = vector.load %arg13[%c64, %c0_22] : memref<432x256xbf16, #tpu.memory_space<vmem>>, vector<16x256xbf16>
    tpu.vector_store %arg13[%c64, %c0_22], %32 {strides = array<i32>} : memref<432x256xbf16, #tpu.memory_space<vmem>>, vector<16x256xbf16>,
    %34 = vector.extract_strided_slice %23 {offsets = [0, 93], sizes = [16, 256], strides = [1, 1]} : vector<16x512xbf16> to vector<16x256xbf16>
    %c80 = arith.constant 80 : index
    %c0_23 = arith.constant 0 : index
    %35 = vector.load %arg13[%c80, %c0_23] : memref<432x256xbf16, #tpu.memory_space<vmem>>, vector<16x256xbf16>
    tpu.vector_store %arg13[%c80, %c0_23], %34 {strides = array<i32>} : memref<432x256xbf16, #tpu.memory_space<vmem>>, vector<16x256xbf16>,
    %36 = vector.extract_strided_slice %23 {offsets = [0, 97], sizes = [16, 256], strides = [1, 1]} : vector<16x512xbf16> to vector<16x256xbf16>
    %c96 = arith.constant 96 : index
    %c0_24 = arith.constant 0 : index
    %37 = vector.load %arg13[%c96, %c0_24] : memref<432x256xbf16, #tpu.memory_space<vmem>>, vector<16x256xbf16>
    tpu.vector_store %arg13[%c96, %c0_24], %36 {strides = array<i32>} : memref<432x256xbf16, #tpu.memory_space<vmem>>, vector<16x256xbf16>,
    %38 = vector.extract_strided_slice %23 {offsets = [0, 98], sizes = [16, 256], strides = [1, 1]} : vector<16x512xbf16> to vector<16x256xbf16>
    %c112 = arith.constant 112 : index
    %c0_25 = arith.constant 0 : index
    %39 = vector.load %arg13[%c112, %c0_25] : memref<432x256xbf16, #tpu.memory_space<vmem>>, vector<16x256xbf16>
    tpu.vector_store %arg13[%c112, %c0_25], %38 {strides = array<i32>} : memref<432x256xbf16, #tpu.memory_space<vmem>>, vector<16x256xbf16>,
    %40 = vector.extract_strided_slice %23 {offsets = [0, 99], sizes = [16, 256], strides = [1, 1]} : vector<16x512xbf16> to vector<16x256xbf16>
    %c128 = arith.constant 128 : index
    %c0_26 = arith.constant 0 : index
    %41 = vector.load %arg13[%c128, %c0_26] : memref<432x256xbf16, #tpu.memory_space<vmem>>, vector<16x256xbf16>
    tpu.vector_store %arg13[%c128, %c0_26], %40 {strides = array<i32>} : memref<432x256xbf16, #tpu.memory_space<vmem>>, vector<16x256xbf16>,
    %42 = vector.extract_strided_slice %23 {offsets = [0, 121], sizes = [16, 256], strides = [1, 1]} : vector<16x512xbf16> to vector<16x256xbf16>
    %c144 = arith.constant 144 : index
    %c0_27 = arith.constant 0 : index
    %43 = vector.load %arg13[%c144, %c0_27] : memref<432x256xbf16, #tpu.memory_space<vmem>>, vector<16x256xbf16>
    tpu.vector_store %arg13[%c144, %c0_27], %42 {strides = array<i32>} : memref<432x256xbf16, #tpu.memory_space<vmem>>, vector<16x256xbf16>,
    %44 = vector.extract_strided_slice %23 {offsets = [0, 122], sizes = [16, 256], strides = [1, 1]} : vector<16x512xbf16> to vector<16x256xbf16>
    %c160 = arith.constant 160 : index
    %c0_28 = arith.constant 0 : index
    %45 = vector.load %arg13[%c160, %c0_28] : memref<432x256xbf16, #tpu.memory_space<vmem>>, vector<16x256xbf16>
    tpu.vector_store %arg13[%c160, %c0_28], %44 {strides = array<i32>} : memref<432x256xbf16, #tpu.memory_space<vmem>>, vector<16x256xbf16>,
    %46 = vector.extract_strided_slice %23 {offsets = [0, 123], sizes = [16, 256], strides = [1, 1]} : vector<16x512xbf16> to vector<16x256xbf16>
    %c176 = arith.constant 176 : index
    %c0_29 = arith.constant 0 : index
    %47 = vector.load %arg13[%c176, %c0_29] : memref<432x256xbf16, #tpu.memory_space<vmem>>, vector<16x256xbf16>
    tpu.vector_store %arg13[%c176, %c0_29], %46 {strides = array<i32>} : memref<432x256xbf16, #tpu.memory_space<vmem>>, vector<16x256xbf16>,
    %48 = vector.extract_strided_slice %23 {offsets = [0, 127], sizes = [16, 256], strides = [1, 1]} : vector<16x512xbf16> to vector<16x256xbf16>
    %c192 = arith.constant 192 : index
    %c0_30 = arith.constant 0 : index
    %49 = vector.load %arg13[%c192, %c0_30] : memref<432x256xbf16, #tpu.memory_space<vmem>>, vector<16x256xbf16>
    tpu.vector_store %arg13[%c192, %c0_30], %48 {strides = array<i32>} : memref<432x256xbf16, #tpu.memory_space<vmem>>, vector<16x256xbf16>,
    %50 = vector.extract_strided_slice %23 {offsets = [0, 128], sizes = [16, 256], strides = [1, 1]} : vector<16x512xbf16> to vector<16x256xbf16>
    %c208 = arith.constant 208 : index
    %c0_31 = arith.constant 0 : index
    %51 = vector.load %arg13[%c208, %c0_31] : memref<432x256xbf16, #tpu.memory_space<vmem>>, vector<16x256xbf16>
    tpu.vector_store %arg13[%c208, %c0_31], %50 {strides = array<i32>} : memref<432x256xbf16, #tpu.memory_space<vmem>>, vector<16x256xbf16>,
    %52 = vector.extract_strided_slice %23 {offsets = [0, 129], sizes = [16, 256], strides = [1, 1]} : vector<16x512xbf16> to vector<16x256xbf16>
    %c224 = arith.constant 224 : index
    %c0_32 = arith.constant 0 : index
    %53 = vector.load %arg13[%c224, %c0_32] : memref<432x256xbf16, #tpu.memory_space<vmem>>, vector<16x256xbf16>
    tpu.vector_store %arg13[%c224, %c0_32], %52 {strides = array<i32>} : memref<432x256xbf16, #tpu.memory_space<vmem>>, vector<16x256xbf16>,
    %54 = vector.extract_strided_slice %23 {offsets = [0, 133], sizes = [16, 256], strides = [1, 1]} : vector<16x512xbf16> to vector<16x256xbf16>
    %c240 = arith.constant 240 : index
    %c0_33 = arith.constant 0 : index
    %55 = vector.load %arg13[%c240, %c0_33] : memref<432x256xbf16, #tpu.memory_space<vmem>>, vector<16x256xbf16>
    tpu.vector_store %arg13[%c240, %c0_33], %54 {strides = array<i32>} : memref<432x256xbf16, #tpu.memory_space<vmem>>, vector<16x256xbf16>,
    %56 = vector.extract_strided_slice %23 {offsets = [0, 134], sizes = [16, 256], strides = [1, 1]} : vector<16x512xbf16> to vector<16x256xbf16>
    %c256 = arith.constant 256 : index
    %c0_34 = arith.constant 0 : index
    %57 = vector.load %arg13[%c256, %c0_34] : memref<432x256xbf16, #tpu.memory_space<vmem>>, vector<16x256xbf16>
    tpu.vector_store %arg13[%c256, %c0_34], %56 {strides = array<i32>} : memref<432x256xbf16, #tpu.memory_space<vmem>>, vector<16x256xbf16>,
    %58 = vector.extract_strided_slice %23 {offsets = [0, 135], sizes = [16, 256], strides = [1, 1]} : vector<16x512xbf16> to vector<16x256xbf16>
    %c272 = arith.constant 272 : index
    %c0_35 = arith.constant 0 : index
    %59 = vector.load %arg13[%c272, %c0_35] : memref<432x256xbf16, #tpu.memory_space<vmem>>, vector<16x256xbf16>
    tpu.vector_store %arg13[%c272, %c0_35], %58 {strides = array<i32>} : memref<432x256xbf16, #tpu.memory_space<vmem>>, vector<16x256xbf16>,
    %60 = vector.extract_strided_slice %23 {offsets = [0, 157], sizes = [16, 256], strides = [1, 1]} : vector<16x512xbf16> to vector<16x256xbf16>
    %c288 = arith.constant 288 : index
    %c0_36 = arith.constant 0 : index
    %61 = vector.load %arg13[%c288, %c0_36] : memref<432x256xbf16, #tpu.memory_space<vmem>>, vector<16x256xbf16>
    tpu.vector_store %arg13[%c288, %c0_36], %60 {strides = array<i32>} : memref<432x256xbf16, #tpu.memory_space<vmem>>, vector<16x256xbf16>,
    %62 = vector.extract_strided_slice %23 {offsets = [0, 158], sizes = [16, 256], strides = [1, 1]} : vector<16x512xbf16> to vector<16x256xbf16>
    %c304 = arith.constant 304 : index
    %c0_37 = arith.constant 0 : index
    %63 = vector.load %arg13[%c304, %c0_37] : memref<432x256xbf16, #tpu.memory_space<vmem>>, vector<16x256xbf16>
    tpu.vector_store %arg13[%c304, %c0_37], %62 {strides = array<i32>} : memref<432x256xbf16, #tpu.memory_space<vmem>>, vector<16x256xbf16>,
    %64 = vector.extract_strided_slice %23 {offsets = [0, 159], sizes = [16, 256], strides = [1, 1]} : vector<16x512xbf16> to vector<16x256xbf16>
    %c320 = arith.constant 320 : index
    %c0_38 = arith.constant 0 : index
    %65 = vector.load %arg13[%c320, %c0_38] : memref<432x256xbf16, #tpu.memory_space<vmem>>, vector<16x256xbf16>
    tpu.vector_store %arg13[%c320, %c0_38], %64 {strides = array<i32>} : memref<432x256xbf16, #tpu.memory_space<vmem>>, vector<16x256xbf16>,
    %66 = vector.extract_strided_slice %23 {offsets = [0, 163], sizes = [16, 256], strides = [1, 1]} : vector<16x512xbf16> to vector<16x256xbf16>
    %c336 = arith.constant 336 : index
    %c0_39 = arith.constant 0 : index
    %67 = vector.load %arg13[%c336, %c0_39] : memref<432x256xbf16, #tpu.memory_space<vmem>>, vector<16x256xbf16>
    tpu.vector_store %arg13[%c336, %c0_39], %66 {strides = array<i32>} : memref<432x256xbf16, #tpu.memory_space<vmem>>, vector<16x256xbf16>,
    %68 = vector.extract_strided_slice %23 {offsets = [0, 164], sizes = [16, 256], strides = [1, 1]} : vector<16x512xbf16> to vector<16x256xbf16>
    %c352 = arith.constant 352 : index
    %c0_40 = arith.constant 0 : index
    %69 = vector.load %arg13[%c352, %c0_40] : memref<432x256xbf16, #tpu.memory_space<vmem>>, vector<16x256xbf16>
    tpu.vector_store %arg13[%c352, %c0_40], %68 {strides = array<i32>} : memref<432x256xbf16, #tpu.memory_space<vmem>>, vector<16x256xbf16>,
    %70 = vector.extract_strided_slice %23 {offsets = [0, 165], sizes = [16, 256], strides = [1, 1]} : vector<16x512xbf16> to vector<16x256xbf16>
    %c368 = arith.constant 368 : index
    %c0_41 = arith.constant 0 : index
    %71 = vector.load %arg13[%c368, %c0_41] : memref<432x256xbf16, #tpu.memory_space<vmem>>, vector<16x256xbf16>
    tpu.vector_store %arg13[%c368, %c0_41], %70 {strides = array<i32>} : memref<432x256xbf16, #tpu.memory_space<vmem>>, vector<16x256xbf16>,
    %72 = vector.extract_strided_slice %23 {offsets = [0, 169], sizes = [16, 256], strides = [1, 1]} : vector<16x512xbf16> to vector<16x256xbf16>
    %c384 = arith.constant 384 : index
    %c0_42 = arith.constant 0 : index
    %73 = vector.load %arg13[%c384, %c0_42] : memref<432x256xbf16, #tpu.memory_space<vmem>>, vector<16x256xbf16>
    tpu.vector_store %arg13[%c384, %c0_42], %72 {strides = array<i32>} : memref<432x256xbf16, #tpu.memory_space<vmem>>, vector<16x256xbf16>,
    %74 = vector.extract_strided_slice %23 {offsets = [0, 170], sizes = [16, 256], strides = [1, 1]} : vector<16x512xbf16> to vector<16x256xbf16>
    %c400 = arith.constant 400 : index
    %c0_43 = arith.constant 0 : index
    %75 = vector.load %arg13[%c400, %c0_43] : memref<432x256xbf16, #tpu.memory_space<vmem>>, vector<16x256xbf16>
    tpu.vector_store %arg13[%c400, %c0_43], %74 {strides = array<i32>} : memref<432x256xbf16, #tpu.memory_space<vmem>>, vector<16x256xbf16>,
    %76 = vector.extract_strided_slice %23 {offsets = [0, 171], sizes = [16, 256], strides = [1, 1]} : vector<16x512xbf16> to vector<16x256xbf16>
    %c416 = arith.constant 416 : index
    %c0_44 = arith.constant 0 : index
    %77 = vector.load %arg13[%c416, %c0_44] : memref<432x256xbf16, #tpu.memory_space<vmem>>, vector<16x256xbf16>
    tpu.vector_store %arg13[%c416, %c0_44], %76 {strides = array<i32>} : memref<432x256xbf16, #tpu.memory_space<vmem>>, vector<16x256xbf16>,
    %c0_45 = arith.constant 0 : index
    %c0_46 = arith.constant 0 : index
    %78 = vector.load %arg9[%c0_45, %c0_46] : memref<16x432xbf16, #tpu.memory_space<vmem>>, vector<16x432xbf16>
    %c0_47 = arith.constant 0 : index
    %c0_48 = arith.constant 0 : index
    %79 = vector.load %arg13[%c0_47, %c0_48] : memref<432x256xbf16, #tpu.memory_space<vmem>>, vector<432x256xbf16>
    %cst_49 = arith.constant dense<0.000000e+00> : vector<16x256xf32>
    %80 = tpu.matmul %78, %79, %cst_49 {dimension_numbers = #tpu.dot_dimension_numbers<[1], [0], [0], [1], [0, 0, 1, 1], [], []>} : vector<16x432xbf16>, vector<432x256xbf16>, vector<16x256xf32> -> vector<16x256xf32>
    %c0_50 = arith.constant 0 : index
    %c0_51 = arith.constant 0 : index
    %81 = vector.load %arg10[%c0_50, %c0_51] : memref<16x1xf32, #tpu.memory_space<vmem>>, vector<16x1xf32>
    %82 = vector.broadcast %81 : vector<16x1xf32> to vector<16x256xf32>
    %83 = arith.addf %80, %82 : vector<16x256xf32>
    %84 = arith.truncf %83 : vector<16x256xf32> to vector<16x256xbf16>
    %c0_52 = arith.constant 0 : index
    %c0_53 = arith.constant 0 : index
    %85 = vector.load %arg11[%c0_52, %c0_53] : memref<16x256xbf16, #tpu.memory_space<vmem>>, vector<16x256xbf16>
    tpu.vector_store %arg11[%c0_52, %c0_53], %84 {strides = array<i32>} : memref<16x256xbf16, #tpu.memory_space<vmem>>, vector<16x256xbf16>,
    %c0_54 = arith.constant 0 : index
    %c0_55 = arith.constant 0 : index
    %86 = vector.load %arg5[%c0_54, %c0_55] : memref<1x256xf32, #tpu.memory_space<vmem>>, vector<1x256xf32>
    %cst_56 = arith.constant 5.000000e-01 : f32
    %87 = vector.broadcast %cst_56 : f32 to vector<1x256xf32>
    %88 = arith.cmpf ogt, %86, %87 : vector<1x256xf32>
    %cst_57 = arith.constant 0.000000e+00 : f32
    %89 = vector.shape_cast %88 : vector<1x256xi1> to vector<1x256xi1>
    %90 = vector.broadcast %89 : vector<1x256xi1> to vector<16x256xi1>
    %91 = vector.broadcast %cst_57 : f32 to vector<16x256xf32>
    %92 = arith.select %90, %83, %91 : vector<16x256xi1>, vector<16x256xf32>
    %cst_58 = arith.constant dense<0.000000e+00> : vector<16xf32>
    %93 = vector.multi_reduction <add>, %92, %cst_58 [1] : vector<16x256xf32> to vector<16xf32>
    %94 = vector.shape_cast %93 : vector<16xf32> to vector<16x1xf32>
    %95 = arith.mulf %92, %92 : vector<16x256xf32>
    %cst_59 = arith.constant dense<0.000000e+00> : vector<16xf32>
    %96 = vector.multi_reduction <add>, %95, %cst_59 [1] : vector<16x256xf32> to vector<16xf32>
    %97 = vector.shape_cast %96 : vector<16xf32> to vector<16x1xf32>
    %98 = tpu.concatenate %94, %97 in 1 : vector<16x1xf32>, vector<16x1xf32> -> vector<16x2xf32>
    %99 = vector.shape_cast %98 : vector<16x2xf32> to vector<1x16x2xf32>
    %c0_60 = arith.constant 0 : index
    %c0_61 = arith.constant 0 : index
    %c0_62 = arith.constant 0 : index
    %100 = vector.load %arg12[%c0_60, %c0_61, %c0_62] : memref<1x16x2xf32, #tpu.memory_space<vmem>>, vector<1x16x2xf32>
    tpu.vector_store %arg12[%c0_60, %c0_61, %c0_62], %99 {strides = array<i32>} : memref<1x16x2xf32, #tpu.memory_space<vmem>>, vector<1x16x2xf32>,
    return
  }
  func.func @transform_0(%arg0: i32) -> (i32, i32) {
    %c2_i32 = arith.constant 2 : i32
    %0 = arith.muli %arg0, %c2_i32 : i32
    %c1_i32 = arith.constant 1 : i32
    %1 = arith.subi %0, %c1_i32 : i32
    %c0_i32 = arith.constant 0 : i32
    %2 = arith.maxsi %1, %c0_i32 : i32
    %c0_i32_0 = arith.constant 0 : i32
    %c0_i32_1 = arith.constant 0 : i32
    return %c0_i32_0, %2 : i32, i32
  }
  func.func @transform_1(%arg0: i32) -> (i32, i32) {
    %c0_i32 = arith.constant 0 : i32
    %c0_i32_0 = arith.constant 0 : i32
    return %c0_i32, %arg0 : i32, i32
  }
  func.func @transform_2(%arg0: i32) -> (i32, i32) {
    %c1_i32 = arith.constant 1 : i32
    %0 = arith.addi %arg0, %c1_i32 : i32
    %c2_i32 = arith.constant 2 : i32
    %1 = arith.muli %0, %c2_i32 : i32
    %c3_i32 = arith.constant 3 : i32
    %2 = arith.minsi %1, %c3_i32 : i32
    %c0_i32 = arith.constant 0 : i32
    %c0_i32_0 = arith.constant 0 : i32
    return %c0_i32, %2 : i32, i32
  }
  func.func @transform_3(%arg0: i32) -> (i32, i32) {
    %c2_i32 = arith.constant 2 : i32
    %0 = arith.muli %arg0, %c2_i32 : i32
    %c1_i32 = arith.constant 1 : i32
    %1 = arith.subi %0, %c1_i32 : i32
    %c0_i32 = arith.constant 0 : i32
    %2 = arith.maxsi %1, %c0_i32 : i32
    %c0_i32_0 = arith.constant 0 : i32
    %c0_i32_1 = arith.constant 0 : i32
    return %c0_i32_0, %2 : i32, i32
  }
  func.func @transform_4(%arg0: i32) -> (i32, i32) {
    %c0_i32 = arith.constant 0 : i32
    %c0_i32_0 = arith.constant 0 : i32
    return %c0_i32, %arg0 : i32, i32
  }
  func.func @transform_5(%arg0: i32) -> (i32, i32) {
    %c1_i32 = arith.constant 1 : i32
    %0 = arith.addi %arg0, %c1_i32 : i32
    %c2_i32 = arith.constant 2 : i32
    %1 = arith.muli %0, %c2_i32 : i32
    %c3_i32 = arith.constant 3 : i32
    %2 = arith.minsi %1, %c3_i32 : i32
    %c0_i32 = arith.constant 0 : i32
    %c0_i32_0 = arith.constant 0 : i32
    return %c0_i32, %2 : i32, i32
  }
  func.func @transform_6(%arg0: i32) -> (i32, i32) {
    %c0_i32 = arith.constant 0 : i32
    %c0_i32_0 = arith.constant 0 : i32
    %c0_i32_1 = arith.constant 0 : i32
    return %c0_i32, %c0_i32_0 : i32, i32
  }
  func.func @transform_7(%arg0: i32) -> (i32, i32) {
    %c0_i32 = arith.constant 0 : i32
    %c0_i32_0 = arith.constant 0 : i32
    %c0_i32_1 = arith.constant 0 : i32
    return %c0_i32, %c0_i32_0 : i32, i32
  }
  func.func @transform_8(%arg0: i32) -> (i32, i32) {
    %c0_i32 = arith.constant 0 : i32
    %c0_i32_0 = arith.constant 0 : i32
    %c0_i32_1 = arith.constant 0 : i32
    return %c0_i32, %c0_i32_0 : i32, i32
  }
  func.func @transform_9(%arg0: i32) -> (i32, i32) {
    %c0_i32 = arith.constant 0 : i32
    %c0_i32_0 = arith.constant 0 : i32
    %c0_i32_1 = arith.constant 0 : i32
    return %c0_i32, %c0_i32_0 : i32, i32
  }
  func.func @transform_10(%arg0: i32) -> (i32, i32) {
    %c0_i32 = arith.constant 0 : i32
    %c0_i32_0 = arith.constant 0 : i32
    return %c0_i32, %arg0 : i32, i32
  }
  func.func @transform_11(%arg0: i32) -> (i32, i32, i32) {
    %c0_i32 = arith.constant 0 : i32
    %c0_i32_0 = arith.constant 0 : i32
    %c0_i32_1 = arith.constant 0 : i32
    return %arg0, %c0_i32, %c0_i32_0 : i32, i32, i32
  }
}

module attributes {stable_mosaic.version = 11 : i64} {
  func.func @kernel(%arg0: i32, %arg1: memref<16x128xbf16, #tpu.memory_space<vmem>>, %arg2: memref<16x256xbf16, #tpu.memory_space<vmem>>, %arg3: memref<16x128xbf16, #tpu.memory_space<vmem>>, %arg4: memref<1x128xf32, #tpu.memory_space<vmem>>, %arg5: memref<1x256xf32, #tpu.memory_space<vmem>>, %arg6: memref<1x128xf32, #tpu.memory_space<vmem>>, %arg7: memref<16x1xf32, #tpu.memory_space<vmem>>, %arg8: memref<16x1xf32, #tpu.memory_space<vmem>>, %arg9: memref<8x432xbf16, #tpu.memory_space<vmem>>, %arg10: memref<8x1xf32, #tpu.memory_space<vmem>>, %arg11: memref<8x256xbf16, #tpu.memory_space<vmem>>, %arg12: memref<1x8x2xf32, #tpu.memory_space<vmem>>, %arg13: memref<432x256xbf16, #tpu.memory_space<vmem>>) attributes {dimension_semantics = [#tpu.dimension_semantics<parallel>], iteration_bounds = array<i64: 2>, scalar_prefetch = 0 : i64, scratch_operands = 1 : i64, tpu.core_type = #tpu.core_type<tc>, window_params = [{transform_indices = @transform_0, window_bounds = array<i64: 16, 128>}, {transform_indices = @transform_1, window_bounds = array<i64: 16, 256>}, {transform_indices = @transform_2, window_bounds = array<i64: 16, 128>}, {transform_indices = @transform_3, window_bounds = array<i64: 1, 128>}, {transform_indices = @transform_4, window_bounds = array<i64: 1, 256>}, {transform_indices = @transform_5, window_bounds = array<i64: 1, 128>}, {pipeline_mode = #tpu.pipeline_mode<synchronous>, transform_indices = @transform_6, window_bounds = array<i64: 16, 1>}, {pipeline_mode = #tpu.pipeline_mode<synchronous>, transform_indices = @transform_7, window_bounds = array<i64: 16, 1>}, {pipeline_mode = #tpu.pipeline_mode<synchronous>, transform_indices = @transform_8, window_bounds = array<i64: 8, 432>}, {pipeline_mode = #tpu.pipeline_mode<synchronous>, transform_indices = @transform_9, window_bounds = array<i64: 8, 1>}, {transform_indices = @transform_10, window_bounds = array<i64: 8, 256>}, {transform_indices = @transform_11, window_bounds = array<i64: 1, 8, 2>}]} {
    %c0 = arith.constant 0 : index
    %c0_0 = arith.constant 0 : index
    %0 = vector.load %arg1[%c0, %c0_0] : memref<16x128xbf16, #tpu.memory_space<vmem>>, vector<16x128xbf16>
    %c0_1 = arith.constant 0 : index
    %c0_2 = arith.constant 0 : index
    %1 = vector.load %arg2[%c0_1, %c0_2] : memref<16x256xbf16, #tpu.memory_space<vmem>>, vector<16x256xbf16>
    %c0_3 = arith.constant 0 : index
    %c0_4 = arith.constant 0 : index
    %2 = vector.load %arg3[%c0_3, %c0_4] : memref<16x128xbf16, #tpu.memory_space<vmem>>, vector<16x128xbf16>
    %3 = tpu.concatenate %0, %1, %2 in 1 : vector<16x128xbf16>, vector<16x256xbf16>, vector<16x128xbf16> -> vector<16x512xbf16>
    %c0_5 = arith.constant 0 : index
    %c0_6 = arith.constant 0 : index
    %4 = vector.load %arg4[%c0_5, %c0_6] : memref<1x128xf32, #tpu.memory_space<vmem>>, vector<1x128xf32>
    %c0_7 = arith.constant 0 : index
    %c0_8 = arith.constant 0 : index
    %5 = vector.load %arg5[%c0_7, %c0_8] : memref<1x256xf32, #tpu.memory_space<vmem>>, vector<1x256xf32>
    %c0_9 = arith.constant 0 : index
    %c0_10 = arith.constant 0 : index
    %6 = vector.load %arg6[%c0_9, %c0_10] : memref<1x128xf32, #tpu.memory_space<vmem>>, vector<1x128xf32>
    %7 = tpu.concatenate %4, %5, %6 in 1 : vector<1x128xf32>, vector<1x256xf32>, vector<1x128xf32> -> vector<1x512xf32>
    %8 = arith.extf %3 : vector<16x512xbf16> to vector<16x512xf32>
    %c0_11 = arith.constant 0 : index
    %c0_12 = arith.constant 0 : index
    %9 = vector.load %arg7[%c0_11, %c0_12] : memref<16x1xf32, #tpu.memory_space<vmem>>, vector<16x1xf32>
    %10 = vector.broadcast %9 : vector<16x1xf32> to vector<16x512xf32>
    %11 = arith.mulf %8, %10 : vector<16x512xf32>
    %c0_13 = arith.constant 0 : index
    %c0_14 = arith.constant 0 : index
    %12 = vector.load %arg8[%c0_13, %c0_14] : memref<16x1xf32, #tpu.memory_space<vmem>>, vector<16x1xf32>
    %13 = vector.broadcast %12 : vector<16x1xf32> to vector<16x512xf32>
    %14 = arith.addf %11, %13 : vector<16x512xf32>
    %cst = arith.constant 0.000000e+00 : f32
    %15 = vector.broadcast %cst : f32 to vector<16x512xf32>
    %16 = arith.maximumf %14, %15 : vector<16x512xf32>
    %cst_15 = arith.constant 5.000000e-01 : f32
    %17 = vector.broadcast %cst_15 : f32 to vector<1x512xf32>
    %18 = arith.cmpf ogt, %7, %17 : vector<1x512xf32>
    %cst_16 = arith.constant 0.000000e+00 : f32
    %19 = vector.shape_cast %18 : vector<1x512xi1> to vector<1x512xi1>
    %20 = vector.broadcast %19 : vector<1x512xi1> to vector<16x512xi1>
    %21 = vector.broadcast %cst_16 : f32 to vector<16x512xf32>
    %22 = arith.select %20, %16, %21 : vector<16x512xi1>, vector<16x512xf32>
    %23 = arith.truncf %22 : vector<16x512xf32> to vector<16x512xbf16>
    %24 = vector.extract_strided_slice %23 {offsets = [0, 85], sizes = [16, 256], strides = [1, 1]} : vector<16x512xbf16> to vector<16x256xbf16>
    %c0_17 = arith.constant 0 : index
    %c0_18 = arith.constant 0 : index
    %25 = vector.load %arg13[%c0_17, %c0_18] : memref<432x256xbf16, #tpu.memory_space<vmem>>, vector<16x256xbf16>
    tpu.vector_store %arg13[%c0_17, %c0_18], %24 {strides = array<i32>} : memref<432x256xbf16, #tpu.memory_space<vmem>>, vector<16x256xbf16>,
    %26 = vector.extract_strided_slice %23 {offsets = [0, 86], sizes = [16, 256], strides = [1, 1]} : vector<16x512xbf16> to vector<16x256xbf16>
    %c16 = arith.constant 16 : index
    %c0_19 = arith.constant 0 : index
    %27 = vector.load %arg13[%c16, %c0_19] : memref<432x256xbf16, #tpu.memory_space<vmem>>, vector<16x256xbf16>
    tpu.vector_store %arg13[%c16, %c0_19], %26 {strides = array<i32>} : memref<432x256xbf16, #tpu.memory_space<vmem>>, vector<16x256xbf16>,
    %28 = vector.extract_strided_slice %23 {offsets = [0, 87], sizes = [16, 256], strides = [1, 1]} : vector<16x512xbf16> to vector<16x256xbf16>
    %c32 = arith.constant 32 : index
    %c0_20 = arith.constant 0 : index
    %29 = vector.load %arg13[%c32, %c0_20] : memref<432x256xbf16, #tpu.memory_space<vmem>>, vector<16x256xbf16>
    tpu.vector_store %arg13[%c32, %c0_20], %28 {strides = array<i32>} : memref<432x256xbf16, #tpu.memory_space<vmem>>, vector<16x256xbf16>,
    %30 = vector.extract_strided_slice %23 {offsets = [0, 91], sizes = [16, 256], strides = [1, 1]} : vector<16x512xbf16> to vector<16x256xbf16>
    %c48 = arith.constant 48 : index
    %c0_21 = arith.constant 0 : index
    %31 = vector.load %arg13[%c48, %c0_21] : memref<432x256xbf16, #tpu.memory_space<vmem>>, vector<16x256xbf16>
    tpu.vector_store %arg13[%c48, %c0_21], %30 {strides = array<i32>} : memref<432x256xbf16, #tpu.memory_space<vmem>>, vector<16x256xbf16>,
    %32 = vector.extract_strided_slice %23 {offsets = [0, 92], sizes = [16, 256], strides = [1, 1]} : vector<16x512xbf16> to vector<16x256xbf16>
    %c64 = arith.constant 64 : index
    %c0_22 = arith.constant 0 : index
    %33 = vector.load %arg13[%c64, %c0_22] : memref<432x256xbf16, #tpu.memory_space<vmem>>, vector<16x256xbf16>
    tpu.vector_store %arg13[%c64, %c0_22], %32 {strides = array<i32>} : memref<432x256xbf16, #tpu.memory_space<vmem>>, vector<16x256xbf16>,
    %34 = vector.extract_strided_slice %23 {offsets = [0, 93], sizes = [16, 256], strides = [1, 1]} : vector<16x512xbf16> to vector<16x256xbf16>
    %c80 = arith.constant 80 : index
    %c0_23 = arith.constant 0 : index
    %35 = vector.load %arg13[%c80, %c0_23] : memref<432x256xbf16, #tpu.memory_space<vmem>>, vector<16x256xbf16>
    tpu.vector_store %arg13[%c80, %c0_23], %34 {strides = array<i32>} : memref<432x256xbf16, #tpu.memory_space<vmem>>, vector<16x256xbf16>,
    %36 = vector.extract_strided_slice %23 {offsets = [0, 97], sizes = [16, 256], strides = [1, 1]} : vector<16x512xbf16> to vector<16x256xbf16>
    %c96 = arith.constant 96 : index
    %c0_24 = arith.constant 0 : index
    %37 = vector.load %arg13[%c96, %c0_24] : memref<432x256xbf16, #tpu.memory_space<vmem>>, vector<16x256xbf16>
    tpu.vector_store %arg13[%c96, %c0_24], %36 {strides = array<i32>} : memref<432x256xbf16, #tpu.memory_space<vmem>>, vector<16x256xbf16>,
    %38 = vector.extract_strided_slice %23 {offsets = [0, 98], sizes = [16, 256], strides = [1, 1]} : vector<16x512xbf16> to vector<16x256xbf16>
    %c112 = arith.constant 112 : index
    %c0_25 = arith.constant 0 : index
    %39 = vector.load %arg13[%c112, %c0_25] : memref<432x256xbf16, #tpu.memory_space<vmem>>, vector<16x256xbf16>
    tpu.vector_store %arg13[%c112, %c0_25], %38 {strides = array<i32>} : memref<432x256xbf16, #tpu.memory_space<vmem>>, vector<16x256xbf16>,
    %40 = vector.extract_strided_slice %23 {offsets = [0, 99], sizes = [16, 256], strides = [1, 1]} : vector<16x512xbf16> to vector<16x256xbf16>
    %c128 = arith.constant 128 : index
    %c0_26 = arith.constant 0 : index
    %41 = vector.load %arg13[%c128, %c0_26] : memref<432x256xbf16, #tpu.memory_space<vmem>>, vector<16x256xbf16>
    tpu.vector_store %arg13[%c128, %c0_26], %40 {strides = array<i32>} : memref<432x256xbf16, #tpu.memory_space<vmem>>, vector<16x256xbf16>,
    %42 = vector.extract_strided_slice %23 {offsets = [0, 121], sizes = [16, 256], strides = [1, 1]} : vector<16x512xbf16> to vector<16x256xbf16>
    %c144 = arith.constant 144 : index
    %c0_27 = arith.constant 0 : index
    %43 = vector.load %arg13[%c144, %c0_27] : memref<432x256xbf16, #tpu.memory_space<vmem>>, vector<16x256xbf16>
    tpu.vector_store %arg13[%c144, %c0_27], %42 {strides = array<i32>} : memref<432x256xbf16, #tpu.memory_space<vmem>>, vector<16x256xbf16>,
    %44 = vector.extract_strided_slice %23 {offsets = [0, 122], sizes = [16, 256], strides = [1, 1]} : vector<16x512xbf16> to vector<16x256xbf16>
    %c160 = arith.constant 160 : index
    %c0_28 = arith.constant 0 : index
    %45 = vector.load %arg13[%c160, %c0_28] : memref<432x256xbf16, #tpu.memory_space<vmem>>, vector<16x256xbf16>
    tpu.vector_store %arg13[%c160, %c0_28], %44 {strides = array<i32>} : memref<432x256xbf16, #tpu.memory_space<vmem>>, vector<16x256xbf16>,
    %46 = vector.extract_strided_slice %23 {offsets = [0, 123], sizes = [16, 256], strides = [1, 1]} : vector<16x512xbf16> to vector<16x256xbf16>
    %c176 = arith.constant 176 : index
    %c0_29 = arith.constant 0 : index
    %47 = vector.load %arg13[%c176, %c0_29] : memref<432x256xbf16, #tpu.memory_space<vmem>>, vector<16x256xbf16>
    tpu.vector_store %arg13[%c176, %c0_29], %46 {strides = array<i32>} : memref<432x256xbf16, #tpu.memory_space<vmem>>, vector<16x256xbf16>,
    %48 = vector.extract_strided_slice %23 {offsets = [0, 127], sizes = [16, 256], strides = [1, 1]} : vector<16x512xbf16> to vector<16x256xbf16>
    %c192 = arith.constant 192 : index
    %c0_30 = arith.constant 0 : index
    %49 = vector.load %arg13[%c192, %c0_30] : memref<432x256xbf16, #tpu.memory_space<vmem>>, vector<16x256xbf16>
    tpu.vector_store %arg13[%c192, %c0_30], %48 {strides = array<i32>} : memref<432x256xbf16, #tpu.memory_space<vmem>>, vector<16x256xbf16>,
    %50 = vector.extract_strided_slice %23 {offsets = [0, 128], sizes = [16, 256], strides = [1, 1]} : vector<16x512xbf16> to vector<16x256xbf16>
    %c208 = arith.constant 208 : index
    %c0_31 = arith.constant 0 : index
    %51 = vector.load %arg13[%c208, %c0_31] : memref<432x256xbf16, #tpu.memory_space<vmem>>, vector<16x256xbf16>
    tpu.vector_store %arg13[%c208, %c0_31], %50 {strides = array<i32>} : memref<432x256xbf16, #tpu.memory_space<vmem>>, vector<16x256xbf16>,
    %52 = vector.extract_strided_slice %23 {offsets = [0, 129], sizes = [16, 256], strides = [1, 1]} : vector<16x512xbf16> to vector<16x256xbf16>
    %c224 = arith.constant 224 : index
    %c0_32 = arith.constant 0 : index
    %53 = vector.load %arg13[%c224, %c0_32] : memref<432x256xbf16, #tpu.memory_space<vmem>>, vector<16x256xbf16>
    tpu.vector_store %arg13[%c224, %c0_32], %52 {strides = array<i32>} : memref<432x256xbf16, #tpu.memory_space<vmem>>, vector<16x256xbf16>,
    %54 = vector.extract_strided_slice %23 {offsets = [0, 133], sizes = [16, 256], strides = [1, 1]} : vector<16x512xbf16> to vector<16x256xbf16>
    %c240 = arith.constant 240 : index
    %c0_33 = arith.constant 0 : index
    %55 = vector.load %arg13[%c240, %c0_33] : memref<432x256xbf16, #tpu.memory_space<vmem>>, vector<16x256xbf16>
    tpu.vector_store %arg13[%c240, %c0_33], %54 {strides = array<i32>} : memref<432x256xbf16, #tpu.memory_space<vmem>>, vector<16x256xbf16>,
    %56 = vector.extract_strided_slice %23 {offsets = [0, 134], sizes = [16, 256], strides = [1, 1]} : vector<16x512xbf16> to vector<16x256xbf16>
    %c256 = arith.constant 256 : index
    %c0_34 = arith.constant 0 : index
    %57 = vector.load %arg13[%c256, %c0_34] : memref<432x256xbf16, #tpu.memory_space<vmem>>, vector<16x256xbf16>
    tpu.vector_store %arg13[%c256, %c0_34], %56 {strides = array<i32>} : memref<432x256xbf16, #tpu.memory_space<vmem>>, vector<16x256xbf16>,
    %58 = vector.extract_strided_slice %23 {offsets = [0, 135], sizes = [16, 256], strides = [1, 1]} : vector<16x512xbf16> to vector<16x256xbf16>
    %c272 = arith.constant 272 : index
    %c0_35 = arith.constant 0 : index
    %59 = vector.load %arg13[%c272, %c0_35] : memref<432x256xbf16, #tpu.memory_space<vmem>>, vector<16x256xbf16>
    tpu.vector_store %arg13[%c272, %c0_35], %58 {strides = array<i32>} : memref<432x256xbf16, #tpu.memory_space<vmem>>, vector<16x256xbf16>,
    %60 = vector.extract_strided_slice %23 {offsets = [0, 157], sizes = [16, 256], strides = [1, 1]} : vector<16x512xbf16> to vector<16x256xbf16>
    %c288 = arith.constant 288 : index
    %c0_36 = arith.constant 0 : index
    %61 = vector.load %arg13[%c288, %c0_36] : memref<432x256xbf16, #tpu.memory_space<vmem>>, vector<16x256xbf16>
    tpu.vector_store %arg13[%c288, %c0_36], %60 {strides = array<i32>} : memref<432x256xbf16, #tpu.memory_space<vmem>>, vector<16x256xbf16>,
    %62 = vector.extract_strided_slice %23 {offsets = [0, 158], sizes = [16, 256], strides = [1, 1]} : vector<16x512xbf16> to vector<16x256xbf16>
    %c304 = arith.constant 304 : index
    %c0_37 = arith.constant 0 : index
    %63 = vector.load %arg13[%c304, %c0_37] : memref<432x256xbf16, #tpu.memory_space<vmem>>, vector<16x256xbf16>
    tpu.vector_store %arg13[%c304, %c0_37], %62 {strides = array<i32>} : memref<432x256xbf16, #tpu.memory_space<vmem>>, vector<16x256xbf16>,
    %64 = vector.extract_strided_slice %23 {offsets = [0, 159], sizes = [16, 256], strides = [1, 1]} : vector<16x512xbf16> to vector<16x256xbf16>
    %c320 = arith.constant 320 : index
    %c0_38 = arith.constant 0 : index
    %65 = vector.load %arg13[%c320, %c0_38] : memref<432x256xbf16, #tpu.memory_space<vmem>>, vector<16x256xbf16>
    tpu.vector_store %arg13[%c320, %c0_38], %64 {strides = array<i32>} : memref<432x256xbf16, #tpu.memory_space<vmem>>, vector<16x256xbf16>,
    %66 = vector.extract_strided_slice %23 {offsets = [0, 163], sizes = [16, 256], strides = [1, 1]} : vector<16x512xbf16> to vector<16x256xbf16>
    %c336 = arith.constant 336 : index
    %c0_39 = arith.constant 0 : index
    %67 = vector.load %arg13[%c336, %c0_39] : memref<432x256xbf16, #tpu.memory_space<vmem>>, vector<16x256xbf16>
    tpu.vector_store %arg13[%c336, %c0_39], %66 {strides = array<i32>} : memref<432x256xbf16, #tpu.memory_space<vmem>>, vector<16x256xbf16>,
    %68 = vector.extract_strided_slice %23 {offsets = [0, 164], sizes = [16, 256], strides = [1, 1]} : vector<16x512xbf16> to vector<16x256xbf16>
    %c352 = arith.constant 352 : index
    %c0_40 = arith.constant 0 : index
    %69 = vector.load %arg13[%c352, %c0_40] : memref<432x256xbf16, #tpu.memory_space<vmem>>, vector<16x256xbf16>
    tpu.vector_store %arg13[%c352, %c0_40], %68 {strides = array<i32>} : memref<432x256xbf16, #tpu.memory_space<vmem>>, vector<16x256xbf16>,
    %70 = vector.extract_strided_slice %23 {offsets = [0, 165], sizes = [16, 256], strides = [1, 1]} : vector<16x512xbf16> to vector<16x256xbf16>
    %c368 = arith.constant 368 : index
    %c0_41 = arith.constant 0 : index
    %71 = vector.load %arg13[%c368, %c0_41] : memref<432x256xbf16, #tpu.memory_space<vmem>>, vector<16x256xbf16>
    tpu.vector_store %arg13[%c368, %c0_41], %70 {strides = array<i32>} : memref<432x256xbf16, #tpu.memory_space<vmem>>, vector<16x256xbf16>,
    %72 = vector.extract_strided_slice %23 {offsets = [0, 169], sizes = [16, 256], strides = [1, 1]} : vector<16x512xbf16> to vector<16x256xbf16>
    %c384 = arith.constant 384 : index
    %c0_42 = arith.constant 0 : index
    %73 = vector.load %arg13[%c384, %c0_42] : memref<432x256xbf16, #tpu.memory_space<vmem>>, vector<16x256xbf16>
    tpu.vector_store %arg13[%c384, %c0_42], %72 {strides = array<i32>} : memref<432x256xbf16, #tpu.memory_space<vmem>>, vector<16x256xbf16>,
    %74 = vector.extract_strided_slice %23 {offsets = [0, 170], sizes = [16, 256], strides = [1, 1]} : vector<16x512xbf16> to vector<16x256xbf16>
    %c400 = arith.constant 400 : index
    %c0_43 = arith.constant 0 : index
    %75 = vector.load %arg13[%c400, %c0_43] : memref<432x256xbf16, #tpu.memory_space<vmem>>, vector<16x256xbf16>
    tpu.vector_store %arg13[%c400, %c0_43], %74 {strides = array<i32>} : memref<432x256xbf16, #tpu.memory_space<vmem>>, vector<16x256xbf16>,
    %76 = vector.extract_strided_slice %23 {offsets = [0, 171], sizes = [16, 256], strides = [1, 1]} : vector<16x512xbf16> to vector<16x256xbf16>
    %c416 = arith.constant 416 : index
    %c0_44 = arith.constant 0 : index
    %77 = vector.load %arg13[%c416, %c0_44] : memref<432x256xbf16, #tpu.memory_space<vmem>>, vector<16x256xbf16>
    tpu.vector_store %arg13[%c416, %c0_44], %76 {strides = array<i32>} : memref<432x256xbf16, #tpu.memory_space<vmem>>, vector<16x256xbf16>,
    %c0_45 = arith.constant 0 : index
    %c0_46 = arith.constant 0 : index
    %78 = vector.load %arg9[%c0_45, %c0_46] : memref<8x432xbf16, #tpu.memory_space<vmem>>, vector<8x432xbf16>
    %c0_47 = arith.constant 0 : index
    %c0_48 = arith.constant 0 : index
    %79 = vector.load %arg13[%c0_47, %c0_48] : memref<432x256xbf16, #tpu.memory_space<vmem>>, vector<432x256xbf16>
    %cst_49 = arith.constant dense<0.000000e+00> : vector<8x256xf32>
    %80 = tpu.matmul %78, %79, %cst_49 {dimension_numbers = #tpu.dot_dimension_numbers<[1], [0], [0], [1], [0, 0, 1, 1], [], []>} : vector<8x432xbf16>, vector<432x256xbf16>, vector<8x256xf32> -> vector<8x256xf32>
    %c0_50 = arith.constant 0 : index
    %c0_51 = arith.constant 0 : index
    %81 = vector.load %arg10[%c0_50, %c0_51] : memref<8x1xf32, #tpu.memory_space<vmem>>, vector<8x1xf32>
    %82 = vector.broadcast %81 : vector<8x1xf32> to vector<8x256xf32>
    %83 = arith.addf %80, %82 : vector<8x256xf32>
    %84 = arith.truncf %83 : vector<8x256xf32> to vector<8x256xbf16>
    %c0_52 = arith.constant 0 : index
    %c0_53 = arith.constant 0 : index
    %85 = vector.load %arg11[%c0_52, %c0_53] : memref<8x256xbf16, #tpu.memory_space<vmem>>, vector<8x256xbf16>
    tpu.vector_store %arg11[%c0_52, %c0_53], %84 {strides = array<i32>} : memref<8x256xbf16, #tpu.memory_space<vmem>>, vector<8x256xbf16>,
    %c0_54 = arith.constant 0 : index
    %c0_55 = arith.constant 0 : index
    %86 = vector.load %arg5[%c0_54, %c0_55] : memref<1x256xf32, #tpu.memory_space<vmem>>, vector<1x256xf32>
    %cst_56 = arith.constant 5.000000e-01 : f32
    %87 = vector.broadcast %cst_56 : f32 to vector<1x256xf32>
    %88 = arith.cmpf ogt, %86, %87 : vector<1x256xf32>
    %cst_57 = arith.constant 0.000000e+00 : f32
    %89 = vector.shape_cast %88 : vector<1x256xi1> to vector<1x256xi1>
    %90 = vector.broadcast %89 : vector<1x256xi1> to vector<8x256xi1>
    %91 = vector.broadcast %cst_57 : f32 to vector<8x256xf32>
    %92 = arith.select %90, %83, %91 : vector<8x256xi1>, vector<8x256xf32>
    %cst_58 = arith.constant dense<0.000000e+00> : vector<8xf32>
    %93 = vector.multi_reduction <add>, %92, %cst_58 [1] : vector<8x256xf32> to vector<8xf32>
    %94 = vector.shape_cast %93 : vector<8xf32> to vector<8x1xf32>
    %95 = arith.mulf %92, %92 : vector<8x256xf32>
    %cst_59 = arith.constant dense<0.000000e+00> : vector<8xf32>
    %96 = vector.multi_reduction <add>, %95, %cst_59 [1] : vector<8x256xf32> to vector<8xf32>
    %97 = vector.shape_cast %96 : vector<8xf32> to vector<8x1xf32>
    %98 = tpu.concatenate %94, %97 in 1 : vector<8x1xf32>, vector<8x1xf32> -> vector<8x2xf32>
    %99 = vector.shape_cast %98 : vector<8x2xf32> to vector<1x8x2xf32>
    %c0_60 = arith.constant 0 : index
    %c0_61 = arith.constant 0 : index
    %c0_62 = arith.constant 0 : index
    %100 = vector.load %arg12[%c0_60, %c0_61, %c0_62] : memref<1x8x2xf32, #tpu.memory_space<vmem>>, vector<1x8x2xf32>
    tpu.vector_store %arg12[%c0_60, %c0_61, %c0_62], %99 {strides = array<i32>} : memref<1x8x2xf32, #tpu.memory_space<vmem>>, vector<1x8x2xf32>,
    return
  }
  func.func @transform_0(%arg0: i32) -> (i32, i32) {
    %c2_i32 = arith.constant 2 : i32
    %0 = arith.muli %arg0, %c2_i32 : i32
    %c1_i32 = arith.constant 1 : i32
    %1 = arith.subi %0, %c1_i32 : i32
    %c0_i32 = arith.constant 0 : i32
    %2 = arith.maxsi %1, %c0_i32 : i32
    %c0_i32_0 = arith.constant 0 : i32
    %c0_i32_1 = arith.constant 0 : i32
    return %c0_i32_0, %2 : i32, i32
  }
  func.func @transform_1(%arg0: i32) -> (i32, i32) {
    %c0_i32 = arith.constant 0 : i32
    %c0_i32_0 = arith.constant 0 : i32
    return %c0_i32, %arg0 : i32, i32
  }
  func.func @transform_2(%arg0: i32) -> (i32, i32) {
    %c1_i32 = arith.constant 1 : i32
    %0 = arith.addi %arg0, %c1_i32 : i32
    %c2_i32 = arith.constant 2 : i32
    %1 = arith.muli %0, %c2_i32 : i32
    %c3_i32 = arith.constant 3 : i32
    %2 = arith.minsi %1, %c3_i32 : i32
    %c0_i32 = arith.constant 0 : i32
    %c0_i32_0 = arith.constant 0 : i32
    return %c0_i32, %2 : i32, i32
  }
  func.func @transform_3(%arg0: i32) -> (i32, i32) {
    %c2_i32 = arith.constant 2 : i32
    %0 = arith.muli %arg0, %c2_i32 : i32
    %c1_i32 = arith.constant 1 : i32
    %1 = arith.subi %0, %c1_i32 : i32
    %c0_i32 = arith.constant 0 : i32
    %2 = arith.maxsi %1, %c0_i32 : i32
    %c0_i32_0 = arith.constant 0 : i32
    %c0_i32_1 = arith.constant 0 : i32
    return %c0_i32_0, %2 : i32, i32
  }
  func.func @transform_4(%arg0: i32) -> (i32, i32) {
    %c0_i32 = arith.constant 0 : i32
    %c0_i32_0 = arith.constant 0 : i32
    return %c0_i32, %arg0 : i32, i32
  }
  func.func @transform_5(%arg0: i32) -> (i32, i32) {
    %c1_i32 = arith.constant 1 : i32
    %0 = arith.addi %arg0, %c1_i32 : i32
    %c2_i32 = arith.constant 2 : i32
    %1 = arith.muli %0, %c2_i32 : i32
    %c3_i32 = arith.constant 3 : i32
    %2 = arith.minsi %1, %c3_i32 : i32
    %c0_i32 = arith.constant 0 : i32
    %c0_i32_0 = arith.constant 0 : i32
    return %c0_i32, %2 : i32, i32
  }
  func.func @transform_6(%arg0: i32) -> (i32, i32) {
    %c0_i32 = arith.constant 0 : i32
    %c0_i32_0 = arith.constant 0 : i32
    %c0_i32_1 = arith.constant 0 : i32
    return %c0_i32, %c0_i32_0 : i32, i32
  }
  func.func @transform_7(%arg0: i32) -> (i32, i32) {
    %c0_i32 = arith.constant 0 : i32
    %c0_i32_0 = arith.constant 0 : i32
    %c0_i32_1 = arith.constant 0 : i32
    return %c0_i32, %c0_i32_0 : i32, i32
  }
  func.func @transform_8(%arg0: i32) -> (i32, i32) {
    %c0_i32 = arith.constant 0 : i32
    %c0_i32_0 = arith.constant 0 : i32
    %c0_i32_1 = arith.constant 0 : i32
    return %c0_i32, %c0_i32_0 : i32, i32
  }
  func.func @transform_9(%arg0: i32) -> (i32, i32) {
    %c0_i32 = arith.constant 0 : i32
    %c0_i32_0 = arith.constant 0 : i32
    %c0_i32_1 = arith.constant 0 : i32
    return %c0_i32, %c0_i32_0 : i32, i32
  }
  func.func @transform_10(%arg0: i32) -> (i32, i32) {
    %c0_i32 = arith.constant 0 : i32
    %c0_i32_0 = arith.constant 0 : i32
    return %c0_i32, %arg0 : i32, i32
  }
  func.func @transform_11(%arg0: i32) -> (i32, i32, i32) {
    %c0_i32 = arith.constant 0 : i32
    %c0_i32_0 = arith.constant 0 : i32
    %c0_i32_1 = arith.constant 0 : i32
    return %arg0, %c0_i32, %c0_i32_0 : i32, i32, i32
  }
}

module attributes {stable_mosaic.version = 11 : i64} {
  func.func @kernel(%arg0: i32, %arg1: memref<8x128xbf16, #tpu.memory_space<vmem>>, %arg2: memref<8x256xbf16, #tpu.memory_space<vmem>>, %arg3: memref<8x128xbf16, #tpu.memory_space<vmem>>, %arg4: memref<1x128xf32, #tpu.memory_space<vmem>>, %arg5: memref<1x256xf32, #tpu.memory_space<vmem>>, %arg6: memref<1x128xf32, #tpu.memory_space<vmem>>, %arg7: memref<8x1xf32, #tpu.memory_space<vmem>>, %arg8: memref<8x1xf32, #tpu.memory_space<vmem>>, %arg9: memref<16x216xbf16, #tpu.memory_space<vmem>>, %arg10: memref<16x1xf32, #tpu.memory_space<vmem>>, %arg11: memref<16x256xbf16, #tpu.memory_space<vmem>>, %arg12: memref<16x256xbf16, #tpu.memory_space<vmem>>, %arg13: memref<1x16x2xf32, #tpu.memory_space<vmem>>, %arg14: memref<216x256xbf16, #tpu.memory_space<vmem>>) attributes {dimension_semantics = [#tpu.dimension_semantics<parallel>], iteration_bounds = array<i64: 2>, scalar_prefetch = 0 : i64, scratch_operands = 1 : i64, tpu.core_type = #tpu.core_type<tc>, window_params = [{transform_indices = @transform_0, window_bounds = array<i64: 8, 128>}, {transform_indices = @transform_1, window_bounds = array<i64: 8, 256>}, {transform_indices = @transform_2, window_bounds = array<i64: 8, 128>}, {transform_indices = @transform_3, window_bounds = array<i64: 1, 128>}, {transform_indices = @transform_4, window_bounds = array<i64: 1, 256>}, {transform_indices = @transform_5, window_bounds = array<i64: 1, 128>}, {pipeline_mode = #tpu.pipeline_mode<synchronous>, transform_indices = @transform_6, window_bounds = array<i64: 8, 1>}, {pipeline_mode = #tpu.pipeline_mode<synchronous>, transform_indices = @transform_7, window_bounds = array<i64: 8, 1>}, {pipeline_mode = #tpu.pipeline_mode<synchronous>, transform_indices = @transform_8, window_bounds = array<i64: 16, 216>}, {pipeline_mode = #tpu.pipeline_mode<synchronous>, transform_indices = @transform_9, window_bounds = array<i64: 16, 1>}, {transform_indices = @transform_10, window_bounds = array<i64: 16, 256>}, {transform_indices = @transform_11, window_bounds = array<i64: 16, 256>}, {transform_indices = @transform_12, window_bounds = array<i64: 1, 16, 2>}]} {
    %c0 = arith.constant 0 : index
    %c0_0 = arith.constant 0 : index
    %0 = vector.load %arg1[%c0, %c0_0] : memref<8x128xbf16, #tpu.memory_space<vmem>>, vector<8x128xbf16>
    %c0_1 = arith.constant 0 : index
    %c0_2 = arith.constant 0 : index
    %1 = vector.load %arg2[%c0_1, %c0_2] : memref<8x256xbf16, #tpu.memory_space<vmem>>, vector<8x256xbf16>
    %c0_3 = arith.constant 0 : index
    %c0_4 = arith.constant 0 : index
    %2 = vector.load %arg3[%c0_3, %c0_4] : memref<8x128xbf16, #tpu.memory_space<vmem>>, vector<8x128xbf16>
    %3 = tpu.concatenate %0, %1, %2 in 1 : vector<8x128xbf16>, vector<8x256xbf16>, vector<8x128xbf16> -> vector<8x512xbf16>
    %c0_5 = arith.constant 0 : index
    %c0_6 = arith.constant 0 : index
    %4 = vector.load %arg4[%c0_5, %c0_6] : memref<1x128xf32, #tpu.memory_space<vmem>>, vector<1x128xf32>
    %c0_7 = arith.constant 0 : index
    %c0_8 = arith.constant 0 : index
    %5 = vector.load %arg5[%c0_7, %c0_8] : memref<1x256xf32, #tpu.memory_space<vmem>>, vector<1x256xf32>
    %c0_9 = arith.constant 0 : index
    %c0_10 = arith.constant 0 : index
    %6 = vector.load %arg6[%c0_9, %c0_10] : memref<1x128xf32, #tpu.memory_space<vmem>>, vector<1x128xf32>
    %7 = tpu.concatenate %4, %5, %6 in 1 : vector<1x128xf32>, vector<1x256xf32>, vector<1x128xf32> -> vector<1x512xf32>
    %8 = arith.extf %3 : vector<8x512xbf16> to vector<8x512xf32>
    %c0_11 = arith.constant 0 : index
    %c0_12 = arith.constant 0 : index
    %9 = vector.load %arg7[%c0_11, %c0_12] : memref<8x1xf32, #tpu.memory_space<vmem>>, vector<8x1xf32>
    %10 = vector.broadcast %9 : vector<8x1xf32> to vector<8x512xf32>
    %11 = arith.mulf %8, %10 : vector<8x512xf32>
    %c0_13 = arith.constant 0 : index
    %c0_14 = arith.constant 0 : index
    %12 = vector.load %arg8[%c0_13, %c0_14] : memref<8x1xf32, #tpu.memory_space<vmem>>, vector<8x1xf32>
    %13 = vector.broadcast %12 : vector<8x1xf32> to vector<8x512xf32>
    %14 = arith.addf %11, %13 : vector<8x512xf32>
    %cst = arith.constant 0.000000e+00 : f32
    %15 = vector.broadcast %cst : f32 to vector<8x512xf32>
    %16 = arith.maximumf %14, %15 : vector<8x512xf32>
    %cst_15 = arith.constant 5.000000e-01 : f32
    %17 = vector.broadcast %cst_15 : f32 to vector<1x512xf32>
    %18 = arith.cmpf ogt, %7, %17 : vector<1x512xf32>
    %cst_16 = arith.constant 0.000000e+00 : f32
    %19 = vector.shape_cast %18 : vector<1x512xi1> to vector<1x512xi1>
    %20 = vector.broadcast %19 : vector<1x512xi1> to vector<8x512xi1>
    %21 = vector.broadcast %cst_16 : f32 to vector<8x512xf32>
    %22 = arith.select %20, %16, %21 : vector<8x512xi1>, vector<8x512xf32>
    %23 = arith.truncf %22 : vector<8x512xf32> to vector<8x512xbf16>
    %24 = vector.extract_strided_slice %23 {offsets = [0, 85], sizes = [8, 256], strides = [1, 1]} : vector<8x512xbf16> to vector<8x256xbf16>
    %c0_17 = arith.constant 0 : index
    %c0_18 = arith.constant 0 : index
    %25 = vector.load %arg14[%c0_17, %c0_18] : memref<216x256xbf16, #tpu.memory_space<vmem>>, vector<8x256xbf16>
    tpu.vector_store %arg14[%c0_17, %c0_18], %24 {strides = array<i32>} : memref<216x256xbf16, #tpu.memory_space<vmem>>, vector<8x256xbf16>,
    %26 = vector.extract_strided_slice %23 {offsets = [0, 86], sizes = [8, 256], strides = [1, 1]} : vector<8x512xbf16> to vector<8x256xbf16>
    %c8 = arith.constant 8 : index
    %c0_19 = arith.constant 0 : index
    %27 = vector.load %arg14[%c8, %c0_19] : memref<216x256xbf16, #tpu.memory_space<vmem>>, vector<8x256xbf16>
    tpu.vector_store %arg14[%c8, %c0_19], %26 {strides = array<i32>} : memref<216x256xbf16, #tpu.memory_space<vmem>>, vector<8x256xbf16>,
    %28 = vector.extract_strided_slice %23 {offsets = [0, 87], sizes = [8, 256], strides = [1, 1]} : vector<8x512xbf16> to vector<8x256xbf16>
    %c16 = arith.constant 16 : index
    %c0_20 = arith.constant 0 : index
    %29 = vector.load %arg14[%c16, %c0_20] : memref<216x256xbf16, #tpu.memory_space<vmem>>, vector<8x256xbf16>
    tpu.vector_store %arg14[%c16, %c0_20], %28 {strides = array<i32>} : memref<216x256xbf16, #tpu.memory_space<vmem>>, vector<8x256xbf16>,
    %30 = vector.extract_strided_slice %23 {offsets = [0, 91], sizes = [8, 256], strides = [1, 1]} : vector<8x512xbf16> to vector<8x256xbf16>
    %c24 = arith.constant 24 : index
    %c0_21 = arith.constant 0 : index
    %31 = vector.load %arg14[%c24, %c0_21] : memref<216x256xbf16, #tpu.memory_space<vmem>>, vector<8x256xbf16>
    tpu.vector_store %arg14[%c24, %c0_21], %30 {strides = array<i32>} : memref<216x256xbf16, #tpu.memory_space<vmem>>, vector<8x256xbf16>,
    %32 = vector.extract_strided_slice %23 {offsets = [0, 92], sizes = [8, 256], strides = [1, 1]} : vector<8x512xbf16> to vector<8x256xbf16>
    %c32 = arith.constant 32 : index
    %c0_22 = arith.constant 0 : index
    %33 = vector.load %arg14[%c32, %c0_22] : memref<216x256xbf16, #tpu.memory_space<vmem>>, vector<8x256xbf16>
    tpu.vector_store %arg14[%c32, %c0_22], %32 {strides = array<i32>} : memref<216x256xbf16, #tpu.memory_space<vmem>>, vector<8x256xbf16>,
    %34 = vector.extract_strided_slice %23 {offsets = [0, 93], sizes = [8, 256], strides = [1, 1]} : vector<8x512xbf16> to vector<8x256xbf16>
    %c40 = arith.constant 40 : index
    %c0_23 = arith.constant 0 : index
    %35 = vector.load %arg14[%c40, %c0_23] : memref<216x256xbf16, #tpu.memory_space<vmem>>, vector<8x256xbf16>
    tpu.vector_store %arg14[%c40, %c0_23], %34 {strides = array<i32>} : memref<216x256xbf16, #tpu.memory_space<vmem>>, vector<8x256xbf16>,
    %36 = vector.extract_strided_slice %23 {offsets = [0, 97], sizes = [8, 256], strides = [1, 1]} : vector<8x512xbf16> to vector<8x256xbf16>
    %c48 = arith.constant 48 : index
    %c0_24 = arith.constant 0 : index
    %37 = vector.load %arg14[%c48, %c0_24] : memref<216x256xbf16, #tpu.memory_space<vmem>>, vector<8x256xbf16>
    tpu.vector_store %arg14[%c48, %c0_24], %36 {strides = array<i32>} : memref<216x256xbf16, #tpu.memory_space<vmem>>, vector<8x256xbf16>,
    %38 = vector.extract_strided_slice %23 {offsets = [0, 98], sizes = [8, 256], strides = [1, 1]} : vector<8x512xbf16> to vector<8x256xbf16>
    %c56 = arith.constant 56 : index
    %c0_25 = arith.constant 0 : index
    %39 = vector.load %arg14[%c56, %c0_25] : memref<216x256xbf16, #tpu.memory_space<vmem>>, vector<8x256xbf16>
    tpu.vector_store %arg14[%c56, %c0_25], %38 {strides = array<i32>} : memref<216x256xbf16, #tpu.memory_space<vmem>>, vector<8x256xbf16>,
    %40 = vector.extract_strided_slice %23 {offsets = [0, 99], sizes = [8, 256], strides = [1, 1]} : vector<8x512xbf16> to vector<8x256xbf16>
    %c64 = arith.constant 64 : index
    %c0_26 = arith.constant 0 : index
    %41 = vector.load %arg14[%c64, %c0_26] : memref<216x256xbf16, #tpu.memory_space<vmem>>, vector<8x256xbf16>
    tpu.vector_store %arg14[%c64, %c0_26], %40 {strides = array<i32>} : memref<216x256xbf16, #tpu.memory_space<vmem>>, vector<8x256xbf16>,
    %42 = vector.extract_strided_slice %23 {offsets = [0, 121], sizes = [8, 256], strides = [1, 1]} : vector<8x512xbf16> to vector<8x256xbf16>
    %c72 = arith.constant 72 : index
    %c0_27 = arith.constant 0 : index
    %43 = vector.load %arg14[%c72, %c0_27] : memref<216x256xbf16, #tpu.memory_space<vmem>>, vector<8x256xbf16>
    tpu.vector_store %arg14[%c72, %c0_27], %42 {strides = array<i32>} : memref<216x256xbf16, #tpu.memory_space<vmem>>, vector<8x256xbf16>,
    %44 = vector.extract_strided_slice %23 {offsets = [0, 122], sizes = [8, 256], strides = [1, 1]} : vector<8x512xbf16> to vector<8x256xbf16>
    %c80 = arith.constant 80 : index
    %c0_28 = arith.constant 0 : index
    %45 = vector.load %arg14[%c80, %c0_28] : memref<216x256xbf16, #tpu.memory_space<vmem>>, vector<8x256xbf16>
    tpu.vector_store %arg14[%c80, %c0_28], %44 {strides = array<i32>} : memref<216x256xbf16, #tpu.memory_space<vmem>>, vector<8x256xbf16>,
    %46 = vector.extract_strided_slice %23 {offsets = [0, 123], sizes = [8, 256], strides = [1, 1]} : vector<8x512xbf16> to vector<8x256xbf16>
    %c88 = arith.constant 88 : index
    %c0_29 = arith.constant 0 : index
    %47 = vector.load %arg14[%c88, %c0_29] : memref<216x256xbf16, #tpu.memory_space<vmem>>, vector<8x256xbf16>
    tpu.vector_store %arg14[%c88, %c0_29], %46 {strides = array<i32>} : memref<216x256xbf16, #tpu.memory_space<vmem>>, vector<8x256xbf16>,
    %48 = vector.extract_strided_slice %23 {offsets = [0, 127], sizes = [8, 256], strides = [1, 1]} : vector<8x512xbf16> to vector<8x256xbf16>
    %c96 = arith.constant 96 : index
    %c0_30 = arith.constant 0 : index
    %49 = vector.load %arg14[%c96, %c0_30] : memref<216x256xbf16, #tpu.memory_space<vmem>>, vector<8x256xbf16>
    tpu.vector_store %arg14[%c96, %c0_30], %48 {strides = array<i32>} : memref<216x256xbf16, #tpu.memory_space<vmem>>, vector<8x256xbf16>,
    %50 = vector.extract_strided_slice %23 {offsets = [0, 128], sizes = [8, 256], strides = [1, 1]} : vector<8x512xbf16> to vector<8x256xbf16>
    %c104 = arith.constant 104 : index
    %c0_31 = arith.constant 0 : index
    %51 = vector.load %arg14[%c104, %c0_31] : memref<216x256xbf16, #tpu.memory_space<vmem>>, vector<8x256xbf16>
    tpu.vector_store %arg14[%c104, %c0_31], %50 {strides = array<i32>} : memref<216x256xbf16, #tpu.memory_space<vmem>>, vector<8x256xbf16>,
    %52 = vector.extract_strided_slice %23 {offsets = [0, 129], sizes = [8, 256], strides = [1, 1]} : vector<8x512xbf16> to vector<8x256xbf16>
    %c112 = arith.constant 112 : index
    %c0_32 = arith.constant 0 : index
    %53 = vector.load %arg14[%c112, %c0_32] : memref<216x256xbf16, #tpu.memory_space<vmem>>, vector<8x256xbf16>
    tpu.vector_store %arg14[%c112, %c0_32], %52 {strides = array<i32>} : memref<216x256xbf16, #tpu.memory_space<vmem>>, vector<8x256xbf16>,
    %54 = vector.extract_strided_slice %23 {offsets = [0, 133], sizes = [8, 256], strides = [1, 1]} : vector<8x512xbf16> to vector<8x256xbf16>
    %c120 = arith.constant 120 : index
    %c0_33 = arith.constant 0 : index
    %55 = vector.load %arg14[%c120, %c0_33] : memref<216x256xbf16, #tpu.memory_space<vmem>>, vector<8x256xbf16>
    tpu.vector_store %arg14[%c120, %c0_33], %54 {strides = array<i32>} : memref<216x256xbf16, #tpu.memory_space<vmem>>, vector<8x256xbf16>,
    %56 = vector.extract_strided_slice %23 {offsets = [0, 134], sizes = [8, 256], strides = [1, 1]} : vector<8x512xbf16> to vector<8x256xbf16>
    %c128 = arith.constant 128 : index
    %c0_34 = arith.constant 0 : index
    %57 = vector.load %arg14[%c128, %c0_34] : memref<216x256xbf16, #tpu.memory_space<vmem>>, vector<8x256xbf16>
    tpu.vector_store %arg14[%c128, %c0_34], %56 {strides = array<i32>} : memref<216x256xbf16, #tpu.memory_space<vmem>>, vector<8x256xbf16>,
    %58 = vector.extract_strided_slice %23 {offsets = [0, 135], sizes = [8, 256], strides = [1, 1]} : vector<8x512xbf16> to vector<8x256xbf16>
    %c136 = arith.constant 136 : index
    %c0_35 = arith.constant 0 : index
    %59 = vector.load %arg14[%c136, %c0_35] : memref<216x256xbf16, #tpu.memory_space<vmem>>, vector<8x256xbf16>
    tpu.vector_store %arg14[%c136, %c0_35], %58 {strides = array<i32>} : memref<216x256xbf16, #tpu.memory_space<vmem>>, vector<8x256xbf16>,
    %60 = vector.extract_strided_slice %23 {offsets = [0, 157], sizes = [8, 256], strides = [1, 1]} : vector<8x512xbf16> to vector<8x256xbf16>
    %c144 = arith.constant 144 : index
    %c0_36 = arith.constant 0 : index
    %61 = vector.load %arg14[%c144, %c0_36] : memref<216x256xbf16, #tpu.memory_space<vmem>>, vector<8x256xbf16>
    tpu.vector_store %arg14[%c144, %c0_36], %60 {strides = array<i32>} : memref<216x256xbf16, #tpu.memory_space<vmem>>, vector<8x256xbf16>,
    %62 = vector.extract_strided_slice %23 {offsets = [0, 158], sizes = [8, 256], strides = [1, 1]} : vector<8x512xbf16> to vector<8x256xbf16>
    %c152 = arith.constant 152 : index
    %c0_37 = arith.constant 0 : index
    %63 = vector.load %arg14[%c152, %c0_37] : memref<216x256xbf16, #tpu.memory_space<vmem>>, vector<8x256xbf16>
    tpu.vector_store %arg14[%c152, %c0_37], %62 {strides = array<i32>} : memref<216x256xbf16, #tpu.memory_space<vmem>>, vector<8x256xbf16>,
    %64 = vector.extract_strided_slice %23 {offsets = [0, 159], sizes = [8, 256], strides = [1, 1]} : vector<8x512xbf16> to vector<8x256xbf16>
    %c160 = arith.constant 160 : index
    %c0_38 = arith.constant 0 : index
    %65 = vector.load %arg14[%c160, %c0_38] : memref<216x256xbf16, #tpu.memory_space<vmem>>, vector<8x256xbf16>
    tpu.vector_store %arg14[%c160, %c0_38], %64 {strides = array<i32>} : memref<216x256xbf16, #tpu.memory_space<vmem>>, vector<8x256xbf16>,
    %66 = vector.extract_strided_slice %23 {offsets = [0, 163], sizes = [8, 256], strides = [1, 1]} : vector<8x512xbf16> to vector<8x256xbf16>
    %c168 = arith.constant 168 : index
    %c0_39 = arith.constant 0 : index
    %67 = vector.load %arg14[%c168, %c0_39] : memref<216x256xbf16, #tpu.memory_space<vmem>>, vector<8x256xbf16>
    tpu.vector_store %arg14[%c168, %c0_39], %66 {strides = array<i32>} : memref<216x256xbf16, #tpu.memory_space<vmem>>, vector<8x256xbf16>,
    %68 = vector.extract_strided_slice %23 {offsets = [0, 164], sizes = [8, 256], strides = [1, 1]} : vector<8x512xbf16> to vector<8x256xbf16>
    %c176 = arith.constant 176 : index
    %c0_40 = arith.constant 0 : index
    %69 = vector.load %arg14[%c176, %c0_40] : memref<216x256xbf16, #tpu.memory_space<vmem>>, vector<8x256xbf16>
    tpu.vector_store %arg14[%c176, %c0_40], %68 {strides = array<i32>} : memref<216x256xbf16, #tpu.memory_space<vmem>>, vector<8x256xbf16>,
    %70 = vector.extract_strided_slice %23 {offsets = [0, 165], sizes = [8, 256], strides = [1, 1]} : vector<8x512xbf16> to vector<8x256xbf16>
    %c184 = arith.constant 184 : index
    %c0_41 = arith.constant 0 : index
    %71 = vector.load %arg14[%c184, %c0_41] : memref<216x256xbf16, #tpu.memory_space<vmem>>, vector<8x256xbf16>
    tpu.vector_store %arg14[%c184, %c0_41], %70 {strides = array<i32>} : memref<216x256xbf16, #tpu.memory_space<vmem>>, vector<8x256xbf16>,
    %72 = vector.extract_strided_slice %23 {offsets = [0, 169], sizes = [8, 256], strides = [1, 1]} : vector<8x512xbf16> to vector<8x256xbf16>
    %c192 = arith.constant 192 : index
    %c0_42 = arith.constant 0 : index
    %73 = vector.load %arg14[%c192, %c0_42] : memref<216x256xbf16, #tpu.memory_space<vmem>>, vector<8x256xbf16>
    tpu.vector_store %arg14[%c192, %c0_42], %72 {strides = array<i32>} : memref<216x256xbf16, #tpu.memory_space<vmem>>, vector<8x256xbf16>,
    %74 = vector.extract_strided_slice %23 {offsets = [0, 170], sizes = [8, 256], strides = [1, 1]} : vector<8x512xbf16> to vector<8x256xbf16>
    %c200 = arith.constant 200 : index
    %c0_43 = arith.constant 0 : index
    %75 = vector.load %arg14[%c200, %c0_43] : memref<216x256xbf16, #tpu.memory_space<vmem>>, vector<8x256xbf16>
    tpu.vector_store %arg14[%c200, %c0_43], %74 {strides = array<i32>} : memref<216x256xbf16, #tpu.memory_space<vmem>>, vector<8x256xbf16>,
    %76 = vector.extract_strided_slice %23 {offsets = [0, 171], sizes = [8, 256], strides = [1, 1]} : vector<8x512xbf16> to vector<8x256xbf16>
    %c208 = arith.constant 208 : index
    %c0_44 = arith.constant 0 : index
    %77 = vector.load %arg14[%c208, %c0_44] : memref<216x256xbf16, #tpu.memory_space<vmem>>, vector<8x256xbf16>
    tpu.vector_store %arg14[%c208, %c0_44], %76 {strides = array<i32>} : memref<216x256xbf16, #tpu.memory_space<vmem>>, vector<8x256xbf16>,
    %c0_45 = arith.constant 0 : index
    %c0_46 = arith.constant 0 : index
    %78 = vector.load %arg9[%c0_45, %c0_46] : memref<16x216xbf16, #tpu.memory_space<vmem>>, vector<16x216xbf16>
    %c0_47 = arith.constant 0 : index
    %c0_48 = arith.constant 0 : index
    %79 = vector.load %arg14[%c0_47, %c0_48] : memref<216x256xbf16, #tpu.memory_space<vmem>>, vector<216x256xbf16>
    %cst_49 = arith.constant dense<0.000000e+00> : vector<16x256xf32>
    %80 = tpu.matmul %78, %79, %cst_49 {dimension_numbers = #tpu.dot_dimension_numbers<[1], [0], [0], [1], [0, 0, 1, 1], [], []>} : vector<16x216xbf16>, vector<216x256xbf16>, vector<16x256xf32> -> vector<16x256xf32>
    %c0_50 = arith.constant 0 : index
    %c0_51 = arith.constant 0 : index
    %81 = vector.load %arg10[%c0_50, %c0_51] : memref<16x1xf32, #tpu.memory_space<vmem>>, vector<16x1xf32>
    %82 = vector.broadcast %81 : vector<16x1xf32> to vector<16x256xf32>
    %83 = arith.addf %80, %82 : vector<16x256xf32>
    %c0_52 = arith.constant 0 : index
    %c0_53 = arith.constant 0 : index
    %84 = vector.load %arg11[%c0_52, %c0_53] : memref<16x256xbf16, #tpu.memory_space<vmem>>, vector<16x256xbf16>
    %85 = arith.extf %84 : vector<16x256xbf16> to vector<16x256xf32>
    %86 = arith.addf %83, %85 : vector<16x256xf32>
    %87 = arith.truncf %86 : vector<16x256xf32> to vector<16x256xbf16>
    %c0_54 = arith.constant 0 : index
    %c0_55 = arith.constant 0 : index
    %88 = vector.load %arg12[%c0_54, %c0_55] : memref<16x256xbf16, #tpu.memory_space<vmem>>, vector<16x256xbf16>
    tpu.vector_store %arg12[%c0_54, %c0_55], %87 {strides = array<i32>} : memref<16x256xbf16, #tpu.memory_space<vmem>>, vector<16x256xbf16>,
    %c0_56 = arith.constant 0 : index
    %c0_57 = arith.constant 0 : index
    %89 = vector.load %arg5[%c0_56, %c0_57] : memref<1x256xf32, #tpu.memory_space<vmem>>, vector<1x256xf32>
    %cst_58 = arith.constant 5.000000e-01 : f32
    %90 = vector.broadcast %cst_58 : f32 to vector<1x256xf32>
    %91 = arith.cmpf ogt, %89, %90 : vector<1x256xf32>
    %cst_59 = arith.constant 0.000000e+00 : f32
    %92 = vector.shape_cast %91 : vector<1x256xi1> to vector<1x256xi1>
    %93 = vector.broadcast %92 : vector<1x256xi1> to vector<16x256xi1>
    %94 = vector.broadcast %cst_59 : f32 to vector<16x256xf32>
    %95 = arith.select %93, %86, %94 : vector<16x256xi1>, vector<16x256xf32>
    %cst_60 = arith.constant dense<0.000000e+00> : vector<16xf32>
    %96 = vector.multi_reduction <add>, %95, %cst_60 [1] : vector<16x256xf32> to vector<16xf32>
    %97 = vector.shape_cast %96 : vector<16xf32> to vector<16x1xf32>
    %98 = arith.mulf %95, %95 : vector<16x256xf32>
    %cst_61 = arith.constant dense<0.000000e+00> : vector<16xf32>
    %99 = vector.multi_reduction <add>, %98, %cst_61 [1] : vector<16x256xf32> to vector<16xf32>
    %100 = vector.shape_cast %99 : vector<16xf32> to vector<16x1xf32>
    %101 = tpu.concatenate %97, %100 in 1 : vector<16x1xf32>, vector<16x1xf32> -> vector<16x2xf32>
    %102 = vector.shape_cast %101 : vector<16x2xf32> to vector<1x16x2xf32>
    %c0_62 = arith.constant 0 : index
    %c0_63 = arith.constant 0 : index
    %c0_64 = arith.constant 0 : index
    %103 = vector.load %arg13[%c0_62, %c0_63, %c0_64] : memref<1x16x2xf32, #tpu.memory_space<vmem>>, vector<1x16x2xf32>
    tpu.vector_store %arg13[%c0_62, %c0_63, %c0_64], %102 {strides = array<i32>} : memref<1x16x2xf32, #tpu.memory_space<vmem>>, vector<1x16x2xf32>,
    return
  }
  func.func @transform_0(%arg0: i32) -> (i32, i32) {
    %c2_i32 = arith.constant 2 : i32
    %0 = arith.muli %arg0, %c2_i32 : i32
    %c1_i32 = arith.constant 1 : i32
    %1 = arith.subi %0, %c1_i32 : i32
    %c0_i32 = arith.constant 0 : i32
    %2 = arith.maxsi %1, %c0_i32 : i32
    %c0_i32_0 = arith.constant 0 : i32
    %c0_i32_1 = arith.constant 0 : i32
    return %c0_i32_0, %2 : i32, i32
  }
  func.func @transform_1(%arg0: i32) -> (i32, i32) {
    %c0_i32 = arith.constant 0 : i32
    %c0_i32_0 = arith.constant 0 : i32
    return %c0_i32, %arg0 : i32, i32
  }
  func.func @transform_2(%arg0: i32) -> (i32, i32) {
    %c1_i32 = arith.constant 1 : i32
    %0 = arith.addi %arg0, %c1_i32 : i32
    %c2_i32 = arith.constant 2 : i32
    %1 = arith.muli %0, %c2_i32 : i32
    %c3_i32 = arith.constant 3 : i32
    %2 = arith.minsi %1, %c3_i32 : i32
    %c0_i32 = arith.constant 0 : i32
    %c0_i32_0 = arith.constant 0 : i32
    return %c0_i32, %2 : i32, i32
  }
  func.func @transform_3(%arg0: i32) -> (i32, i32) {
    %c2_i32 = arith.constant 2 : i32
    %0 = arith.muli %arg0, %c2_i32 : i32
    %c1_i32 = arith.constant 1 : i32
    %1 = arith.subi %0, %c1_i32 : i32
    %c0_i32 = arith.constant 0 : i32
    %2 = arith.maxsi %1, %c0_i32 : i32
    %c0_i32_0 = arith.constant 0 : i32
    %c0_i32_1 = arith.constant 0 : i32
    return %c0_i32_0, %2 : i32, i32
  }
  func.func @transform_4(%arg0: i32) -> (i32, i32) {
    %c0_i32 = arith.constant 0 : i32
    %c0_i32_0 = arith.constant 0 : i32
    return %c0_i32, %arg0 : i32, i32
  }
  func.func @transform_5(%arg0: i32) -> (i32, i32) {
    %c1_i32 = arith.constant 1 : i32
    %0 = arith.addi %arg0, %c1_i32 : i32
    %c2_i32 = arith.constant 2 : i32
    %1 = arith.muli %0, %c2_i32 : i32
    %c3_i32 = arith.constant 3 : i32
    %2 = arith.minsi %1, %c3_i32 : i32
    %c0_i32 = arith.constant 0 : i32
    %c0_i32_0 = arith.constant 0 : i32
    return %c0_i32, %2 : i32, i32
  }
  func.func @transform_6(%arg0: i32) -> (i32, i32) {
    %c0_i32 = arith.constant 0 : i32
    %c0_i32_0 = arith.constant 0 : i32
    %c0_i32_1 = arith.constant 0 : i32
    return %c0_i32, %c0_i32_0 : i32, i32
  }
  func.func @transform_7(%arg0: i32) -> (i32, i32) {
    %c0_i32 = arith.constant 0 : i32
    %c0_i32_0 = arith.constant 0 : i32
    %c0_i32_1 = arith.constant 0 : i32
    return %c0_i32, %c0_i32_0 : i32, i32
  }
  func.func @transform_8(%arg0: i32) -> (i32, i32) {
    %c0_i32 = arith.constant 0 : i32
    %c0_i32_0 = arith.constant 0 : i32
    %c0_i32_1 = arith.constant 0 : i32
    return %c0_i32, %c0_i32_0 : i32, i32
  }
  func.func @transform_9(%arg0: i32) -> (i32, i32) {
    %c0_i32 = arith.constant 0 : i32
    %c0_i32_0 = arith.constant 0 : i32
    %c0_i32_1 = arith.constant 0 : i32
    return %c0_i32, %c0_i32_0 : i32, i32
  }
  func.func @transform_10(%arg0: i32) -> (i32, i32) {
    %c0_i32 = arith.constant 0 : i32
    %c0_i32_0 = arith.constant 0 : i32
    return %c0_i32, %arg0 : i32, i32
  }
  func.func @transform_11(%arg0: i32) -> (i32, i32) {
    %c0_i32 = arith.constant 0 : i32
    %c0_i32_0 = arith.constant 0 : i32
    return %c0_i32, %arg0 : i32, i32
  }
  func.func @transform_12(%arg0: i32) -> (i32, i32, i32) {
    %c0_i32 = arith.constant 0 : i32
    %c0_i32_0 = arith.constant 0 : i32
    %c0_i32_1 = arith.constant 0 : i32
    return %arg0, %c0_i32, %c0_i32_0 : i32, i32, i32
  }
}

module attributes {stable_mosaic.version = 11 : i64} {
  func.func @_head_kernel(%arg0: i32, %arg1: memref<16x256xbf16, #tpu.memory_space<vmem>>, %arg2: memref<16x1xf32, #tpu.memory_space<vmem>>, %arg3: memref<16x1xf32, #tpu.memory_space<vmem>>, %arg4: memref<8x16xf32, #tpu.memory_space<vmem>>, %arg5: memref<8x1xf32, #tpu.memory_space<vmem>>, %arg6: memref<8x256xf32, #tpu.memory_space<vmem>>) attributes {dimension_semantics = [#tpu.dimension_semantics<parallel>], iteration_bounds = array<i64: 2>, scalar_prefetch = 0 : i64, scratch_operands = 0 : i64, tpu.core_type = #tpu.core_type<tc>, window_params = [{transform_indices = @transform_0, window_bounds = array<i64: 16, 256>}, {pipeline_mode = #tpu.pipeline_mode<synchronous>, transform_indices = @transform_1, window_bounds = array<i64: 16, 1>}, {pipeline_mode = #tpu.pipeline_mode<synchronous>, transform_indices = @transform_2, window_bounds = array<i64: 16, 1>}, {pipeline_mode = #tpu.pipeline_mode<synchronous>, transform_indices = @transform_3, window_bounds = array<i64: 8, 16>}, {pipeline_mode = #tpu.pipeline_mode<synchronous>, transform_indices = @transform_4, window_bounds = array<i64: 8, 1>}, {transform_indices = @transform_5, window_bounds = array<i64: 8, 256>}]} {
    %c0 = arith.constant 0 : index
    %c0_0 = arith.constant 0 : index
    %0 = vector.load %arg1[%c0, %c0_0] : memref<16x256xbf16, #tpu.memory_space<vmem>>, vector<16x256xbf16>
    %1 = arith.extf %0 : vector<16x256xbf16> to vector<16x256xf32>
    %c0_1 = arith.constant 0 : index
    %c0_2 = arith.constant 0 : index
    %2 = vector.load %arg2[%c0_1, %c0_2] : memref<16x1xf32, #tpu.memory_space<vmem>>, vector<16x1xf32>
    %3 = vector.broadcast %2 : vector<16x1xf32> to vector<16x256xf32>
    %4 = arith.mulf %1, %3 : vector<16x256xf32>
    %c0_3 = arith.constant 0 : index
    %c0_4 = arith.constant 0 : index
    %5 = vector.load %arg3[%c0_3, %c0_4] : memref<16x1xf32, #tpu.memory_space<vmem>>, vector<16x1xf32>
    %6 = vector.broadcast %5 : vector<16x1xf32> to vector<16x256xf32>
    %7 = arith.addf %4, %6 : vector<16x256xf32>
    %cst = arith.constant 0.000000e+00 : f32
    %8 = vector.broadcast %cst : f32 to vector<16x256xf32>
    %9 = arith.maximumf %7, %8 : vector<16x256xf32>
    %c0_5 = arith.constant 0 : index
    %c0_6 = arith.constant 0 : index
    %10 = vector.load %arg4[%c0_5, %c0_6] : memref<8x16xf32, #tpu.memory_space<vmem>>, vector<8x16xf32>
    %cst_7 = arith.constant dense<0.000000e+00> : vector<8x256xf32>
    %11 = tpu.matmul %10, %9, %cst_7 {dimension_numbers = #tpu.dot_dimension_numbers<[1], [0], [0], [1], [0, 0, 1, 1], [], []>} : vector<8x16xf32>, vector<16x256xf32>, vector<8x256xf32> -> vector<8x256xf32>
    %c0_8 = arith.constant 0 : index
    %c0_9 = arith.constant 0 : index
    %12 = vector.load %arg5[%c0_8, %c0_9] : memref<8x1xf32, #tpu.memory_space<vmem>>, vector<8x1xf32>
    %13 = vector.broadcast %12 : vector<8x1xf32> to vector<8x256xf32>
    %14 = arith.addf %11, %13 : vector<8x256xf32>
    %c0_10 = arith.constant 0 : index
    %c0_11 = arith.constant 0 : index
    %15 = vector.load %arg6[%c0_10, %c0_11] : memref<8x256xf32, #tpu.memory_space<vmem>>, vector<8x256xf32>
    tpu.vector_store %arg6[%c0_10, %c0_11], %14 {strides = array<i32>} : memref<8x256xf32, #tpu.memory_space<vmem>>, vector<8x256xf32>,
    return
  }
  func.func @transform_0(%arg0: i32) -> (i32, i32) {
    %c0_i32 = arith.constant 0 : i32
    %c0_i32_0 = arith.constant 0 : i32
    return %c0_i32, %arg0 : i32, i32
  }
  func.func @transform_1(%arg0: i32) -> (i32, i32) {
    %c0_i32 = arith.constant 0 : i32
    %c0_i32_0 = arith.constant 0 : i32
    %c0_i32_1 = arith.constant 0 : i32
    return %c0_i32, %c0_i32_0 : i32, i32
  }
  func.func @transform_2(%arg0: i32) -> (i32, i32) {
    %c0_i32 = arith.constant 0 : i32
    %c0_i32_0 = arith.constant 0 : i32
    %c0_i32_1 = arith.constant 0 : i32
    return %c0_i32, %c0_i32_0 : i32, i32
  }
  func.func @transform_3(%arg0: i32) -> (i32, i32) {
    %c0_i32 = arith.constant 0 : i32
    %c0_i32_0 = arith.constant 0 : i32
    %c0_i32_1 = arith.constant 0 : i32
    return %c0_i32, %c0_i32_0 : i32, i32
  }
  func.func @transform_4(%arg0: i32) -> (i32, i32) {
    %c0_i32 = arith.constant 0 : i32
    %c0_i32_0 = arith.constant 0 : i32
    %c0_i32_1 = arith.constant 0 : i32
    return %c0_i32, %c0_i32_0 : i32, i32
  }
  func.func @transform_5(%arg0: i32) -> (i32, i32) {
    %c0_i32 = arith.constant 0 : i32
    %c0_i32_0 = arith.constant 0 : i32
    return %c0_i32, %arg0 : i32, i32
  }
}

</mosaic_0001>

<bundles_post_ra>
// kernel: encoder_forward.8
= control target key start
LH: loop header
LB: loop body
LE: loop exit
PB: predicated region body
PF: predicated region fallthrough
CT: control target
= control target key end

     0   :  { %s1603_s21 = smov 0   ;;  %s1605_s22 = smov 0   ;;  %s2095_s0 = inlined_call_operand.vmem [shape: bf16[32,1536], index: 0, kind: input, shape index: {}, may-alias: {0,1}]   ;;  %s2096_s1 = inlined_call_operand.vmem [shape: bf16[32,1536], index: 1, kind: input, shape index: {}, may-alias: {0,1}]   ;;  %s2097_s2 = inlined_call_operand.vmem [shape: f32[1,1536], index: 2, kind: input, shape index: {}]   ;;  %s2098_s3 = inlined_call_operand.vmem [shape: bf16[8,256], index: 3, kind: input, shape index: {}]   ;;  %s2099_s4 = inlined_call_operand.vmem [shape: f32[8,1], index: 4, kind: input, shape index: {}]   ;;  %s2100_s5 = inlined_call_operand.vmem [shape: bf16[8,1536], index: 5, kind: output, shape index: {0}]   ;;  %s2101_s6 = inlined_call_operand.vmem [shape: f32[2,8,2], index: 6, kind: output, shape index: {1}]  }
   0x1   :  { %s1607_s23 = smov 0   ;;  %s1609_s24 = smov 0  }
   0x2   :  { %s1611_s25 = smov 0  }
   0x3 LB: > { %s1629_s26 = sadd.s32 4294967295, %s1558_s25   ;;  %s1632_s27 = sadd.s32 1, %s1558_s25   ;;  %s1558_s25 = sphi %s1611_s25, %s2108_s25   ;;  %s1554_s24 = sphi %s1609_s24, %s2107_s24   ;;  %s1550_s23 = sphi %s1607_s23, %s2106_s23   ;;  %s1546_s22 = sphi %s1605_s22, %s2105_s22   ;;  %s1542_s21 = sphi %s1603_s21, %s2104_s21  }
   0x4   : > { %s21_s28 = ssub.s32 %s1558_s25, %s1632_s27  ;;  %s24_s29 = sadd.s32 1, %s1554_s24 }
   0x5   : > { %p22_p0 = scmp.eq.s32.totalorder %s21_s28, 0  ;;  %p31_p1 = scmp.ne.s32.totalorder %s1554_s24, %s1550_s23 }
   0x6   : > { %p32_p2 = scmp.eq.s32.totalorder %s1558_s25, 0  ;;  %s48_s30 = smul.u32 6, %s1632_s27 }
   0x7   : > { %s1642_s7 = scalar_select %p22_p0, %s1554_s24, %s24_s29  }
   0x8   : > { %p1644_p3 = por %p32_p2, %p31_p1  ;;  %p49_p4 = scmp.lt.s32.totalorder %s48_s30, 11 }
   0x9   : > { %s51_s9 = sadd.s32 1, %s1632_s27  ;;  %p65_p5 = scmp.ne.s32.totalorder %s1546_s22, %s1542_s21 }
   0xa   : > { %s52_s10 = smul.u32 6, %s51_s9  ;;  %s2110_s30 = smov (!%p49_p4, %s48_s30), 11 }
   0xb   : > { %p1653_p7 = por %p65_p5, %p32_p2  ;;  %s58_s13 = sadd.s32 1, %s1546_s22 }
   0xc   : > { %p53_p6 = scmp.lt.s32.totalorder %s52_s10, 11  ;;  %p1414_p9 = scmp.ge.s32.totalorder %s1558_s25, 2 }
   0xe   : > { %s2112_s10 = smov (!%p53_p6, %s52_s10), 11  ;;  %217 = sbr.rel (%p1414_p9) target bundleno = 39 (0x27), region = 24 }
   0xf   : > { %s55_s12 = ssub.s32 %s2110_s30, %s2112_s10 }
  0x10   : > { %p56_p8 = scmp.eq.s32.totalorder %s55_s12, 0 }
  0x12   : > { %s1660_s14 = scalar_select %p56_p8, %s1546_s22, %s58_s13  }
  0x15   : > { %220 = sbr.rel (!%p1644_p3) target bundleno = 32 (0x20), region = 28  ;;  %s222_s15 = sand.u32 (%p1644_p3), 1, %s1554_s24  }
  0x16   : > { %s1443_s16 = smul.u32 (%p1644_p3), 24, %s1558_s25 }
  0x17   : > { %s1447_s17 = smul.u32 (%p1644_p3), 96, %s222_s15 }
  0x18   : > { %s227_s20 = scalar_lea.vmem (%p1644_p3), %s2095_s0, %s1443_s16 }
  0x19   : > { %v240_v0 = vld [vmem:[%s227_s20] sm:$0xff] (%p1644_p3)  ;;  %v242_v1 = vld [vmem:[%s227_s20 + $0x8] sm:$0xff] (%p1644_p3)  ;;  %v244_v2 = vld [vmem:[%s227_s20 + $0x10] sm:$0xff] (%p1644_p3)  ;;  %s224_s28 = scalar_lea.vmem (%p1644_p3), [#allocation3], %s1447_s17 }
  0x1a   : > { %241 = vst [vmem:[%s224_s28] sm:$0xff] (%p1644_p3), %v240_v0  ;;  %243 = vst [vmem:[%s224_s28 + $0x8] sm:$0xff] (%p1644_p3), %v242_v1  ;;  %v246_v3 = vld [vmem:[%s227_s20 + $0x30] sm:$0xff] (%p1644_p3)  ;;  %v248_v4 = vld [vmem:[%s227_s20 + $0x38] sm:$0xff] (%p1644_p3) }
  0x1b   : > { %245 = vst [vmem:[%s224_s28 + $0x10] sm:$0xff] (%p1644_p3), %v244_v2  ;;  %v250_v5 = vld [vmem:[%s227_s20 + $0x40] sm:$0xff] (%p1644_p3)  ;;  %247 = vst [vmem:[%s224_s28 + $0x18] sm:$0xff] (%p1644_p3), %v246_v3  ;;  %v254_v7 = vld [vmem:[%s227_s20 + $0x68] sm:$0xff] (%p1644_p3) }
  0x1c   : > { %249 = vst [vmem:[%s224_s28 + $0x20] sm:$0xff] %v248_v4  ;;  %251 = vst [vmem:[%s224_s28 + $0x28] sm:$0xff] %v250_v5  ;;  %v252_v6 = vld [vmem:[%s227_s20 + $0x60] sm:$0xff]  ;;  %v256_v8 = vld [vmem:[%s227_s20 + $0x70] sm:$0xff] }
  0x1d   : > { %253 = vst [vmem:[%s224_s28 + $0x30] sm:$0xff] %v252_v6  ;;  %255 = vst [vmem:[%s224_s28 + $0x38] sm:$0xff] %v254_v7  ;;  %v258_v9 = vld [vmem:[%s227_s20 + $0x90] sm:$0xff]  ;;  %v260_v10 = vld [vmem:[%s227_s20 + $0x98] sm:$0xff] }
  0x1e   : > { %257 = vst [vmem:[%s224_s28 + $0x40] sm:$0xff] %v256_v8  ;;  %v262_v11 = vld [vmem:[%s227_s20 + $0xa0] sm:$0xff]  ;;  %259 = vst [vmem:[%s224_s28 + $0x48] sm:$0xff] %v258_v9 }
  0x1f   : > { %261 = vst [vmem:[%s224_s28 + $0x50] sm:$0xff] %v260_v10  ;;  %263 = vst [vmem:[%s224_s28 + $0x58] sm:$0xff] %v262_v11 }
  0x20 PF: > { %269 = sbr.rel (!%p1653_p7) target bundleno = 39 (0x27), region = 51  ;;  %s271_s29 = sand.u32 (%p1653_p7), 1, %s1546_s22  }
  0x21   : > { %s1417_s8 = sshll.u32 (%p1653_p7), %s2110_s30, 2  ;;  %s1416_s9 = sshll.u32 (%p1653_p7), %s271_s29, 4 }
  0x22   : > { %s279_s13 = scalar_lea.vmem (%p1653_p7), %s2096_s1, %s1417_s8  ;;  %s273_s15 = scalar_lea.vmem (%p1653_p7), [#allocation4], %s1416_s9 }
  0x23   : > { %v295_v12 = vld [vmem:[%s279_s13] sm:$0xf] (%p1653_p7)  ;;  %v297_v13 = vld [vmem:[%s279_s13 + $0x30] sm:$0xf] (%p1653_p7) }
  0x24   : > { %296 = vst [vmem:[%s273_s15] sm:$0xf] (%p1653_p7), %v295_v12  ;;  %298 = vst [vmem:[%s273_s15 + $0x4] sm:$0xf] (%p1653_p7), %v297_v13  ;;  %v299_v14 = vld [vmem:[%s279_s13 + $0x60] sm:$0xf] (%p1653_p7) }
  0x25   : > { %v301_v15 = vld [vmem:[%s279_s13 + $0x90] sm:$0xf] (%p1653_p7)  ;;  %300 = vst [vmem:[%s273_s15 + $0x8] sm:$0xf] (%p1653_p7), %v299_v14 }
  0x26   : > { %302 = vst [vmem:[%s273_s15 + $0xc] sm:$0xf] (%p1653_p7), %v301_v15 }
  0x27 PF: > { %p1418_p10 = scmp.ge.s32.totalorder %s1558_s25, 1  ;;  %p340_p11 = scmp.lt.s32.totalorder %s1558_s25, 3 }
  0x29   : > { %p341_p12 = pnand %p1418_p10, %p340_p11 }
  0x2a   : > { %s347_s30 = sand.u32 (!%p341_p12), 1, %s1550_s23   ;;  %s354_s25 = sand.u32 (!%p341_p12), 1, %s1542_s21   ;;  %v1757_v24 = vld [vmem:[%s2098_s3] sm:$0xff] (!%p341_p12)  ;;  %vm541_vm0 = vcmask (!%p341_p12), 1039360   ;;  %vm606_vm1 = vcmask (!%p341_p12), 973824   ;;  %vm671_vm2 = vcmask (!%p341_p12), 965632  }
  0x2b   : > { %344 = sbr.rel (%p341_p12) target bundleno = 726 (0x2d6), region = 96  ;;  %s1560_s17 = smov (!%p341_p12), 127   ;;  %v1761_v25 = vcombine.high (!%p341_p12), %v1757_v24, %v1757_v24  ;;  %vm736_vm3 = vcmask (!%p341_p12), 384000   ;;  %vm801_vm4 = vcmask (!%p341_p12), 375808   ;;  %vm866_vm5 = vcmask (!%p341_p12), 310272  }
  0x2c   : > { %s1448_s11 = smul.u32 (!%p341_p12), 96, %s347_s30  ;;  %s1692_s23 = sshll.u32 (!%p341_p12), %s354_s25, 4  ;;  %vm931_vm6 = vcmask (!%p341_p12), 302080   ;;  %vm1287_vm14 = vcmask (!%p341_p12), 7168   ;;  %vm1289_vm15 = vcmask (!%p341_p12), 15360  }
  0x2d   : > { %s356_s21 = scalar_lea.vmem (!%p341_p12), [#allocation4], %s1692_s23  ;;  %s1561_s18 = smov (!%p341_p12), 119   ;;  %1110 = vmatprep.mubr.bf16.mxu0 (!%p341_p12), %v1761_v25  ;;  %1151 = vmatprep.mubr.bf16.mxu1 (!%p341_p12), %v1761_v25 }
  0x2e   : > { %s1680_s16 = scalar_lea.vmem (!%p341_p12), [#allocation3], %s1448_s11  ;;  %s1562_s19 = smov (!%p341_p12), 118   ;;  %v1785_v28 = vld [vmem:[%s356_s21] sm:$0xff] (!%p341_p12)   ;;  %v1803_v31 = vld [vmem:[%s356_s21 + $0x8] sm:$0xff] (!%p341_p12)  }
  0x2f   : > { %v1683_v16 = vld [vmem:[%s1680_s16 + $0x4] ss:$24 sps:$4 sm:$0xff] (!%p341_p12)   ;;  %v1686_v17 = vld [vmem:[%s1680_s16] ss:$24 sps:$4 sm:$0xff] (!%p341_p12)   ;;  %v1503_v19 = vld [vmem:[%s1680_s16 + $0x34] ss:$24 sps:$4 sm:$0xff] (!%p341_p12)  }
  0x30   : > { %515 = vrot.lane.b32.xlu0 (!%p341_p12), %v1683_v16, %s1560_s17  ;;  %v1501_v18 = vld [vmem:[%s1680_s16 + $0x8] ss:$24 sps:$4 sm:$0xff] (!%p341_p12)   ;;  %1078 = vmatprep.subr.bf16.mxu0 (!%p341_p12), %v1683_v16  ;;  %v1700_v20 = vld [vmem:[%s1680_s16 + $0xc] ss:$24 sps:$4 sm:$0xff] (!%p341_p12)   ;;  %v1505_v22 = vld [vmem:[%s1680_s16 + $0x38] ss:$24 sps:$4 sm:$0xff] (!%p341_p12)  }
  0x31   : > { %513 = vrot.lane.b32.xlu1 (!%p341_p12), %v1686_v17, %s1560_s17  ;;  %1079 = vmatpush1.bf16.msra.mxu0 (!%p341_p12), %v1686_v17  ;;  %v1507_v21 = vld [vmem:[%s1680_s16 + $0x30] ss:$24 sps:$4 sm:$0xff] (!%p341_p12)   ;;  %v1709_v23 = vld [vmem:[%s1680_s16 + $0x3c] ss:$24 sps:$4 sm:$0xff] (!%p341_p12)   ;;  %s1563_s20 = smov (!%p341_p12), 47   ;;  %s1564_s28 = smov (!%p341_p12), 46  }
  0x32   : > { %1080 = vmatprep.subr.bf16.mxu0 %v1503_v19  ;;  %1119 = vmatprep.subr.bf16.mxu1 %v1700_v20  ;;  %s1565_s29 = smov 38   ;;  %s1566_s10 = smov 37   ;;  %v1774_v26 = vld [vmem:[%s1680_s16 + $0x10] ss:$24 sps:$4 sm:$0xff]   ;;  %v1779_v27 = vld [vmem:[%s1680_s16 + $0x14] ss:$24 sps:$4 sm:$0xff]  }
  0x33   : > { %1120 = vmatpush1.bf16.msra.mxu1 %v1501_v18  ;;  %v1792_v29 = vld [vmem:[%s1680_s16 + $0x40] ss:$24 sps:$4 sm:$0xff]   ;;  %v1797_v30 = vld [vmem:[%s1680_s16 + $0x44] ss:$24 sps:$4 sm:$0xff]   ;;  %s400_s15 = smul.u32 6, %s1629_s26  ;;  %p411_p0 = scmp.lt.s32.totalorder %s1629_s26, 1 }
  0x34   : > { %517 = vrot.lane.b32.xlu0 %v1501_v18, %s1560_s17  ;;  %1121 = vmatprep.subr.bf16.mxu1 %v1709_v23 }
  0x35   : > { %529 = vrot.lane.b32.xlu1 %v1503_v19, %s1560_s17  ;;  %1081 = vmatpush1.bf16.msra.mxu0 %v1507_v21  ;;  %p401_p13 = scmp.lt.s32.totalorder %s400_s15, 11  ;;  %s2116_s26 = smov (!%p411_p0, %s1629_s26), 1 }
  0x37   : > { %1122 = vmatpush1.bf16.msra.mxu1 %v1505_v22  ;;  %s2114_s15 = smov (!%p401_p13, %s400_s15), 11 }
  0x38   : > { %531 = vrot.lane.b32.xlu0 %v1505_v22, %s1560_s17  ;;  %s403_s16 = scalar_lea.vmem %s2097_s2, %s2114_s15  ;;  %s1420_s25 = sshll.u32 %s2114_s15, 2 }
  0x39   : > { %527 = vrot.lane.b32.xlu1 %v1507_v21, %s1560_s17  ;;  %s2069_s21 = scalar_lea.vmem %s2100_s5, %s1420_s25 }
  0x3c   : > { %580 = vrot.lane.b32.xlu0 %v1683_v16, %s1561_s18 }
  0x3d   : > { %582 = vrot.lane.b32.xlu1 %v1501_v18, %s1561_s18 }
  0x40   : > { %578 = vrot.lane.b32.xlu0 %v1686_v17, %s1561_s18 }
  0x41   : > { %594 = vrot.lane.b32.xlu1 %v1503_v19, %s1561_s18 }
  0x44   : > { %596 = vrot.lane.b32.xlu0 %v1505_v22, %s1561_s18 }
  0x45   : > { %592 = vrot.lane.b32.xlu1 %v1507_v21, %s1561_s18 }
  0x48   : > { %645 = vrot.lane.b32.xlu0 %v1683_v16, %s1562_s19 }
  0x49   : > { %647 = vrot.lane.b32.xlu1 %v1501_v18, %s1562_s19 }
  0x4c   : > { %643 = vrot.lane.b32.xlu0 %v1686_v17, %s1562_s19 }
  0x4d   : > { %659 = vrot.lane.b32.xlu1 %v1503_v19, %s1562_s19 }
  0x50   : > { %661 = vrot.lane.b32.xlu0 %v1505_v22, %s1562_s19 }
  0x51   : > { %657 = vrot.lane.b32.xlu1 %v1507_v21, %s1562_s19 }
  0x54   : > { %710 = vrot.lane.b32.xlu0 %v1683_v16, %s1563_s20 }
  0x55   : > { %712 = vrot.lane.b32.xlu1 %v1501_v18, %s1563_s20 }
  0x58   : > { %708 = vrot.lane.b32.xlu0 %v1686_v17, %s1563_s20 }
  0x59   : > { %724 = vrot.lane.b32.xlu1 %v1503_v19, %s1563_s20 }
  0x5c   : > { %726 = vrot.lane.b32.xlu0 %v1505_v22, %s1563_s20 }
  0x5d   : > { %722 = vrot.lane.b32.xlu1 %v1507_v21, %s1563_s20 }
  0x60   : > { %775 = vrot.lane.b32.xlu0 %v1683_v16, %s1564_s28 }
  0x61   : > { %777 = vrot.lane.b32.xlu1 %v1501_v18, %s1564_s28 }
  0x64   : > { %773 = vrot.lane.b32.xlu0 %v1686_v17, %s1564_s28 }
  0x65   : > { %789 = vrot.lane.b32.xlu1 %v1503_v19, %s1564_s28 }
  0x68   : > { %791 = vrot.lane.b32.xlu0 %v1505_v22, %s1564_s28 }
  0x69   : > { %787 = vrot.lane.b32.xlu1 %v1507_v21, %s1564_s28 }
  0x6c   : > { %840 = vrot.lane.b32.xlu0 %v1683_v16, %s1565_s29 }
  0x6d   : > { %842 = vrot.lane.b32.xlu1 %v1501_v18, %s1565_s29 }
  0x70   : > { %838 = vrot.lane.b32.xlu0 %v1686_v17, %s1565_s29 }
  0x71   : > { %854 = vrot.lane.b32.xlu1 %v1503_v19, %s1565_s29 }
  0x74   : > { %856 = vrot.lane.b32.xlu0 %v1505_v22, %s1565_s29 }
  0x75   : > { %852 = vrot.lane.b32.xlu1 %v1507_v21, %s1565_s29 }
  0x78   : > { %905 = vrot.lane.b32.xlu0 %v1683_v16, %s1566_s10 }
  0x79   : > { %907 = vrot.lane.b32.xlu1 %v1501_v18, %s1566_s10 }
  0x7c   : > { %903 = vrot.lane.b32.xlu0 %v1686_v17, %s1566_s10 }
  0x7d   : > { %919 = vrot.lane.b32.xlu1 %v1503_v19, %s1566_s10 }
  0x80   : > { %921 = vrot.lane.b32.xlu0 %v1505_v22, %s1566_s10 }
  0x81   : > { %917 = vrot.lane.b32.xlu1 %v1507_v21, %s1566_s10 }
  0x84   : > { %519 = vrot.lane.b32.xlu0 %v1700_v20, %s1560_s17 }
  0x85   : > { %521 = vrot.lane.b32.xlu1 %v1774_v26, %s1560_s17 }
  0x88   : > { %523 = vrot.lane.b32.xlu0 %v1779_v27, %s1560_s17 }
  0x89   : > { %525 = vrot.lane.b32.xlu1 %v1785_v28, %s1560_s17 }
  0x8c   : > { %533 = vrot.lane.b32.xlu0 %v1709_v23, %s1560_s17 }
  0x8d   : > { %535 = vrot.lane.b32.xlu1 %v1792_v29, %s1560_s17 }
  0x90   : > { %537 = vrot.lane.b32.xlu0 %v1797_v30, %s1560_s17 }
  0x91   : > { %539 = vrot.lane.b32.xlu1 %v1803_v31, %s1560_s17 }
  0x94   : > { %584 = vrot.lane.b32.xlu0 %v1700_v20, %s1561_s18 }
  0x95   : > { %586 = vrot.lane.b32.xlu1 %v1774_v26, %s1561_s18 }
  0x98   : > { %588 = vrot.lane.b32.xlu0 %v1779_v27, %s1561_s18 }
  0x99   : > { %590 = vrot.lane.b32.xlu1 %v1785_v28, %s1561_s18 }
  0x9c   : > { %598 = vrot.lane.b32.xlu0 %v1709_v23, %s1561_s18 }
  0x9d   : > { %600 = vrot.lane.b32.xlu1 %v1792_v29, %s1561_s18 }
  0xa0   : > { %602 = vrot.lane.b32.xlu0 %v1797_v30, %s1561_s18 }
  0xa1   : > { %604 = vrot.lane.b32.xlu1 %v1803_v31, %s1561_s18  ;;  %s1421_s18 = sshll.u32 %s2116_s26, 3 }
  0xa2   : > { %v516_v32 = vpop.permute.xlu0 %515 }
  0xa3   : > { %v514_v33 = vpop.permute.xlu1 %513 }
  0xa4   : > { %649 = vrot.lane.b32.xlu0 %v1700_v20, %s1562_s19  ;;  %v542_v37 = vsel %vm541_vm0, %v514_v33, %v516_v32 }
  0xa5   : > { %651 = vrot.lane.b32.xlu1 %v1774_v26, %s1562_s19 }
  0xa6   : > { %v1829_v34 = vpop.permute.xlu0 %517 }
  0xa7   : > { %v530_v35 = vpop.permute.xlu1 %529  ;;  %v543_v36 = vsel %vm541_vm0, %v516_v32, %v1829_v34 }
  0xa8   : > { %653 = vrot.lane.b32.xlu0 %v1779_v27, %s1562_s19  ;;  %1082 = vmatprep.subr.bf16.mxu0 %v543_v36 }
  0xa9   : > { %655 = vrot.lane.b32.xlu1 %v1785_v28, %s1562_s19  ;;  %1083 = vmatpush1.bf16.msra.mxu0 %v542_v37 }
  0xaa   : > { %v1838_v38 = vpop.permute.xlu0 %531 }
  0xab   : > { %v528_v39 = vpop.permute.xlu1 %527  ;;  %v549_v40 = vsel %vm541_vm0, %v530_v35, %v1838_v38 }
  0xac   : > { %663 = vrot.lane.b32.xlu0 %v1709_v23, %s1562_s19  ;;  %1084 = vmatprep.subr.bf16.mxu0 %v549_v40  ;;  %v548_v41 = vsel %vm541_vm0, %v528_v39, %v530_v35  ;;  %v1567_v40 = vmov 0  }
  0xad   : > { %665 = vrot.lane.b32.xlu1 %v1792_v29, %s1562_s19  ;;  %1085 = vmatpush1.bf16.msra.mxu0 %v548_v41 }
  0xae   : > { %v581_v42 = vpop.permute.xlu0 %580  ;;  %1497 = vset.pattern.permute.xlu0 %v1567_v40 }
  0xaf   : > { %v1847_v43 = vpop.permute.xlu1 %582 }
  0xb0   : > { %667 = vrot.lane.b32.xlu0 %v1797_v30, %s1562_s19  ;;  %v608_v44 = vsel %vm606_vm1, %v581_v42, %v1847_v43 }
  0xb1   : > { %669 = vrot.lane.b32.xlu1 %v1803_v31, %s1562_s19  ;;  %1086 = vmatprep.subr.bf16.mxu0 %v608_v44 }
  0xb2   : > { %v579_v45 = vpop.permute.xlu0 %578 }
  0xb3   : > { %v595_v46 = vpop.permute.xlu1 %594  ;;  %v607_v47 = vsel %vm606_vm1, %v579_v45, %v581_v42 }
  0xb4   : > { %714 = vrot.lane.b32.xlu0 %v1700_v20, %s1563_s20  ;;  %1087 = vmatpush1.bf16.msra.mxu0 %v607_v47 }
  0xb5   : > { %716 = vrot.lane.b32.xlu1 %v1774_v26, %s1563_s20 }
  0xb6   : > { %v1860_v48 = vpop.permute.xlu0 %596 }
  0xb7   : > { %v593_v49 = vpop.permute.xlu1 %592  ;;  %v614_v50 = vsel %vm606_vm1, %v595_v46, %v1860_v48 }
  0xb8   : > { %718 = vrot.lane.b32.xlu0 %v1779_v27, %s1563_s20  ;;  %1088 = vmatprep.subr.bf16.mxu0 %v614_v50  ;;  %v613_v51 = vsel %vm606_vm1, %v593_v49, %v595_v46 }
  0xb9   : > { %720 = vrot.lane.b32.xlu1 %v1785_v28, %s1563_s20  ;;  %1089 = vmatpush1.bf16.msra.mxu0 %v613_v51  ;;  %v1981_v51 = vcombine.low %v1757_v24, %v1757_v24 }
  0xba   : > { %v646_v52 = vpop.permute.xlu0 %645 }
  0xbb   : > { %v1869_v53 = vpop.permute.xlu1 %647 }
  0xbc   : > { %728 = vrot.lane.b32.xlu0 %v1709_v23, %s1563_s20  ;;  %v673_v54 = vsel %vm671_vm2, %v646_v52, %v1869_v53 }
  0xbd   : > { %730 = vrot.lane.b32.xlu1 %v1792_v29, %s1563_s20  ;;  %1090 = vmatprep.subr.bf16.mxu0 %v673_v54 }
  0xbe   : > { %v644_v55 = vpop.permute.xlu0 %643 }
  0xbf   : > { %v660_v56 = vpop.permute.xlu1 %659  ;;  %v672_v57 = vsel %vm671_vm2, %v644_v55, %v646_v52 }
  0xc0   : > { %732 = vrot.lane.b32.xlu0 %v1797_v30, %s1563_s20  ;;  %1091 = vmatpush1.bf16.msra.mxu0 %v672_v57 }
  0xc1   : > { %734 = vrot.lane.b32.xlu1 %v1803_v31, %s1563_s20 }
  0xc2   : > { %v1882_v58 = vpop.permute.xlu0 %661 }
  0xc3   : > { %v658_v59 = vpop.permute.xlu1 %657  ;;  %v679_v60 = vsel %vm671_vm2, %v660_v56, %v1882_v58 }
  0xc4   : > { %779 = vrot.lane.b32.xlu0 %v1700_v20, %s1564_s28  ;;  %1092 = vmatprep.subr.bf16.mxu0 %v679_v60  ;;  %v678_v61 = vsel %vm671_vm2, %v658_v59, %v660_v56 }
  0xc5   : > { %781 = vrot.lane.b32.xlu1 %v1774_v26, %s1564_s28  ;;  %1093 = vmatpush1.bf16.msra.mxu0 %v678_v61 }
  0xc6   : > { %v711_v62 = vpop.permute.xlu0 %710 }
  0xc7   : > { %v1891_v63 = vpop.permute.xlu1 %712 }
  0xc8   : > { %783 = vrot.lane.b32.xlu0 %v1779_v27, %s1564_s28  ;;  %v738_v0 = vsel %vm736_vm3, %v711_v62, %v1891_v63 }
  0xc9   : > { %785 = vrot.lane.b32.xlu1 %v1785_v28, %s1564_s28  ;;  %1094 = vmatprep.subr.bf16.mxu0 %v738_v0 }
  0xca   : > { %v709_v1 = vpop.permute.xlu0 %708 }
  0xcb   : > { %v725_v2 = vpop.permute.xlu1 %724  ;;  %v737_v3 = vsel %vm736_vm3, %v709_v1, %v711_v62 }
  0xcc   : > { %793 = vrot.lane.b32.xlu0 %v1709_v23, %s1564_s28  ;;  %1095 = vmatpush1.bf16.msra.mxu0 %v737_v3 }
  0xcd   : > { %795 = vrot.lane.b32.xlu1 %v1792_v29, %s1564_s28 }
  0xce   : > { %v1904_v4 = vpop.permute.xlu0 %726 }
  0xcf   : > { %v723_v5 = vpop.permute.xlu1 %722  ;;  %v744_v6 = vsel %vm736_vm3, %v725_v2, %v1904_v4 }
  0xd0   : > { %797 = vrot.lane.b32.xlu0 %v1797_v30, %s1564_s28  ;;  %1096 = vmatprep.subr.bf16.mxu0 %v744_v6  ;;  %v743_v7 = vsel %vm736_vm3, %v723_v5, %v725_v2 }
  0xd1   : > { %799 = vrot.lane.b32.xlu1 %v1803_v31, %s1564_s28  ;;  %1097 = vmatpush1.bf16.msra.mxu0 %v743_v7  ;;  %s414_s28 = scalar_lea.vmem %s2101_s6, %s1421_s18 }
  0xd2   : > { %v776_v8 = vpop.permute.xlu0 %775 }
  0xd3   : > { %v1913_v9 = vpop.permute.xlu1 %777 }
  0xd4   : > { %844 = vrot.lane.b32.xlu0 %v1700_v20, %s1565_s29  ;;  %v803_v10 = vsel %vm801_vm4, %v776_v8, %v1913_v9 }
  0xd5   : > { %846 = vrot.lane.b32.xlu1 %v1774_v26, %s1565_s29  ;;  %1098 = vmatprep.subr.bf16.mxu0 %v803_v10 }
  0xd6   : > { %v774_v11 = vpop.permute.xlu0 %773 }
  0xd7   : > { %v790_v12 = vpop.permute.xlu1 %789  ;;  %v802_v13 = vsel %vm801_vm4, %v774_v11, %v776_v8 }
  0xd8   : > { %848 = vrot.lane.b32.xlu0 %v1779_v27, %s1565_s29  ;;  %1099 = vmatpush1.bf16.msra.mxu0 %v802_v13 }
  0xd9   : > { %850 = vrot.lane.b32.xlu1 %v1785_v28, %s1565_s29 }
  0xda   : > { %v1926_v14 = vpop.permute.xlu0 %791 }
  0xdb   : > { %v788_v15 = vpop.permute.xlu1 %787  ;;  %v809_v16 = vsel %vm801_vm4, %v790_v12, %v1926_v14 }
  0xdc   : > { %858 = vrot.lane.b32.xlu0 %v1709_v23, %s1565_s29  ;;  %1100 = vmatprep.subr.bf16.mxu0 %v809_v16  ;;  %v808_v17 = vsel %vm801_vm4, %v788_v15, %v790_v12 }
  0xdd   : > { %860 = vrot.lane.b32.xlu1 %v1792_v29, %s1565_s29  ;;  %1101 = vmatpush1.bf16.msra.mxu0 %v808_v17 }
  0xde   : > { %v841_v18 = vpop.permute.xlu0 %840 }
  0xdf   : > { %v1935_v19 = vpop.permute.xlu1 %842 }
  0xe0   : > { %862 = vrot.lane.b32.xlu0 %v1797_v30, %s1565_s29  ;;  %v868_v21 = vsel %vm866_vm5, %v841_v18, %v1935_v19 }
  0xe1   : > { %864 = vrot.lane.b32.xlu1 %v1803_v31, %s1565_s29  ;;  %1102 = vmatprep.subr.bf16.mxu0 %v868_v21 }
  0xe2   : > { %v839_v22 = vpop.permute.xlu0 %838 }
  0xe3   : > { %v855_v32 = vpop.permute.xlu1 %854  ;;  %v867_v33 = vsel %vm866_vm5, %v839_v22, %v841_v18 }
  0xe4   : > { %909 = vrot.lane.b32.xlu0 %v1700_v20, %s1566_s10  ;;  %1103 = vmatpush1.bf16.msra.mxu0 %v867_v33 }
  0xe5   : > { %911 = vrot.lane.b32.xlu1 %v1774_v26, %s1566_s10 }
  0xe6   : > { %v1948_v35 = vpop.permute.xlu0 %856 }
  0xe7   : > { %v853_v36 = vpop.permute.xlu1 %852  ;;  %v874_v37 = vsel %vm866_vm5, %v855_v32, %v1948_v35 }
  0xe8   : > { %913 = vrot.lane.b32.xlu0 %v1779_v27, %s1566_s10  ;;  %1104 = vmatprep.subr.bf16.mxu0 %v874_v37  ;;  %v873_v39 = vsel %vm866_vm5, %v853_v36, %v855_v32 }
  0xe9   : > { %915 = vrot.lane.b32.xlu1 %v1785_v28, %s1566_s10  ;;  %1105 = vmatpush1.bf16.msra.mxu0 %v873_v39 }
  0xea   : > { %v906_v20 = vpop.permute.xlu0 %905 }
  0xeb   : > { %v1958_v41 = vpop.permute.xlu1 %907 }
  0xec   : > { %923 = vrot.lane.b32.xlu0 %v1709_v23, %s1566_s10  ;;  %v933_v42 = vsel %vm931_vm6, %v906_v20, %v1958_v41  ;;  %v1065_v23 = vld [vmem:[%s2099_s4] sm:$0xff] }
  0xed   : > { %925 = vrot.lane.b32.xlu1 %v1792_v29, %s1566_s10  ;;  %1106 = vmatprep.subr.bf16.mxu0 %v933_v42 }
  0xee   : > { %v904_v44 = vpop.permute.xlu0 %903 }
  0xef   : > { %v920_v28 = vpop.permute.xlu1 %919  ;;  %v932_v45 = vsel %vm931_vm6, %v904_v44, %v906_v20 }
  0xf0   : > { %927 = vrot.lane.b32.xlu0 %v1797_v30, %s1566_s10  ;;  %1107 = vmatpush1.bf16.msra.mxu0 %v932_v45 }
  0xf1   : > { %929 = vrot.lane.b32.xlu1 %v1803_v31, %s1566_s10 }
  0xf2   : > { %v1974_v46 = vpop.permute.xlu0 %921 }
  0xf3   : > { %v918_v47 = vpop.permute.xlu1 %917  ;;  %v939_v49 = vsel %vm931_vm6, %v920_v28, %v1974_v46 }
  0xf4   : > { %1108 = vmatprep.subr.bf16.mxu0 %v939_v49  ;;  %v938_v50 = vsel %vm931_vm6, %v918_v47, %v920_v28  ;;  %1068 = vperm.xlu0 %1497, %v1065_v23  }
  0xf5   : > { %1109 = vmatpush1.bf16.msra.mxu0 %v938_v50 }
  0xf6   : > { %v520_v31 = vpop.permute.xlu0 %519  ;;  %1160 = vmatprep.subr.bf16.mxu0 %v1779_v27 }
  0xf7   : > { %v522_v52 = vpop.permute.xlu1 %521  ;;  %v544_v54 = vsel %vm541_vm0, %v1829_v34, %v520_v31 }
  0xf8   : > { %v545_v55 = vsel %vm541_vm0, %v520_v31, %v522_v52  ;;  %1111 = vmatmul.mubr.bf16.vlgmr.msra.gmra.mrb[0].mxu0 %v1981_v51 }
  0xf9   : > { %1123 = vmatprep.subr.bf16.mxu1 %v545_v55  ;;  %1161 = vmatpush1.bf16.msra.mxu0 %v1774_v26 }
  0xfa   : > { %1124 = vmatpush1.bf16.msra.mxu1 %v544_v54  ;;  %v524_v56 = vpop.permute.xlu0 %523  ;;  %1162 = vmatprep.subr.bf16.mxu0 %v1797_v30 }
  0xfb   : > { %v526_v24 = vpop.permute.xlu1 %525  ;;  %1192 = vmatprep.mubr.bf16.mxu0 %v1761_v25  ;;  %v546_v60 = vsel %vm541_vm0, %v522_v52, %v524_v56 }
  0xfc   : > { %v547_v27 = vsel %vm541_vm0, %v524_v56, %v526_v24 }
  0xfd   : > { %1163 = vmatpush1.bf16.msra.mxu0 %v1792_v29 }
  0xfe   : > { %v534_v57 = vpop.permute.xlu0 %533  ;;  %1164 = vmatprep.subr.bf16.mxu0 %v547_v27 }
  0xff   : > { %v536_v34 = vpop.permute.xlu1 %535  ;;  %v550_v59 = vsel %vm541_vm0, %v1838_v38, %v534_v57 }
 0x100   : > { %v551_v26 = vsel %vm541_vm0, %v534_v57, %v536_v34 }
 0x101   : > { %1125 = vmatprep.subr.bf16.mxu1 %v551_v26  ;;  %1165 = vmatpush1.bf16.msra.mxu0 %v546_v60 }
 0x102   : > { %1126 = vmatpush1.bf16.msra.mxu1 %v550_v59  ;;  %v538_v30 = vpop.permute.xlu0 %537 }
 0x103   : > { %v552_v25 = vsel %vm541_vm0, %v536_v34, %v538_v30  ;;  %v540_v61 = vpop.permute.xlu1 %539 }
 0x104   : > { %v553_v29 = vsel %vm541_vm0, %v538_v30, %v540_v61 }
 0x105   : > { %1166 = vmatprep.subr.bf16.mxu0 %v553_v29 }
 0x106   : > { %1167 = vmatpush1.bf16.msra.mxu0 %v552_v25  ;;  %v585_v62 = vpop.permute.xlu0 %584 }
 0x107   : > { %v587_v0 = vpop.permute.xlu1 %586  ;;  %v609_v38 = vsel %vm606_vm1, %v1847_v43, %v585_v62 }
 0x108   : > { %v610_v1 = vsel %vm606_vm1, %v585_v62, %v587_v0 }
 0x109   : > { %1127 = vmatprep.subr.bf16.mxu1 %v610_v1 }
 0x10a   : > { %1128 = vmatpush1.bf16.msra.mxu1 %v609_v38  ;;  %v589_v2 = vpop.permute.xlu0 %588 }
 0x10b   : > { %v611_v3 = vsel %vm606_vm1, %v587_v0, %v589_v2  ;;  %v591_v5 = vpop.permute.xlu1 %590 }
 0x10c   : > { %v612_v6 = vsel %vm606_vm1, %v589_v2, %v591_v5 }
 0x10d   : > { %1168 = vmatprep.subr.bf16.mxu0 %v612_v6 }
 0x10e   : > { %1169 = vmatpush1.bf16.msra.mxu0 %v611_v3  ;;  %v599_v7 = vpop.permute.xlu0 %598 }
 0x10f   : > { %v601_v8 = vpop.permute.xlu1 %600  ;;  %v615_v10 = vsel %vm606_vm1, %v1860_v48, %v599_v7 }
 0x110   : > { %v616_v11 = vsel %vm606_vm1, %v599_v7, %v601_v8 }
 0x111   : > { %1129 = vmatprep.subr.bf16.mxu1 %v616_v11 }
 0x112   : > { %1130 = vmatpush1.bf16.msra.mxu1 %v615_v10  ;;  %v603_v43 = vpop.permute.xlu0 %602 }
 0x113   : > { %v617_v12 = vsel %vm606_vm1, %v601_v8, %v603_v43  ;;  %v605_v13 = vpop.permute.xlu1 %604 }
 0x114   : > { %v618_v15 = vsel %vm606_vm1, %v603_v43, %v605_v13 }
 0x115   : > { %1170 = vmatprep.subr.bf16.mxu0 %v618_v15 }
 0x116   : > { %1171 = vmatpush1.bf16.msra.mxu0 %v617_v12  ;;  %v650_v16 = vpop.permute.xlu0 %649 }
 0x117   : > { %v652_v17 = vpop.permute.xlu1 %651  ;;  %v674_v18 = vsel %vm671_vm2, %v1869_v53, %v650_v16 }
 0x118   : > { %v675_v21 = vsel %vm671_vm2, %v650_v16, %v652_v17 }
 0x119   : > { %1131 = vmatprep.subr.bf16.mxu1 %v675_v21 }
 0x11a   : > { %1132 = vmatpush1.bf16.msra.mxu1 %v674_v18  ;;  %v654_v48 = vpop.permute.xlu0 %653 }
 0x11b   : > { %v676_v22 = vsel %vm671_vm2, %v652_v17, %v654_v48  ;;  %v656_v32 = vpop.permute.xlu1 %655 }
 0x11c   : > { %v677_v33 = vsel %vm671_vm2, %v654_v48, %v656_v32 }
 0x11d   : > { %1172 = vmatprep.subr.bf16.mxu0 %v677_v33 }
 0x11e   : > { %1173 = vmatpush1.bf16.msra.mxu0 %v676_v22  ;;  %v664_v36 = vpop.permute.xlu0 %663 }
 0x11f   : > { %v666_v37 = vpop.permute.xlu1 %665  ;;  %v680_v39 = vsel %vm671_vm2, %v1882_v58, %v664_v36 }
 0x120   : > { %v681_v20 = vsel %vm671_vm2, %v664_v36, %v666_v37 }
 0x121   : > { %1133 = vmatprep.subr.bf16.mxu1 %v681_v20 }
 0x122   : > { %1134 = vmatpush1.bf16.msra.mxu1 %v680_v39  ;;  %v668_v53 = vpop.permute.xlu0 %667 }
 0x123   : > { %v682_v42 = vsel %vm671_vm2, %v666_v37, %v668_v53  ;;  %v670_v44 = vpop.permute.xlu1 %669 }
 0x124   : > { %v683_v28 = vsel %vm671_vm2, %v668_v53, %v670_v44 }
 0x125   : > { %1174 = vmatprep.subr.bf16.mxu0 %v683_v28 }
 0x126   : > { %1175 = vmatpush1.bf16.msra.mxu0 %v682_v42  ;;  %v715_v45 = vpop.permute.xlu0 %714 }
 0x127   : > { %v717_v23 = vpop.permute.xlu1 %716  ;;  %v739_v47 = vsel %vm736_vm3, %v1891_v63, %v715_v45 }
 0x128   : > { %v740_v49 = vsel %vm736_vm3, %v715_v45, %v717_v23 }
 0x129   : > { %1135 = vmatprep.subr.bf16.mxu1 %v740_v49  ;;  %v1228_v49 = vld [vmem:[%s403_s16] sm:$0x3f] }
 0x12a   : > { %1136 = vmatpush1.bf16.msra.mxu1 %v739_v47  ;;  %v719_v58 = vpop.permute.xlu0 %718  ;;  %vm1229_vm7 = vcmp.gt.f32.partialorder %v1228_v49, 0.5 }
 0x12b   : > { %v741_v50 = vsel %vm736_vm3, %v717_v23, %v719_v58  ;;  %v721_v31 = vpop.permute.xlu1 %720 }
 0x12c   : > { %v742_v52 = vsel %vm736_vm3, %v719_v58, %v721_v31  ;;  %v1230_v31 = vsel %vm1229_vm7, 1, %v1567_v40 }
 0x12d   : > { %1176 = vmatprep.subr.bf16.mxu0 %v742_v52 }
 0x12e   : > { %1177 = vmatpush1.bf16.msra.mxu0 %v741_v50  ;;  %v729_v54 = vpop.permute.xlu0 %728 }
 0x12f   : > { %v731_v55 = vpop.permute.xlu1 %730  ;;  %v745_v56 = vsel %vm736_vm3, %v1904_v4, %v729_v54 }
 0x130   : > { %v746_v24 = vsel %vm736_vm3, %v729_v54, %v731_v55 }
 0x131   : > { %1137 = vmatprep.subr.bf16.mxu1 %v746_v24 }
 0x132   : > { %1138 = vmatpush1.bf16.msra.mxu1 %v745_v56  ;;  %v733_v63 = vpop.permute.xlu0 %732 }
 0x133   : > { %v747_v27 = vsel %vm736_vm3, %v731_v55, %v733_v63  ;;  %v735_v57 = vpop.permute.xlu1 %734 }
 0x134   : > { %v748_v34 = vsel %vm736_vm3, %v733_v63, %v735_v57 }
 0x135   : > { %1178 = vmatprep.subr.bf16.mxu0 %v748_v34 }
 0x136   : > { %1179 = vmatpush1.bf16.msra.mxu0 %v747_v27  ;;  %v780_v59 = vpop.permute.xlu0 %779 }
 0x137   : > { %v782_v60 = vpop.permute.xlu1 %781  ;;  %v804_v26 = vsel %vm801_vm4, %v1913_v9, %v780_v59 }
 0x138   : > { %v805_v30 = vsel %vm801_vm4, %v780_v59, %v782_v60 }
 0x139   : > { %1139 = vmatprep.subr.bf16.mxu1 %v805_v30 }
 0x13a   : > { %1140 = vmatpush1.bf16.msra.mxu1 %v804_v26  ;;  %v784_v4 = vpop.permute.xlu0 %783 }
 0x13b   : > { %v806_v25 = vsel %vm801_vm4, %v782_v60, %v784_v4  ;;  %v786_v61 = vpop.permute.xlu1 %785 }
 0x13c   : > { %v807_v29 = vsel %vm801_vm4, %v784_v4, %v786_v61 }
 0x13d   : > { %1180 = vmatprep.subr.bf16.mxu0 %v807_v29 }
 0x13e   : > { %1181 = vmatpush1.bf16.msra.mxu0 %v806_v25  ;;  %v794_v62 = vpop.permute.xlu0 %793 }
 0x13f   : > { %v796_v0 = vpop.permute.xlu1 %795  ;;  %v810_v38 = vsel %vm801_vm4, %v1926_v14, %v794_v62 }
 0x140   : > { %v811_v1 = vsel %vm801_vm4, %v794_v62, %v796_v0 }
 0x141   : > { %1141 = vmatprep.subr.bf16.mxu1 %v811_v1 }
 0x142   : > { %1142 = vmatpush1.bf16.msra.mxu1 %v810_v38  ;;  %v798_v9 = vpop.permute.xlu0 %797 }
 0x143   : > { %v812_v2 = vsel %vm801_vm4, %v796_v0, %v798_v9  ;;  %v800_v3 = vpop.permute.xlu1 %799 }
 0x144   : > { %v813_v5 = vsel %vm801_vm4, %v798_v9, %v800_v3 }
 0x145   : > { %1182 = vmatprep.subr.bf16.mxu0 %v813_v5 }
 0x146   : > { %1183 = vmatpush1.bf16.msra.mxu0 %v812_v2  ;;  %v845_v6 = vpop.permute.xlu0 %844 }
 0x147   : > { %v847_v7 = vpop.permute.xlu1 %846  ;;  %v869_v8 = vsel %vm866_vm5, %v1935_v19, %v845_v6 }
 0x148   : > { %v870_v10 = vsel %vm866_vm5, %v845_v6, %v847_v7 }
 0x149   : > { %1143 = vmatprep.subr.bf16.mxu1 %v870_v10 }
 0x14a   : > { %1144 = vmatpush1.bf16.msra.mxu1 %v869_v8  ;;  %v849_v14 = vpop.permute.xlu0 %848 }
 0x14b   : > { %v871_v11 = vsel %vm866_vm5, %v847_v7, %v849_v14  ;;  %v851_v43 = vpop.permute.xlu1 %850 }
 0x14c   : > { %v872_v12 = vsel %vm866_vm5, %v849_v14, %v851_v43 }
 0x14d   : > { %1184 = vmatprep.subr.bf16.mxu0 %v872_v12 }
 0x14e   : > { %1185 = vmatpush1.bf16.msra.mxu0 %v871_v11  ;;  %v859_v13 = vpop.permute.xlu0 %858 }
 0x14f   : > { %v861_v15 = vpop.permute.xlu1 %860  ;;  %v875_v16 = vsel %vm866_vm5, %v1948_v35, %v859_v13 }
 0x150   : > { %v876_v17 = vsel %vm866_vm5, %v859_v13, %v861_v15 }
 0x151   : > { %1145 = vmatprep.subr.bf16.mxu1 %v876_v17 }
 0x152   : > { %1146 = vmatpush1.bf16.msra.mxu1 %v875_v16  ;;  %v863_v19 = vpop.permute.xlu0 %862 }
 0x153   : > { %v877_v18 = vsel %vm866_vm5, %v861_v15, %v863_v19  ;;  %v865_v21 = vpop.permute.xlu1 %864 }
 0x154   : > { %v878_v48 = vsel %vm866_vm5, %v863_v19, %v865_v21 }
 0x155   : > { %1186 = vmatprep.subr.bf16.mxu0 %v878_v48 }
 0x156   : > { %1187 = vmatpush1.bf16.msra.mxu0 %v877_v18  ;;  %v910_v22 = vpop.permute.xlu0 %909 }
 0x157   : > { %v912_v32 = vpop.permute.xlu1 %911  ;;  %v934_v33 = vsel %vm931_vm6, %v1958_v41, %v910_v22 }
 0x158   : > { %v935_v36 = vsel %vm931_vm6, %v910_v22, %v912_v32 }
 0x159   : > { %1147 = vmatprep.subr.bf16.mxu1 %v935_v36 }
 0x15a   : > { %1148 = vmatpush1.bf16.msra.mxu1 %v934_v33  ;;  %v914_v35 = vpop.permute.xlu0 %913 }
 0x15b   : > { %v936_v37 = vsel %vm931_vm6, %v912_v32, %v914_v35  ;;  %v916_v39 = vpop.permute.xlu1 %915 }
 0x15c   : > { %v937_v20 = vsel %vm931_vm6, %v914_v35, %v916_v39 }
 0x15d   : > { %1188 = vmatprep.subr.bf16.mxu0 %v937_v20 }
 0x15e   : > { %1189 = vmatpush1.bf16.msra.mxu0 %v936_v37  ;;  %v924_v53 = vpop.permute.xlu0 %923 }
 0x15f   : > { %v926_v42 = vpop.permute.xlu1 %925  ;;  %v940_v44 = vsel %vm931_vm6, %v1974_v46, %v924_v53  ;;  %v1231_v46 = vlaneseq }
 0x160   : > { %v941_v41 = vsel %vm931_vm6, %v924_v53, %v926_v42 }
 0x161   : > { %1149 = vmatprep.subr.bf16.mxu1 %v941_v41  ;;  %v1232_v58 = vshrl.u32 %v1231_v46, 7 }
 0x162   : > { %1150 = vmatpush1.bf16.msra.mxu1 %v940_v44  ;;  %v928_v28 = vpop.permute.xlu0 %927 }
 0x163   : > { %v942_v45 = vsel %vm931_vm6, %v926_v42, %v928_v28  ;;  %v930_v23 = vpop.permute.xlu1 %929  ;;  %v1233_v50 = vsub.s32 0, %v1232_v58  ;;  %v1237_v52 = vsub.s32 1, %v1232_v58  ;;  %v1241_v61 = vsub.s32 2, %v1232_v58 }
 0x164   : > { %v943_v47 = vsel %vm931_vm6, %v928_v28, %v930_v23  ;;  %v1245_v29 = vsub.s32 3, %v1232_v58  ;;  %v1249_v62 = vsub.s32 4, %v1232_v58  ;;  %v1253_v1 = vsub.s32 5, %v1232_v58 }
 0x165   : > { %1152 = vmatmul.mubr.bf16.vlgmr.msra.gmra.mrb[0].mxu1 %v1981_v51  ;;  %1190 = vmatprep.subr.bf16.mxu0 %v943_v47  ;;  %v1234_v54 = vrot.slane %v1230_v31, %v1233_v50  ;;  %v1238_v55 = vrot.slane %v1230_v31, %v1237_v52  ;;  %v1242_v0 = vrot.slane %v1230_v31, %v1241_v61 }
 0x166   : > { %1191 = vmatpush1.bf16.msra.mxu0 %v942_v45  ;;  %v1246_v38 = vrot.slane %v1230_v31, %v1245_v29  ;;  %v1250_v9 = vrot.slane %v1230_v31, %v1249_v62  ;;  %v1254_v8 = vrot.slane %v1230_v31, %v1253_v1 }
 0x167   : > { %vm1255_vm8 = vcmp.eq.s32.totalorder %v1234_v54, 1  ;;  %vm1256_vm9 = vcmp.eq.s32.totalorder %v1238_v55, 1  ;;  %vm1257_vm10 = vcmp.eq.s32.totalorder %v1242_v0, 1 }
 0x168   : > { %vm1258_vm11 = vcmp.eq.s32.totalorder %v1246_v38, 1  ;;  %vm1259_vm12 = vcmp.eq.s32.totalorder %v1250_v9, 1  ;;  %vm1260_vm13 = vcmp.eq.s32.totalorder %v1254_v8, 1 }
 0x169   : > { %1193 = vmatmul.mubr.bf16.vlgmr.msra.gmra.mrb[4].mxu0 %v1981_v51 }
 0x173   : > { %v1069_v56 = vpop.permute.xlu0 %1068 }
 0x1cb   : > { %v1112_v24 = vpop.f32.mrb[0].mxu0 }
 0x1cc   : > { %v1114_v51 = vpop.f32.mrb[1].mxu0  ;;  %v1113_v63 = vadd.f32 %v1112_v24, %v1069_v56 }
 0x1cd   : > { %v1116_v27 = vpop.f32.mrb[2].mxu0  ;;  %v1115_v57 = vadd.f32 %v1114_v51, %v1069_v56 }
 0x1ce   : > { %v1117_v34 = vpop.f32.mrb[3].mxu0  ;;  %v1261_v59 = vsel %vm1255_vm8, %v1113_v63, 0.0 }
 0x1cf   : > { %v1444_v40 = vpack.c.bf16 %v1115_v57, %v1113_v63  ;;  %v1262_v60 = vsel %vm1256_vm9, %v1115_v57, 0.0  ;;  %v1274_v26 = vmul.f32 %v1261_v59, %v1261_v59 }
 0x1d0   : > { %v1267_v30 = vadd.f32 %v1262_v60, %v1261_v59  ;;  %v1275_v4 = vmul.f32 %v1262_v60, %v1262_v60 }
 0x1d1   : > { %1225 = vst [vmem:[%s2069_s21] sm:$0xff] %v1444_v40 }
 0x1d2   : > { %v1280_v25 = vadd.f32 %v1275_v4, %v1274_v26 }
 0x238   : > { %v1153_v2 = vpop.f32.mrb[0].mxu1 }
 0x239   : > { %v1154_v3 = vadd.f32 %v1153_v2, %v1069_v56  ;;  %v1155_v5 = vpop.f32.mrb[1].mxu1 }
 0x23a   : > { %v1156_v6 = vadd.f32 %v1155_v5, %v1069_v56  ;;  %v1157_v7 = vpop.f32.mrb[2].mxu1 }
 0x23b   : > { %v1263_v10 = vsel %vm1257_vm10, %v1154_v3, 0.0  ;;  %v1158_v14 = vpop.f32.mrb[3].mxu1 }
 0x23c   : > { %v1268_v11 = vadd.f32 %v1267_v30, %v1263_v10  ;;  %v1276_v43 = vmul.f32 %v1263_v10, %v1263_v10  ;;  %v1445_v12 = vpack.c.bf16 %v1156_v6, %v1154_v3  ;;  %v1264_v13 = vsel %vm1258_vm11, %v1156_v6, 0.0  ;;  %v1194_v15 = vpop.f32.mrb[4].mxu0 }
 0x23d   : > { %v1277_v16 = vmul.f32 %v1264_v13, %v1264_v13  ;;  %v1195_v17 = vadd.f32 %v1194_v15, %v1069_v56  ;;  %v1196_v19 = vpop.f32.mrb[5].mxu0 }
 0x23e   : > { %v1281_v18 = vadd.f32 %v1280_v25, %v1276_v43  ;;  %1226 = vst [vmem:[%s2069_s21 + $0x8] sm:$0xff] %v1445_v12  ;;  %v1269_v21 = vadd.f32 %v1268_v11, %v1264_v13  ;;  %v1197_v48 = vadd.f32 %v1196_v19, %v1069_v56  ;;  %v1198_v22 = vpop.f32.mrb[6].mxu0 }
 0x23f   : > { %v1265_v32 = vsel %vm1259_vm12, %v1195_v17, 0.0  ;;  %v1199_v33 = vpop.f32.mrb[7].mxu0 }
 0x240   : > { %v1282_v36 = vadd.f32 %v1281_v18, %v1277_v16  ;;  %v1270_v35 = vadd.f32 %v1269_v21, %v1265_v32  ;;  %v1278_v37 = vmul.f32 %v1265_v32, %v1265_v32  ;;  %v1446_v39 = vpack.c.bf16 %v1197_v48, %v1195_v17 }
 0x241   : > { %v1266_v20 = vsel %vm1260_vm13, %v1197_v48, 0.0 }
 0x242   : > { %v1283_v53 = vadd.f32 %v1282_v36, %v1278_v37  ;;  %1227 = vst [vmem:[%s2069_s21 + $0x10] sm:$0xff] %v1446_v39  ;;  %v1271_v42 = vadd.f32 %v1270_v35, %v1266_v20  ;;  %v1279_v44 = vmul.f32 %v1266_v20, %v1266_v20 }
 0x244   : > { %1272 = vadd.xlane.f32.xlu1 %v1271_v42  ;;  %v1284_v41 = vadd.f32 %v1283_v53, %v1279_v44 }
 0x246   : > { %1285 = vadd.xlane.f32.xlu0 %v1284_v41 }
 0x2d1   : > { %v1273_v28 = vpop.xlane.xlu1 %1272 }
 0x2d3   : > { %v1286_v45 = vpop.xlane.xlu0 %1285 }
 0x2d4   : > { %v1288_v23 = vsel %vm1287_vm14, %v1273_v28, %v1286_v45 }
 0x2d5   : > { %1290 = vst.msk [vmem:[%s414_s28] sm:$0xff] %vm1289_vm15, %v1288_v23 }
 0x2d6 PF: > { %p14_p1 = scmp.ge.s32.totalorder %s1632_s27, 4   ;;  %s2104_s21 = smov %s1546_s22 }
 0x2d7   : > { %s2105_s22 = smov %s1660_s14  ;;  %s2106_s23 = smov %s1554_s24 }
 0x2d8   : > { %s2107_s24 = smov %s1642_s7  ;;  %s2108_s25 = smov %s1632_s27 }
 0x2d9   :  { %16 = sbr.rel (!%p14_p1) target bundleno = 3 (0x3), region = 162 }

// kernel: encoder_forward.9
= control target key start
LH: loop header
LB: loop body
LE: loop exit
PB: predicated region body
PF: predicated region fallthrough
CT: control target
= control target key end

     0   :  { %s1296_s21 = smov 0   ;;  %s1298_s22 = smov 0   ;;  %s1553_s0 = inlined_call_operand.vmem [shape: bf16[64,256], index: 0, kind: input, shape index: {}, may-alias: {0,1}]   ;;  %s1554_s1 = inlined_call_operand.vmem [shape: bf16[64,256], index: 1, kind: input, shape index: {}, may-alias: {0,1}]   ;;  %s1555_s2 = inlined_call_operand.vmem [shape: f32[1,256], index: 2, kind: input, shape index: {}]   ;;  %s1556_s3 = inlined_call_operand.vmem [shape: bf16[16,512], index: 3, kind: input, shape index: {}]   ;;  %s1557_s4 = inlined_call_operand.vmem [shape: f32[16,1], index: 4, kind: input, shape index: {}]   ;;  %s1558_s5 = inlined_call_operand.vmem [shape: bf16[16,256], index: 5, kind: output, shape index: {0}]   ;;  %s1559_s6 = inlined_call_operand.vmem [shape: f32[2,16,2], index: 6, kind: output, shape index: {1}]  }
   0x1   :  { %s1300_s23 = smov 0   ;;  %s1302_s24 = smov 0  }
   0x2   :  { %s1304_s25 = smov 0  }
   0x3 LB: > { %s1322_s26 = sadd.s32 4294967295, %s1251_s25   ;;  %s1325_s27 = sadd.s32 1, %s1251_s25   ;;  %s1251_s25 = sphi %s1304_s25, %s1567_s25   ;;  %s1247_s24 = sphi %s1302_s24, %s1566_s24   ;;  %s1243_s23 = sphi %s1300_s23, %s1565_s23   ;;  %s1239_s22 = sphi %s1298_s22, %s1564_s22   ;;  %s1235_s21 = sphi %s1296_s21, %s1563_s21  }
   0x4   : > { %s21_s28 = ssub.s32 %s1251_s25, %s1325_s27  ;;  %s24_s29 = sadd.s32 1, %s1247_s24 }
   0x5   : > { %p22_p0 = scmp.eq.s32.totalorder %s21_s28, 0  ;;  %p31_p1 = scmp.ne.s32.totalorder %s1247_s24, %s1243_s23 }
   0x6   : > { %p32_p2 = scmp.eq.s32.totalorder %s1251_s25, 0  ;;  %p48_p3 = scmp.lt.s32.totalorder %s1325_s27, 1 }
   0x7   : > { %s1335_s30 = scalar_select %p22_p0, %s1247_s24, %s24_s29  }
   0x8   : > { %p1337_p4 = por %p32_p2, %p31_p1  ;;  %s50_s8 = sadd.s32 1, %s1325_s27 }
   0x9   : > { %s1343_s9 = scalar_select %p48_p3, %s1325_s27, 1 }
   0xa   : > { %p51_p5 = scmp.lt.s32.totalorder %s50_s8, 1  ;;  %p63_p6 = scmp.ne.s32.totalorder %s1239_s22, %s1235_s21 }
   0xb   : > { %p161_p7 = scmp.eq.s32.totalorder %s1322_s26, 1  ;;  %s56_s13 = sadd.s32 1, %s1239_s22 }
   0xc   : > { %s1569_s8 = smov (!%p51_p5, %s50_s8), 1  ;;  %p1348_p8 = por %p63_p6, %p32_p2 }
   0xd   : > { %p1352_p9 = por %p161_p7, %p31_p1  ;;  %s53_s12 = ssub.s32 %s1343_s9, %s1569_s8 }
   0xe   : > { %p54_p10 = scmp.eq.s32.totalorder %s53_s12, 0  ;;  %p1068_p11 = scmp.ge.s32.totalorder %s1251_s25, 2 }
  0x10   : > { %s1359_s14 = scalar_select %p54_p10, %s1239_s22, %s56_s13  }
  0x11   : > { %215 = sbr.rel (%p1068_p11) target bundleno = 42 (0x2a), region = 24 }
  0x18   : > { %218 = sbr.rel (!%p1337_p4) target bundleno = 33 (0x21), region = 28  ;;  %s220_s15 = sand.u32 (%p1337_p4), 1, %s1247_s24  }
  0x19   : > { %s1070_s16 = sshll.u32 (%p1337_p4), %s1251_s25, 2  ;;  %s1069_s17 = sshll.u32 (%p1337_p4), %s220_s15, 5 }
  0x1a   : > { %s224_s20 = scalar_lea.vmem (%p1337_p4), %s1553_s0, %s1070_s16  ;;  %s222_s28 = scalar_lea.vmem (%p1337_p4), [#allocation3], %s1069_s17 }
  0x1b   : > { %v240_v0 = vld [vmem:[%s224_s20] sm:$0xf] (%p1337_p4)  ;;  %v242_v1 = vld [vmem:[%s224_s20 + $0x8] sm:$0xf] (%p1337_p4)  ;;  %v244_v2 = vld [vmem:[%s224_s20 + $0x10] sm:$0xf] (%p1337_p4) }
  0x1c   : > { %241 = vst [vmem:[%s222_s28] sm:$0xf] (%p1337_p4), %v240_v0  ;;  %243 = vst [vmem:[%s222_s28 + $0x4] sm:$0xf] (%p1337_p4), %v242_v1  ;;  %v246_v3 = vld [vmem:[%s224_s20 + $0x18] sm:$0xf] (%p1337_p4) }
  0x1d   : > { %v248_v4 = vld [vmem:[%s224_s20 + $0x20] sm:$0xf] (%p1337_p4)  ;;  %245 = vst [vmem:[%s222_s28 + $0x8] sm:$0xf] (%p1337_p4), %v244_v2  ;;  %247 = vst [vmem:[%s222_s28 + $0xc] sm:$0xf] (%p1337_p4), %v246_v3 }
  0x1e   : > { %249 = vst [vmem:[%s222_s28 + $0x10] sm:$0xf] (%p1337_p4), %v248_v4  ;;  %v250_v5 = vld [vmem:[%s224_s20 + $0x28] sm:$0xf] (%p1337_p4)  ;;  %v252_v6 = vld [vmem:[%s224_s20 + $0x30] sm:$0xf] (%p1337_p4) }
  0x1f   : > { %v254_v7 = vld [vmem:[%s224_s20 + $0x38] sm:$0xf]  ;;  %251 = vst [vmem:[%s222_s28 + $0x14] sm:$0xf] %v250_v5  ;;  %253 = vst [vmem:[%s222_s28 + $0x18] sm:$0xf] %v252_v6 }
  0x20   : > { %255 = vst [vmem:[%s222_s28 + $0x1c] sm:$0xf] %v254_v7 }
  0x21 PF: > { %294 = sbr.rel (!%p1348_p8) target bundleno = 42 (0x2a), region = 69  ;;  %s296_s29 = sand.u32 (%p1348_p8), 1, %s1239_s22  }
  0x22   : > { %s1072_s7 = sshll.u32 (%p1348_p8), %s1343_s9, 2  ;;  %s1071_s8 = sshll.u32 (%p1348_p8), %s296_s29, 5 }
  0x23   : > { %s303_s15 = scalar_lea.vmem (%p1348_p8), %s1554_s1, %s1072_s7  ;;  %s298_s16 = scalar_lea.vmem (%p1348_p8), [#allocation4], %s1071_s8 }
  0x24   : > { %v319_v8 = vld [vmem:[%s303_s15] sm:$0xf] (%p1348_p8)  ;;  %v321_v9 = vld [vmem:[%s303_s15 + $0x8] sm:$0xf] (%p1348_p8)  ;;  %v323_v10 = vld [vmem:[%s303_s15 + $0x10] sm:$0xf] (%p1348_p8) }
  0x25   : > { %320 = vst [vmem:[%s298_s16] sm:$0xf] (%p1348_p8), %v319_v8  ;;  %322 = vst [vmem:[%s298_s16 + $0x4] sm:$0xf] (%p1348_p8), %v321_v9  ;;  %v325_v11 = vld [vmem:[%s303_s15 + $0x18] sm:$0xf] (%p1348_p8) }
  0x26   : > { %v327_v12 = vld [vmem:[%s303_s15 + $0x20] sm:$0xf] (%p1348_p8)  ;;  %324 = vst [vmem:[%s298_s16 + $0x8] sm:$0xf] (%p1348_p8), %v323_v10  ;;  %326 = vst [vmem:[%s298_s16 + $0xc] sm:$0xf] (%p1348_p8), %v325_v11 }
  0x27   : > { %328 = vst [vmem:[%s298_s16 + $0x10] sm:$0xf] (%p1348_p8), %v327_v12  ;;  %v329_v13 = vld [vmem:[%s303_s15 + $0x28] sm:$0xf] (%p1348_p8)  ;;  %v331_v14 = vld [vmem:[%s303_s15 + $0x30] sm:$0xf] (%p1348_p8) }
  0x28   : > { %v333_v15 = vld [vmem:[%s303_s15 + $0x38] sm:$0xf]  ;;  %330 = vst [vmem:[%s298_s16 + $0x14] sm:$0xf] %v329_v13  ;;  %332 = vst [vmem:[%s298_s16 + $0x18] sm:$0xf] %v331_v14 }
  0x29   : > { %334 = vst [vmem:[%s298_s16 + $0x1c] sm:$0xf] %v333_v15 }
  0x2a PF: > { %p1073_p12 = scmp.ge.s32.totalorder %s1251_s25, 1  ;;  %p378_p13 = scmp.lt.s32.totalorder %s1251_s25, 3 }
  0x2c   : > { %p379_p0 = pnand %p1073_p12, %p378_p13 }
  0x2d   : > { %s385_s9 = sand.u32 (!%p379_p0), 1, %s1243_s23   ;;  %s392_s17 = sand.u32 (!%p379_p0), 1, %s1235_s21   ;;  %v1209_v24 = vld [vmem:[%s1556_s3 + $0x4] ss:$16 sps:$4 sm:$0xff] (!%p379_p0)   ;;  %v1212_v25 = vld [vmem:[%s1556_s3 + $0xc] ss:$16 sps:$4 sm:$0xff] (!%p379_p0)  }
  0x2e   : > { %382 = sbr.rel (%p379_p0) target bundleno = 644 (0x284), region = 114  ;;  %s1074_s10 = sshll.u32 (!%p379_p0), %s385_s9, 5  ;;  %811 = vmatprep.mubr.bf16.mxu0 (!%p379_p0), %v1209_v24  ;;  %852 = vmatprep.mubr.bf16.mxu1 (!%p379_p0), %v1212_v25  ;;  %v1260_v26 = vmov (!%p379_p0), 0   ;;  %v748_v27 = vld [vmem:[%s1557_s4 + $0x8] sm:$0xff] (!%p379_p0)  ;;  %v747_v28 = vld [vmem:[%s1557_s4] sm:$0xff] (!%p379_p0)  ;;  %vm553_vm0 = vcmask (!%p379_p0), 1006592  }
  0x2f   : > { %s1382_s18 = scalar_lea.vmem (!%p379_p0), [#allocation3], %s1074_s10  ;;  %s1075_s19 = sshll.u32 (!%p379_p0), %s392_s17, 5  ;;  %1198 = vset.pattern.permute.xlu1 (!%p379_p0), %v1260_v26  ;;  %1197 = vset.pattern.permute.xlu0 (!%p379_p0), %v1260_v26  ;;  %vm669_vm1 = vcmask (!%p379_p0), 801792   ;;  %vm611_vm2 = vcmask (!%p379_p0), 842752   ;;  %vm582_vm3 = vcmask (!%p379_p0), 998400   ;;  %vm524_vm4 = vcmask (!%p379_p0), 1039360  }
  0x30   : > { %v1385_v16 = vld [vmem:[%s1382_s18] sm:$0xff] (!%p379_p0)   ;;  %s1253_s20 = smov (!%p379_p0), 98   ;;  %s1254_s25 = smov (!%p379_p0), 123   ;;  %v1393_v19 = vld [vmem:[%s1382_s18 + $0x8] sm:$0xff] (!%p379_p0)   ;;  %v1401_v21 = vld [vmem:[%s1382_s18 + $0x10] sm:$0xff] (!%p379_p0)   ;;  %vm698_vm5 = vcmask (!%p379_p0), 793600  }
  0x31   : > { %653 = vrot.lane.b32.xlu1 (!%p379_p0), %v1385_v16, %s1253_s20  ;;  %537 = vrot.lane.b32.xlu0 (!%p379_p0), %v1385_v16, %s1254_s25  ;;  %s394_s28 = scalar_lea.vmem (!%p379_p0), [#allocation4], %s1075_s19  ;;  %s1255_s21 = smov (!%p379_p0), 103   ;;  %v1409_v23 = vld [vmem:[%s1382_s18 + $0x18] sm:$0xff] (!%p379_p0)   ;;  %vm640_vm6 = vcmask (!%p379_p0), 834560   ;;  %vm891_vm9 = vcmask (!%p379_p0), 7168   ;;  %vm894_vm10 = vcmask (!%p379_p0), 15360  }
  0x32   : > { %v1200_v17 = vld [vmem:[%s394_s28] sm:$0xff] (!%p379_p0)   ;;  %v1201_v18 = vld [vmem:[%s394_s28 + $0x8] sm:$0xff] (!%p379_p0)   ;;  %v1203_v20 = vld [vmem:[%s394_s28 + $0x10] sm:$0xff] (!%p379_p0)   ;;  %s1256_s29 = smov (!%p379_p0), 122   ;;  %s1257_s7 = smov (!%p379_p0), 127  }
  0x33   : > { %v1205_v22 = vld [vmem:[%s394_s28 + $0x18] sm:$0xff] (!%p379_p0)   ;;  %s1258_s8 = smov (!%p379_p0), 97   ;;  %s1259_s12 = smov (!%p379_p0), 102  }
  0x34   : > { %p435_p1 = scmp.lt.s32.totalorder (!%p379_p0), %s1322_s26, 1  ;;  %s1076_s15 = sshll.u32 (!%p379_p0), %s385_s9, 3 }
  0x35   : > { %655 = vrot.lane.b32.xlu1 %v1200_v17, %s1253_s20  ;;  %539 = vrot.lane.b32.xlu0 %v1200_v17, %s1254_s25  ;;  %s424_s16 = scalar_lea.vmem [#allocation5], %s1076_s15  ;;  %s1094_s9 = sshll.u32 (%p1352_p9), %s1322_s26, 2 }
  0x39   : > { %597 = vrot.lane.b32.xlu1 %v1200_v17, %s1255_s21  ;;  %595 = vrot.lane.b32.xlu0 %v1385_v16, %s1255_s21 }
  0x3d   : > { %543 = vrot.lane.b32.xlu1 %v1201_v18, %s1254_s25  ;;  %541 = vrot.lane.b32.xlu0 %v1393_v19, %s1254_s25 }
  0x41   : > { %659 = vrot.lane.b32.xlu1 %v1201_v18, %s1253_s20  ;;  %657 = vrot.lane.b32.xlu0 %v1393_v19, %s1253_s20 }
  0x45   : > { %601 = vrot.lane.b32.xlu1 %v1201_v18, %s1255_s21  ;;  %599 = vrot.lane.b32.xlu0 %v1393_v19, %s1255_s21 }
  0x49   : > { %547 = vrot.lane.b32.xlu1 %v1203_v20, %s1254_s25  ;;  %545 = vrot.lane.b32.xlu0 %v1401_v21, %s1254_s25 }
  0x4d   : > { %663 = vrot.lane.b32.xlu1 %v1203_v20, %s1253_s20  ;;  %661 = vrot.lane.b32.xlu0 %v1401_v21, %s1253_s20 }
  0x51   : > { %605 = vrot.lane.b32.xlu1 %v1203_v20, %s1255_s21  ;;  %603 = vrot.lane.b32.xlu0 %v1401_v21, %s1255_s21 }
  0x55   : > { %551 = vrot.lane.b32.xlu1 %v1205_v22, %s1254_s25  ;;  %549 = vrot.lane.b32.xlu0 %v1409_v23, %s1254_s25  ;;  %s910_s25 = scalar_lea.vmem (%p1352_p9), %s1558_s5, %s1094_s9 }
  0x59   : > { %667 = vrot.lane.b32.xlu1 %v1205_v22, %s1253_s20  ;;  %665 = vrot.lane.b32.xlu0 %v1409_v23, %s1253_s20 }
  0x5d   : > { %609 = vrot.lane.b32.xlu1 %v1205_v22, %s1255_s21  ;;  %607 = vrot.lane.b32.xlu0 %v1409_v23, %s1255_s21 }
  0x61   : > { %568 = vrot.lane.b32.xlu1 %v1200_v17, %s1256_s29  ;;  %566 = vrot.lane.b32.xlu0 %v1385_v16, %s1256_s29 }
  0x65   : > { %510 = vrot.lane.b32.xlu1 %v1200_v17, %s1257_s7  ;;  %508 = vrot.lane.b32.xlu0 %v1385_v16, %s1257_s7 }
  0x69   : > { %684 = vrot.lane.b32.xlu1 %v1200_v17, %s1258_s8  ;;  %682 = vrot.lane.b32.xlu0 %v1385_v16, %s1258_s8 }
  0x6d   : > { %626 = vrot.lane.b32.xlu1 %v1200_v17, %s1259_s12  ;;  %624 = vrot.lane.b32.xlu0 %v1385_v16, %s1259_s12 }
  0x71   : > { %572 = vrot.lane.b32.xlu1 %v1201_v18, %s1256_s29  ;;  %570 = vrot.lane.b32.xlu0 %v1393_v19, %s1256_s29 }
  0x75   : > { %514 = vrot.lane.b32.xlu1 %v1201_v18, %s1257_s7  ;;  %512 = vrot.lane.b32.xlu0 %v1393_v19, %s1257_s7 }
  0x79   : > { %688 = vrot.lane.b32.xlu1 %v1201_v18, %s1258_s8  ;;  %686 = vrot.lane.b32.xlu0 %v1393_v19, %s1258_s8 }
  0x7d   : > { %630 = vrot.lane.b32.xlu1 %v1201_v18, %s1259_s12  ;;  %628 = vrot.lane.b32.xlu0 %v1393_v19, %s1259_s12 }
  0x81   : > { %576 = vrot.lane.b32.xlu1 %v1203_v20, %s1256_s29  ;;  %574 = vrot.lane.b32.xlu0 %v1401_v21, %s1256_s29 }
  0x85   : > { %518 = vrot.lane.b32.xlu1 %v1203_v20, %s1257_s7  ;;  %516 = vrot.lane.b32.xlu0 %v1401_v21, %s1257_s7 }
  0x89   : > { %692 = vrot.lane.b32.xlu1 %v1203_v20, %s1258_s8  ;;  %690 = vrot.lane.b32.xlu0 %v1401_v21, %s1258_s8 }
  0x8d   : > { %634 = vrot.lane.b32.xlu1 %v1203_v20, %s1259_s12  ;;  %632 = vrot.lane.b32.xlu0 %v1401_v21, %s1259_s12 }
  0x91   : > { %580 = vrot.lane.b32.xlu1 %v1205_v22, %s1256_s29  ;;  %578 = vrot.lane.b32.xlu0 %v1409_v23, %s1256_s29 }
  0x95   : > { %522 = vrot.lane.b32.xlu1 %v1205_v22, %s1257_s7  ;;  %520 = vrot.lane.b32.xlu0 %v1409_v23, %s1257_s7  ;;  %s1518_s7 = scalar_select %p435_p1, %s1322_s26, 1 }
  0x97   : > { %s437_s13 = scalar_lea.vmem %s1555_s2, %s1518_s7  ;;  %s1097_s10 = sshll.u32 %s1518_s7, 4 }
  0x98   : > { %s442_s23 = scalar_lea.vmem %s1559_s6, %s1097_s10 }
  0x99   : > { %696 = vrot.lane.b32.xlu1 %v1205_v22, %s1258_s8  ;;  %694 = vrot.lane.b32.xlu0 %v1409_v23, %s1258_s8 }
  0x9d   : > { %638 = vrot.lane.b32.xlu1 %v1205_v22, %s1259_s12  ;;  %636 = vrot.lane.b32.xlu0 %v1409_v23, %s1259_s12 }
  0xa1   : > { %756 = vperm.xlu1 %1198, %v748_v27   ;;  %751 = vperm.xlu0 %1197, %v747_v28  }
  0xa3   : > { %v654_v29 = vpop.permute.xlu1 %653  ;;  %v538_v30 = vpop.permute.xlu0 %537 }
  0xa7   : > { %v656_v31 = vpop.permute.xlu1 %655  ;;  %v540_v32 = vpop.permute.xlu0 %539 }
  0xa8   : > { %v554_v33 = vsel %vm553_vm0, %v538_v30, %v540_v32  ;;  %v670_v34 = vsel %vm669_vm1, %v654_v29, %v656_v31 }
  0xa9   : > { %1105 = vmatprep.subr.bf16.mxu0 %v554_v33  ;;  %1127 = vmatprep.subr.bf16.mxu1 %v670_v34 }
  0xaa   : > { %1106 = vmatpush3.bf16.msra.mxu0 %v1385_v16 }
  0xab   : > { %v598_v35 = vpop.permute.xlu1 %597  ;;  %v596_v36 = vpop.permute.xlu0 %595 }
  0xac   : > { %v612_v37 = vsel %vm611_vm2, %v596_v36, %v598_v35 }
  0xad   : > { %1128 = vmatpush3.bf16.msra.mxu1 %v612_v37 }
  0xaf   : > { %v544_v38 = vpop.permute.xlu1 %543  ;;  %v542_v39 = vpop.permute.xlu0 %541 }
  0xb0   : > { %v555_v40 = vsel %vm553_vm0, %v542_v39, %v544_v38 }
  0xb1   : > { %1107 = vmatprep.subr.bf16.mxu0 %v555_v40 }
  0xb2   : > { %1108 = vmatpush3.bf16.msra.mxu0 %v1393_v19 }
  0xb3   : > { %v660_v41 = vpop.permute.xlu1 %659  ;;  %v658_v42 = vpop.permute.xlu0 %657 }
  0xb4   : > { %v671_v43 = vsel %vm669_vm1, %v658_v42, %v660_v41 }
  0xb5   : > { %1129 = vmatprep.subr.bf16.mxu1 %v671_v43 }
  0xb7   : > { %v602_v44 = vpop.permute.xlu1 %601  ;;  %v600_v45 = vpop.permute.xlu0 %599 }
  0xb8   : > { %v613_v46 = vsel %vm611_vm2, %v600_v45, %v602_v44  ;;  %v1207_v44 = vld [vmem:[%s1556_s3] ss:$16 sps:$4 sm:$0xff]  }
  0xb9   : > { %1130 = vmatpush3.bf16.msra.mxu1 %v613_v46 }
  0xbb   : > { %v548_v47 = vpop.permute.xlu1 %547  ;;  %v546_v48 = vpop.permute.xlu0 %545 }
  0xbc   : > { %v556_v49 = vsel %vm553_vm0, %v546_v48, %v548_v47 }
  0xbd   : > { %1109 = vmatprep.subr.bf16.mxu0 %v556_v49 }
  0xbe   : > { %1110 = vmatpush3.bf16.msra.mxu0 %v1401_v21 }
  0xbf   : > { %v664_v50 = vpop.permute.xlu1 %663  ;;  %v662_v51 = vpop.permute.xlu0 %661 }
  0xc0   : > { %v672_v52 = vsel %vm669_vm1, %v662_v51, %v664_v50  ;;  %v1210_v51 = vld [vmem:[%s1556_s3 + $0x8] ss:$16 sps:$4 sm:$0xff]  }
  0xc1   : > { %1131 = vmatprep.subr.bf16.mxu1 %v672_v52  ;;  %v874_v52 = vlaneseq }
  0xc3   : > { %v606_v53 = vpop.permute.xlu1 %605  ;;  %v604_v54 = vpop.permute.xlu0 %603 }
  0xc4   : > { %v614_v55 = vsel %vm611_vm2, %v604_v54, %v606_v53  ;;  %v871_v53 = vld [vmem:[%s437_s13] sm:$0x1]  ;;  %v875_v54 = vshrl.u32 %v874_v52, 7 }
  0xc5   : > { %1132 = vmatpush3.bf16.msra.mxu1 %v614_v55  ;;  %vm872_vm7 = vcmp.gt.f32.partialorder %v871_v53, 0.5 }
  0xc7   : > { %v552_v56 = vpop.permute.xlu1 %551  ;;  %v550_v57 = vpop.permute.xlu0 %549 }
  0xc8   : > { %v557_v58 = vsel %vm553_vm0, %v550_v57, %v552_v56 }
  0xc9   : > { %1111 = vmatprep.subr.bf16.mxu0 %v557_v58 }
  0xca   : > { %1112 = vmatpush3.bf16.msra.mxu0 %v1409_v23 }
  0xcb   : > { %v668_v59 = vpop.permute.xlu1 %667  ;;  %v666_v60 = vpop.permute.xlu0 %665 }
  0xcc   : > { %v673_v61 = vsel %vm669_vm1, %v666_v60, %v668_v59  ;;  %v876_v60 = vsub.s32 0, %v875_v54 }
  0xcd   : > { %1133 = vmatprep.subr.bf16.mxu1 %v673_v61 }
  0xcf   : > { %v610_v62 = vpop.permute.xlu1 %609  ;;  %v608_v63 = vpop.permute.xlu0 %607 }
  0xd0   : > { %v615_v0 = vsel %vm611_vm2, %v608_v63, %v610_v62  ;;  %v873_v62 = vsel %vm872_vm7, 1, %v1260_v26 }
  0xd1   : > { %1134 = vmatpush3.bf16.msra.mxu1 %v615_v0  ;;  %v877_v0 = vrot.slane %v873_v62, %v876_v60 }
  0xd3   : > { %v569_v1 = vpop.permute.xlu1 %568  ;;  %v567_v2 = vpop.permute.xlu0 %566  ;;  %vm878_vm8 = vcmp.eq.s32.totalorder %v877_v0, 1 }
  0xd4   : > { %v583_v3 = vsel %vm582_vm3, %v567_v2, %v569_v1 }
  0xd5   : > { %1113 = vmatprep.subr.bf16.mxu0 %v583_v3 }
  0xd7   : > { %v511_v4 = vpop.permute.xlu1 %510  ;;  %v509_v5 = vpop.permute.xlu0 %508 }
  0xd8   : > { %v525_v6 = vsel %vm524_vm4, %v509_v5, %v511_v4 }
  0xd9   : > { %1114 = vmatpush3.bf16.msra.mxu0 %v525_v6 }
  0xdb   : > { %v685_v7 = vpop.permute.xlu1 %684  ;;  %v683_v8 = vpop.permute.xlu0 %682 }
  0xdc   : > { %v699_v9 = vsel %vm698_vm5, %v683_v8, %v685_v7 }
  0xdd   : > { %1135 = vmatprep.subr.bf16.mxu1 %v699_v9 }
  0xdf   : > { %v627_v10 = vpop.permute.xlu1 %626  ;;  %v625_v11 = vpop.permute.xlu0 %624 }
  0xe0   : > { %v641_v12 = vsel %vm640_vm6, %v625_v11, %v627_v10 }
  0xe1   : > { %1136 = vmatpush3.bf16.msra.mxu1 %v641_v12 }
  0xe3   : > { %v573_v13 = vpop.permute.xlu1 %572  ;;  %v571_v14 = vpop.permute.xlu0 %570 }
  0xe4   : > { %v584_v15 = vsel %vm582_vm3, %v571_v14, %v573_v13 }
  0xe5   : > { %1115 = vmatprep.subr.bf16.mxu0 %v584_v15 }
  0xe7   : > { %v515_v16 = vpop.permute.xlu1 %514  ;;  %v513_v17 = vpop.permute.xlu0 %512 }
  0xe8   : > { %v526_v18 = vsel %vm524_vm4, %v513_v17, %v515_v16 }
  0xe9   : > { %1116 = vmatpush3.bf16.msra.mxu0 %v526_v18 }
  0xeb   : > { %v689_v19 = vpop.permute.xlu1 %688  ;;  %v687_v20 = vpop.permute.xlu0 %686 }
  0xec   : > { %v700_v21 = vsel %vm698_vm5, %v687_v20, %v689_v19 }
  0xed   : > { %1137 = vmatprep.subr.bf16.mxu1 %v700_v21 }
  0xef   : > { %v631_v22 = vpop.permute.xlu1 %630  ;;  %v629_v23 = vpop.permute.xlu0 %628 }
  0xf0   : > { %v642_v24 = vsel %vm640_vm6, %v629_v23, %v631_v22 }
  0xf1   : > { %1138 = vmatpush3.bf16.msra.mxu1 %v642_v24 }
  0xf3   : > { %v577_v25 = vpop.permute.xlu1 %576  ;;  %v575_v27 = vpop.permute.xlu0 %574 }
  0xf4   : > { %v585_v28 = vsel %vm582_vm3, %v575_v27, %v577_v25 }
  0xf5   : > { %1117 = vmatprep.subr.bf16.mxu0 %v585_v28 }
  0xf7   : > { %v519_v29 = vpop.permute.xlu1 %518  ;;  %v517_v30 = vpop.permute.xlu0 %516 }
  0xf8   : > { %v527_v31 = vsel %vm524_vm4, %v517_v30, %v519_v29 }
  0xf9   : > { %1118 = vmatpush3.bf16.msra.mxu0 %v527_v31 }
  0xfb   : > { %v693_v32 = vpop.permute.xlu1 %692  ;;  %v691_v33 = vpop.permute.xlu0 %690 }
  0xfc   : > { %v701_v34 = vsel %vm698_vm5, %v691_v33, %v693_v32 }
  0xfd   : > { %1139 = vmatprep.subr.bf16.mxu1 %v701_v34 }
  0xff   : > { %v635_v35 = vpop.permute.xlu1 %634  ;;  %v633_v36 = vpop.permute.xlu0 %632 }
 0x100   : > { %v643_v37 = vsel %vm640_vm6, %v633_v36, %v635_v35 }
 0x101   : > { %1140 = vmatpush3.bf16.msra.mxu1 %v643_v37 }
 0x103   : > { %v581_v38 = vpop.permute.xlu1 %580  ;;  %v579_v39 = vpop.permute.xlu0 %578 }
 0x104   : > { %v586_v40 = vsel %vm582_vm3, %v579_v39, %v581_v38 }
 0x105   : > { %1119 = vmatprep.subr.bf16.mxu0 %v586_v40 }
 0x107   : > { %v523_v41 = vpop.permute.xlu1 %522  ;;  %v521_v42 = vpop.permute.xlu0 %520 }
 0x108   : > { %v528_v43 = vsel %vm524_vm4, %v521_v42, %v523_v41 }
 0x109   : > { %1120 = vmatpush3.bf16.msra.mxu0 %v528_v43 }
 0x10b   : > { %v697_v45 = vpop.permute.xlu1 %696  ;;  %v695_v46 = vpop.permute.xlu0 %694 }
 0x10c   : > { %v702_v47 = vsel %vm698_vm5, %v695_v46, %v697_v45  ;;  %812 = vmatmul.mubr.bf16.vlgmr.msra.gmra.mrb[0].mxu0 %v1207_v44 }
 0x10d   : > { %1141 = vmatprep.subr.bf16.mxu1 %v702_v47 }
 0x10f   : > { %v639_v48 = vpop.permute.xlu1 %638  ;;  %v637_v49 = vpop.permute.xlu0 %636 }
 0x110   : > { %v644_v50 = vsel %vm640_vm6, %v637_v49, %v639_v48 }
 0x111   : > { %1142 = vmatpush3.bf16.msra.mxu1 %v644_v50 }
 0x114   : > { %853 = vmatmul.mubr.bf16.vlgmr.msra.gmra.mrb[0].mxu1 %v1210_v51 }
 0x120   : > { %v752_v63 = vpop.permute.xlu0 %751  ;;  %v757_v3 = vpop.permute.xlu1 %756 }
 0x1df   : > { %v1121_v55 = vpop.f32.mrb[0].mxu0 }
 0x1e0   : > { %v1122_v56 = vpop.f32.mrb[1].mxu0 }
 0x1e1   : > { %v1123_v57 = vadd.f32 %v1122_v56, %v1121_v55  ;;  %v1124_v58 = vpop.f32.mrb[2].mxu0 }
 0x1e2   : > { %v1125_v59 = vpop.f32.mrb[3].mxu0 }
 0x1e3   : > { %v1126_v61 = vadd.f32 %v1125_v59, %v1124_v58  ;;  %v814_v2 = vadd.f32 %v1123_v57, %v752_v63 }
 0x1e5   : > { %v817_v8 = vadd.f32 %v1126_v61, %v757_v3 }
 0x1e7   : > { %v1143_v1 = vpop.f32.mrb[0].mxu1 }
 0x1e8   : > { %v1144_v4 = vpop.f32.mrb[1].mxu1 }
 0x1e9   : > { %v1145_v5 = vadd.f32 %v1144_v4, %v1143_v1  ;;  %v1146_v6 = vpop.f32.mrb[2].mxu1 }
 0x1ea   : > { %v1147_v7 = vpop.f32.mrb[3].mxu1 }
 0x1eb   : > { %v1148_v9 = vadd.f32 %v1147_v7, %v1146_v6  ;;  %v855_v10 = vadd.f32 %v1145_v5, %v814_v2 }
 0x1ed   : > { %v879_v11 = vsel %vm878_vm8, %v855_v10, 0.0  ;;  %v858_v12 = vadd.f32 %v1148_v9, %v817_v8 }
 0x1ee   : > { %881 = vadd.xlane.f32.xlu1 %v879_v11  ;;  %v885_v15 = vmul.f32 %v879_v11, %v879_v11 }
 0x1ef   : > { %v880_v26 = vsel %vm878_vm8, %v858_v12, 0.0  ;;  %v1103_v13 = vpack.c.bf16 %v858_v12, %v855_v10 }
 0x1f0   : > { %883 = vadd.xlane.f32.xlu0 %v880_v26  ;;  %v886_v14 = vmul.f32 %v880_v26, %v880_v26 }
 0x1f1   : > { %1104 = vst [vmem:[%s424_s16] sm:$0xff] %v1103_v13  }
 0x1f2   : > { %889 = vadd.xlane.f32.xlu1 %v886_v14 }
 0x1f4   : > { %887 = vadd.xlane.f32.xlu0 %v885_v15 }
 0x1f8   : > { %v926_v22 = vld [vmem:[%s424_s16] sm:$0xf] (%p1352_p9)  ;;  %v928_v23 = vld [vmem:[%s424_s16 + $0x4] sm:$0xf] (%p1352_p9) }
 0x1f9   : > { %927 = vst [vmem:[%s910_s25] sm:$0xf] (%p1352_p9), %v926_v22  ;;  %929 = vst [vmem:[%s910_s25 + $0x8] sm:$0xf] (%p1352_p9), %v928_v23 }
 0x27b   : > { %v882_v16 = vpop.xlane.xlu1 %881 }
 0x27d   : > { %v884_v17 = vpop.xlane.xlu0 %883  ;;  %908 = sbr.rel (!%p1352_p9) target bundleno = 644 (0x284), region = 126 }
 0x27f   : > { %v890_v18 = vpop.xlane.xlu1 %889 }
 0x280   : > { %v893_v19 = vsel %vm891_vm9, %v884_v17, %v890_v18 }
 0x281   : > { %896 = vst.msk [vmem:[%s442_s23 + $0x8] sm:$0xff] %vm894_vm10, %v893_v19  ;;  %v888_v20 = vpop.xlane.xlu0 %887 }
 0x282   : > { %v892_v21 = vsel %vm891_vm9, %v882_v16, %v888_v20 }
 0x283   : > { %895 = vst.msk [vmem:[%s442_s23] sm:$0xff] %vm894_vm10, %v892_v21 }
 0x284 PF: > { %p14_p2 = scmp.ge.s32.totalorder %s1325_s27, 4   ;;  %s1563_s21 = smov %s1239_s22 }
 0x285   : > { %s1564_s22 = smov %s1359_s14  ;;  %s1565_s23 = smov %s1247_s24 }
 0x286   : > { %s1566_s24 = smov %s1335_s30  ;;  %s1567_s25 = smov %s1325_s27 }
 0x287   :  { %16 = sbr.rel (!%p14_p2) target bundleno = 3 (0x3), region = 221 }

// kernel: encoder_forward.10
= control target key start
LH: loop header
LB: loop body
LE: loop exit
PB: predicated region body
PF: predicated region fallthrough
CT: control target
= control target key end

     0   :  { %s2332_s0 = inlined_call_operand.vmem [shape: bf16[16,512], index: 0, kind: input, shape index: {}, may-alias: {0,1,2}]   ;;  %s2333_s1 = inlined_call_operand.vmem [shape: bf16[16,512], index: 1, kind: input, shape index: {}, may-alias: {0,1,2}]   ;;  %s2334_s2 = inlined_call_operand.vmem [shape: bf16[16,512], index: 2, kind: input, shape index: {}, may-alias: {0,1,2}]   ;;  %s2335_s3 = inlined_call_operand.vmem [shape: f32[1,512], index: 3, kind: input, shape index: {}, may-alias: {3,4,5}]   ;;  %s2336_s4 = inlined_call_operand.vmem [shape: f32[1,512], index: 4, kind: input, shape index: {}, may-alias: {3,4,5}]   ;;  %s2337_s5 = inlined_call_operand.vmem [shape: f32[1,512], index: 5, kind: input, shape index: {}, may-alias: {3,4,5}]   ;;  %s2338_s6 = inlined_call_operand.vmem [shape: f32[16,1], index: 6, kind: input, shape index: {}]   ;;  %s2339_s7 = inlined_call_operand.vmem [shape: f32[16,1], index: 7, kind: input, shape index: {}]   ;;  %s2340_s8 = inlined_call_operand.vmem [shape: bf16[16,432], index: 8, kind: input, shape index: {}]   ;;  %s2341_s9 = inlined_call_operand.vmem [shape: f32[16,1], index: 9, kind: input, shape index: {}]   ;;  %s2342_s10 = inlined_call_operand.vmem [shape: bf16[16,512], index: 10, kind: output, shape index: {0}]   ;;  %s2343_s11 = inlined_call_operand.vmem [shape: f32[2,16,2], index: 11, kind: output, shape index: {1}]  }
   0x1   :  { %2350 = sst [smem:[#allocation12_spill]] %s2340_s8 }
   0x2   :  { %2351 = sst [smem:[#allocation13_spill]] %s2341_s9 }
   0x3   :  { %2352 = sst [smem:[#allocation14_spill]] %s2342_s10 }
   0x4   :  { %2353 = sst [smem:[#allocation15_spill]] %s2343_s11 }
   0x5   :  { %s1952_s17 = smov 0   ;;  %s1954_s18 = smov 0  }
   0x6   :  { %s1956_s19 = smov 0   ;;  %s1958_s20 = smov 0  }
   0x7   :  { %s1960_s21 = smov 0   ;;  %s1962_s22 = smov 0  }
   0x8   :  { %s1964_s23 = smov 0  }
   0x9 LB: > { %2354 = sst [smem:[#allocation7_spill]] %s1859_s22  ;;  %s1988_s24 = sadd.s32 1, %s1863_s23   ;;  %s1863_s23 = sphi %s1964_s23, %s2375_s23   ;;  %s1859_s22 = sphi %s1962_s22, %s2383_s22   ;;  %s1855_s21 = sphi %s1960_s21, %s2377_s21   ;;  %s1851_s20 = sphi %s1958_s20, %s2382_s20   ;;  %s1847_s19 = sphi %s1956_s19, %s2381_s19   ;;  %s1843_s18 = sphi %s1954_s18, %s2380_s18   ;;  %s1839_s17 = sphi %s1952_s17, %s2379_s17  }
   0xa   : > { %2355 = sst [smem:[#allocation8_spill]] %s1988_s24  ;;  %s1615_s25 = sshll.u32 %s1863_s23, 1 }
   0xb   : > { %s37_s26 = sadd.s32 1, %s1859_s22  ;;  %s1616_s27 = sadd.s32 4294967295, %s1615_s25 }
   0xc   : > { %s1675_s28 = sadd.s32 2, %s1615_s25  ;;  %p28_p0 = scmp.gt.s32.totalorder %s1616_s27, 0 }
   0xd   : > { %s1618_s29 = sadd.s32 4294967295, %s1675_s28  ;;  %p44_p2 = scmp.ne.s32.totalorder %s1859_s22, %s1855_s21 }
   0xe   : > { %p32_p1 = scmp.gt.s32.totalorder %s1618_s29, 0  ;;  %s2385_s27 = smov (!%p28_p0, %s1616_s27), 0 }
   0xf   : > { %p45_p3 = scmp.eq.s32.totalorder %s1863_s23, 0  ;;  %s60_s30 = ssub.s32 %s1863_s23, %s1988_s24 }
  0x10   : > { %s2387_s29 = smov (!%p32_p1, %s1618_s29), 0  ;;  %p61_p4 = scmp.eq.s32.totalorder %s60_s30, 0 }
  0x11   : > { %s34_s12 = ssub.s32 %s2385_s27, %s2387_s29  ;;  %p2002_p6 = por %p45_p3, %p44_p2 }
  0x12   : > { %p35_p5 = scmp.eq.s32.totalorder %s34_s12, 0  ;;  %s63_s14 = sadd.s32 1, %s1851_s20 }
  0x13   : > { %p70_p7 = scmp.ne.s32.totalorder %s1851_s20, %s1847_s19  ;;  %p88_p9 = scmp.lt.s32.totalorder %s1675_s28, 3 }
  0x14   : > { %s2010_s15 = scalar_select %p35_p5, %s1859_s22, %s37_s26  }
  0x15   : > { %s2013_s16 = scalar_select %p61_p4, %s1851_s20, %s63_s14  }
  0x16   : > { %2357 = sst [smem:[#allocation9_spill]] %s2010_s15  ;;  %p2020_p8 = por %p70_p7, %p45_p3 }
  0x17   : > { %2358 = sst [smem:[#allocation10_spill]] %s2013_s16  ;;  %s2025_s29 = sadd.s32 4294967295, %s1863_s23  }
  0x18   : > { %s1679_s30 = sadd.s32 2, %s1675_s28  ;;  %s2389_s28 = smov (!%p88_p9, %s1675_s28), 3 }
  0x19   : > { %p92_p10 = scmp.lt.s32.totalorder %s1679_s30, 3  ;;  %p104_p11 = scmp.ne.s32.totalorder %s1843_s18, %s1839_s17 }
  0x1a   : > { %p312_p12 = scmp.eq.s32.totalorder %s2025_s29, 1  ;;  %s97_s15 = sadd.s32 1, %s1843_s18 }
  0x1b   : > { %s2391_s30 = smov (!%p92_p10, %s1679_s30), 3  ;;  %p2034_p13 = por %p104_p11, %p45_p3 }
  0x1c   : > { %p2041_p0 = por %p312_p12, %p70_p7  ;;  %s94_s14 = ssub.s32 %s2389_s28, %s2391_s30 }
  0x1d   : > { %p95_p1 = scmp.eq.s32.totalorder %s94_s14, 0  ;;  %p1628_p2 = scmp.ge.s32.totalorder %s1863_s23, 2 }
  0x1e   : > { %s2361_s12 = scalar_select %p2041_p0, 1, 0 }
  0x1f   : > { %s2048_s16 = scalar_select %p95_p1, %s1843_s18, %s97_s15  }
  0x20   : > { %2362 = sst [smem:[#allocation11_spill]] %s2361_s12  ;;  %372 = sbr.rel (%p1628_p2) target bundleno = 60 (0x3c), region = 32 }
  0x27   : > { %375 = sbr.rel (!%p2002_p6) target bundleno = 46 (0x2e), region = 36  ;;  %s377_s24 = sand.u32 (%p2002_p6), 1, %s1859_s22  }
  0x28   : > { %s1632_s10 = sshll.u32 (%p2002_p6), %s2385_s27, 2  ;;  %s1629_s11 = sshll.u32 (%p2002_p6), %s377_s24, 3 }
  0x29   : > { %s385_s12 = scalar_lea.vmem (%p2002_p6), %s2332_s0, %s1632_s10  ;;  %s379_s30 = scalar_lea.vmem (%p2002_p6), [#allocation3], %s1629_s11 }
  0x2a   : > { %v401_v0 = vld [vmem:[%s385_s12] sm:$0xf] (%p2002_p6)  ;;  %v403_v1 = vld [vmem:[%s385_s12 + $0x10] sm:$0xf] (%p2002_p6) }
  0x2b   : > { %402 = vst [vmem:[%s379_s30] sm:$0xf] (%p2002_p6), %v401_v0  ;;  %404 = vst [vmem:[%s379_s30 + $0x4] sm:$0xf] (%p2002_p6), %v403_v1 }
  0x2e PF: > { %431 = sbr.rel (!%p2020_p8) target bundleno = 53 (0x35), region = 77  ;;  %s433_s13 = sand.u32 (%p2020_p8), 1, %s1851_s20  }
  0x2f   : > { %s1686_s15 = sshll.u32 (%p2020_p8), %s1863_s23, 3  ;;  %s1633_s14 = sshll.u32 (%p2020_p8), %s433_s13, 4 }
  0x30   : > { %s438_s22 = scalar_lea.vmem (%p2020_p8), %s2333_s1, %s1686_s15  ;;  %s435_s8 = scalar_lea.vmem (%p2020_p8), [#allocation4], %s1633_s14 }
  0x31   : > { %v468_v2 = vld [vmem:[%s438_s22] sm:$0xff] (%p2020_p8)  ;;  %v470_v3 = vld [vmem:[%s438_s22 + $0x10] sm:$0xff] (%p2020_p8) }
  0x32   : > { %469 = vst [vmem:[%s435_s8] sm:$0xff] (%p2020_p8), %v468_v2  ;;  %471 = vst [vmem:[%s435_s8 + $0x8] sm:$0xff] (%p2020_p8), %v470_v3 }
  0x35 PF: > { %477 = sbr.rel (!%p2034_p13) target bundleno = 60 (0x3c), region = 115  ;;  %s479_s9 = sand.u32 (%p2034_p13), 1, %s1843_s18  }
  0x36   : > { %s1638_s10 = sshll.u32 (%p2034_p13), %s2389_s28, 2  ;;  %s1636_s11 = sshll.u32 (%p2034_p13), %s479_s9, 3 }
  0x37   : > { %s487_s30 = scalar_lea.vmem (%p2034_p13), %s2334_s2, %s1638_s10  ;;  %s481_s13 = scalar_lea.vmem (%p2034_p13), [#allocation5], %s1636_s11 }
  0x38   : > { %v503_v4 = vld [vmem:[%s487_s30] sm:$0xf] (%p2034_p13)  ;;  %v505_v5 = vld [vmem:[%s487_s30 + $0x10] sm:$0xf] (%p2034_p13) }
  0x39   : > { %504 = vst [vmem:[%s481_s13] sm:$0xf] (%p2034_p13), %v503_v4  ;;  %506 = vst [vmem:[%s481_s13 + $0x4] sm:$0xf] (%p2034_p13), %v505_v5 }
  0x3c PF: > { %p1639_p3 = scmp.ge.s32.totalorder %s1863_s23, 1  ;;  %p568_p4 = scmp.lt.s32.totalorder %s1863_s23, 3 }
  0x3e   : > { %p569_p5 = pnand %p1639_p3, %p568_p4 }
  0x3f   : > { %v771_v6 = vld [vmem:[%s2339_s7] sm:$0xff] (!%p569_p5)  ;;  %s575_s14 = sand.u32 (!%p569_p5), 1, %s1855_s21   ;;  %s582_s27 = sand.u32 (!%p569_p5), 1, %s1847_s19   ;;  %v1865_v8 = vmov (!%p569_p5), 0   ;;  %v772_v9 = vld [vmem:[%s2339_s7 + $0x8] sm:$0xff] (!%p569_p5)  ;;  %v733_v11 = vlaneseq (!%p569_p5)  ;;  %vm848_vm8 = vcmask (!%p569_p5), 351232  }
  0x40   : > { %572 = sbr.rel (%p569_p5) target bundleno = 849 (0x351), region = 168  ;;  %v751_v7 = vld [vmem:[%s2338_s6] sm:$0xff] (!%p569_p5)  ;;  %1797 = vset.pattern.permute.xlu1 (!%p569_p5), %v1865_v8  ;;  %1796 = vset.pattern.permute.xlu0 (!%p569_p5), %v1865_v8  ;;  %s1640_s8 = sshll.u32 (!%p569_p5), %s575_s14, 3  ;;  %v752_v10 = vld [vmem:[%s2338_s6 + $0x8] sm:$0xff] (!%p569_p5)  ;;  %vm861_vm9 = vcmask (!%p569_p5), 343040   ;;  %vm874_vm10 = vcmask (!%p569_p5), 334848  }
  0x41   : > { %s2087_s9 = sshll.u32 (!%p569_p5), %s582_s27, 4  ;;  %775 = vperm.xlu1 (!%p569_p5), %1797, %v771_v6   ;;  %755 = vperm.xlu0 (!%p569_p5), %1796, %v751_v7   ;;  %s589_s19 = sand.u32 (!%p569_p5), 1, %s1839_s17   ;;  %v2103_v12 = vshrl.u32 (!%p569_p5), %v733_v11, 7  ;;  %vm887_vm11 = vcmask (!%p569_p5), 302080   ;;  %vm900_vm12 = vcmask (!%p569_p5), 293888   ;;  %vm1272_vm13 = vcmask (!%p569_p5), 392192  }
  0x42   : > { %s577_s21 = scalar_lea.vmem (!%p569_p5), [#allocation3], %s1640_s8  ;;  %s2093_s25 = sshll.u32 (!%p569_p5), %s589_s19, 3  ;;  %vm913_vm14 = vcmask (!%p569_p5), 285696   ;;  %vm1046_vm15 = vcmask (!%p569_p5), 998400  }
  0x43   : > { %s584_s12 = scalar_lea.vmem (!%p569_p5), [#allocation4], %s2087_s9  ;;  %s591_s30 = scalar_lea.vmem (!%p569_p5), [#allocation5], %s2093_s25  ;;  %v2111_v13 = vsub.s32 (!%p569_p5), 0, %v2103_v12  ;;  %v739_v14 = vsub.s32 (!%p569_p5), 1, %v2103_v12  ;;  %v1798_v18 = vld [vmem:[%s577_s21] sm:$0xff] (!%p569_p5)  }
  0x44   : > { %s2098_s13 = sshll.u32 (!%p569_p5), %s2025_s29, 1  ;;  %v1799_v16 = vld [vmem:[%s584_s12] ss:$8 sps:$4 sm:$0xff] (!%p569_p5)   ;;  %v1801_v17 = vld [vmem:[%s584_s12 + $0x4] ss:$8 sps:$4 sm:$0xff] (!%p569_p5)   ;;  %v743_v23 = vunpack.c.l.bf16 (!%p569_p5), %v1798_v18  ;;  %v747_v29 = vunpack.c.h.bf16 (!%p569_p5), %v1798_v18  ;;  %s1866_s10 = smov (!%p569_p5), 43  }
  0x45   : > { %780 = vperm.xlu1 (!%p569_p5), %1797, %v772_v9   ;;  %760 = vperm.xlu0 (!%p569_p5), %1796, %v752_v10   ;;  %s1645_s22 = sadd.s32 (!%p569_p5), 4294967295, %s2098_s13  ;;  %p679_p6 = scmp.lt.s32.totalorder (!%p569_p5), %s2098_s13, 3  ;;  %v744_v21 = vunpack.c.l.bf16 (!%p569_p5), %v1799_v16  ;;  %v745_v22 = vunpack.c.l.bf16 (!%p569_p5), %v1801_v17  ;;  %v748_v32 = vunpack.c.h.bf16 (!%p569_p5), %v1799_v16  ;;  %v749_v33 = vunpack.c.h.bf16 (!%p569_p5), %v1801_v17  ;;  %v1802_v5 = vld [vmem:[%s591_s30] sm:$0xff] (!%p569_p5)  }
  0x46   : > { %p669_p7 = scmp.gt.s32.totalorder (!%p569_p5), %s1645_s22, 0  ;;  %p1646_p8 = scmp.lt.s32.totalorder (!%p569_p5), %s1645_s22, 3  ;;  %v750_v6 = vunpack.c.h.bf16 (!%p569_p5), %v1802_v5  ;;  %v746_v9 = vunpack.c.l.bf16 (!%p569_p5), %v1802_v5 }
  0x47   : > { %s680_s28 = scalar_select %p679_p6, %s2098_s13, 3 }
  0x48   : > { %s670_s17 = scalar_select %p669_p7, %s1645_s22, 0 }
  0x49   : > { %s2108_s14 = scalar_lea.vmem %s2336_s4, %s680_s28  ;;  %s1692_s8 = sadd.s32 2, %s2098_s13 }
  0x4a   : > { %v730_v15 = vld [vmem:[%s2108_s14] sm:$0x3]  ;;  %s2393_s17 = smov (!%p1646_p8, %s670_s17), 3  ;;  %p685_p9 = scmp.lt.s32.totalorder %s1692_s8, 3 }
  0x4b   : > { %v736_v19 = vrot.slane %v730_v15, %v2111_v13  ;;  %v740_v20 = vrot.slane %v730_v15, %v739_v14  ;;  %s673_s24 = scalar_lea.vmem %s2335_s3, %s2393_s17  ;;  %s1867_s11 = smov 42  }
  0x4c   : > { %v729_v25 = vld [vmem:[%s673_s24] sm:$0x1]  ;;  %s2395_s8 = smov (!%p685_p9, %s1692_s8), 3  ;;  %s1868_s19 = smov 41  }
  0x4d   : > { %vm800_vm0 = vcmp.gt.f32.partialorder %v736_v19, 0.5  ;;  %vm801_vm1 = vcmp.gt.f32.partialorder %v740_v20, 0.5  ;;  %vm799_vm2 = vcmp.gt.f32.partialorder %v729_v25, 0.5  ;;  %s2397_s8 = smov (!%p685_p9, %s2395_s8), 3  ;;  %s1869_s22 = smov 37  }
  0x4e   : > { %v804_v30 = vsel %vm800_vm0, 1, %v1865_v8  ;;  %v805_v31 = vsel %vm801_vm1, 1, %v1865_v8  ;;  %v803_v40 = vsel %vm799_vm2, 1, %v1865_v8  ;;  %s689_s13 = scalar_lea.vmem %s2337_s5, %s2397_s8  ;;  %s1870_s25 = smov 36   ;;  %vm926_vm0 = vcmask 252928  }
  0x4f   : > { %v814_v38 = vrot.slane %v804_v30, %v2111_v13  ;;  %v818_v39 = vrot.slane %v805_v31, %v2111_v13  ;;  %v810_v51 = vrot.slane %v803_v40, %v2111_v13  ;;  %v731_v7 = vld [vmem:[%s689_s13] sm:$0x1]  ;;  %s1871_s30 = smov 35   ;;  %s1872_s28 = smov 122   ;;  %vm1059_vm1 = vcmask 990208  }
  0x50   : > { %vm802_vm6 = vcmp.gt.f32.partialorder %v731_v7, 0.5  ;;  %s1873_s17 = smov 31   ;;  %s1874_s26 = smov 121   ;;  %vm939_vm2 = vcmask 244736  }
  0x51   : > { %vm2137_vm3 = vcmp.eq.s32.totalorder %v814_v38, 1  ;;  %vm2141_vm4 = vcmp.eq.s32.totalorder %v818_v39, 1  ;;  %vm823_vm5 = vcmp.eq.s32.totalorder %v810_v51, 1  ;;  %v806_v15 = vsel %vm802_vm6, 1, %v1865_v8  ;;  %s1875_s15 = smov 30   ;;  %s1876_s27 = smov 99  }
  0x52   : > { %v822_v18 = vrot.slane %v806_v15, %v2111_v13  ;;  %s1877_s23 = smov 29   ;;  %s1878_s24 = smov 98   ;;  %vm952_vm6 = vcmask 236544  }
  0x53   : > { %s1879_s8 = smov 7   ;;  %s1883_s21 = smov 5  }
  0x54   : > { %vm826_vm7 = vcmp.eq.s32.totalorder %v822_v18, 1  ;;  %s1884_s12 = smov 92   ;;  %s1885_s13 = smov 1  }
  0x55   : > { %p695_p10 = scmp.lt.s32.totalorder %s2025_s29, 1 }
  0xc0   : > { %v2121_v24 = vpop.permute.xlu0 %755  ;;  %v2123_v26 = vpop.permute.xlu1 %775 }
  0xc1   : > { %v764_v27 = vmul.f32 %v2121_v24, %v744_v21  ;;  %v765_v28 = vmul.f32 %v2121_v24, %v745_v22  ;;  %v763_v34 = vmul.f32 %v2121_v24, %v743_v23  ;;  %v766_v11 = vmul.f32 %v2121_v24, %v746_v9 }
  0xc3   : > { %v784_v35 = vadd.f32 %v2123_v26, %v764_v27  ;;  %v785_v36 = vadd.f32 %v2123_v26, %v765_v28  ;;  %v783_v44 = vadd.f32 %v2123_v26, %v763_v34  ;;  %v786_v17 = vadd.f32 %v2123_v26, %v766_v11 }
  0xc4   : > { %v761_v37 = vpop.permute.xlu0 %760  ;;  %v781_v46 = vpop.permute.xlu1 %780 }
  0xc5   : > { %v767_v41 = vmul.f32 %v761_v37, %v747_v29  ;;  %v768_v42 = vmul.f32 %v761_v37, %v748_v32  ;;  %v769_v43 = vmul.f32 %v761_v37, %v749_v33  ;;  %v792_v45 = vmax.f32 %v784_v35, 0.0 }
  0xc6   : > { %v793_v47 = vmax.f32 %v785_v36, 0.0  ;;  %v791_v57 = vmax.f32 %v783_v44, 0.0  ;;  %v770_v10 = vmul.f32 %v761_v37, %v750_v6  ;;  %v794_v20 = vmax.f32 %v786_v17, 0.0 }
  0xc7   : > { %v787_v48 = vadd.f32 %v781_v46, %v767_v41  ;;  %v788_v49 = vadd.f32 %v781_v46, %v768_v42  ;;  %v789_v50 = vadd.f32 %v781_v46, %v769_v43  ;;  %v828_v58 = vsel %vm2137_vm3, %v792_v45, 0.0 }
  0xc8   : > { %v829_v59 = vsel %vm2141_vm4, %v793_v47, 0.0  ;;  %v827_v3 = vsel %vm823_vm5, %v791_v57, 0.0  ;;  %v790_v16 = vadd.f32 %v781_v46, %v770_v10  ;;  %v830_v22 = vsel %vm826_vm7, %v794_v20, 0.0 }
  0xc9   : > { %v795_v54 = vmax.f32 %v787_v48, 0.0  ;;  %v796_v55 = vmax.f32 %v788_v49, 0.0  ;;  %v797_v56 = vmax.f32 %v789_v50, 0.0 }
  0xca   : > { %v798_v19 = vmax.f32 %v790_v16, 0.0 }
  0xcb   : > { %v832_v60 = vsel %vm2137_vm3, %v796_v55, 0.0  ;;  %v833_v61 = vsel %vm2141_vm4, %v797_v56, 0.0  ;;  %v831_v0 = vsel %vm823_vm5, %v795_v54, 0.0  ;;  %v2158_v1 = vpack.c.bf16 %v797_v56, %v793_v47 }
  0xcc   : > { %v2153_v62 = vpack.c.bf16 %v832_v60, %v828_v58  ;;  %v2155_v63 = vpack.c.bf16 %v833_v61, %v829_v59  ;;  %v2160_v2 = vpack.c.bf16 %v796_v55, %v792_v45  ;;  %v2164_v4 = vpack.c.bf16 %v831_v0, %v827_v3 }
  0xcd   : > { %v834_v21 = vsel %vm826_vm7, %v798_v19, 0.0  ;;  %vm1072_vm5 = vcmask 809984   ;;  %vm1085_vm7 = vcmask 801792  }
  0xce   : > { %846 = vrot.lane.b32.xlu1 %v2155_v63, %s1866_s10  ;;  %844 = vrot.lane.b32.xlu0 %v2153_v62, %s1866_s10  ;;  %v2191_v23 = vpack.c.bf16 %v834_v21, %v830_v22 }
  0xd2   : > { %857 = vrot.lane.b32.xlu1 %v2153_v62, %s1867_s11  ;;  %842 = vrot.lane.b32.xlu0 %v2164_v4, %s1866_s10  ;;  %s1880_s10 = smov 97  }
  0xd6   : > { %855 = vrot.lane.b32.xlu1 %v2164_v4, %s1867_s11  ;;  %859 = vrot.lane.b32.xlu0 %v2155_v63, %s1867_s11  ;;  %s1881_s11 = smov 6  }
  0xda   : > { %872 = vrot.lane.b32.xlu1 %v2155_v63, %s1868_s19  ;;  %870 = vrot.lane.b32.xlu0 %v2153_v62, %s1868_s19 }
  0xde   : > { %883 = vrot.lane.b32.xlu1 %v2153_v62, %s1869_s22  ;;  %868 = vrot.lane.b32.xlu0 %v2164_v4, %s1868_s19  ;;  %s1882_s19 = smov 93  }
  0xe2   : > { %881 = vrot.lane.b32.xlu1 %v2164_v4, %s1869_s22  ;;  %885 = vrot.lane.b32.xlu0 %v2155_v63, %s1869_s22  ;;  %s1886_s22 = smov 91  }
  0xe6   : > { %898 = vrot.lane.b32.xlu1 %v2155_v63, %s1870_s25  ;;  %896 = vrot.lane.b32.xlu0 %v2153_v62, %s1870_s25 }
  0xea   : > { %909 = vrot.lane.b32.xlu1 %v2153_v62, %s1871_s30  ;;  %894 = vrot.lane.b32.xlu0 %v2164_v4, %s1870_s25  ;;  %s1887_s25 = smov 87  }
  0xee   : > { %907 = vrot.lane.b32.xlu1 %v2164_v4, %s1871_s30  ;;  %911 = vrot.lane.b32.xlu0 %v2155_v63, %s1871_s30  ;;  %s1888_s30 = smov 127  }
  0xf2   : > { %1044 = vrot.lane.b32.xlu1 %v2191_v23, %s1872_s28  ;;  %1042 = vrot.lane.b32.xlu0 %v2155_v63, %s1872_s28 }
  0xf6   : > { %922 = vrot.lane.b32.xlu1 %v2153_v62, %s1873_s17  ;;  %1040 = vrot.lane.b32.xlu0 %v2153_v62, %s1872_s28  ;;  %s1889_s28 = smov 86  }
  0xfa   : > { %920 = vrot.lane.b32.xlu1 %v2164_v4, %s1873_s17  ;;  %924 = vrot.lane.b32.xlu0 %v2155_v63, %s1873_s17  ;;  %s696_s17 = scalar_select %p695_p10, %s2025_s29, 1 }
  0xfe   : > { %1057 = vrot.lane.b32.xlu1 %v2191_v23, %s1874_s26  ;;  %1055 = vrot.lane.b32.xlu0 %v2155_v63, %s1874_s26 }
 0x102   : > { %935 = vrot.lane.b32.xlu1 %v2153_v62, %s1875_s15  ;;  %1053 = vrot.lane.b32.xlu0 %v2153_v62, %s1874_s26  ;;  %s1693_s26 = sshll.u32 %s696_s17, 4 }
 0x106   : > { %933 = vrot.lane.b32.xlu1 %v2164_v4, %s1875_s15  ;;  %937 = vrot.lane.b32.xlu0 %v2155_v63, %s1875_s15  ;;  %s2367_s15 = sld [smem:[#allocation12_spill]] }
 0x10a   : > { %1070 = vrot.lane.b32.xlu1 %v2191_v23, %s1876_s27  ;;  %1068 = vrot.lane.b32.xlu0 %v2155_v63, %s1876_s27 }
 0x10c   : > { %v1805_v44 = vld [vmem:[%s2367_s15 + $0x4] ss:$16 sps:$4 sm:$0xff]   ;;  %v1808_v50 = vld [vmem:[%s2367_s15 + $0xc] ss:$16 sps:$4 sm:$0xff]  }
 0x10d   : > { %1308 = vmatprep.mubr.bf16.mxu1 %v1805_v44  ;;  %1666 = vmatprep.mubr.msk.bf16.mxu0 %vm1272_vm13, %v1808_v50  ;;  %vm1124_vm13 = vcmask 752640  }
 0x10e   : > { %948 = vrot.lane.b32.xlu1 %v2153_v62, %s1877_s23  ;;  %1066 = vrot.lane.b32.xlu0 %v2153_v62, %s1876_s27 }
 0x112   : > { %946 = vrot.lane.b32.xlu1 %v2164_v4, %s1877_s23  ;;  %950 = vrot.lane.b32.xlu0 %v2155_v63, %s1877_s23  ;;  %s2372_s23 = sld [smem:[#allocation15_spill]] }
 0x116   : > { %1083 = vrot.lane.b32.xlu1 %v2191_v23, %s1878_s24  ;;  %1081 = vrot.lane.b32.xlu0 %v2155_v63, %s1878_s24 }
 0x11a   : > { %961 = vrot.lane.b32.xlu1 %v2153_v62, %s1879_s8  ;;  %1079 = vrot.lane.b32.xlu0 %v2153_v62, %s1878_s24  ;;  %s1890_s24 = smov 123  }
 0x11e   : > { %959 = vrot.lane.b32.xlu1 %v2164_v4, %s1879_s8  ;;  %963 = vrot.lane.b32.xlu0 %v2155_v63, %s1879_s8  ;;  %s1891_s8 = smov 85  }
 0x122   : > { %1096 = vrot.lane.b32.xlu1 %v2191_v23, %s1880_s10  ;;  %1094 = vrot.lane.b32.xlu0 %v2155_v63, %s1880_s10 }
 0x126   : > { %974 = vrot.lane.b32.xlu1 %v2153_v62, %s1881_s11  ;;  %1092 = vrot.lane.b32.xlu0 %v2153_v62, %s1880_s10  ;;  %s1696_s10 = sshll.u32 (%p2041_p0), %s2025_s29, 3 }
 0x12a   : > { %972 = vrot.lane.b32.xlu1 %v2164_v4, %s1881_s11  ;;  %976 = vrot.lane.b32.xlu0 %v2155_v63, %s1881_s11 }
 0x12e   : > { %1109 = vrot.lane.b32.xlu1 %v2191_v23, %s1882_s19  ;;  %1107 = vrot.lane.b32.xlu0 %v2155_v63, %s1882_s19 }
 0x132   : > { %987 = vrot.lane.b32.xlu1 %v2153_v62, %s1883_s21  ;;  %1105 = vrot.lane.b32.xlu0 %v2153_v62, %s1882_s19  ;;  %s2368_s19 = sld [smem:[#allocation13_spill]] }
 0x136   : > { %985 = vrot.lane.b32.xlu1 %v2164_v4, %s1883_s21  ;;  %989 = vrot.lane.b32.xlu0 %v2155_v63, %s1883_s21  ;;  %s2374_s21 = sld [smem:[#allocation14_spill]] (%p2041_p0) }
 0x138   : > { %v1242_v61 = vld [vmem:[%s2368_s19 + $0x8] sm:$0xff] }
 0x13a   : > { %1122 = vrot.lane.b32.xlu1 %v2191_v23, %s1884_s12  ;;  %1120 = vrot.lane.b32.xlu0 %v2155_v63, %s1884_s12 }
 0x13e   : > { %1000 = vrot.lane.b32.xlu1 %v2153_v62, %s1885_s13  ;;  %1118 = vrot.lane.b32.xlu0 %v2153_v62, %s1884_s12  ;;  %s2369_s12 = smov %s2368_s19 }
 0x140   : > { %v847_v24 = vpop.permute.xlu1 %846  ;;  %v845_v25 = vpop.permute.xlu0 %844 }
 0x141   : > { %v850_v26 = vsel %vm848_vm8, %v845_v25, %v847_v24 }
 0x142   : > { %1276 = vmatprep.subr.bf16.mxu1 %v850_v26  ;;  %998 = vrot.lane.b32.xlu1 %v2164_v4, %s1885_s13 }
 0x143   : > { %1002 = vrot.lane.b32.xlu0 %v2155_v63, %s1885_s13  ;;  %s1429_s13 = scalar_lea.vmem (%p2041_p0), %s2374_s21, %s1696_s10 }
 0x144   : > { %v858_v27 = vpop.permute.xlu1 %857  ;;  %v843_v28 = vpop.permute.xlu0 %842 }
 0x145   : > { %v849_v29 = vsel %vm848_vm8, %v843_v28, %v845_v25  ;;  %vm965_vm8 = vcmask 56320  }
 0x146   : > { %1135 = vrot.lane.b32.xlu1 %v2191_v23, %s1886_s22  ;;  %1277 = vmatpush1.bf16.msra.mxu1 %v849_v29 }
 0x147   : > { %1133 = vrot.lane.b32.xlu0 %v2155_v63, %s1886_s22 }
 0x148   : > { %v856_v30 = vpop.permute.xlu1 %855  ;;  %v860_v31 = vpop.permute.xlu0 %859 }
 0x149   : > { %v863_v32 = vsel %vm861_vm9, %v858_v27, %v860_v31  ;;  %v862_v33 = vsel %vm861_vm9, %v856_v30, %v858_v27  ;;  %vm1098_vm9 = vcmask 793600  }
 0x14a   : > { %1146 = vrot.lane.b32.xlu1 %v2155_v63, %s1887_s25  ;;  %1278 = vmatprep.subr.bf16.mxu1 %v863_v32 }
 0x14b   : > { %1131 = vrot.lane.b32.xlu0 %v2153_v62, %s1886_s22  ;;  %1279 = vmatpush1.bf16.msra.mxu1 %v862_v33 }
 0x14c   : > { %v873_v34 = vpop.permute.xlu1 %872  ;;  %v871_v35 = vpop.permute.xlu0 %870 }
 0x14d   : > { %v876_v36 = vsel %vm874_vm10, %v871_v35, %v873_v34 }
 0x14e   : > { %1144 = vrot.lane.b32.xlu1 %v2153_v62, %s1887_s25  ;;  %1280 = vmatprep.subr.bf16.mxu1 %v876_v36 }
 0x14f   : > { %1148 = vrot.lane.b32.xlu0 %v2191_v23, %s1887_s25 }
 0x150   : > { %v884_v37 = vpop.permute.xlu1 %883  ;;  %v869_v38 = vpop.permute.xlu0 %868 }
 0x151   : > { %v875_v39 = vsel %vm874_vm10, %v869_v38, %v871_v35  ;;  %vm978_vm10 = vcmask 48128  }
 0x152   : > { %1018 = vrot.lane.b32.xlu1 %v2191_v23, %s1888_s30  ;;  %1281 = vmatpush1.bf16.msra.mxu1 %v875_v39 }
 0x153   : > { %1016 = vrot.lane.b32.xlu0 %v2155_v63, %s1888_s30 }
 0x154   : > { %v882_v40 = vpop.permute.xlu1 %881  ;;  %v886_v41 = vpop.permute.xlu0 %885 }
 0x155   : > { %v889_v42 = vsel %vm887_vm11, %v884_v37, %v886_v41  ;;  %v888_v43 = vsel %vm887_vm11, %v882_v40, %v884_v37  ;;  %vm1111_vm11 = vcmask 760832  }
 0x156   : > { %1159 = vrot.lane.b32.xlu1 %v2155_v63, %s1889_s28  ;;  %1282 = vmatprep.subr.bf16.mxu1 %v889_v42 }
 0x157   : > { %1014 = vrot.lane.b32.xlu0 %v2153_v62, %s1888_s30  ;;  %1283 = vmatpush1.bf16.msra.mxu1 %v888_v43 }
 0x158   : > { %v899_v45 = vpop.permute.xlu1 %898  ;;  %v897_v46 = vpop.permute.xlu0 %896 }
 0x159   : > { %v902_v47 = vsel %vm900_vm12, %v897_v46, %v899_v45 }
 0x15a   : > { %1157 = vrot.lane.b32.xlu1 %v2153_v62, %s1889_s28  ;;  %1284 = vmatprep.subr.bf16.mxu1 %v902_v47 }
 0x15b   : > { %1161 = vrot.lane.b32.xlu0 %v2191_v23, %s1889_s28 }
 0x15c   : > { %v910_v48 = vpop.permute.xlu1 %909  ;;  %v895_v49 = vpop.permute.xlu0 %894 }
 0x15d   : > { %v901_v51 = vsel %vm900_vm12, %v895_v49, %v897_v46  ;;  %vm991_vm12 = vcmask 39936  }
 0x15e   : > { %1031 = vrot.lane.b32.xlu1 %v2191_v23, %s1890_s24  ;;  %1285 = vmatpush1.bf16.msra.mxu1 %v901_v51 }
 0x15f   : > { %1029 = vrot.lane.b32.xlu0 %v2155_v63, %s1890_s24 }
 0x160   : > { %v908_v54 = vpop.permute.xlu1 %907  ;;  %v912_v55 = vpop.permute.xlu0 %911 }
 0x161   : > { %v915_v56 = vsel %vm913_vm14, %v910_v48, %v912_v55  ;;  %v914_v57 = vsel %vm913_vm14, %v908_v54, %v910_v48  ;;  %vm1004_vm14 = vcmask 7168  }
 0x162   : > { %1172 = vrot.lane.b32.xlu1 %v2155_v63, %s1891_s8  ;;  %1286 = vmatprep.subr.bf16.mxu1 %v915_v56  ;;  %v1241_v63 = vld [vmem:[%s2369_s12] sm:$0xff] }
 0x163   : > { %1027 = vrot.lane.b32.xlu0 %v2153_v62, %s1890_s24  ;;  %1287 = vmatpush1.bf16.msra.mxu1 %v914_v57  ;;  %s699_s24 = scalar_lea.vmem %s2372_s23, %s1693_s26 }
 0x164   : > { %v1045_v58 = vpop.permute.xlu1 %1044  ;;  %v1043_v59 = vpop.permute.xlu0 %1042 }
 0x165   : > { %v1048_v60 = vsel %vm1046_vm15, %v1043_v59, %v1045_v58 }
 0x166   : > { %1170 = vrot.lane.b32.xlu1 %v2153_v62, %s1891_s8  ;;  %1319 = vmatprep.subr.bf16.mxu0 %v1048_v60 }
 0x167   : > { %1174 = vrot.lane.b32.xlu0 %v2191_v23, %s1891_s8 }
 0x168   : > { %v923_v0 = vpop.permute.xlu1 %922  ;;  %v1041_v3 = vpop.permute.xlu0 %1040 }
 0x169   : > { %v1047_v4 = vsel %vm1046_vm15, %v1041_v3, %v1043_v59  ;;  %vm1699_vm15 = vmpackc.low %vm2141_vm4, %vm2141_vm4  ;;  %vm1020_vm4 = vcmask 1039360  }
 0x16a   : > { %1250 = vperm.xlu1 %1797, %v1242_v61   ;;  %1320 = vmatpush1.bf16.msra.mxu0 %v1047_v4 }
 0x16b   : > { %1245 = vperm.xlu0 %1796, %v1241_v63  }
 0x16c   : > { %v921_v5 = vpop.permute.xlu1 %920  ;;  %v925_v62 = vpop.permute.xlu0 %924 }
 0x16d   : > { %v928_v6 = vsel %vm926_vm0, %v923_v0, %v925_v62  ;;  %v927_v7 = vsel %vm926_vm0, %v921_v5, %v923_v0  ;;  %vm1137_vm0 = vcmask 744448  }
 0x16e   : > { %1288 = vmatprep.subr.bf16.mxu1 %v928_v6 }
 0x16f   : > { %1289 = vmatpush1.bf16.msra.mxu1 %v927_v7 }
 0x170   : > { %v1058_v9 = vpop.permute.xlu1 %1057  ;;  %v1056_v10 = vpop.permute.xlu0 %1055 }
 0x171   : > { %v1061_v11 = vsel %vm1059_vm1, %v1056_v10, %v1058_v9 }
 0x172   : > { %1321 = vmatprep.subr.bf16.mxu0 %v1061_v11 }
 0x174   : > { %v936_v15 = vpop.permute.xlu1 %935  ;;  %v1054_v16 = vpop.permute.xlu0 %1053 }
 0x175   : > { %v1060_v17 = vsel %vm1059_vm1, %v1054_v16, %v1056_v10  ;;  %vm1702_vm1 = vmpackc.low %vm2137_vm3, %vm2137_vm3  ;;  %vm1163_vm3 = vcmask 703488  }
 0x176   : > { %1322 = vmatpush1.bf16.msra.mxu0 %v1060_v17 }
 0x178   : > { %v934_v18 = vpop.permute.xlu1 %933  ;;  %v938_v19 = vpop.permute.xlu0 %937 }
 0x179   : > { %v941_v20 = vsel %vm939_vm2, %v936_v15, %v938_v19  ;;  %v940_v21 = vsel %vm939_vm2, %v934_v18, %v936_v15  ;;  %vm1150_vm2 = vcmask 711680  }
 0x17a   : > { %1290 = vmatprep.subr.bf16.mxu1 %v941_v20 }
 0x17b   : > { %1291 = vmatpush1.bf16.msra.mxu1 %v940_v21 }
 0x17c   : > { %v1071_v22 = vpop.permute.xlu1 %1070  ;;  %v1069_v23 = vpop.permute.xlu0 %1068 }
 0x17d   : > { %v1074_v24 = vsel %vm1072_vm5, %v1069_v23, %v1071_v22 }
 0x17e   : > { %1323 = vmatprep.subr.bf16.mxu0 %v1074_v24 }
 0x180   : > { %v949_v25 = vpop.permute.xlu1 %948  ;;  %v1067_v26 = vpop.permute.xlu0 %1066 }
 0x181   : > { %v1073_v27 = vsel %vm1072_vm5, %v1067_v26, %v1069_v23  ;;  %vm1033_vm5 = vcmask 1006592  }
 0x182   : > { %1324 = vmatpush1.bf16.msra.mxu0 %v1073_v27 }
 0x184   : > { %v947_v28 = vpop.permute.xlu1 %946  ;;  %v951_v29 = vpop.permute.xlu0 %950 }
 0x185   : > { %v954_v30 = vsel %vm952_vm6, %v949_v25, %v951_v29  ;;  %v953_v31 = vsel %vm952_vm6, %v947_v28, %v949_v25  ;;  %vm1176_vm6 = vcmask 695296  }
 0x186   : > { %1292 = vmatprep.subr.bf16.mxu1 %v954_v30 }
 0x187   : > { %1293 = vmatpush1.bf16.msra.mxu1 %v953_v31 }
 0x188   : > { %v1084_v32 = vpop.permute.xlu1 %1083  ;;  %v1082_v33 = vpop.permute.xlu0 %1081 }
 0x189   : > { %v1087_v34 = vsel %vm1085_vm7, %v1082_v33, %v1084_v32 }
 0x18a   : > { %1325 = vmatprep.subr.bf16.mxu0 %v1087_v34 }
 0x18c   : > { %v962_v35 = vpop.permute.xlu1 %961  ;;  %v1080_v36 = vpop.permute.xlu0 %1079 }
 0x18d   : > { %v1086_v37 = vsel %vm1085_vm7, %v1080_v36, %v1082_v33 }
 0x18e   : > { %1326 = vmatpush1.bf16.msra.mxu0 %v1086_v37 }
 0x190   : > { %v960_v38 = vpop.permute.xlu1 %959  ;;  %v964_v39 = vpop.permute.xlu0 %963 }
 0x191   : > { %v967_v40 = vsel %vm965_vm8, %v962_v35, %v964_v39  ;;  %v966_v41 = vsel %vm965_vm8, %v960_v38, %v962_v35  ;;  %v1803_v38 = vld [vmem:[%s2367_s15] ss:$16 sps:$4 sm:$0xff]  }
 0x192   : > { %1294 = vmatprep.subr.bf16.mxu1 %v967_v40 }
 0x193   : > { %1295 = vmatpush1.bf16.msra.mxu1 %v966_v41 }
 0x194   : > { %v1097_v42 = vpop.permute.xlu1 %1096  ;;  %v1095_v43 = vpop.permute.xlu0 %1094 }
 0x195   : > { %v1100_v44 = vsel %vm1098_vm9, %v1095_v43, %v1097_v42 }
 0x196   : > { %1327 = vmatprep.subr.bf16.mxu0 %v1100_v44  ;;  %v1376_v44 = vld [vmem:[%s2108_s14] sm:$0x3]  ;;  %s650_s14 = scalar_lea.vmem [#allocation6], %s2087_s9 }
 0x197   : > { %vm1377_vm7 = vcmp.gt.f32.partialorder %v1376_v44, 0.5 }
 0x198   : > { %v975_v45 = vpop.permute.xlu1 %974  ;;  %v1093_v46 = vpop.permute.xlu0 %1092 }
 0x199   : > { %v1099_v47 = vsel %vm1098_vm9, %v1093_v46, %v1095_v43  ;;  %v1806_v43 = vld [vmem:[%s2367_s15 + $0x8] ss:$16 sps:$4 sm:$0xff]  }
 0x19a   : > { %1328 = vmatpush1.bf16.msra.mxu0 %v1099_v47 }
 0x19c   : > { %v973_v48 = vpop.permute.xlu1 %972  ;;  %v977_v49 = vpop.permute.xlu0 %976 }
 0x19d   : > { %v980_v50 = vsel %vm978_vm10, %v975_v45, %v977_v49  ;;  %v979_v51 = vsel %vm978_vm10, %v973_v48, %v975_v45  ;;  %v1378_v45 = vsel %vm1377_vm7, 1, %v1865_v8  ;;  %vm1412_vm10 = vcmask 15360  }
 0x19e   : > { %1296 = vmatprep.subr.bf16.mxu1 %v980_v50  ;;  %v1382_v48 = vrot.slane %v1378_v45, %v2111_v13  ;;  %v1386_v50 = vrot.slane %v1378_v45, %v739_v14 }
 0x19f   : > { %1297 = vmatpush1.bf16.msra.mxu1 %v979_v51 }
 0x1a0   : > { %v1110_v54 = vpop.permute.xlu1 %1109  ;;  %v1108_v55 = vpop.permute.xlu0 %1107  ;;  %vm2286_vm8 = vcmp.eq.s32.totalorder %v1382_v48, 1  ;;  %vm1388_vm9 = vcmp.eq.s32.totalorder %v1386_v50, 1 }
 0x1a1   : > { %v1113_v56 = vsel %vm1111_vm11, %v1108_v55, %v1110_v54 }
 0x1a2   : > { %1329 = vmatprep.subr.bf16.mxu0 %v1113_v56 }
 0x1a4   : > { %v988_v57 = vpop.permute.xlu1 %987  ;;  %v1106_v58 = vpop.permute.xlu0 %1105 }
 0x1a5   : > { %v1112_v59 = vsel %vm1111_vm11, %v1106_v58, %v1108_v55 }
 0x1a6   : > { %1330 = vmatpush1.bf16.msra.mxu0 %v1112_v59 }
 0x1a8   : > { %v986_v60 = vpop.permute.xlu1 %985  ;;  %v990_v61 = vpop.permute.xlu0 %989 }
 0x1a9   : > { %v993_v0 = vsel %vm991_vm12, %v988_v57, %v990_v61  ;;  %v992_v3 = vsel %vm991_vm12, %v986_v60, %v988_v57 }
 0x1aa   : > { %1298 = vmatprep.subr.bf16.mxu1 %v993_v0 }
 0x1ab   : > { %1299 = vmatpush1.bf16.msra.mxu1 %v992_v3 }
 0x1ac   : > { %v1123_v63 = vpop.permute.xlu1 %1122  ;;  %v1121_v4 = vpop.permute.xlu0 %1120 }
 0x1ad   : > { %v1126_v5 = vsel %vm1124_vm13, %v1121_v4, %v1123_v63 }
 0x1ae   : > { %1331 = vmatprep.subr.bf16.mxu0 %v1126_v5 }
 0x1b0   : > { %v1001_v62 = vpop.permute.xlu1 %1000  ;;  %v1119_v6 = vpop.permute.xlu0 %1118 }
 0x1b1   : > { %v1125_v7 = vsel %vm1124_vm13, %v1119_v6, %v1121_v4 }
 0x1b2   : > { %1332 = vmatpush1.bf16.msra.mxu0 %v1125_v7 }
 0x1b4   : > { %v999_v9 = vpop.permute.xlu1 %998 }
 0x1b5   : > { %v1003_v10 = vpop.permute.xlu0 %1002  ;;  %v1005_v11 = vsel %vm1004_vm14, %v999_v9, %v1001_v62 }
 0x1b6   : > { %v1006_v15 = vsel %vm1004_vm14, %v1001_v62, %v1003_v10 }
 0x1b7   : > { %1300 = vmatprep.subr.bf16.mxu1 %v1006_v15 }
 0x1b8   : > { %1301 = vmatpush1.bf16.msra.mxu1 %v1005_v11  ;;  %v1136_v16 = vpop.permute.xlu1 %1135 }
 0x1b9   : > { %1701 = vmatprep.subr.msk.bf16.mxu1 %vm1699_vm15, %v2158_v1  ;;  %v1134_v17 = vpop.permute.xlu0 %1133 }
 0x1ba   : > { %v1139_v18 = vsel %vm1137_vm0, %v1134_v17, %v1136_v16 }
 0x1bb   : > { %1333 = vmatprep.subr.bf16.mxu0 %v1139_v18 }
 0x1bc   : > { %1704 = vmatpush1.bf16.msk.msra.mxu1 %vm1702_vm1, %v2160_v2  ;;  %v1147_v19 = vpop.permute.xlu1 %1146 }
 0x1bd   : > { %v1132_v20 = vpop.permute.xlu0 %1131 }
 0x1be   : > { %v1138_v53 = vsel %vm1137_vm0, %v1132_v20, %v1134_v17 }
 0x1bf   : > { %1334 = vmatpush1.bf16.msra.mxu0 %v1138_v53 }
 0x1c0   : > { %v1145_v21 = vpop.permute.xlu1 %1144 }
 0x1c1   : > { %v1149_v22 = vpop.permute.xlu0 %1148  ;;  %v1151_v23 = vsel %vm1150_vm2, %v1145_v21, %v1147_v19 }
 0x1c2   : > { %v1152_v24 = vsel %vm1150_vm2, %v1147_v19, %v1149_v22 }
 0x1c3   : > { %1335 = vmatprep.subr.bf16.mxu0 %v1152_v24 }
 0x1c4   : > { %1336 = vmatpush1.bf16.msra.mxu0 %v1151_v23  ;;  %v1019_v1 = vpop.permute.xlu1 %1018 }
 0x1c5   : > { %v1017_v52 = vpop.permute.xlu0 %1016 }
 0x1c6   : > { %v1022_v25 = vsel %vm1020_vm4, %v1017_v52, %v1019_v1 }
 0x1c7   : > { %1304 = vmatprep.subr.bf16.mxu1 %v1022_v25 }
 0x1c8   : > { %v1160_v26 = vpop.permute.xlu1 %1159 }
 0x1c9   : > { %v1015_v27 = vpop.permute.xlu0 %1014 }
 0x1ca   : > { %v1021_v28 = vsel %vm1020_vm4, %v1015_v27, %v1017_v52 }
 0x1cb   : > { %1305 = vmatpush1.bf16.msra.mxu1 %v1021_v28 }
 0x1cc   : > { %v1158_v2 = vpop.permute.xlu1 %1157 }
 0x1cd   : > { %v1162_v29 = vpop.permute.xlu0 %1161  ;;  %v1164_v30 = vsel %vm1163_vm3, %v1158_v2, %v1160_v26 }
 0x1ce   : > { %v1165_v31 = vsel %vm1163_vm3, %v1160_v26, %v1162_v29 }
 0x1cf   : > { %1337 = vmatprep.subr.bf16.mxu0 %v1165_v31 }
 0x1d0   : > { %1338 = vmatpush1.bf16.msra.mxu0 %v1164_v30  ;;  %v1032_v32 = vpop.permute.xlu1 %1031 }
 0x1d1   : > { %v1030_v33 = vpop.permute.xlu0 %1029 }
 0x1d2   : > { %v1035_v34 = vsel %vm1033_vm5, %v1030_v33, %v1032_v32 }
 0x1d3   : > { %1306 = vmatprep.subr.bf16.mxu1 %v1035_v34 }
 0x1d4   : > { %v1173_v35 = vpop.permute.xlu1 %1172 }
 0x1d5   : > { %v1028_v36 = vpop.permute.xlu0 %1027 }
 0x1d6   : > { %v1034_v37 = vsel %vm1033_vm5, %v1028_v36, %v1030_v33 }
 0x1d7   : > { %1307 = vmatpush1.bf16.msra.mxu1 %v1034_v37 }
 0x1d8   : > { %v1171_v39 = vpop.permute.xlu1 %1170 }
 0x1d9   : > { %v1175_v40 = vpop.permute.xlu0 %1174  ;;  %v1177_v41 = vsel %vm1176_vm6, %v1171_v39, %v1173_v35 }
 0x1da   : > { %1309 = vmatmul.mubr.bf16.vlgmr.msra.gmra.mrb[0].mxu1 %v1803_v38  ;;  %v1178_v42 = vsel %vm1176_vm6, %v1173_v35, %v1175_v40 }
 0x1db   : > { %1339 = vmatprep.subr.bf16.mxu0 %v1178_v42 }
 0x1dc   : > { %1340 = vmatpush1.bf16.msra.mxu0 %v1177_v41 }
 0x1df   : > { %1352 = vmatmul.mubr.bf16.vlgmr.msra.gmra.mrb[0].mxu0 %v1806_v43 }
 0x1e9   : > { %v1251_v56 = vpop.permute.xlu1 %1250 }
 0x1ea   : > { %v1246_v51 = vpop.permute.xlu0 %1245 }
 0x2ad   : > { %v1310_v46 = vpop.f32.mrb[0].mxu1 }
 0x2ae   : > { %v1312_v47 = vpop.f32.mrb[1].mxu1  ;;  %v1311_v55 = vadd.f32 %v1310_v46, %v1246_v51 }
 0x2af   : > { %v1314_v49 = vpop.f32.mrb[2].mxu1  ;;  %v1313_v57 = vadd.f32 %v1312_v47, %v1246_v51 }
 0x2b0   : > { %v1316_v54 = vpop.f32.mrb[3].mxu1  ;;  %v1315_v60 = vadd.f32 %v1314_v49, %v1251_v56 }
 0x2b1   : > { %v1317_v13 = vadd.f32 %v1316_v54, %v1251_v56 }
 0x2b2   : > { %v1353_v58 = vpop.f32.mrb[0].mxu0 }
 0x2b3   : > { %v1354_v8 = vadd.f32 %v1353_v58, %v1311_v55  ;;  %v1355_v61 = vpop.f32.mrb[1].mxu0 }
 0x2b4   : > { %v1356_v0 = vadd.f32 %v1355_v61, %v1313_v57  ;;  %v1357_v3 = vpop.f32.mrb[2].mxu0 }
 0x2b5   : > { %v1358_v12 = vadd.f32 %v1357_v3, %v1315_v60  ;;  %v1359_v14 = vpop.f32.mrb[3].mxu0  ;;  %v1389_v63 = vsel %vm2286_vm8, %v1354_v8, 0.0 }
 0x2b6   : > { %v1694_v4 = vpack.c.bf16 %v1356_v0, %v1354_v8  ;;  %v1360_v5 = vadd.f32 %v1359_v14, %v1317_v13  ;;  %v1390_v62 = vsel %vm1388_vm9, %v1356_v0, 0.0  ;;  %v1399_v6 = vmul.f32 %v1389_v63, %v1389_v63 }
 0x2b7   : > { %v1393_v7 = vadd.f32 %v1390_v62, %v1389_v63  ;;  %v1391_v9 = vsel %vm2286_vm8, %v1358_v12, 0.0  ;;  %v1400_v10 = vmul.f32 %v1390_v62, %v1390_v62 }
 0x2b8   : > { %1374 = vst [vmem:[%s650_s14] sm:$0xff] %v1694_v4  ;;  %v1695_v11 = vpack.c.bf16 %v1360_v5, %v1358_v12  ;;  %v1392_v15 = vsel %vm1388_vm9, %v1360_v5, 0.0  ;;  %v1401_v16 = vmul.f32 %v1391_v9, %v1391_v9 }
 0x2b9   : > { %1394 = vadd.xlane.f32.xlu0 %v1393_v7  ;;  %v1396_v17 = vadd.f32 %v1392_v15, %v1391_v9  ;;  %v1403_v18 = vadd.f32 %v1400_v10, %v1399_v6  ;;  %v1402_v19 = vmul.f32 %v1392_v15, %v1392_v15 }
 0x2ba   : > { %1375 = vst [vmem:[%s650_s14 + $0x8] sm:$0xff] %v1695_v11 }
 0x2bb   : > { %1397 = vadd.xlane.f32.xlu1 %v1396_v17  ;;  %v1406_v20 = vadd.f32 %v1402_v19, %v1401_v16 }
 0x2bd   : > { %1404 = vadd.xlane.f32.xlu0 %v1403_v18 }
 0x2bf   : > { %v1459_v52 = vld [vmem:[%s650_s14] sm:$0xff] (%p2041_p0) }
 0x2c0   : > { %1460 = vst [vmem:[%s1429_s13] sm:$0xff] (%p2041_p0), %v1459_v52 }
 0x2c1   : > { %1407 = vadd.xlane.f32.xlu0 %v1406_v20  ;;  %v1461_v25 = vld [vmem:[%s650_s14 + $0x8] sm:$0xff] (%p2041_p0) }
 0x2c2   : > { %1462 = vst [vmem:[%s1429_s13 + $0x10] sm:$0xff] (%p2041_p0), %v1461_v25 }
 0x346   : > { %v1395_v53 = vpop.xlane.xlu0 %1394 }
 0x348   : > { %v1398_v23 = vpop.xlane.xlu1 %1397 }
 0x34a   : > { %v1405_v21 = vpop.xlane.xlu0 %1404  ;;  %1426 = sbr.rel (!%p2041_p0) target bundleno = 849 (0x351), region = 184 }
 0x34b   : > { %v1410_v22 = vsel %vm1004_vm14, %v1395_v53, %v1405_v21 }
 0x34c   : > { %1413 = vst.msk [vmem:[%s699_s24] sm:$0xff] %vm1412_vm10, %v1410_v22 }
 0x34e   : > { %v1408_v24 = vpop.xlane.xlu0 %1407 }
 0x34f   : > { %v1411_v1 = vsel %vm1004_vm14, %v1398_v23, %v1408_v24 }
 0x350   : > { %1414 = vst.msk [vmem:[%s699_s24 + $0x8] sm:$0xff] %vm1412_vm10, %v1411_v1 }
 0x351 PF: > { %s2375_s23 = sld [smem:[#allocation8_spill]]  ;;  %s2376_s22 = sld [smem:[#allocation10_spill]] }
 0x352   : > { %s2377_s21 = sld [smem:[#allocation7_spill]]  ;;  %s2378_s25 = sld [smem:[#allocation9_spill]] }
 0x353   : > { %s2379_s17 = smov %s1843_s18  ;;  %s2380_s18 = smov %s2048_s16 }
 0x354   : > { %s2381_s19 = smov %s1851_s20 }
 0x357   : > { %p19_p11 = scmp.ge.s32.totalorder %s2375_s23, 4   ;;  %s2382_s20 = smov %s2376_s22 }
 0x358   : > { %s2383_s22 = smov %s2378_s25 }
 0x359   :  { %21 = sbr.rel (!%p19_p11) target bundleno = 9 (0x9), region = 290 }

// kernel: encoder_forward.11
= control target key start
LH: loop header
LB: loop body
LE: loop exit
PB: predicated region body
PF: predicated region fallthrough
CT: control target
= control target key end

     0   :  { %s2229_s0 = inlined_call_operand.vmem [shape: bf16[16,512], index: 0, kind: input, shape index: {}, may-alias: {0,1,2}]   ;;  %s2230_s1 = inlined_call_operand.vmem [shape: bf16[16,512], index: 1, kind: input, shape index: {}, may-alias: {0,1,2}]   ;;  %s2231_s2 = inlined_call_operand.vmem [shape: bf16[16,512], index: 2, kind: input, shape index: {}, may-alias: {0,1,2}]   ;;  %s2232_s3 = inlined_call_operand.vmem [shape: f32[1,512], index: 3, kind: input, shape index: {}, may-alias: {3,4,5}]   ;;  %s2233_s4 = inlined_call_operand.vmem [shape: f32[1,512], index: 4, kind: input, shape index: {}, may-alias: {3,4,5}]   ;;  %s2234_s5 = inlined_call_operand.vmem [shape: f32[1,512], index: 5, kind: input, shape index: {}, may-alias: {3,4,5}]   ;;  %s2235_s6 = inlined_call_operand.vmem [shape: f32[16,1], index: 6, kind: input, shape index: {}]   ;;  %s2236_s7 = inlined_call_operand.vmem [shape: f32[16,1], index: 7, kind: input, shape index: {}]   ;;  %s2237_s8 = inlined_call_operand.vmem [shape: bf16[8,432], index: 8, kind: input, shape index: {}]   ;;  %s2238_s9 = inlined_call_operand.vmem [shape: f32[8,1], index: 9, kind: input, shape index: {}]   ;;  %s2239_s10 = inlined_call_operand.vmem [shape: bf16[8,512], index: 10, kind: output, shape index: {0}]   ;;  %s2240_s11 = inlined_call_operand.vmem [shape: f32[2,8,2], index: 11, kind: output, shape index: {1}]  }
   0x1   :  { %2245 = sst [smem:[#allocation10_spill]] %s2237_s8 }
   0x2   :  { %2246 = sst [smem:[#allocation11_spill]] %s2238_s9 }
   0x3   :  { %2247 = sst [smem:[#allocation12_spill]] %s2239_s10 }
   0x4   :  { %2248 = sst [smem:[#allocation13_spill]] %s2240_s11 }
   0x5   :  { %s1866_s17 = smov 0   ;;  %s1868_s18 = smov 0  }
   0x6   :  { %s1870_s19 = smov 0   ;;  %s1872_s20 = smov 0  }
   0x7   :  { %s1874_s21 = smov 0   ;;  %s1876_s22 = smov 0  }
   0x8   :  { %s1878_s23 = smov 0  }
   0x9 LB: > { %2249 = sst [smem:[#allocation6_spill]] %s1773_s22  ;;  %s1902_s24 = sadd.s32 4294967295, %s1777_s23   ;;  %s1777_s23 = sphi %s1878_s23, %s2264_s23   ;;  %s1773_s22 = sphi %s1876_s22, %s2267_s22   ;;  %s1769_s21 = sphi %s1874_s21, %s2266_s21   ;;  %s1765_s20 = sphi %s1872_s20, %s2271_s20   ;;  %s1761_s19 = sphi %s1870_s19, %s2270_s19   ;;  %s1757_s18 = sphi %s1868_s18, %s2269_s18   ;;  %s1753_s17 = sphi %s1866_s17, %s2268_s17  }
   0xa   : > { %s1905_s25 = sadd.s32 1, %s1777_s23   ;;  %s1542_s26 = sshll.u32 %s1777_s23, 1 }
   0xb   : > { %2250 = sst [smem:[#allocation7_spill]] %s1905_s25  ;;  %s37_s27 = sadd.s32 1, %s1773_s22 }
   0xc   : > { %s1543_s28 = sadd.s32 4294967295, %s1542_s26  ;;  %s1598_s29 = sadd.s32 2, %s1542_s26 }
   0xd   : > { %p28_p0 = scmp.gt.s32.totalorder %s1543_s28, 0  ;;  %s1545_s30 = sadd.s32 4294967295, %s1598_s29 }
   0xe   : > { %p32_p1 = scmp.gt.s32.totalorder %s1545_s30, 0  ;;  %p44_p2 = scmp.ne.s32.totalorder %s1773_s22, %s1769_s21 }
   0xf   : > { %s2273_s28 = smov (!%p28_p0, %s1543_s28), 0  ;;  %p45_p3 = scmp.eq.s32.totalorder %s1777_s23, 0 }
  0x10   : > { %s2275_s30 = smov (!%p32_p1, %s1545_s30), 0  ;;  %s60_s12 = ssub.s32 %s1777_s23, %s1905_s25 }
  0x11   : > { %s34_s13 = ssub.s32 %s2273_s28, %s2275_s30  ;;  %p61_p4 = scmp.eq.s32.totalorder %s60_s12, 0 }
  0x12   : > { %p35_p5 = scmp.eq.s32.totalorder %s34_s13, 0  ;;  %p1919_p6 = por %p45_p3, %p44_p2 }
  0x13   : > { %s63_s15 = sadd.s32 1, %s1765_s20  ;;  %p70_p7 = scmp.ne.s32.totalorder %s1765_s20, %s1761_s19 }
  0x14   : > { %s1927_s16 = scalar_select %p35_p5, %s1773_s22, %s37_s27  }
  0x15   : > { %s1930_s26 = scalar_select %p61_p4, %s1765_s20, %s63_s15  }
  0x16   : > { %2252 = sst [smem:[#allocation8_spill]] %s1927_s16  ;;  %p1934_p8 = por %p70_p7, %p45_p3 }
  0x17   : > { %2253 = sst [smem:[#allocation9_spill]] %s1930_s26  ;;  %p88_p9 = scmp.lt.s32.totalorder %s1598_s29, 3 }
  0x18   : > { %s1602_s30 = sadd.s32 2, %s1598_s29  ;;  %p104_p11 = scmp.ne.s32.totalorder %s1757_s18, %s1753_s17 }
  0x19   : > { %s2277_s29 = smov (!%p88_p9, %s1598_s29), 3  ;;  %p92_p10 = scmp.lt.s32.totalorder %s1602_s30, 3 }
  0x1a   : > { %p1944_p12 = por %p104_p11, %p45_p3  ;;  %s97_s13 = sadd.s32 1, %s1757_s18 }
  0x1b   : > { %s2279_s30 = smov (!%p92_p10, %s1602_s30), 3  ;;  %p1555_p0 = scmp.ge.s32.totalorder %s1777_s23, 2 }
  0x1c   : > { %s94_s27 = ssub.s32 %s2277_s29, %s2279_s30 }
  0x1d   : > { %p95_p13 = scmp.eq.s32.totalorder %s94_s27, 0  ;;  %372 = sbr.rel (%p1555_p0) target bundleno = 57 (0x39), region = 32 }
  0x1f   : > { %s1951_s15 = scalar_select %p95_p13, %s1757_s18, %s97_s13  }
  0x24   : > { %375 = sbr.rel (!%p1919_p6) target bundleno = 43 (0x2b), region = 36  ;;  %s377_s16 = sand.u32 (%p1919_p6), 1, %s1773_s22  }
  0x25   : > { %s1559_s26 = sshll.u32 (%p1919_p6), %s2273_s28, 2  ;;  %s1556_s11 = sshll.u32 (%p1919_p6), %s377_s16, 3 }
  0x26   : > { %s385_s8 = scalar_lea.vmem (%p1919_p6), %s2229_s0, %s1559_s26  ;;  %s379_s30 = scalar_lea.vmem (%p1919_p6), [#allocation3], %s1556_s11 }
  0x27   : > { %v401_v0 = vld [vmem:[%s385_s8] sm:$0xf] (%p1919_p6)  ;;  %v403_v1 = vld [vmem:[%s385_s8 + $0x10] sm:$0xf] (%p1919_p6) }
  0x28   : > { %402 = vst [vmem:[%s379_s30] sm:$0xf] (%p1919_p6), %v401_v0  ;;  %404 = vst [vmem:[%s379_s30 + $0x4] sm:$0xf] (%p1919_p6), %v403_v1 }
  0x2b PF: > { %431 = sbr.rel (!%p1934_p8) target bundleno = 50 (0x32), region = 77  ;;  %s433_s14 = sand.u32 (%p1934_p8), 1, %s1765_s20  }
  0x2c   : > { %s1609_s27 = sshll.u32 (%p1934_p8), %s1777_s23, 3  ;;  %s1560_s13 = sshll.u32 (%p1934_p8), %s433_s14, 4 }
  0x2d   : > { %s438_s22 = scalar_lea.vmem (%p1934_p8), %s2230_s1, %s1609_s27  ;;  %s435_s9 = scalar_lea.vmem (%p1934_p8), [#allocation4], %s1560_s13 }
  0x2e   : > { %v468_v2 = vld [vmem:[%s438_s22] sm:$0xff] (%p1934_p8)  ;;  %v470_v3 = vld [vmem:[%s438_s22 + $0x10] sm:$0xff] (%p1934_p8) }
  0x2f   : > { %469 = vst [vmem:[%s435_s9] sm:$0xff] (%p1934_p8), %v468_v2  ;;  %471 = vst [vmem:[%s435_s9 + $0x8] sm:$0xff] (%p1934_p8), %v470_v3 }
  0x32 PF: > { %477 = sbr.rel (!%p1944_p12) target bundleno = 57 (0x39), region = 115  ;;  %s479_s8 = sand.u32 (%p1944_p12), 1, %s1757_s18  }
  0x33   : > { %s1565_s10 = sshll.u32 (%p1944_p12), %s2277_s29, 2  ;;  %s1563_s11 = sshll.u32 (%p1944_p12), %s479_s8, 3 }
  0x34   : > { %s487_s30 = scalar_lea.vmem (%p1944_p12), %s2231_s2, %s1565_s10  ;;  %s481_s14 = scalar_lea.vmem (%p1944_p12), [#allocation5], %s1563_s11 }
  0x35   : > { %v503_v4 = vld [vmem:[%s487_s30] sm:$0xf] (%p1944_p12)  ;;  %v505_v5 = vld [vmem:[%s487_s30 + $0x10] sm:$0xf] (%p1944_p12) }
  0x36   : > { %504 = vst [vmem:[%s481_s14] sm:$0xf] (%p1944_p12), %v503_v4  ;;  %506 = vst [vmem:[%s481_s14 + $0x4] sm:$0xf] (%p1944_p12), %v505_v5 }
  0x39 PF: > { %p1566_p1 = scmp.ge.s32.totalorder %s1777_s23, 1  ;;  %p568_p2 = scmp.lt.s32.totalorder %s1777_s23, 3 }
  0x3b   : > { %p569_p3 = pnand %p1566_p1, %p568_p2 }
  0x3c   : > { %v775_v6 = vld [vmem:[%s2236_s7] sm:$0xff] (!%p569_p3)  ;;  %s575_s13 = sand.u32 (!%p569_p3), 1, %s1769_s21   ;;  %s582_s28 = sand.u32 (!%p569_p3), 1, %s1761_s19   ;;  %v1779_v8 = vmov (!%p569_p3), 0   ;;  %v776_v9 = vld [vmem:[%s2236_s7 + $0x8] sm:$0xff] (!%p569_p3)  ;;  %v737_v11 = vlaneseq (!%p569_p3)  ;;  %vm852_vm8 = vcmask (!%p569_p3), 351232  }
  0x3d   : > { %572 = sbr.rel (%p569_p3) target bundleno = 840 (0x348), region = 168  ;;  %v755_v7 = vld [vmem:[%s2235_s6] sm:$0xff] (!%p569_p3)  ;;  %1713 = vset.pattern.permute.xlu1 (!%p569_p3), %v1779_v8  ;;  %1712 = vset.pattern.permute.xlu0 (!%p569_p3), %v1779_v8  ;;  %s1987_s23 = sshll.u32 (!%p569_p3), %s575_s13, 3  ;;  %v756_v10 = vld [vmem:[%s2235_s6 + $0x8] sm:$0xff] (!%p569_p3)  ;;  %vm865_vm9 = vcmask (!%p569_p3), 343040   ;;  %vm878_vm10 = vcmask (!%p569_p3), 334848  }
  0x3e   : > { %s1568_s16 = sshll.u32 (!%p569_p3), %s582_s28, 4  ;;  %779 = vperm.xlu1 (!%p569_p3), %1713, %v775_v6   ;;  %759 = vperm.xlu0 (!%p569_p3), %1712, %v755_v7   ;;  %s589_s19 = sand.u32 (!%p569_p3), 1, %s1753_s17   ;;  %v2008_v12 = vshrl.u32 (!%p569_p3), %v737_v11, 7  ;;  %vm891_vm11 = vcmask (!%p569_p3), 302080   ;;  %vm904_vm12 = vcmask (!%p569_p3), 293888   ;;  %vm1262_vm13 = vcmask (!%p569_p3), 392192  }
  0x3f   : > { %s577_s21 = scalar_lea.vmem (!%p569_p3), [#allocation3], %s1987_s23  ;;  %s1997_s25 = sshll.u32 (!%p569_p3), %s589_s19, 3  ;;  %vm917_vm14 = vcmask (!%p569_p3), 285696   ;;  %vm1050_vm15 = vcmask (!%p569_p3), 998400  }
  0x40   : > { %s584_s26 = scalar_lea.vmem (!%p569_p3), [#allocation4], %s1568_s16  ;;  %s591_s30 = scalar_lea.vmem (!%p569_p3), [#allocation5], %s1997_s25  ;;  %v2017_v13 = vsub.s32 (!%p569_p3), 0, %v2008_v12  ;;  %v743_v14 = vsub.s32 (!%p569_p3), 1, %v2008_v12  ;;  %v1714_v18 = vld [vmem:[%s577_s21] sm:$0xff] (!%p569_p3)  }
  0x41   : > { %s2001_s14 = sshll.u32 (!%p569_p3), %s1902_s24, 1  ;;  %v1715_v16 = vld [vmem:[%s584_s26] ss:$8 sps:$4 sm:$0xff] (!%p569_p3)   ;;  %v1717_v17 = vld [vmem:[%s584_s26 + $0x4] ss:$8 sps:$4 sm:$0xff] (!%p569_p3)   ;;  %v747_v23 = vunpack.c.l.bf16 (!%p569_p3), %v1714_v18  ;;  %v751_v29 = vunpack.c.h.bf16 (!%p569_p3), %v1714_v18  ;;  %s1780_s8 = smov (!%p569_p3), 43  }
  0x42   : > { %784 = vperm.xlu1 (!%p569_p3), %1713, %v776_v9   ;;  %764 = vperm.xlu0 (!%p569_p3), %1712, %v756_v10   ;;  %s1571_s22 = sadd.s32 (!%p569_p3), 4294967295, %s2001_s14  ;;  %p679_p4 = scmp.lt.s32.totalorder (!%p569_p3), %s2001_s14, 3  ;;  %v748_v21 = vunpack.c.l.bf16 (!%p569_p3), %v1715_v16  ;;  %v749_v22 = vunpack.c.l.bf16 (!%p569_p3), %v1717_v17  ;;  %v752_v32 = vunpack.c.h.bf16 (!%p569_p3), %v1715_v16  ;;  %v753_v33 = vunpack.c.h.bf16 (!%p569_p3), %v1717_v17  ;;  %v1718_v5 = vld [vmem:[%s591_s30] sm:$0xff] (!%p569_p3)  }
  0x43   : > { %p669_p5 = scmp.gt.s32.totalorder (!%p569_p3), %s1571_s22, 0  ;;  %p1572_p6 = scmp.lt.s32.totalorder (!%p569_p3), %s1571_s22, 3  ;;  %v754_v6 = vunpack.c.h.bf16 (!%p569_p3), %v1718_v5  ;;  %v750_v9 = vunpack.c.l.bf16 (!%p569_p3), %v1718_v5 }
  0x44   : > { %s2006_s29 = scalar_select %p679_p4, %s2001_s14, 3 }
  0x45   : > { %s670_s17 = scalar_select %p669_p5, %s1571_s22, 0 }
  0x46   : > { %s2014_s13 = scalar_lea.vmem %s2233_s4, %s2006_s29  ;;  %s1615_s9 = sadd.s32 2, %s2001_s14 }
  0x47   : > { %v734_v15 = vld [vmem:[%s2014_s13] sm:$0x3]  ;;  %s2281_s17 = smov (!%p1572_p6, %s670_s17), 3  ;;  %p685_p7 = scmp.lt.s32.totalorder %s1615_s9, 3 }
  0x48   : > { %v740_v19 = vrot.slane %v734_v15, %v2017_v13  ;;  %v744_v20 = vrot.slane %v734_v15, %v743_v14  ;;  %s673_s16 = scalar_lea.vmem %s2232_s3, %s2281_s17  ;;  %s1781_s10 = smov 42  }
  0x49   : > { %v733_v25 = vld [vmem:[%s673_s16] sm:$0x1]  ;;  %s2283_s9 = smov (!%p685_p7, %s1615_s9), 3  ;;  %s1782_s11 = smov 41  }
  0x4a   : > { %vm804_vm0 = vcmp.gt.f32.partialorder %v740_v19, 0.5  ;;  %vm805_vm1 = vcmp.gt.f32.partialorder %v744_v20, 0.5  ;;  %vm803_vm2 = vcmp.gt.f32.partialorder %v733_v25, 0.5  ;;  %s2285_s9 = smov (!%p685_p7, %s2283_s9), 3  ;;  %s1783_s14 = smov 37  }
  0x4b   : > { %v808_v30 = vsel %vm804_vm0, 1, %v1779_v8  ;;  %v809_v31 = vsel %vm805_vm1, 1, %v1779_v8  ;;  %v807_v40 = vsel %vm803_vm2, 1, %v1779_v8  ;;  %s689_s26 = scalar_lea.vmem %s2234_s5, %s2285_s9  ;;  %s1784_s25 = smov 36   ;;  %vm930_vm0 = vcmask 252928  }
  0x4c   : > { %v818_v38 = vrot.slane %v808_v30, %v2017_v13  ;;  %v822_v39 = vrot.slane %v809_v31, %v2017_v13  ;;  %v814_v51 = vrot.slane %v807_v40, %v2017_v13  ;;  %v735_v7 = vld [vmem:[%s689_s26] sm:$0x1]  ;;  %s1785_s30 = smov 35   ;;  %s1786_s22 = smov 122   ;;  %vm1063_vm1 = vcmask 990208  }
  0x4d   : > { %vm806_vm6 = vcmp.gt.f32.partialorder %v735_v7, 0.5  ;;  %s1787_s17 = smov 31   ;;  %s1788_s12 = smov 121   ;;  %vm943_vm2 = vcmask 244736  }
  0x4e   : > { %vm2043_vm3 = vcmp.eq.s32.totalorder %v818_v38, 1  ;;  %vm2047_vm4 = vcmp.eq.s32.totalorder %v822_v39, 1  ;;  %vm827_vm5 = vcmp.eq.s32.totalorder %v814_v51, 1  ;;  %v810_v15 = vsel %vm806_vm6, 1, %v1779_v8  ;;  %s1789_s27 = smov 30   ;;  %s1790_s28 = smov 99  }
  0x4f   : > { %v826_v18 = vrot.slane %v810_v15, %v2017_v13  ;;  %s1791_s23 = smov 29   ;;  %s1792_s16 = smov 98   ;;  %vm956_vm6 = vcmask 236544  }
  0x50   : > { %s1793_s9 = smov 7   ;;  %s1797_s19 = smov 5  }
  0x51   : > { %vm830_vm7 = vcmp.eq.s32.totalorder %v826_v18, 1  ;;  %s1798_s21 = smov 92   ;;  %s1799_s26 = smov 1  }
  0x52   : > { %p700_p8 = scmp.lt.s32.totalorder %s1902_s24, 1 }
  0x54   : > { %s2287_s24 = smov (!%p700_p8, %s1902_s24), 1 }
  0xbd   : > { %v2027_v24 = vpop.permute.xlu0 %759  ;;  %v2029_v26 = vpop.permute.xlu1 %779 }
  0xbe   : > { %v768_v27 = vmul.f32 %v2027_v24, %v748_v21  ;;  %v769_v28 = vmul.f32 %v2027_v24, %v749_v22  ;;  %v767_v34 = vmul.f32 %v2027_v24, %v747_v23  ;;  %v770_v11 = vmul.f32 %v2027_v24, %v750_v9 }
  0xc0   : > { %v788_v35 = vadd.f32 %v2029_v26, %v768_v27  ;;  %v789_v36 = vadd.f32 %v2029_v26, %v769_v28  ;;  %v787_v44 = vadd.f32 %v2029_v26, %v767_v34  ;;  %v790_v17 = vadd.f32 %v2029_v26, %v770_v11 }
  0xc1   : > { %v765_v37 = vpop.permute.xlu0 %764  ;;  %v785_v46 = vpop.permute.xlu1 %784 }
  0xc2   : > { %v771_v41 = vmul.f32 %v765_v37, %v751_v29  ;;  %v772_v42 = vmul.f32 %v765_v37, %v752_v32  ;;  %v773_v43 = vmul.f32 %v765_v37, %v753_v33  ;;  %v796_v45 = vmax.f32 %v788_v35, 0.0 }
  0xc3   : > { %v797_v47 = vmax.f32 %v789_v36, 0.0  ;;  %v795_v57 = vmax.f32 %v787_v44, 0.0  ;;  %v774_v10 = vmul.f32 %v765_v37, %v754_v6  ;;  %v798_v20 = vmax.f32 %v790_v17, 0.0 }
  0xc4   : > { %v791_v48 = vadd.f32 %v785_v46, %v771_v41  ;;  %v792_v49 = vadd.f32 %v785_v46, %v772_v42  ;;  %v793_v50 = vadd.f32 %v785_v46, %v773_v43  ;;  %v832_v58 = vsel %vm2043_vm3, %v796_v45, 0.0 }
  0xc5   : > { %v833_v59 = vsel %vm2047_vm4, %v797_v47, 0.0  ;;  %v831_v3 = vsel %vm827_vm5, %v795_v57, 0.0  ;;  %v794_v16 = vadd.f32 %v785_v46, %v774_v10  ;;  %v834_v22 = vsel %vm830_vm7, %v798_v20, 0.0 }
  0xc6   : > { %v799_v54 = vmax.f32 %v791_v48, 0.0  ;;  %v800_v55 = vmax.f32 %v792_v49, 0.0  ;;  %v801_v56 = vmax.f32 %v793_v50, 0.0 }
  0xc7   : > { %v802_v19 = vmax.f32 %v794_v16, 0.0 }
  0xc8   : > { %v836_v60 = vsel %vm2043_vm3, %v800_v55, 0.0  ;;  %v837_v61 = vsel %vm2047_vm4, %v801_v56, 0.0  ;;  %v835_v0 = vsel %vm827_vm5, %v799_v54, 0.0  ;;  %v2064_v1 = vpack.c.bf16 %v801_v56, %v797_v47 }
  0xc9   : > { %v2059_v62 = vpack.c.bf16 %v836_v60, %v832_v58  ;;  %v2061_v63 = vpack.c.bf16 %v837_v61, %v833_v59  ;;  %v2066_v2 = vpack.c.bf16 %v800_v55, %v796_v45  ;;  %v2070_v4 = vpack.c.bf16 %v835_v0, %v831_v3 }
  0xca   : > { %v838_v21 = vsel %vm830_vm7, %v802_v19, 0.0  ;;  %vm1076_vm5 = vcmask 809984   ;;  %vm1089_vm7 = vcmask 801792  }
  0xcb   : > { %850 = vrot.lane.b32.xlu1 %v2061_v63, %s1780_s8  ;;  %848 = vrot.lane.b32.xlu0 %v2059_v62, %s1780_s8  ;;  %v2097_v23 = vpack.c.bf16 %v838_v21, %v834_v22 }
  0xcf   : > { %861 = vrot.lane.b32.xlu1 %v2059_v62, %s1781_s10  ;;  %846 = vrot.lane.b32.xlu0 %v2070_v4, %s1780_s8  ;;  %s1794_s8 = smov 97  }
  0xd3   : > { %859 = vrot.lane.b32.xlu1 %v2070_v4, %s1781_s10  ;;  %863 = vrot.lane.b32.xlu0 %v2061_v63, %s1781_s10  ;;  %s1795_s10 = smov 6  }
  0xd7   : > { %876 = vrot.lane.b32.xlu1 %v2061_v63, %s1782_s11  ;;  %874 = vrot.lane.b32.xlu0 %v2059_v62, %s1782_s11 }
  0xdb   : > { %887 = vrot.lane.b32.xlu1 %v2059_v62, %s1783_s14  ;;  %872 = vrot.lane.b32.xlu0 %v2070_v4, %s1782_s11  ;;  %s1796_s11 = smov 93  }
  0xdf   : > { %885 = vrot.lane.b32.xlu1 %v2070_v4, %s1783_s14  ;;  %889 = vrot.lane.b32.xlu0 %v2061_v63, %s1783_s14  ;;  %s1800_s14 = smov 91  }
  0xe3   : > { %902 = vrot.lane.b32.xlu1 %v2061_v63, %s1784_s25  ;;  %900 = vrot.lane.b32.xlu0 %v2059_v62, %s1784_s25 }
  0xe7   : > { %913 = vrot.lane.b32.xlu1 %v2059_v62, %s1785_s30  ;;  %898 = vrot.lane.b32.xlu0 %v2070_v4, %s1784_s25  ;;  %s1801_s25 = smov 87  }
  0xeb   : > { %911 = vrot.lane.b32.xlu1 %v2070_v4, %s1785_s30  ;;  %915 = vrot.lane.b32.xlu0 %v2061_v63, %s1785_s30  ;;  %s1802_s30 = smov 127  }
  0xef   : > { %1048 = vrot.lane.b32.xlu1 %v2097_v23, %s1786_s22  ;;  %1046 = vrot.lane.b32.xlu0 %v2061_v63, %s1786_s22 }
  0xf3   : > { %926 = vrot.lane.b32.xlu1 %v2059_v62, %s1787_s17  ;;  %1044 = vrot.lane.b32.xlu0 %v2059_v62, %s1786_s22  ;;  %s1803_s22 = smov 86  }
  0xf7   : > { %924 = vrot.lane.b32.xlu1 %v2070_v4, %s1787_s17  ;;  %928 = vrot.lane.b32.xlu0 %v2061_v63, %s1787_s17 }
  0xfb   : > { %1061 = vrot.lane.b32.xlu1 %v2097_v23, %s1788_s12  ;;  %1059 = vrot.lane.b32.xlu0 %v2061_v63, %s1788_s12 }
  0xff   : > { %939 = vrot.lane.b32.xlu1 %v2059_v62, %s1789_s27  ;;  %1057 = vrot.lane.b32.xlu0 %v2059_v62, %s1788_s12 }
 0x103   : > { %937 = vrot.lane.b32.xlu1 %v2070_v4, %s1789_s27  ;;  %941 = vrot.lane.b32.xlu0 %v2061_v63, %s1789_s27  ;;  %s2260_s27 = sld [smem:[#allocation10_spill]] }
 0x107   : > { %1074 = vrot.lane.b32.xlu1 %v2097_v23, %s1790_s28  ;;  %1072 = vrot.lane.b32.xlu0 %v2061_v63, %s1790_s28 }
 0x109   : > { %v2154_v44 = vld [vmem:[%s2260_s27] sm:$0xff]  ;;  %v2164_v51 = vld [vmem:[%s2260_s27 + $0x8] sm:$0xff] }
 0x10a   : > { %v1590_v47 = vcombine.high %v2154_v44, %v2154_v44  ;;  %v1592_v55 = vcombine.high %v2164_v51, %v2164_v51 }
 0x10b   : > { %952 = vrot.lane.b32.xlu1 %v2059_v62, %s1791_s23  ;;  %1070 = vrot.lane.b32.xlu0 %v2059_v62, %s1790_s28 }
 0x10c   : > { %1298 = vmatprep.mubr.bf16.mxu1 %v1590_v47  ;;  %1593 = vmatprep.mubr.msk.bf16.mxu0 %vm1262_vm13, %v1592_v55  ;;  %vm1128_vm13 = vcmask 752640  }
 0x10f   : > { %950 = vrot.lane.b32.xlu1 %v2070_v4, %s1791_s23  ;;  %954 = vrot.lane.b32.xlu0 %v2061_v63, %s1791_s23 }
 0x113   : > { %1087 = vrot.lane.b32.xlu1 %v2097_v23, %s1792_s16  ;;  %1085 = vrot.lane.b32.xlu0 %v2061_v63, %s1792_s16 }
 0x117   : > { %965 = vrot.lane.b32.xlu1 %v2059_v62, %s1793_s9  ;;  %1083 = vrot.lane.b32.xlu0 %v2059_v62, %s1792_s16  ;;  %s1804_s16 = smov 123  }
 0x11b   : > { %963 = vrot.lane.b32.xlu1 %v2070_v4, %s1793_s9  ;;  %967 = vrot.lane.b32.xlu0 %v2061_v63, %s1793_s9  ;;  %s1805_s9 = smov 85  }
 0x11f   : > { %1100 = vrot.lane.b32.xlu1 %v2097_v23, %s1794_s8  ;;  %1098 = vrot.lane.b32.xlu0 %v2061_v63, %s1794_s8 }
 0x123   : > { %978 = vrot.lane.b32.xlu1 %v2059_v62, %s1795_s10  ;;  %1096 = vrot.lane.b32.xlu0 %v2059_v62, %s1794_s8 }
 0x127   : > { %976 = vrot.lane.b32.xlu1 %v2070_v4, %s1795_s10  ;;  %980 = vrot.lane.b32.xlu0 %v2061_v63, %s1795_s10 }
 0x12b   : > { %1113 = vrot.lane.b32.xlu1 %v2097_v23, %s1796_s11  ;;  %1111 = vrot.lane.b32.xlu0 %v2061_v63, %s1796_s11 }
 0x12f   : > { %991 = vrot.lane.b32.xlu1 %v2059_v62, %s1797_s19  ;;  %1109 = vrot.lane.b32.xlu0 %v2059_v62, %s1796_s11  ;;  %s2261_s11 = sld [smem:[#allocation11_spill]] }
 0x133   : > { %989 = vrot.lane.b32.xlu1 %v2070_v4, %s1797_s19  ;;  %993 = vrot.lane.b32.xlu0 %v2061_v63, %s1797_s19  ;;  %s1583_s19 = sshll.u32 %s2006_s29, 2  ;;  %s1584_s29 = sshll.u32 %s2287_s24, 3 }
 0x135   : > { %v1243_v5 = vld [vmem:[%s2261_s11] sm:$0xff] }
 0x137   : > { %1126 = vrot.lane.b32.xlu1 %v2097_v23, %s1798_s21  ;;  %1124 = vrot.lane.b32.xlu0 %v2061_v63, %s1798_s21 }
 0x13b   : > { %1004 = vrot.lane.b32.xlu1 %v2059_v62, %s1799_s26  ;;  %1122 = vrot.lane.b32.xlu0 %v2059_v62, %s1798_s21 }
 0x13d   : > { %v851_v24 = vpop.permute.xlu1 %850  ;;  %v849_v25 = vpop.permute.xlu0 %848 }
 0x13e   : > { %v854_v26 = vsel %vm852_vm8, %v849_v25, %v851_v24 }
 0x13f   : > { %1266 = vmatprep.subr.bf16.mxu1 %v854_v26  ;;  %1002 = vrot.lane.b32.xlu1 %v2070_v4, %s1799_s26 }
 0x140   : > { %1006 = vrot.lane.b32.xlu0 %v2061_v63, %s1799_s26  ;;  %s2262_s26 = sld [smem:[#allocation12_spill]] }
 0x141   : > { %v862_v27 = vpop.permute.xlu1 %861  ;;  %v847_v28 = vpop.permute.xlu0 %846 }
 0x142   : > { %v853_v29 = vsel %vm852_vm8, %v847_v28, %v849_v25  ;;  %vm969_vm8 = vcmask 56320  }
 0x143   : > { %1139 = vrot.lane.b32.xlu1 %v2097_v23, %s1800_s14  ;;  %1267 = vmatpush1.bf16.msra.mxu1 %v853_v29 }
 0x144   : > { %1137 = vrot.lane.b32.xlu0 %v2061_v63, %s1800_s14 }
 0x145   : > { %v860_v30 = vpop.permute.xlu1 %859  ;;  %v864_v31 = vpop.permute.xlu0 %863 }
 0x146   : > { %v867_v32 = vsel %vm865_vm9, %v862_v27, %v864_v31  ;;  %v866_v33 = vsel %vm865_vm9, %v860_v30, %v862_v27  ;;  %vm1102_vm9 = vcmask 793600  }
 0x147   : > { %1150 = vrot.lane.b32.xlu1 %v2061_v63, %s1801_s25  ;;  %1268 = vmatprep.subr.bf16.mxu1 %v867_v32 }
 0x148   : > { %1135 = vrot.lane.b32.xlu0 %v2059_v62, %s1800_s14  ;;  %1269 = vmatpush1.bf16.msra.mxu1 %v866_v33  ;;  %s698_s14 = scalar_lea.vmem %s2262_s26, %s1583_s19 }
 0x149   : > { %v877_v34 = vpop.permute.xlu1 %876  ;;  %v875_v35 = vpop.permute.xlu0 %874 }
 0x14a   : > { %v880_v36 = vsel %vm878_vm10, %v875_v35, %v877_v34 }
 0x14b   : > { %1148 = vrot.lane.b32.xlu1 %v2059_v62, %s1801_s25  ;;  %1270 = vmatprep.subr.bf16.mxu1 %v880_v36 }
 0x14c   : > { %1152 = vrot.lane.b32.xlu0 %v2097_v23, %s1801_s25 }
 0x14d   : > { %v888_v37 = vpop.permute.xlu1 %887  ;;  %v873_v38 = vpop.permute.xlu0 %872 }
 0x14e   : > { %v879_v39 = vsel %vm878_vm10, %v873_v38, %v875_v35  ;;  %vm982_vm10 = vcmask 48128  }
 0x14f   : > { %1022 = vrot.lane.b32.xlu1 %v2097_v23, %s1802_s30  ;;  %1271 = vmatpush1.bf16.msra.mxu1 %v879_v39 }
 0x150   : > { %1020 = vrot.lane.b32.xlu0 %v2061_v63, %s1802_s30 }
 0x151   : > { %v886_v40 = vpop.permute.xlu1 %885  ;;  %v890_v41 = vpop.permute.xlu0 %889 }
 0x152   : > { %v893_v42 = vsel %vm891_vm11, %v888_v37, %v890_v41  ;;  %v892_v43 = vsel %vm891_vm11, %v886_v40, %v888_v37  ;;  %vm1115_vm11 = vcmask 760832  }
 0x153   : > { %1163 = vrot.lane.b32.xlu1 %v2061_v63, %s1803_s22  ;;  %1272 = vmatprep.subr.bf16.mxu1 %v893_v42 }
 0x154   : > { %1018 = vrot.lane.b32.xlu0 %v2059_v62, %s1802_s30  ;;  %1273 = vmatpush1.bf16.msra.mxu1 %v892_v43 }
 0x155   : > { %v903_v45 = vpop.permute.xlu1 %902  ;;  %v901_v46 = vpop.permute.xlu0 %900 }
 0x156   : > { %v906_v48 = vsel %vm904_vm12, %v901_v46, %v903_v45 }
 0x157   : > { %1161 = vrot.lane.b32.xlu1 %v2059_v62, %s1803_s22  ;;  %1274 = vmatprep.subr.bf16.mxu1 %v906_v48 }
 0x158   : > { %1165 = vrot.lane.b32.xlu0 %v2097_v23, %s1803_s22  ;;  %s2263_s22 = sld [smem:[#allocation13_spill]] }
 0x159   : > { %v914_v49 = vpop.permute.xlu1 %913  ;;  %v899_v50 = vpop.permute.xlu0 %898 }
 0x15a   : > { %v905_v54 = vsel %vm904_vm12, %v899_v50, %v901_v46  ;;  %vm995_vm12 = vcmask 39936  }
 0x15b   : > { %1035 = vrot.lane.b32.xlu1 %v2097_v23, %s1804_s16  ;;  %1275 = vmatpush1.bf16.msra.mxu1 %v905_v54 }
 0x15c   : > { %1033 = vrot.lane.b32.xlu0 %v2061_v63, %s1804_s16 }
 0x15d   : > { %v912_v56 = vpop.permute.xlu1 %911  ;;  %v916_v57 = vpop.permute.xlu0 %915 }
 0x15e   : > { %v919_v58 = vsel %vm917_vm14, %v914_v49, %v916_v57  ;;  %v918_v59 = vsel %vm917_vm14, %v912_v56, %v914_v49  ;;  %vm1008_vm14 = vcmask 7168   ;;  %s703_s17 = scalar_lea.vmem %s2263_s22, %s1584_s29 }
 0x15f   : > { %1176 = vrot.lane.b32.xlu1 %v2061_v63, %s1805_s9  ;;  %1276 = vmatprep.subr.bf16.mxu1 %v919_v58 }
 0x160   : > { %1031 = vrot.lane.b32.xlu0 %v2059_v62, %s1804_s16  ;;  %1277 = vmatpush1.bf16.msra.mxu1 %v918_v59 }
 0x161   : > { %v1049_v60 = vpop.permute.xlu1 %1048  ;;  %v1047_v61 = vpop.permute.xlu0 %1046 }
 0x162   : > { %v1052_v0 = vsel %vm1050_vm15, %v1047_v61, %v1049_v60 }
 0x163   : > { %1174 = vrot.lane.b32.xlu1 %v2059_v62, %s1805_s9  ;;  %1307 = vmatprep.subr.bf16.mxu0 %v1052_v0 }
 0x164   : > { %1178 = vrot.lane.b32.xlu0 %v2097_v23, %s1805_s9 }
 0x165   : > { %v927_v3 = vpop.permute.xlu1 %926  ;;  %v1045_v4 = vpop.permute.xlu0 %1044 }
 0x166   : > { %v1051_v63 = vsel %vm1050_vm15, %v1045_v4, %v1047_v61  ;;  %vm1619_vm15 = vmpackc.low %vm2047_vm4, %vm2047_vm4  ;;  %vm1024_vm4 = vcmask 1039360  }
 0x167   : > { %1308 = vmatpush1.bf16.msra.mxu0 %v1051_v63 }
 0x168   : > { %1246 = vperm.xlu0 %1712, %v1243_v5  }
 0x169   : > { %v925_v6 = vpop.permute.xlu1 %924  ;;  %v929_v7 = vpop.permute.xlu0 %928 }
 0x16a   : > { %v932_v9 = vsel %vm930_vm0, %v927_v3, %v929_v7  ;;  %v931_v10 = vsel %vm930_vm0, %v925_v6, %v927_v3  ;;  %vm1141_vm0 = vcmask 744448  }
 0x16b   : > { %1278 = vmatprep.subr.bf16.mxu1 %v932_v9 }
 0x16c   : > { %1279 = vmatpush1.bf16.msra.mxu1 %v931_v10 }
 0x16d   : > { %v1062_v62 = vpop.permute.xlu1 %1061  ;;  %v1060_v11 = vpop.permute.xlu0 %1059 }
 0x16e   : > { %v1065_v15 = vsel %vm1063_vm1, %v1060_v11, %v1062_v62 }
 0x16f   : > { %1309 = vmatprep.subr.bf16.mxu0 %v1065_v15 }
 0x171   : > { %v940_v16 = vpop.permute.xlu1 %939  ;;  %v1058_v17 = vpop.permute.xlu0 %1057 }
 0x172   : > { %v1064_v18 = vsel %vm1063_vm1, %v1058_v17, %v1060_v11  ;;  %vm1622_vm1 = vmpackc.low %vm2043_vm3, %vm2043_vm3  ;;  %vm1167_vm3 = vcmask 703488  }
 0x173   : > { %1310 = vmatpush1.bf16.msra.mxu0 %v1064_v18 }
 0x175   : > { %v938_v19 = vpop.permute.xlu1 %937  ;;  %v942_v20 = vpop.permute.xlu0 %941 }
 0x176   : > { %v945_v21 = vsel %vm943_vm2, %v940_v16, %v942_v20  ;;  %v944_v22 = vsel %vm943_vm2, %v938_v19, %v940_v16  ;;  %vm1154_vm2 = vcmask 711680  }
 0x177   : > { %1280 = vmatprep.subr.bf16.mxu1 %v945_v21 }
 0x178   : > { %1281 = vmatpush1.bf16.msra.mxu1 %v944_v22 }
 0x179   : > { %v1075_v23 = vpop.permute.xlu1 %1074  ;;  %v1073_v24 = vpop.permute.xlu0 %1072 }
 0x17a   : > { %v1078_v25 = vsel %vm1076_vm5, %v1073_v24, %v1075_v23 }
 0x17b   : > { %1311 = vmatprep.subr.bf16.mxu0 %v1078_v25 }
 0x17d   : > { %v953_v26 = vpop.permute.xlu1 %952  ;;  %v1071_v27 = vpop.permute.xlu0 %1070 }
 0x17e   : > { %v1077_v28 = vsel %vm1076_vm5, %v1071_v27, %v1073_v24  ;;  %vm1037_vm5 = vcmask 1006592  }
 0x17f   : > { %1312 = vmatpush1.bf16.msra.mxu0 %v1077_v28 }
 0x181   : > { %v951_v29 = vpop.permute.xlu1 %950  ;;  %v955_v30 = vpop.permute.xlu0 %954 }
 0x182   : > { %v958_v31 = vsel %vm956_vm6, %v953_v26, %v955_v30  ;;  %v957_v32 = vsel %vm956_vm6, %v951_v29, %v953_v26  ;;  %vm1180_vm6 = vcmask 695296  }
 0x183   : > { %1282 = vmatprep.subr.bf16.mxu1 %v958_v31 }
 0x184   : > { %1283 = vmatpush1.bf16.msra.mxu1 %v957_v32 }
 0x185   : > { %v1088_v33 = vpop.permute.xlu1 %1087  ;;  %v1086_v34 = vpop.permute.xlu0 %1085 }
 0x186   : > { %v1091_v35 = vsel %vm1089_vm7, %v1086_v34, %v1088_v33 }
 0x187   : > { %1313 = vmatprep.subr.bf16.mxu0 %v1091_v35 }
 0x189   : > { %v966_v36 = vpop.permute.xlu1 %965  ;;  %v1084_v37 = vpop.permute.xlu0 %1083 }
 0x18a   : > { %v1090_v38 = vsel %vm1089_vm7, %v1084_v37, %v1086_v34 }
 0x18b   : > { %1314 = vmatpush1.bf16.msra.mxu0 %v1090_v38 }
 0x18d   : > { %v964_v39 = vpop.permute.xlu1 %963  ;;  %v968_v40 = vpop.permute.xlu0 %967 }
 0x18e   : > { %v971_v41 = vsel %vm969_vm8, %v966_v36, %v968_v40  ;;  %v970_v42 = vsel %vm969_vm8, %v964_v39, %v966_v36 }
 0x18f   : > { %1284 = vmatprep.subr.bf16.mxu1 %v971_v41  ;;  %v1589_v41 = vcombine.low %v2154_v44, %v2154_v44 }
 0x190   : > { %1285 = vmatpush1.bf16.msra.mxu1 %v970_v42 }
 0x191   : > { %v1101_v43 = vpop.permute.xlu1 %1100  ;;  %v1099_v45 = vpop.permute.xlu0 %1098 }
 0x192   : > { %v1104_v46 = vsel %vm1102_vm9, %v1099_v45, %v1101_v43 }
 0x193   : > { %1315 = vmatprep.subr.bf16.mxu0 %v1104_v46 }
 0x195   : > { %v979_v47 = vpop.permute.xlu1 %978  ;;  %v1097_v48 = vpop.permute.xlu0 %1096 }
 0x196   : > { %v1103_v49 = vsel %vm1102_vm9, %v1097_v48, %v1099_v45  ;;  %v1357_v48 = vld [vmem:[%s2014_s13] sm:$0x3] }
 0x197   : > { %1316 = vmatpush1.bf16.msra.mxu0 %v1103_v49  ;;  %vm1358_vm7 = vcmp.gt.f32.partialorder %v1357_v48, 0.5 }
 0x198   : > { %v1359_v49 = vsel %vm1358_vm7, 1, %v1779_v8 }
 0x199   : > { %v977_v50 = vpop.permute.xlu1 %976  ;;  %v981_v54 = vpop.permute.xlu0 %980 }
 0x19a   : > { %v984_v55 = vsel %vm982_vm10, %v979_v47, %v981_v54  ;;  %v983_v56 = vsel %vm982_vm10, %v977_v50, %v979_v47  ;;  %v1591_v47 = vcombine.low %v2164_v51, %v2164_v51  ;;  %v1363_v54 = vrot.slane %v1359_v49, %v2017_v13 }
 0x19b   : > { %1286 = vmatprep.subr.bf16.mxu1 %v984_v55  ;;  %vm1382_vm10 = vcmask 15360  }
 0x19c   : > { %1287 = vmatpush1.bf16.msra.mxu1 %v983_v56  ;;  %v1367_v56 = vrot.slane %v1359_v49, %v743_v14  ;;  %vm1368_vm8 = vcmp.eq.s32.totalorder %v1363_v54, 1 }
 0x19d   : > { %v1114_v57 = vpop.permute.xlu1 %1113  ;;  %v1112_v58 = vpop.permute.xlu0 %1111 }
 0x19e   : > { %v1117_v59 = vsel %vm1115_vm11, %v1112_v58, %v1114_v57  ;;  %vm1369_vm9 = vcmp.eq.s32.totalorder %v1367_v56, 1 }
 0x19f   : > { %1317 = vmatprep.subr.bf16.mxu0 %v1117_v59 }
 0x1a1   : > { %v992_v60 = vpop.permute.xlu1 %991  ;;  %v1110_v61 = vpop.permute.xlu0 %1109 }
 0x1a2   : > { %v1116_v0 = vsel %vm1115_vm11, %v1110_v61, %v1112_v58 }
 0x1a3   : > { %1318 = vmatpush1.bf16.msra.mxu0 %v1116_v0 }
 0x1a5   : > { %v990_v3 = vpop.permute.xlu1 %989  ;;  %v994_v4 = vpop.permute.xlu0 %993 }
 0x1a6   : > { %v997_v5 = vsel %vm995_vm12, %v992_v60, %v994_v4  ;;  %v996_v63 = vsel %vm995_vm12, %v990_v3, %v992_v60 }
 0x1a7   : > { %1288 = vmatprep.subr.bf16.mxu1 %v997_v5 }
 0x1a8   : > { %1289 = vmatpush1.bf16.msra.mxu1 %v996_v63 }
 0x1a9   : > { %v1127_v6 = vpop.permute.xlu1 %1126  ;;  %v1125_v7 = vpop.permute.xlu0 %1124 }
 0x1aa   : > { %v1130_v9 = vsel %vm1128_vm13, %v1125_v7, %v1127_v6 }
 0x1ab   : > { %1319 = vmatprep.subr.bf16.mxu0 %v1130_v9 }
 0x1ad   : > { %v1005_v10 = vpop.permute.xlu1 %1004  ;;  %v1123_v62 = vpop.permute.xlu0 %1122 }
 0x1ae   : > { %v1129_v11 = vsel %vm1128_vm13, %v1123_v62, %v1125_v7 }
 0x1af   : > { %1320 = vmatpush1.bf16.msra.mxu0 %v1129_v11 }
 0x1b1   : > { %v1003_v15 = vpop.permute.xlu1 %1002 }
 0x1b2   : > { %v1007_v16 = vpop.permute.xlu0 %1006  ;;  %v1009_v17 = vsel %vm1008_vm14, %v1003_v15, %v1005_v10 }
 0x1b3   : > { %v1010_v18 = vsel %vm1008_vm14, %v1005_v10, %v1007_v16 }
 0x1b4   : > { %1290 = vmatprep.subr.bf16.mxu1 %v1010_v18 }
 0x1b5   : > { %1291 = vmatpush1.bf16.msra.mxu1 %v1009_v17  ;;  %v1140_v19 = vpop.permute.xlu1 %1139 }
 0x1b6   : > { %1621 = vmatprep.subr.msk.bf16.mxu1 %vm1619_vm15, %v2064_v1  ;;  %v1138_v20 = vpop.permute.xlu0 %1137 }
 0x1b7   : > { %v1143_v21 = vsel %vm1141_vm0, %v1138_v20, %v1140_v19 }
 0x1b8   : > { %1321 = vmatprep.subr.bf16.mxu0 %v1143_v21 }
 0x1b9   : > { %1624 = vmatpush1.bf16.msk.msra.mxu1 %vm1622_vm1, %v2066_v2  ;;  %v1151_v22 = vpop.permute.xlu1 %1150 }
 0x1ba   : > { %v1136_v23 = vpop.permute.xlu0 %1135 }
 0x1bb   : > { %v1142_v53 = vsel %vm1141_vm0, %v1136_v23, %v1138_v20 }
 0x1bc   : > { %1322 = vmatpush1.bf16.msra.mxu0 %v1142_v53 }
 0x1bd   : > { %v1149_v24 = vpop.permute.xlu1 %1148 }
 0x1be   : > { %v1153_v25 = vpop.permute.xlu0 %1152  ;;  %v1155_v26 = vsel %vm1154_vm2, %v1149_v24, %v1151_v22 }
 0x1bf   : > { %v1156_v27 = vsel %vm1154_vm2, %v1151_v22, %v1153_v25 }
 0x1c0   : > { %1323 = vmatprep.subr.bf16.mxu0 %v1156_v27 }
 0x1c1   : > { %1324 = vmatpush1.bf16.msra.mxu0 %v1155_v26  ;;  %v1023_v1 = vpop.permute.xlu1 %1022 }
 0x1c2   : > { %v1021_v52 = vpop.permute.xlu0 %1020 }
 0x1c3   : > { %v1026_v28 = vsel %vm1024_vm4, %v1021_v52, %v1023_v1 }
 0x1c4   : > { %1294 = vmatprep.subr.bf16.mxu1 %v1026_v28 }
 0x1c5   : > { %v1164_v29 = vpop.permute.xlu1 %1163 }
 0x1c6   : > { %v1019_v30 = vpop.permute.xlu0 %1018 }
 0x1c7   : > { %v1025_v31 = vsel %vm1024_vm4, %v1019_v30, %v1021_v52 }
 0x1c8   : > { %1295 = vmatpush1.bf16.msra.mxu1 %v1025_v31 }
 0x1c9   : > { %v1162_v2 = vpop.permute.xlu1 %1161 }
 0x1ca   : > { %v1166_v32 = vpop.permute.xlu0 %1165  ;;  %v1168_v33 = vsel %vm1167_vm3, %v1162_v2, %v1164_v29 }
 0x1cb   : > { %v1169_v34 = vsel %vm1167_vm3, %v1164_v29, %v1166_v32 }
 0x1cc   : > { %1325 = vmatprep.subr.bf16.mxu0 %v1169_v34 }
 0x1cd   : > { %1326 = vmatpush1.bf16.msra.mxu0 %v1168_v33  ;;  %v1036_v35 = vpop.permute.xlu1 %1035 }
 0x1ce   : > { %v1034_v36 = vpop.permute.xlu0 %1033 }
 0x1cf   : > { %v1039_v37 = vsel %vm1037_vm5, %v1034_v36, %v1036_v35 }
 0x1d0   : > { %1296 = vmatprep.subr.bf16.mxu1 %v1039_v37 }
 0x1d1   : > { %v1177_v38 = vpop.permute.xlu1 %1176 }
 0x1d2   : > { %v1032_v39 = vpop.permute.xlu0 %1031 }
 0x1d3   : > { %v1038_v40 = vsel %vm1037_vm5, %v1032_v39, %v1034_v36 }
 0x1d4   : > { %1297 = vmatpush1.bf16.msra.mxu1 %v1038_v40 }
 0x1d5   : > { %v1175_v42 = vpop.permute.xlu1 %1174 }
 0x1d6   : > { %v1179_v43 = vpop.permute.xlu0 %1178  ;;  %v1181_v45 = vsel %vm1180_vm6, %v1175_v42, %v1177_v38 }
 0x1d7   : > { %1299 = vmatmul.mubr.bf16.vlgmr.msra.gmra.mrb[0].mxu1 %v1589_v41  ;;  %v1182_v46 = vsel %vm1180_vm6, %v1177_v38, %v1179_v43 }
 0x1d8   : > { %1327 = vmatprep.subr.bf16.mxu0 %v1182_v46 }
 0x1d9   : > { %1328 = vmatpush1.bf16.msra.mxu0 %v1181_v45 }
 0x1dc   : > { %1340 = vmatmul.mubr.bf16.vlgmr.msra.gmra.mrb[0].mxu0 %v1591_v47 }
 0x1e7   : > { %v1247_v57 = vpop.permute.xlu0 %1246 }
 0x2aa   : > { %v1300_v50 = vpop.f32.mrb[0].mxu1 }
 0x2ab   : > { %v1302_v44 = vpop.f32.mrb[1].mxu1  ;;  %v1301_v59 = vadd.f32 %v1300_v50, %v1247_v57 }
 0x2ac   : > { %v1304_v55 = vpop.f32.mrb[2].mxu1  ;;  %v1303_v60 = vadd.f32 %v1302_v44, %v1247_v57 }
 0x2ad   : > { %v1305_v58 = vpop.f32.mrb[3].mxu1 }
 0x2af   : > { %v1341_v51 = vpop.f32.mrb[0].mxu0 }
 0x2b0   : > { %v1342_v61 = vadd.f32 %v1341_v51, %v1301_v59  ;;  %v1343_v0 = vpop.f32.mrb[1].mxu0 }
 0x2b1   : > { %v1344_v8 = vadd.f32 %v1343_v0, %v1303_v60  ;;  %v1345_v3 = vpop.f32.mrb[2].mxu0 }
 0x2b2   : > { %v1346_v12 = vpop.f32.mrb[3].mxu0  ;;  %v1370_v13 = vsel %vm1368_vm8, %v1342_v61, 0.0 }
 0x2b3   : > { %v1616_v14 = vpack.c.bf16 %v1344_v8, %v1342_v61  ;;  %v1371_v4 = vsel %vm1369_vm9, %v1344_v8, 0.0  ;;  %v1375_v5 = vmul.f32 %v1370_v13, %v1370_v13 }
 0x2b4   : > { %v1372_v63 = vadd.f32 %v1371_v4, %v1370_v13  ;;  %v1376_v6 = vmul.f32 %v1371_v4, %v1371_v4 }
 0x2b5   : > { %1356 = vst [vmem:[%s698_s14] sm:$0xff] %v1616_v14 }
 0x2b6   : > { %1373 = vadd.xlane.f32.xlu1 %v1372_v63  ;;  %v1377_v7 = vadd.f32 %v1376_v6, %v1375_v5 }
 0x2b8   : > { %1378 = vadd.xlane.f32.xlu0 %v1377_v7 }
 0x343   : > { %v1374_v9 = vpop.xlane.xlu1 %1373 }
 0x345   : > { %v1379_v10 = vpop.xlane.xlu0 %1378 }
 0x346   : > { %v1381_v62 = vsel %vm1008_vm14, %v1374_v9, %v1379_v10 }
 0x347   : > { %1383 = vst.msk [vmem:[%s703_s17] sm:$0xff] %vm1382_vm10, %v1381_v62 }
 0x348 PF: > { %s2264_s23 = sld [smem:[#allocation7_spill]]  ;;  %s2265_s12 = sld [smem:[#allocation9_spill]] }
 0x349   : > { %s2266_s21 = sld [smem:[#allocation6_spill]]  ;;  %s2267_s22 = sld [smem:[#allocation8_spill]] }
 0x34a   : > { %s2268_s17 = smov %s1757_s18  ;;  %s2269_s18 = smov %s1951_s15 }
 0x34b   : > { %s2270_s19 = smov %s1765_s20 }
 0x34e   : > { %p19_p9 = scmp.ge.s32.totalorder %s2264_s23, 4   ;;  %s2271_s20 = smov %s2265_s12 }
 0x350   :  { %21 = sbr.rel (!%p19_p9) target bundleno = 9 (0x9), region = 252 }

// kernel: encoder_forward.15
= control target key start
LH: loop header
LB: loop body
LE: loop exit
PB: predicated region body
PF: predicated region fallthrough
CT: control target
= control target key end

     0   :  { %s557_s18 = smov 0   ;;  %s559_s19 = smov 0   ;;  %s627_s0 = inlined_call_operand.vmem [shape: bf16[16,512], index: 0, kind: input, shape index: {}]   ;;  %s628_s1 = inlined_call_operand.vmem [shape: f32[16,1], index: 1, kind: input, shape index: {}]   ;;  %s629_s2 = inlined_call_operand.vmem [shape: f32[16,1], index: 2, kind: input, shape index: {}]   ;;  %s630_s3 = inlined_call_operand.vmem [shape: f32[8,16], index: 3, kind: input, shape index: {}]   ;;  %s631_s4 = inlined_call_operand.vmem [shape: f32[8,1], index: 4, kind: input, shape index: {}]   ;;  %s632_s5 = inlined_call_operand.vmem [shape: f32[8,512], index: 5, kind: output, shape index: {}]  }
   0x1   :  { %s561_s20 = smov 0  }
   0x2 LB: > { %s454_s21 = sadd.s32 4294967295, %s523_s20   ;;  %s574_s22 = sadd.s32 1, %s523_s20   ;;  %s523_s20 = sphi %s561_s20, %s635_s20   ;;  %s519_s19 = sphi %s559_s19, %s634_s19   ;;  %s515_s18 = sphi %s557_s18, %s633_s18  }
   0x3   : > { %s19_s23 = ssub.s32 %s523_s20, %s574_s22  ;;  %s22_s24 = sadd.s32 1, %s519_s19 }
   0x4   : > { %p20_p0 = scmp.eq.s32.totalorder %s19_s23, 0  ;;  %p29_p1 = scmp.ne.s32.totalorder %s519_s19, %s515_s18 }
   0x5   : > { %p30_p2 = scmp.eq.s32.totalorder %s523_s20, 0  ;;  %p457_p4 = scmp.ge.s32.totalorder %s523_s20, 2 }
   0x6   : > { %s583_s25 = scalar_select %p20_p0, %s519_s19, %s22_s24  }
   0x7   : > { %p31_p3 = por %p30_p2, %p29_p1  ;;  %177 = sbr.rel (%p457_p4) target bundleno = 21 (0x15), region = 32 }
   0xe   : > { %180 = sbr.rel (!%p31_p3) target bundleno = 21 (0x15), region = 36  ;;  %s182_s26 = sand.u32 (%p31_p3), 1, %s519_s19  }
   0xf   : > { %s468_s27 = sshll.u32 (%p31_p3), %s523_s20, 3  ;;  %s458_s28 = sshll.u32 (%p31_p3), %s182_s26, 4 }
  0x10   : > { %s187_s6 = scalar_lea.vmem (%p31_p3), %s627_s0, %s468_s27  ;;  %s184_s7 = scalar_lea.vmem (%p31_p3), [#allocation2], %s458_s28 }
  0x11   : > { %v217_v0 = vld [vmem:[%s187_s6] sm:$0xff] (%p31_p3)  ;;  %v219_v1 = vld [vmem:[%s187_s6 + $0x10] sm:$0xff] (%p31_p3) }
  0x12   : > { %218 = vst [vmem:[%s184_s7] sm:$0xff] (%p31_p3), %v217_v0  ;;  %220 = vst [vmem:[%s184_s7 + $0x8] sm:$0xff] (%p31_p3), %v219_v1 }
  0x15 PF: > { %p461_p5 = scmp.ge.s32.totalorder %s523_s20, 1  ;;  %p225_p6 = scmp.lt.s32.totalorder %s523_s20, 3 }
  0x17   : > { %p226_p7 = pnand %p461_p5, %p225_p6 }
  0x18   : > { %v288_v2 = vld [vmem:[%s629_s2] sm:$0xff] (!%p226_p7)  ;;  %v525_v4 = vmov (!%p226_p7), 0   ;;  %v289_v5 = vld [vmem:[%s629_s2 + $0x8] sm:$0xff] (!%p226_p7)  ;;  %v526_v8 = vmov (!%p226_p7), 0.0   ;;  %s232_s23 = sand.u32 (!%p226_p7), 1, %s515_s18   ;;  %vm315_vm0 = vcmask (!%p226_p7), 130048  }
  0x19   : > { %229 = sbr.rel (%p226_p7) target bundleno = 386 (0x182), region = 74  ;;  %v272_v3 = vld [vmem:[%s628_s1] sm:$0xff] (!%p226_p7)  ;;  %500 = vset.pattern.permute.xlu1 (!%p226_p7), %v525_v4  ;;  %499 = vset.pattern.permute.xlu0 (!%p226_p7), %v525_v4  ;;  %v273_v6 = vld [vmem:[%s628_s1 + $0x8] sm:$0xff] (!%p226_p7)  ;;  %s462_s24 = sshll.u32 (!%p226_p7), %s232_s23, 4 }
  0x1a   : > { %292 = vperm.xlu1 (!%p226_p7), %500, %v288_v2   ;;  %276 = vperm.xlu0 (!%p226_p7), %499, %v272_v3   ;;  %v309_v7 = vld [vmem:[%s631_s4] sm:$0xff] (!%p226_p7)  ;;  %s234_s26 = scalar_lea.vmem (!%p226_p7), [#allocation2], %s462_s24  ;;  %s463_s28 = sshll.u32 (!%p226_p7), %s454_s21, 1 }
  0x1b   : > { %383 = vmatprep.mubr.f32.mxu0 (!%p226_p7), %v526_v8  ;;  %v266_v9 = vld [vmem:[%s234_s26] sm:$0xff] (!%p226_p7)  ;;  %v267_v12 = vld [vmem:[%s234_s26 + $0x8] sm:$0xff] (!%p226_p7)  ;;  %p261_p8 = scmp.lt.s32.totalorder (!%p226_p7), %s463_s28, 3 }
  0x1c   : > { %v268_v10 = vunpack.c.l.bf16 (!%p226_p7), %v266_v9  ;;  %v269_v11 = vunpack.c.h.bf16 (!%p226_p7), %v266_v9  ;;  %v270_v17 = vunpack.c.l.bf16 (!%p226_p7), %v267_v12  ;;  %v271_v18 = vunpack.c.h.bf16 (!%p226_p7), %v267_v12  ;;  %v308_v33 = vld [vmem:[%s630_s3] sm:$0xff] (!%p226_p7) }
  0x1e   : > { %297 = vperm.xlu1 (!%p226_p7), %500, %v289_v5   ;;  %281 = vperm.xlu0 (!%p226_p7), %499, %v273_v6  }
  0x20   : > { %s637_s28 = smov (!%p261_p8, %s463_s28), 3 }
  0x21   : > { %s464_s29 = sshll.u32 %s637_s28, 3 }
  0x22   : > { %312 = vperm.xlu0 %499, %v309_v7   ;;  %s264_s7 = scalar_lea.vmem %s632_s5, %s464_s29 }
  0x99   : > { %v293_v13 = vpop.permute.xlu1 %292  ;;  %v277_v14 = vpop.permute.xlu0 %276 }
  0x9a   : > { %v284_v15 = vmul.f32 %v277_v14, %v268_v10  ;;  %v285_v16 = vmul.f32 %v277_v14, %v269_v11 }
  0x9c   : > { %v300_v20 = vadd.f32 %v293_v13, %v284_v15  ;;  %v301_v23 = vadd.f32 %v293_v13, %v285_v16 }
  0x9d   : > { %v282_v19 = vpop.permute.xlu0 %281  ;;  %v298_v24 = vpop.permute.xlu1 %297 }
  0x9e   : > { %v286_v21 = vmul.f32 %v282_v19, %v270_v17  ;;  %v287_v22 = vmul.f32 %v282_v19, %v271_v18  ;;  %v305_v27 = vmax.f32 %v301_v23, 0.0  ;;  %v304_v29 = vmax.f32 %v300_v20, 0.0 }
  0xa0   : > { %v302_v25 = vadd.f32 %v298_v24, %v286_v21  ;;  %v303_v26 = vadd.f32 %v298_v24, %v287_v22 }
  0xa1   : > { %v313_v34 = vpop.permute.xlu0 %312 }
  0xa2   : > { %v307_v28 = vmax.f32 %v303_v26, 0.0  ;;  %v306_v30 = vmax.f32 %v302_v25, 0.0 }
  0xa4   : > { %v469_v31 = vpack.c.bf16 %v307_v28, %v305_v27  ;;  %v471_v32 = vpack.c.bf16 %v306_v30, %v304_v29 }
  0xa6   : > { %470 = vmatprep.subr.bf16.mxu0 %v469_v31 }
  0xa7   : > { %472 = vmatpush1.bf16.msra.mxu0 %v471_v32 }
  0xaa   : > { %465 = vmatmul.mubr.msk.f32.vlgmr.msra.gmra.mrb[0].mxu0 %vm315_vm0, %v308_v33 }
 0x17d   : > { %v385_v35 = vpop.f32.mrb[0].mxu0 }
 0x17e   : > { %v386_v36 = vadd.f32 %v385_v35, %v313_v34  ;;  %v387_v37 = vpop.f32.mrb[1].mxu0 }
 0x17f   : > { %v388_v38 = vadd.f32 %v387_v37, %v313_v34 }
 0x180   : > { %390 = vst [vmem:[%s264_s7] sm:$0xff] %v386_v36 }
 0x181   : > { %391 = vst [vmem:[%s264_s7 + $0x8] sm:$0xff] %v388_v38 }
 0x182 PF: > { %p12_p9 = scmp.ge.s32.totalorder %s574_s22, 4   ;;  %s633_s18 = smov %s519_s19 }
 0x183   : > { %s634_s19 = smov %s583_s25  ;;  %s635_s20 = smov %s574_s22 }
 0x184   :  { %14 = sbr.rel (!%p12_p9) target bundleno = 2 (0x2), region = 113 }

// kernel: encoder_forward.12
= control target key start
LH: loop header
LB: loop body
LE: loop exit
PB: predicated region body
PF: predicated region fallthrough
CT: control target
= control target key end

     0   :  { %s2055_s0 = inlined_call_operand.vmem [shape: bf16[8,512], index: 0, kind: input, shape index: {}, may-alias: {0,1,2}]   ;;  %s2056_s1 = inlined_call_operand.vmem [shape: bf16[8,512], index: 1, kind: input, shape index: {}, may-alias: {0,1,2}]   ;;  %s2057_s2 = inlined_call_operand.vmem [shape: bf16[8,512], index: 2, kind: input, shape index: {}, may-alias: {0,1,2}]   ;;  %s2058_s3 = inlined_call_operand.vmem [shape: f32[1,512], index: 3, kind: input, shape index: {}, may-alias: {3,4,5}]   ;;  %s2059_s4 = inlined_call_operand.vmem [shape: f32[1,512], index: 4, kind: input, shape index: {}, may-alias: {3,4,5}]   ;;  %s2060_s5 = inlined_call_operand.vmem [shape: f32[1,512], index: 5, kind: input, shape index: {}, may-alias: {3,4,5}]   ;;  %s2061_s6 = inlined_call_operand.vmem [shape: f32[8,1], index: 6, kind: input, shape index: {}]   ;;  %s2062_s7 = inlined_call_operand.vmem [shape: f32[8,1], index: 7, kind: input, shape index: {}]   ;;  %s2063_s8 = inlined_call_operand.vmem [shape: bf16[16,216], index: 8, kind: input, shape index: {}]   ;;  %s2064_s9 = inlined_call_operand.vmem [shape: f32[16,1], index: 9, kind: input, shape index: {}]   ;;  %s2065_s10 = inlined_call_operand.vmem [shape: bf16[16,512], index: 10, kind: input, shape index: {}]   ;;  %s2066_s11 = inlined_call_operand.vmem [shape: bf16[16,512], index: 11, kind: output, shape index: {0}]   ;;  %s2067_s12 = inlined_call_operand.vmem [shape: f32[2,16,2], index: 12, kind: output, shape index: {1}]  }
   0x1   :  { %2068 = sst [smem:[#allocation5_spill]] %s2061_s6 }
   0x2   :  { %2069 = sst [smem:[#allocation6_spill]] %s2062_s7 }
   0x3   :  { %2070 = sst [smem:[#allocation7_spill]] %s2065_s10 }
   0x4   :  { %s1866_s21 = smov 0   ;;  %s1868_s22 = smov 0  }
   0x5   :  { %s1870_s23 = smov 0  }
   0x6 LB: > { %s1879_s24 = sadd.s32 4294967295, %s1772_s23   ;;  %s1881_s25 = sadd.s32 1, %s1772_s23   ;;  %s1772_s23 = sphi %s1870_s23, %s2077_s23   ;;  %s1768_s22 = sphi %s1868_s22, %s2076_s22   ;;  %s1764_s21 = sphi %s1866_s21, %s2075_s21  }
   0x7   : > { %s299_s26 = ssub.s32 %s1772_s23, %s1881_s25  ;;  %s302_s27 = sadd.s32 1, %s1768_s22 }
   0x8   : > { %p300_p0 = scmp.eq.s32.totalorder %s299_s26, 0  ;;  %p309_p1 = scmp.ne.s32.totalorder %s1768_s22, %s1764_s21 }
   0x9   : > { %p310_p2 = scmp.eq.s32.totalorder %s1772_s23, 0  ;;  %p339_p3 = scmp.eq.s32.totalorder %s1879_s24, 1 }
   0xa   : > { %s1889_s28 = scalar_select %p300_p0, %s1768_s22, %s302_s27  }
   0xb   : > { %p311_p4 = por %p310_p2, %p309_p1  ;;  %p1891_p5 = por %p339_p3, %p309_p1 }
   0xc   : > { %p1582_p6 = scmp.ge.s32.totalorder %s1772_s23, 2 }
   0xe   : > { %399 = sbr.rel (%p1582_p6) target bundleno = 32 (0x20), region = 32 }
  0x15   : > { %477 = sbr.rel (!%p311_p4) target bundleno = 32 (0x20), region = 60  ;;  %s479_s30 = sand.u32 (%p311_p4), 1, %s1768_s22  }
  0x16   : > { %s1675_s13 = sshll.u32 (%p311_p4), %s1772_s23, 3  ;;  %s1583_s14 = sshll.u32 (%p311_p4), %s479_s30, 4 }
  0x17   : > { %s2072_s10 = sld [smem:[#allocation7_spill]] (%p311_p4)  ;;  %s481_s18 = scalar_lea.vmem (%p311_p4), [#allocation3], %s1583_s14 }
  0x1d   : > { %s484_s17 = scalar_lea.vmem %s2072_s10, %s1675_s13 }
  0x1e   : > { %v514_v0 = vld [vmem:[%s484_s17] sm:$0xff]  ;;  %v516_v1 = vld [vmem:[%s484_s17 + $0x10] sm:$0xff] }
  0x1f   : > { %515 = vst [vmem:[%s481_s18] sm:$0xff] %v514_v0  ;;  %517 = vst [vmem:[%s481_s18 + $0x8] sm:$0xff] %v516_v1 }
  0x20 PF: > { %p1586_p7 = scmp.ge.s32.totalorder %s1772_s23, 1  ;;  %p522_p8 = scmp.lt.s32.totalorder %s1772_s23, 3 }
  0x22   : > { %p523_p9 = pnand %p1586_p7, %p522_p8 }
  0x23   : > { %s2073_s6 = sld [smem:[#allocation5_spill]] (!%p523_p9)  ;;  %v1774_v3 = vmov (!%p523_p9), 0   ;;  %s2074_s7 = sld [smem:[#allocation6_spill]] (!%p523_p9)  ;;  %v692_v5 = vlaneseq (!%p523_p9)  ;;  %v1096_v53 = vld [vmem:[%s2064_s9] sm:$0xff] (!%p523_p9)  ;;  %vm1252_vm8 = vcmask (!%p523_p9), 719872   ;;  %v1097_v55 = vld [vmem:[%s2064_s9 + $0x8] sm:$0xff] (!%p523_p9) }
  0x24   : > { %526 = sbr.rel (%p523_p9) target bundleno = 782 (0x30e), region = 98  ;;  %1743 = vset.pattern.permute.xlu0 (!%p523_p9), %v1774_v3  ;;  %1744 = vset.pattern.permute.xlu1 (!%p523_p9), %v1774_v3  ;;  %s1908_s30 = sshll.u32 (!%p523_p9), %s1879_s24, 1  ;;  %v1749_v54 = vld [vmem:[%s2063_s8 + $0x4] ss:$8 sps:$4 sm:$0xff] (!%p523_p9)   ;;  %vm780_vm9 = vcmask (!%p523_p9), 1043456   ;;  %vm782_vm10 = vcmask (!%p523_p9), 351232  }
  0x25   : > { %s1590_s23 = sadd.s32 (!%p523_p9), 4294967295, %s1908_s30  ;;  %p626_p11 = scmp.lt.s32.totalorder (!%p523_p9), %s1908_s30, 3  ;;  %v1913_v6 = vshrl.u32 (!%p523_p9), %v692_v5, 7  ;;  %1655 = vmatprep.mubr.msk.bf16.mxu0 (!%p523_p9), %vm1252_vm8, %v1749_v54  ;;  %vm793_vm11 = vcmask (!%p523_p9), 343040   ;;  %vm804_vm12 = vcmask (!%p523_p9), 334848   ;;  %vm815_vm13 = vcmask (!%p523_p9), 302080  }
  0x26   : > { %p615_p10 = scmp.gt.s32.totalorder (!%p523_p9), %s1590_s23, 0  ;;  %p1591_p12 = scmp.lt.s32.totalorder (!%p523_p9), %s1590_s23, 3  ;;  %vm826_vm14 = vcmask (!%p523_p9), 293888   ;;  %vm837_vm15 = vcmask (!%p523_p9), 285696   ;;  %vm942_vm8 = vcmask (!%p523_p9), 1006592  }
  0x27   : > { %v1921_v7 = vsub.s32 (!%p523_p9), 0, %v1913_v6  ;;  %v698_v9 = vsub.s32 (!%p523_p9), 1, %v1913_v6  ;;  %s1777_s10 = smov (!%p523_p9), 41   ;;  %s1679_s16 = sadd.s32 (!%p523_p9), 2, %s1908_s30 }
  0x28   : > { %p633_p13 = scmp.lt.s32.totalorder (!%p523_p9), %s1679_s16, 3  ;;  %s1781_s19 = smov (!%p523_p9), 31  }
  0x29   : > { %v706_v2 = vld [vmem:[%s2073_s6] sm:$0xff] (!%p523_p9)  ;;  %s1775_s6 = smov (!%p523_p9), 42   ;;  %s1782_s20 = smov (!%p523_p9), 30  }
  0x2a   : > { %709 = vperm.xlu0 (!%p523_p9), %1743, %v706_v2   ;;  %v716_v4 = vld [vmem:[%s2074_s7] sm:$0xff] (!%p523_p9)  ;;  %s1783_s27 = smov (!%p523_p9), 29   ;;  %s1792_s15 = smov (!%p523_p9), 99  }
  0x2b   : > { %s2079_s23 = smov (!%p615_p10, %s1590_s23), 0  ;;  %s2083_s16 = smov (!%p633_p13, %s1679_s16), 3 }
  0x2c   : > { %s627_s13 = scalar_select %p626_p11, %s1908_s30, 3 }
  0x2d   : > { %s2081_s23 = smov (!%p1591_p12, %s2079_s23), 3  ;;  %s2085_s16 = smov (!%p633_p13, %s2083_s16), 3 }
  0x2e   : > { %719 = vperm.xlu0 %1743, %v716_v4   ;;  %s1598_s14 = sshll.u32 %s627_s13, 2  ;;  %s1918_s17 = scalar_lea.vmem %s2059_s4, %s627_s13 }
  0x2f   : > { %s1596_s18 = sshll.u32 %s2081_s23, 2  ;;  %s629_s26 = scalar_lea.vmem %s2056_s1, %s1598_s14  ;;  %v689_v8 = vld [vmem:[%s1918_s17] sm:$0x3] }
  0x30   : > { %s649_s7 = scalar_lea.vmem %s2058_s3, %s2081_s23  ;;  %s620_s13 = scalar_lea.vmem %s2055_s0, %s1596_s18  ;;  %v679_v10 = vld [vmem:[%s629_s26] sm:$0xff]  ;;  %v695_v11 = vrot.slane %v689_v8, %v1921_v7  ;;  %v699_v13 = vrot.slane %v689_v8, %v698_v9 }
  0x31   : > { %v688_v12 = vld [vmem:[%s649_s7] sm:$0x1]  ;;  %v1618_v15 = vcombine.low %v679_v10, %v679_v10  ;;  %v1619_v16 = vcombine.high %v679_v10, %v679_v10  ;;  %s1776_s7 = smov 43   ;;  %s1778_s23 = smov 37  }
  0x32   : > { %v678_v14 = vld [vmem:[%s620_s13] sm:$0xf]  ;;  %vm730_vm0 = vcmp.gt.f32.partialorder %v688_v12, 0.5  ;;  %vm731_vm1 = vcmp.gt.f32.partialorder %v695_v11, 0.5  ;;  %vm732_vm2 = vcmp.gt.f32.partialorder %v699_v13, 0.5  ;;  %s1779_s14 = smov 36  }
  0x33   : > { %v702_v17 = vunpack.c.l.bf16 %v678_v14  ;;  %v703_v18 = vunpack.c.l.bf16 %v1618_v15  ;;  %v704_v19 = vunpack.c.l.bf16 %v1619_v16  ;;  %v734_v20 = vsel %vm730_vm0, 1, %v1774_v3  ;;  %s1780_s18 = smov 35   ;;  %s1603_s26 = sshll.u32 %s2085_s16, 2 }
  0x34   : > { %v735_v21 = vsel %vm731_vm1, 1, %v1774_v3  ;;  %v736_v23 = vsel %vm732_vm2, 1, %v1774_v3  ;;  %v741_v24 = vrot.slane %v734_v20, %v1921_v7  ;;  %s638_s30 = scalar_lea.vmem %s2057_s2, %s1603_s26  ;;  %s1790_s26 = smov 122   ;;  %vm848_vm0 = vcmask 252928  }
  0x35   : > { %v745_v25 = vrot.slane %v735_v21, %v1921_v7  ;;  %v749_v30 = vrot.slane %v736_v23, %v1921_v7  ;;  %v680_v42 = vld [vmem:[%s638_s30] sm:$0xf]  ;;  %s1793_s13 = smov 98   ;;  %s1794_s30 = smov 97   ;;  %vm859_vm1 = vcmask 244736   ;;  %vm870_vm2 = vcmask 236544  }
  0x36   : > { %vm754_vm3 = vcmp.eq.s32.totalorder %v741_v24, 1  ;;  %v705_v44 = vunpack.c.l.bf16 %v680_v42  ;;  %p672_p0 = scmp.lt.s32.totalorder %s1879_s24, 1 }
  0x37   : > { %vm755_vm4 = vcmp.eq.s32.totalorder %v745_v25, 1  ;;  %vm756_vm5 = vcmp.eq.s32.totalorder %v749_v30, 1 }
  0xa9   : > { %v1939_v22 = vpop.permute.xlu0 %709 }
  0xaa   : > { %v712_v26 = vmul.f32 %v1939_v22, %v702_v17  ;;  %v713_v27 = vmul.f32 %v1939_v22, %v703_v18  ;;  %v714_v28 = vmul.f32 %v1939_v22, %v704_v19  ;;  %v715_v45 = vmul.f32 %v1939_v22, %v705_v44 }
  0xad   : > { %v1947_v29 = vpop.permute.xlu0 %719 }
  0xae   : > { %v722_v31 = vadd.f32 %v1947_v29, %v712_v26  ;;  %v723_v32 = vadd.f32 %v1947_v29, %v713_v27  ;;  %v724_v33 = vadd.f32 %v1947_v29, %v714_v28  ;;  %v725_v47 = vadd.f32 %v1947_v29, %v715_v45 }
  0xb0   : > { %v726_v34 = vmax.f32 %v722_v31, 0.0  ;;  %v727_v35 = vmax.f32 %v723_v32, 0.0  ;;  %v728_v36 = vmax.f32 %v724_v33, 0.0  ;;  %v729_v50 = vmax.f32 %v725_v47, 0.0 }
  0xb2   : > { %v758_v37 = vsel %vm754_vm3, %v726_v34, 0.0  ;;  %v759_v38 = vsel %vm755_vm4, %v727_v35, 0.0  ;;  %v760_v40 = vsel %vm756_vm5, %v728_v36, 0.0  ;;  %vm881_vm3 = vcmask 56320  }
  0xb3   : > { %v1685_v39 = vpack.c.bf16 %v759_v38, %v758_v37  ;;  %v1686_v41 = vpack.c.bf16 %v760_v40, %v760_v40  ;;  %v1964_v49 = vpack.c.bf16 %v760_v40, %v759_v38  ;;  %vm892_vm4 = vcmask 48128  }
  0xb4   : > { %vm903_vm5 = vcmask 39936  }
  0xb5   : > { %786 = vrot.lane.b32.xlu0 %v1685_v39, %s1775_s6  ;;  %774 = vrot.lane.b32.xlu1 %v1685_v39, %s1776_s7 }
  0xb9   : > { %797 = vrot.lane.b32.xlu0 %v1685_v39, %s1777_s10  ;;  %776 = vrot.lane.b32.xlu1 %v1686_v41, %s1776_s7  ;;  %s1796_s7 = smov 92  }
  0xbd   : > { %808 = vrot.lane.b32.xlu0 %v1685_v39, %s1778_s23  ;;  %788 = vrot.lane.b32.xlu1 %v1686_v41, %s1775_s6  ;;  %s1795_s6 = smov 93  }
  0xc1   : > { %819 = vrot.lane.b32.xlu0 %v1685_v39, %s1779_s14  ;;  %799 = vrot.lane.b32.xlu1 %v1686_v41, %s1777_s10  ;;  %s665_s10 = scalar_lea.vmem %s2060_s5, %s2085_s16  ;;  %s1787_s16 = smov 1  }
  0xc2   : > { %v690_v43 = vld [vmem:[%s665_s10] sm:$0x1]  ;;  %s1797_s10 = smov 91  }
  0xc3   : > { %vm733_vm6 = vcmp.gt.f32.partialorder %v690_v43, 0.5 }
  0xc4   : > { %v737_v46 = vsel %vm733_vm6, 1, %v1774_v3  ;;  %vm914_vm6 = vcmask 7168  }
  0xc5   : > { %830 = vrot.lane.b32.xlu0 %v1685_v39, %s1780_s18  ;;  %810 = vrot.lane.b32.xlu1 %v1686_v41, %s1778_s23  ;;  %s1784_s23 = smov 7   ;;  %v753_v48 = vrot.slane %v737_v46, %v1921_v7 }
  0xc7   : > { %vm757_vm7 = vcmp.eq.s32.totalorder %v753_v48, 1 }
  0xc8   : > { %v761_v51 = vsel %vm757_vm7, %v729_v50, 0.0  ;;  %vm931_vm7 = vcmask 1039360  }
  0xc9   : > { %841 = vrot.lane.b32.xlu0 %v1685_v39, %s1781_s19  ;;  %821 = vrot.lane.b32.xlu1 %v1686_v41, %s1779_s14  ;;  %s1785_s14 = smov 6   ;;  %v1688_v52 = vpack.c.bf16 %v761_v51, %v761_v51 }
  0xcd   : > { %852 = vrot.lane.b32.xlu0 %v1685_v39, %s1782_s20  ;;  %832 = vrot.lane.b32.xlu1 %v1686_v41, %s1780_s18  ;;  %s1786_s18 = smov 5  }
  0xd1   : > { %863 = vrot.lane.b32.xlu0 %v1685_v39, %s1783_s27  ;;  %843 = vrot.lane.b32.xlu1 %v1686_v41, %s1781_s19  ;;  %s1788_s19 = smov 127  }
  0xd5   : > { %874 = vrot.lane.b32.xlu0 %v1685_v39, %s1784_s23  ;;  %854 = vrot.lane.b32.xlu1 %v1686_v41, %s1782_s20  ;;  %s1789_s20 = smov 123  }
  0xd9   : > { %885 = vrot.lane.b32.xlu0 %v1685_v39, %s1785_s14  ;;  %865 = vrot.lane.b32.xlu1 %v1686_v41, %s1783_s27  ;;  %s1791_s27 = smov 121  }
  0xdd   : > { %896 = vrot.lane.b32.xlu0 %v1685_v39, %s1786_s18  ;;  %876 = vrot.lane.b32.xlu1 %v1686_v41, %s1784_s23  ;;  %s1798_s23 = smov 87  }
  0xe1   : > { %907 = vrot.lane.b32.xlu0 %v1685_v39, %s1787_s16  ;;  %887 = vrot.lane.b32.xlu1 %v1686_v41, %s1785_s14  ;;  %s1799_s14 = smov 86  }
  0xe5   : > { %924 = vrot.lane.b32.xlu0 %v1964_v49, %s1788_s19  ;;  %898 = vrot.lane.b32.xlu1 %v1686_v41, %s1786_s18  ;;  %s1800_s18 = smov 85  }
  0xe9   : > { %935 = vrot.lane.b32.xlu0 %v1964_v49, %s1789_s20  ;;  %909 = vrot.lane.b32.xlu1 %v1686_v41, %s1787_s16 }
  0xed   : > { %946 = vrot.lane.b32.xlu0 %v1964_v49, %s1790_s26  ;;  %926 = vrot.lane.b32.xlu1 %v1688_v52, %s1788_s19  ;;  %s1691_s19 = sshll.u32 (%p1891_p5), %s1879_s24, 3 }
  0xf1   : > { %957 = vrot.lane.b32.xlu0 %v1964_v49, %s1791_s27  ;;  %937 = vrot.lane.b32.xlu1 %v1688_v52, %s1789_s20 }
  0xf5   : > { %968 = vrot.lane.b32.xlu0 %v1964_v49, %s1792_s15  ;;  %948 = vrot.lane.b32.xlu1 %v1688_v52, %s1790_s26 }
  0xf9   : > { %979 = vrot.lane.b32.xlu0 %v1964_v49, %s1793_s13  ;;  %959 = vrot.lane.b32.xlu1 %v1688_v52, %s1791_s27  ;;  %s1383_s27 = scalar_lea.vmem (%p1891_p5), %s2066_s11, %s1691_s19 }
  0xfd   : > { %990 = vrot.lane.b32.xlu0 %v1964_v49, %s1794_s30  ;;  %970 = vrot.lane.b32.xlu1 %v1688_v52, %s1792_s15 }
 0x101   : > { %1001 = vrot.lane.b32.xlu0 %v1964_v49, %s1795_s6  ;;  %981 = vrot.lane.b32.xlu1 %v1688_v52, %s1793_s13 }
 0x105   : > { %1012 = vrot.lane.b32.xlu0 %v1964_v49, %s1796_s7  ;;  %992 = vrot.lane.b32.xlu1 %v1688_v52, %s1794_s30 }
 0x109   : > { %1023 = vrot.lane.b32.xlu0 %v1964_v49, %s1797_s10  ;;  %1003 = vrot.lane.b32.xlu1 %v1688_v52, %s1795_s6  ;;  %s529_s6 = sand.u32 1, %s1764_s21  }
 0x10d   : > { %1034 = vrot.lane.b32.xlu0 %v1964_v49, %s1798_s23  ;;  %1014 = vrot.lane.b32.xlu1 %v1688_v52, %s1796_s7  ;;  %s2024_s7 = sshll.u32 %s529_s6, 4 }
 0x10e   : > { %s605_s21 = scalar_lea.vmem [#allocation4], %s2024_s7 }
 0x111   : > { %1045 = vrot.lane.b32.xlu0 %v1964_v49, %s1799_s14  ;;  %1025 = vrot.lane.b32.xlu1 %v1688_v52, %s1797_s10  ;;  %s531_s10 = scalar_lea.vmem [#allocation3], %s2024_s7 }
 0x115   : > { %1056 = vrot.lane.b32.xlu0 %v1964_v49, %s1800_s18  ;;  %1036 = vrot.lane.b32.xlu1 %v1688_v52, %s1798_s23 }
 0x119   : > { %1100 = vperm.xlu0 %1743, %v1096_v53   ;;  %1047 = vrot.lane.b32.xlu1 %v1688_v52, %s1799_s14 }
 0x11d   : > { %1058 = vrot.lane.b32.xlu1 %v1688_v52, %s1800_s18 }
 0x121   : > { %1105 = vperm.xlu1 %1744, %v1097_v55  }
 0x127   : > { %v787_v56 = vpop.permute.xlu0 %786  ;;  %v775_v57 = vpop.permute.xlu1 %774 }
 0x128   : > { %v778_v61 = vrot.slane %v775_v57, 4  ;;  %v790_v0 = vrot.slane %v787_v56, 4 }
 0x12b   : > { %v798_v58 = vpop.permute.xlu0 %797  ;;  %v777_v59 = vpop.permute.xlu1 %776 }
 0x12c   : > { %v779_v60 = vrot.slane %v777_v59, 4  ;;  %v801_v15 = vrot.slane %v798_v58, 4 }
 0x12e   : > { %v781_v2 = vsel %vm780_vm9, %v778_v61, %v779_v60 }
 0x12f   : > { %v809_v62 = vpop.permute.xlu0 %808  ;;  %v789_v63 = vpop.permute.xlu1 %788  ;;  %v783_v10 = vsel %vm782_vm10, %v775_v57, %v781_v2  ;;  %vm953_vm10 = vcmask 998400  }
 0x130   : > { %v791_v1 = vrot.slane %v789_v63, 4  ;;  %v812_v18 = vrot.slane %v809_v62, 4 }
 0x132   : > { %v792_v4 = vsel %vm780_vm9, %v790_v0, %v791_v1 }
 0x133   : > { %v820_v5 = vpop.permute.xlu0 %819  ;;  %v800_v8 = vpop.permute.xlu1 %799  ;;  %v794_v11 = vsel %vm793_vm11, %v787_v56, %v792_v4  ;;  %vm964_vm11 = vcmask 990208  }
 0x134   : > { %v802_v12 = vrot.slane %v800_v8, 4  ;;  %v1627_v13 = vcombine.high %v783_v10, %v794_v11  ;;  %v1626_v14 = vcombine.low %v783_v10, %v794_v11  ;;  %v823_v29 = vrot.slane %v820_v5, 4 }
 0x136   : > { %1263 = vmatprep.subr.bf16.mxu0 %v1627_v13  ;;  %v803_v19 = vsel %vm780_vm9, %v801_v15, %v802_v12 }
 0x137   : > { %v831_v16 = vpop.permute.xlu0 %830  ;;  %1264 = vmatpush1.bf16.msra.mxu0 %v1626_v14  ;;  %v811_v17 = vpop.permute.xlu1 %810  ;;  %v805_v24 = vsel %vm804_vm12, %v798_v58, %v803_v19  ;;  %vm975_vm12 = vcmask 809984  }
 0x138   : > { %v813_v20 = vrot.slane %v811_v17, 4  ;;  %v834_v32 = vrot.slane %v831_v16, 4 }
 0x13a   : > { %v814_v21 = vsel %vm780_vm9, %v812_v18, %v813_v20 }
 0x13b   : > { %v842_v22 = vpop.permute.xlu0 %841  ;;  %v822_v23 = vpop.permute.xlu1 %821  ;;  %v816_v25 = vsel %vm815_vm13, %v809_v62, %v814_v21  ;;  %vm986_vm13 = vcmask 801792  }
 0x13c   : > { %v824_v26 = vrot.slane %v822_v23, 4  ;;  %v1629_v27 = vcombine.high %v805_v24, %v816_v25  ;;  %v1628_v28 = vcombine.low %v805_v24, %v816_v25  ;;  %v845_v43 = vrot.slane %v842_v22, 4 }
 0x13e   : > { %1265 = vmatprep.subr.bf16.mxu0 %v1629_v27  ;;  %v825_v33 = vsel %vm780_vm9, %v823_v29, %v824_v26 }
 0x13f   : > { %v853_v30 = vpop.permute.xlu0 %852  ;;  %1266 = vmatpush1.bf16.msra.mxu0 %v1628_v28  ;;  %v833_v31 = vpop.permute.xlu1 %832  ;;  %v827_v38 = vsel %vm826_vm14, %v820_v5, %v825_v33  ;;  %vm997_vm14 = vcmask 793600  }
 0x140   : > { %v835_v34 = vrot.slane %v833_v31, 4  ;;  %v856_v46 = vrot.slane %v853_v30, 4 }
 0x142   : > { %v836_v35 = vsel %vm780_vm9, %v834_v32, %v835_v34 }
 0x143   : > { %v864_v36 = vpop.permute.xlu0 %863  ;;  %v844_v37 = vpop.permute.xlu1 %843  ;;  %v838_v39 = vsel %vm837_vm15, %v831_v16, %v836_v35  ;;  %vm1008_vm15 = vcmask 760832  }
 0x144   : > { %v846_v40 = vrot.slane %v844_v37, 4  ;;  %v1631_v41 = vcombine.high %v827_v38, %v838_v39  ;;  %v1630_v42 = vcombine.low %v827_v38, %v838_v39  ;;  %v867_v58 = vrot.slane %v864_v36, 4 }
 0x146   : > { %1267 = vmatprep.subr.bf16.mxu0 %v1631_v41  ;;  %v847_v47 = vsel %vm780_vm9, %v845_v43, %v846_v40 }
 0x147   : > { %v875_v44 = vpop.permute.xlu0 %874  ;;  %1268 = vmatpush1.bf16.msra.mxu0 %v1630_v42  ;;  %v855_v45 = vpop.permute.xlu1 %854  ;;  %v849_v53 = vsel %vm848_vm0, %v842_v22, %v847_v47  ;;  %vm1019_vm0 = vcmask 752640  }
 0x148   : > { %v857_v48 = vrot.slane %v855_v45, 4  ;;  %v878_v61 = vrot.slane %v875_v44, 4 }
 0x14a   : > { %v858_v50 = vsel %vm780_vm9, %v856_v46, %v857_v48 }
 0x14b   : > { %v886_v51 = vpop.permute.xlu0 %885  ;;  %v866_v52 = vpop.permute.xlu1 %865  ;;  %v860_v54 = vsel %vm859_vm1, %v853_v30, %v858_v50  ;;  %vm1030_vm1 = vcmask 744448  }
 0x14c   : > { %v868_v55 = vrot.slane %v866_v52, 4  ;;  %v1633_v56 = vcombine.high %v849_v53, %v860_v54  ;;  %v1632_v57 = vcombine.low %v849_v53, %v860_v54  ;;  %v889_v12 = vrot.slane %v886_v51, 4 }
 0x14e   : > { %1269 = vmatprep.subr.bf16.mxu0 %v1633_v56  ;;  %v869_v62 = vsel %vm780_vm9, %v867_v58, %v868_v55 }
 0x14f   : > { %v897_v59 = vpop.permute.xlu0 %896  ;;  %1270 = vmatpush1.bf16.msra.mxu0 %v1632_v57  ;;  %v877_v60 = vpop.permute.xlu1 %876  ;;  %v871_v4 = vsel %vm870_vm2, %v864_v36, %v869_v62  ;;  %vm1041_vm2 = vcmask 711680  }
 0x150   : > { %v879_v63 = vrot.slane %v877_v60, 4  ;;  %v900_v15 = vrot.slane %v897_v59, 4 }
 0x152   : > { %v880_v0 = vsel %vm780_vm9, %v878_v61, %v879_v63 }
 0x153   : > { %v908_v1 = vpop.permute.xlu0 %907  ;;  %v888_v2 = vpop.permute.xlu1 %887  ;;  %v882_v5 = vsel %vm881_vm3, %v875_v44, %v880_v0  ;;  %vm1052_vm3 = vcmask 703488  }
 0x154   : > { %v890_v8 = vrot.slane %v888_v2, 4  ;;  %v1635_v10 = vcombine.high %v871_v4, %v882_v5  ;;  %v1634_v11 = vcombine.low %v871_v4, %v882_v5  ;;  %v911_v23 = vrot.slane %v908_v1, 4 }
 0x156   : > { %1271 = vmatprep.subr.bf16.mxu0 %v1635_v10  ;;  %v891_v16 = vsel %vm780_vm9, %v889_v12, %v890_v8 }
 0x157   : > { %v925_v13 = vpop.permute.xlu0 %924  ;;  %1272 = vmatpush1.bf16.msra.mxu0 %v1634_v11  ;;  %v899_v14 = vpop.permute.xlu1 %898  ;;  %v893_v21 = vsel %vm892_vm4, %v886_v51, %v891_v16  ;;  %vm1063_vm4 = vcmask 695296  }
 0x158   : > { %v901_v17 = vrot.slane %v899_v14, 4  ;;  %v928_v34 = vrot.slane %v925_v13, 4 }
 0x15a   : > { %v902_v18 = vsel %vm780_vm9, %v900_v15, %v901_v17 }
 0x15b   : > { %v936_v19 = vpop.permute.xlu0 %935  ;;  %v910_v20 = vpop.permute.xlu1 %909  ;;  %v904_v22 = vsel %vm903_vm5, %v897_v59, %v902_v18 }
 0x15c   : > { %v912_v24 = vrot.slane %v910_v20, 4  ;;  %v1637_v25 = vcombine.high %v893_v21, %v904_v22  ;;  %v1636_v26 = vcombine.low %v893_v21, %v904_v22  ;;  %v939_v37 = vrot.slane %v936_v19, 4 }
 0x15e   : > { %v913_v27 = vsel %vm780_vm9, %v911_v23, %v912_v24  ;;  %1273 = vmatprep.subr.bf16.mxu0 %v1637_v25 }
 0x15f   : > { %v947_v28 = vpop.permute.xlu0 %946  ;;  %1274 = vmatpush1.bf16.msra.mxu0 %v1636_v26  ;;  %v927_v29 = vpop.permute.xlu1 %926  ;;  %v915_v30 = vsel %vm914_vm6, %v908_v1, %v913_v27 }
 0x160   : > { %v929_v31 = vrot.slane %v927_v29, 4  ;;  %v1639_v32 = vcombine.high %v915_v30, %v1964_v49  ;;  %v1638_v33 = vcombine.low %v915_v30, %v1964_v49  ;;  %v950_v47 = vrot.slane %v947_v28, 4 }
 0x162   : > { %1275 = vmatprep.subr.bf16.mxu0 %v1639_v32  ;;  %v930_v38 = vsel %vm780_vm9, %v928_v34, %v929_v31 }
 0x163   : > { %v958_v35 = vpop.permute.xlu0 %957  ;;  %1276 = vmatpush1.bf16.msra.mxu0 %v1638_v33  ;;  %v938_v36 = vpop.permute.xlu1 %937  ;;  %v932_v43 = vsel %vm931_vm7, %v925_v13, %v930_v38 }
 0x164   : > { %v940_v39 = vrot.slane %v938_v36, 4  ;;  %v961_v51 = vrot.slane %v958_v35, 4 }
 0x166   : > { %v941_v40 = vsel %vm780_vm9, %v939_v37, %v940_v39 }
 0x167   : > { %v969_v41 = vpop.permute.xlu0 %968  ;;  %v949_v42 = vpop.permute.xlu1 %948  ;;  %v943_v44 = vsel %vm942_vm8, %v936_v19, %v941_v40  ;;  %vm1366_vm8 = vcmask 15360  }
 0x168   : > { %v951_v45 = vrot.slane %v949_v42, 4  ;;  %v1641_v46 = vcombine.high %v932_v43, %v943_v44  ;;  %v1640_v49 = vcombine.low %v932_v43, %v943_v44  ;;  %v972_v62 = vrot.slane %v969_v41, 4 }
 0x16a   : > { %1277 = vmatprep.subr.bf16.mxu0 %v1641_v46  ;;  %v952_v52 = vsel %vm780_vm9, %v950_v47, %v951_v45 }
 0x16b   : > { %v980_v48 = vpop.permute.xlu0 %979  ;;  %1278 = vmatpush1.bf16.msra.mxu0 %v1640_v49  ;;  %v960_v50 = vpop.permute.xlu1 %959  ;;  %v954_v57 = vsel %vm953_vm10, %v947_v28, %v952_v52 }
 0x16c   : > { %v962_v53 = vrot.slane %v960_v50, 4  ;;  %v983_v1 = vrot.slane %v980_v48, 4 }
 0x16e   : > { %v963_v54 = vsel %vm780_vm9, %v961_v51, %v962_v53 }
 0x16f   : > { %v991_v55 = vpop.permute.xlu0 %990  ;;  %v971_v56 = vpop.permute.xlu1 %970  ;;  %v965_v58 = vsel %vm964_vm11, %v958_v35, %v963_v54 }
 0x170   : > { %v973_v59 = vrot.slane %v971_v56, 4  ;;  %v1643_v60 = vcombine.high %v954_v57, %v965_v58  ;;  %v1642_v61 = vcombine.low %v954_v57, %v965_v58  ;;  %v994_v16 = vrot.slane %v991_v55, 4 }
 0x172   : > { %1279 = vmatprep.subr.bf16.mxu0 %v1643_v60  ;;  %v974_v2 = vsel %vm780_vm9, %v972_v62, %v973_v59  ;;  %v1747_v62 = vld [vmem:[%s2063_s8] ss:$8 sps:$4 sm:$0xff]  }
 0x173   : > { %v1002_v63 = vpop.permute.xlu0 %1001  ;;  %1280 = vmatpush1.bf16.msra.mxu0 %v1642_v61  ;;  %v982_v0 = vpop.permute.xlu1 %981  ;;  %v976_v11 = vsel %vm975_vm12, %v969_v41, %v974_v2  ;;  %v1307_v2 = vld [vmem:[%s531_s10 + $0x8] sm:$0xff] }
 0x174   : > { %v984_v4 = vrot.slane %v982_v0, 4  ;;  %v1005_v19 = vrot.slane %v1002_v63, 4 }
 0x176   : > { %v985_v5 = vsel %vm780_vm9, %v983_v1, %v984_v4  ;;  %v1306_v1 = vld [vmem:[%s531_s10] sm:$0xff] }
 0x177   : > { %v1013_v8 = vpop.permute.xlu0 %1012  ;;  %v993_v10 = vpop.permute.xlu1 %992  ;;  %v987_v12 = vsel %vm986_vm13, %v980_v48, %v985_v5 }
 0x178   : > { %v995_v13 = vrot.slane %v993_v10, 4  ;;  %v1645_v14 = vcombine.high %v976_v11, %v987_v12  ;;  %v1644_v15 = vcombine.low %v976_v11, %v987_v12  ;;  %v1016_v30 = vrot.slane %v1013_v8, 4 }
 0x179   : > { %v1309_v12 = vunpack.c.h.bf16 %v1306_v1 }
 0x17a   : > { %1281 = vmatprep.subr.bf16.mxu0 %v1645_v14  ;;  %v996_v20 = vsel %vm780_vm9, %v994_v16, %v995_v13  ;;  %v1310_v16 = vunpack.c.l.bf16 %v1307_v2 }
 0x17b   : > { %v1024_v17 = vpop.permute.xlu0 %1023  ;;  %1282 = vmatpush1.bf16.msra.mxu0 %v1644_v15  ;;  %v1004_v18 = vpop.permute.xlu1 %1003  ;;  %v998_v24 = vsel %vm997_vm14, %v991_v55, %v996_v20 }
 0x17c   : > { %v1006_v21 = vrot.slane %v1004_v18, 4  ;;  %v1027_v32 = vrot.slane %v1024_v17, 4 }
 0x17e   : > { %v1007_v22 = vsel %vm780_vm9, %v1005_v19, %v1006_v21  ;;  %v1311_v19 = vunpack.c.h.bf16 %v1307_v2 }
 0x17f   : > { %v1015_v23 = vpop.permute.xlu1 %1014  ;;  %v1009_v25 = vsel %vm1008_vm15, %v1002_v63, %v1007_v22  ;;  %v1035_v29 = vpop.permute.xlu0 %1034  ;;  %v1330_v63 = vld [vmem:[%s1918_s17] sm:$0x3]  ;;  %s673_s17 = scalar_select %p672_p0, %s1879_s24, 1 }
 0x180   : > { %v1017_v26 = vrot.slane %v1015_v23, 4  ;;  %v1647_v27 = vcombine.high %v998_v24, %v1009_v25  ;;  %v1646_v28 = vcombine.low %v998_v24, %v1009_v25  ;;  %v1038_v43 = vrot.slane %v1035_v29, 4 }
 0x181   : > { %vm1331_vm5 = vcmp.gt.f32.partialorder %v1330_v63, 0.5  ;;  %s1684_s23 = sshll.u32 %s673_s17, 4 }
 0x182   : > { %1283 = vmatprep.subr.bf16.mxu0 %v1647_v27  ;;  %v1018_v33 = vsel %vm780_vm9, %v1016_v30, %v1017_v26  ;;  %v1332_v0 = vsel %vm1331_vm5, 1, %v1774_v3  ;;  %s676_s16 = scalar_lea.vmem %s2067_s12, %s1684_s23 }
 0x183   : > { %1284 = vmatpush1.bf16.msra.mxu0 %v1646_v28  ;;  %v1026_v31 = vpop.permute.xlu1 %1025  ;;  %v1046_v36 = vpop.permute.xlu0 %1045  ;;  %v1020_v38 = vsel %vm1019_vm0, %v1013_v8, %v1018_v33  ;;  %v1336_v4 = vrot.slane %v1332_v0, %v1921_v7  ;;  %v1308_v8 = vunpack.c.l.bf16 %v1306_v1  ;;  %v1340_v10 = vrot.slane %v1332_v0, %v698_v9 }
 0x184   : > { %v1028_v34 = vrot.slane %v1026_v31, 4  ;;  %v1049_v45 = vrot.slane %v1046_v36, 4 }
 0x185   : > { %vm1342_vm7 = vcmp.eq.s32.totalorder %v1340_v10, 1 }
 0x186   : > { %v1029_v35 = vsel %vm780_vm9, %v1027_v32, %v1028_v34 }
 0x187   : > { %v1037_v37 = vpop.permute.xlu1 %1036  ;;  %v1031_v39 = vsel %vm1030_vm1, %v1024_v17, %v1029_v35  ;;  %v1057_v47 = vpop.permute.xlu0 %1056 }
 0x188   : > { %v1039_v40 = vrot.slane %v1037_v37, 4  ;;  %v1649_v41 = vcombine.high %v1020_v38, %v1031_v39  ;;  %v1648_v42 = vcombine.low %v1020_v38, %v1031_v39  ;;  %v1060_v53 = vrot.slane %v1057_v47, 4 }
 0x18a   : > { %1285 = vmatprep.subr.bf16.mxu0 %v1649_v41  ;;  %v1040_v46 = vsel %vm780_vm9, %v1038_v43, %v1039_v40 }
 0x18b   : > { %1286 = vmatpush1.bf16.msra.mxu0 %v1648_v42  ;;  %v1048_v44 = vpop.permute.xlu1 %1047  ;;  %v1042_v51 = vsel %vm1041_vm2, %v1035_v29, %v1040_v46 }
 0x18c   : > { %v1050_v49 = vrot.slane %v1048_v44, 4 }
 0x18e   : > { %v1051_v48 = vsel %vm780_vm9, %v1049_v45, %v1050_v49 }
 0x18f   : > { %v1059_v50 = vpop.permute.xlu1 %1058  ;;  %v1053_v52 = vsel %vm1052_vm3, %v1046_v36, %v1051_v48 }
 0x190   : > { %v1061_v54 = vrot.slane %v1059_v50, 4  ;;  %v1651_v55 = vcombine.high %v1042_v51, %v1053_v52  ;;  %v1650_v56 = vcombine.low %v1042_v51, %v1053_v52 }
 0x192   : > { %v1062_v57 = vsel %vm780_vm9, %v1060_v53, %v1061_v54  ;;  %1287 = vmatprep.subr.bf16.mxu0 %v1651_v55 }
 0x193   : > { %v1064_v58 = vsel %vm1063_vm4, %v1057_v47, %v1062_v57  ;;  %1288 = vmatpush1.bf16.msra.mxu0 %v1650_v56 }
 0x194   : > { %v1653_v59 = vcombine.high %v1064_v58, %v1064_v58  ;;  %v1652_v60 = vcombine.low %v1064_v58, %v1064_v58 }
 0x196   : > { %1654 = vmatprep.subr.msk.bf16.mxu0 %vm780_vm9, %v1653_v59  ;;  %v1258_v61 = vsel %vm780_vm9, %v1652_v60, 0  ;;  %vm1341_vm9 = vcmp.eq.s32.totalorder %v1336_v4, 1 }
 0x197   : > { %1290 = vmatpush1.bf16.msra.mxu0 %v1258_v61 }
 0x198   : > { %v1101_v5 = vpop.permute.xlu0 %1100 }
 0x19a   : > { %1296 = vmatmul.mubr.bf16.vlgmr.msra.gmra.mrb[0].mxu0 %v1747_v62 }
 0x1a0   : > { %v1106_v13 = vpop.permute.xlu1 %1105 }
 0x26d   : > { %v1297_v11 = vpop.f32.mrb[0].mxu0 }
 0x26e   : > { %v1298_v14 = vadd.f32 %v1297_v11, %v1101_v5  ;;  %v1299_v15 = vpop.f32.mrb[1].mxu0 }
 0x26f   : > { %v1300_v17 = vadd.f32 %v1299_v15, %v1101_v5  ;;  %v1301_v18 = vpop.f32.mrb[2].mxu0 }
 0x270   : > { %v1312_v3 = vadd.f32 %v1308_v8, %v1298_v14  ;;  %v1302_v20 = vadd.f32 %v1301_v18, %v1106_v13  ;;  %v1303_v21 = vpop.f32.mrb[3].mxu0 }
 0x271   : > { %v1313_v7 = vadd.f32 %v1309_v12, %v1300_v17  ;;  %v1304_v22 = vadd.f32 %v1303_v21, %v1106_v13 }
 0x272   : > { %v1314_v23 = vadd.f32 %v1310_v16, %v1302_v20  ;;  %v1343_v6 = vsel %vm1341_vm9, %v1312_v3, 0.0 }
 0x273   : > { %v1689_v9 = vpack.c.bf16 %v1313_v7, %v1312_v3  ;;  %v1315_v24 = vadd.f32 %v1311_v19, %v1304_v22  ;;  %v1344_v25 = vsel %vm1342_vm7, %v1313_v7, 0.0  ;;  %v1353_v26 = vmul.f32 %v1343_v6, %v1343_v6 }
 0x274   : > { %v1347_v27 = vadd.f32 %v1344_v25, %v1343_v6  ;;  %v1345_v28 = vsel %vm1341_vm9, %v1314_v23, 0.0  ;;  %v1354_v29 = vmul.f32 %v1344_v25, %v1344_v25 }
 0x275   : > { %1328 = vst [vmem:[%s605_s21] sm:$0xff] %v1689_v9  ;;  %v1690_v30 = vpack.c.bf16 %v1315_v24, %v1314_v23  ;;  %v1346_v31 = vsel %vm1342_vm7, %v1315_v24, 0.0  ;;  %v1355_v32 = vmul.f32 %v1345_v28, %v1345_v28 }
 0x276   : > { %1348 = vadd.xlane.f32.xlu0 %v1347_v27  ;;  %v1350_v33 = vadd.f32 %v1346_v31, %v1345_v28  ;;  %v1357_v34 = vadd.f32 %v1354_v29, %v1353_v26  ;;  %v1356_v35 = vmul.f32 %v1346_v31, %v1346_v31 }
 0x277   : > { %1329 = vst [vmem:[%s605_s21 + $0x8] sm:$0xff] %v1690_v30 }
 0x278   : > { %1351 = vadd.xlane.f32.xlu1 %v1350_v33  ;;  %v1360_v36 = vadd.f32 %v1356_v35, %v1355_v32 }
 0x27a   : > { %1358 = vadd.xlane.f32.xlu0 %v1357_v34 }
 0x27c   : > { %v1413_v43 = vld [vmem:[%s605_s21] sm:$0xff] (%p1891_p5) }
 0x27d   : > { %1414 = vst [vmem:[%s1383_s27] sm:$0xff] (%p1891_p5), %v1413_v43 }
 0x27e   : > { %1361 = vadd.xlane.f32.xlu0 %v1360_v36  ;;  %v1415_v44 = vld [vmem:[%s605_s21 + $0x8] sm:$0xff] (%p1891_p5) }
 0x27f   : > { %1416 = vst [vmem:[%s1383_s27 + $0x10] sm:$0xff] (%p1891_p5), %v1415_v44 }
 0x303   : > { %v1349_v37 = vpop.xlane.xlu0 %1348 }
 0x305   : > { %v1352_v40 = vpop.xlane.xlu1 %1351 }
 0x307   : > { %v1359_v38 = vpop.xlane.xlu0 %1358  ;;  %1380 = sbr.rel (!%p1891_p5) target bundleno = 782 (0x30e), region = 106 }
 0x308   : > { %v1364_v39 = vsel %vm914_vm6, %v1349_v37, %v1359_v38 }
 0x309   : > { %1367 = vst.msk [vmem:[%s676_s16] sm:$0xff] %vm1366_vm8, %v1364_v39 }
 0x30b   : > { %v1362_v41 = vpop.xlane.xlu0 %1361 }
 0x30c   : > { %v1365_v42 = vsel %vm914_vm6, %v1352_v40, %v1362_v41 }
 0x30d   : > { %1368 = vst.msk [vmem:[%s676_s16 + $0x8] sm:$0xff] %vm1366_vm8, %v1365_v42 }
 0x30e PF: > { %p20_p1 = scmp.ge.s32.totalorder %s1881_s25, 4   ;;  %s2075_s21 = smov %s1768_s22 }
 0x30f   : > { %s2076_s22 = smov %s1889_s28  ;;  %s2077_s23 = smov %s1881_s25 }
 0x310   :  { %22 = sbr.rel (!%p20_p1) target bundleno = 6 (0x6), region = 205 }

</bundles_post_ra>
